<compile_context>
chip_gen: v6e
topology: v6e:2x2x1
jax: 0.10.0
libtpu: 0.0.40
codegen_flags: <defaults>
</compile_context>

<pallas_src>
import jax
import jax.numpy as jnp
from jax.experimental import pallas as pl
from jax.experimental.pallas import tpu as pltpu

N_EMBD = 384
BLOCK_SZ = 64
N_HEAD = 6
HIDDEN = 4 * N_EMBD
EPS = 1e-5  # nn.LayerNorm default
MAX_ROW_BLOCK = 256  # row tile if B*T grows beyond a single slab


def _layernorm(x, gamma, beta):
    # x: (R, C) f32 ; gamma/beta: (1, C) broadcast over rows. Keep in f32.
    mu = jnp.mean(x, axis=-1, keepdims=True)
    xc = x - mu
    var = jnp.mean(xc * xc, axis=-1, keepdims=True)   # biased variance, like PyTorch LN
    inv = jax.lax.rsqrt(var + EPS)
    return xc * inv * gamma + beta


def block_kernel(x_ref,
                 g1_ref, b1_ref,            # LayerNorm1 affine              (1, C) f32
                 wproj_ref, bproj_ref,      # attention-branch proj (C, C) bf16, (1, C) f32
                 g2_ref, b2_ref,            # LayerNorm2 affine              (1, C) f32
                 w1_ref, bb1_ref,           # FFN first linear  (C, 4C) bf16, (1, 4C) f32
                 w2_ref, bb2_ref,           # FFN second linear (4C, C) bf16, (1, C) f32
                 o_ref):
    x = x_ref[...].astype(jnp.float32)                              # (R, C)

    # Hoist small-parameter reads once (no per-use re-broadcast).
    g1, b1 = g1_ref[...], b1_ref[...]
    g2, b2 = g2_ref[...], b2_ref[...]
    bproj, bb1, bb2 = bproj_ref[...], bb1_ref[...], bb2_ref[...]

    # --- attention branch (per reference: proj applied to ln1(x); heads are dead code)
    h1 = _layernorm(x, g1, b1)                                      # f32
    attn = jnp.dot(h1.astype(jnp.bfloat16), wproj_ref[...],
                   preferred_element_type=jnp.float32) + bproj
    # dropout -> identity (eval mode)
    x1 = x + attn                                                   # residual 1, f32

    # --- feed-forward branch
    h2 = _layernorm(x1, g2, b2)                                     # f32
    f = jnp.dot(h2.astype(jnp.bfloat16), w1_ref[...],
                preferred_element_type=jnp.float32) + bb1
    f = jnp.maximum(f, 0.0)                                         # ReLU (f32)
    f = jnp.dot(f.astype(jnp.bfloat16), w2_ref[...],
                preferred_element_type=jnp.float32) + bb2
    # dropout -> identity (eval mode)

    o_ref[...] = (x1 + f).astype(o_ref.dtype)                       # residual 2


def block_forward(x, params):
    """x: (B, T, C) float32. params: dict of weights; linear weights pre-transposed
    to (in, out) and stored in bf16 so the kernel does y = bf16(x) @ W_bf16 + b
    with f32 accumulation."""
    B, T, C = x.shape
    H = HIDDEN

    # Flatten batch*seq into the matmul row dim.
    rows = B * T
    x2 = x.reshape(rows, C)

    # Single slab if small, otherwise 256-row "parallel" tiles (v7x: shards across TCs).
    row_block = rows if rows <= MAX_ROW_BLOCK else MAX_ROW_BLOCK
    padded = pl.cdiv(rows, row_block) * row_block
    if padded != rows:
        x2 = jnp.pad(x2, ((0, padded - rows), (0, 0)))
    grid = (padded // row_block,)

    full = lambda shape: pl.BlockSpec(shape, lambda i: tuple(0 for _ in shape))

    out2 = pl.pallas_call(
        block_kernel,
        out_shape=jax.ShapeDtypeStruct((padded, C), x.dtype),
        grid_spec=pltpu.PrefetchScalarGridSpec(
            num_scalar_prefetch=0,
            grid=grid,
            in_specs=[
                pl.BlockSpec((row_block, C), lambda i: (i, 0)),   # x (flattened rows)
                full((1, C)),    # ln1 gamma
                full((1, C)),    # ln1 beta
                full((C, C)),    # W_proj^T  (bf16)
                full((1, C)),    # b_proj
                full((1, C)),    # ln2 gamma
                full((1, C)),    # ln2 beta
                full((C, H)),    # W1^T      (bf16)
                full((1, H)),    # b1
                full((H, C)),    # W2^T      (bf16)
                full((1, C)),    # b2
            ],
            out_specs=pl.BlockSpec((row_block, C), lambda i: (i, 0)),
        ),
        compiler_params=pltpu.CompilerParams(
            dimension_semantics=("parallel",)),
    )(x2,
      params["g1"], params["b1"],
      params["wproj_t"], params["bproj"],
      params["g2"], params["b2"],
      params["w1_t"], params["bb1"],
      params["w2_t"], params["bb2"])

    return out2[:rows].reshape(B, T, C)


def _reference(x, p):
    """Plain-JAX reference of the same (eval-mode) forward, with matching bf16
    matmul operands / f32 accumulation, for a sanity check."""
    def ln(v, g, b):
        mu = jnp.mean(v, axis=-1, keepdims=True)
        var = jnp.mean((v - mu) ** 2, axis=-1, keepdims=True)
        return (v - mu) * jax.lax.rsqrt(var + EPS) * g + b

    def mm(a, w_bf16):
        return jnp.dot(a.astype(jnp.bfloat16), w_bf16,
                       preferred_element_type=jnp.float32)

    h1 = ln(x, p["g1"], p["b1"])
    x1 = x + (mm(h1, p["wproj_t"]) + p["bproj"])
    h2 = ln(x1, p["g2"], p["b2"])
    f = mm(jnp.maximum(mm(h2, p["w1_t"]) + p["bb1"], 0.0), p["w2_t"]) + p["bb2"]
    return x1 + f


def init_params(key):
    """Deterministic PyTorch-Linear-style (uniform) init; weights stored as (in, out)
    in bf16 (matmul operands), biases / LN affine kept in f32."""
    ks = jax.random.split(key, 6)

    def linear(k, fan_in, fan_out):
        kw, kb = jax.random.split(k)
        bound = 1.0 / (fan_in ** 0.5)
        w_t = jax.random.uniform(kw, (fan_in, fan_out), jnp.float32, -bound, bound)
        b = jax.random.uniform(kb, (1, fan_out), jnp.float32, -bound, bound)
        return w_t.astype(jnp.bfloat16), b

    wproj_t, bproj = linear(ks[0], N_EMBD, N_EMBD)       # MultiHeadAttention.proj
    w1_t, bb1 = linear(ks[1], N_EMBD, HIDDEN)            # FeedForward Linear 1
    w2_t, bb2 = linear(ks[2], HIDDEN, N_EMBD)            # FeedForward Linear 2
    return {
        "g1": jnp.ones((1, N_EMBD), jnp.float32),
        "b1": jnp.zeros((1, N_EMBD), jnp.float32),
        "wproj_t": wproj_t, "bproj": bproj,
        "g2": jnp.ones((1, N_EMBD), jnp.float32),
        "b2": jnp.zeros((1, N_EMBD), jnp.float32),
        "w1_t": w1_t, "bb1": bb1,
        "w2_t": w2_t, "bb2": bb2,
    }


if __name__ == "__main__":
    key = jax.random.PRNGKey(0)
    kx, kp = jax.random.split(key)

    B, T, C = 2, BLOCK_SZ, N_EMBD          # (2, 64, 384)
    x = jax.random.normal(kx, (B, T, C), jnp.float32)
    params = init_params(kp)

    out = block_forward(x, params)
    out = jax.block_until_ready(out)

    ref = _reference(x, params)
    assert out.shape == (B, T, C)
    assert jnp.allclose(out, ref, atol=2e-2, rtol=2e-2), "mismatch vs plain-JAX reference"

    print("KERNEL_OK")
</pallas_src>

<mosaic_0001>
module attributes {stable_mosaic.version = 11 : i64} {
  func.func @block_kernel(%arg0: i32, %arg1: memref<128x384xf32, #tpu.memory_space<vmem>>, %arg2: memref<1x384xf32, #tpu.memory_space<vmem>>, %arg3: memref<1x384xf32, #tpu.memory_space<vmem>>, %arg4: memref<384x384xbf16, #tpu.memory_space<vmem>>, %arg5: memref<1x384xf32, #tpu.memory_space<vmem>>, %arg6: memref<1x384xf32, #tpu.memory_space<vmem>>, %arg7: memref<1x384xf32, #tpu.memory_space<vmem>>, %arg8: memref<384x1536xbf16, #tpu.memory_space<vmem>>, %arg9: memref<1x1536xf32, #tpu.memory_space<vmem>>, %arg10: memref<1536x384xbf16, #tpu.memory_space<vmem>>, %arg11: memref<1x384xf32, #tpu.memory_space<vmem>>, %arg12: memref<128x384xf32, #tpu.memory_space<vmem>>) attributes {dimension_semantics = [#tpu.dimension_semantics<parallel>], iteration_bounds = array<i64: 1>, scalar_prefetch = 0 : i64, scratch_operands = 0 : i64, tpu.core_type = #tpu.core_type<tc>, window_params = [{transform_indices = @transform_0, window_bounds = array<i64: 128, 384>}, {pipeline_mode = #tpu.pipeline_mode<synchronous>, transform_indices = @transform_1, window_bounds = array<i64: 1, 384>}, {pipeline_mode = #tpu.pipeline_mode<synchronous>, transform_indices = @transform_2, window_bounds = array<i64: 1, 384>}, {pipeline_mode = #tpu.pipeline_mode<synchronous>, transform_indices = @transform_3, window_bounds = array<i64: 384, 384>}, {pipeline_mode = #tpu.pipeline_mode<synchronous>, transform_indices = @transform_4, window_bounds = array<i64: 1, 384>}, {pipeline_mode = #tpu.pipeline_mode<synchronous>, transform_indices = @transform_5, window_bounds = array<i64: 1, 384>}, {pipeline_mode = #tpu.pipeline_mode<synchronous>, transform_indices = @transform_6, window_bounds = array<i64: 1, 384>}, {pipeline_mode = #tpu.pipeline_mode<synchronous>, transform_indices = @transform_7, window_bounds = array<i64: 384, 1536>}, {pipeline_mode = #tpu.pipeline_mode<synchronous>, transform_indices = @transform_8, window_bounds = array<i64: 1, 1536>}, {pipeline_mode = #tpu.pipeline_mode<synchronous>, transform_indices = @transform_9, window_bounds = array<i64: 1536, 384>}, {pipeline_mode = #tpu.pipeline_mode<synchronous>, transform_indices = @transform_10, window_bounds = array<i64: 1, 384>}, {transform_indices = @transform_11, window_bounds = array<i64: 128, 384>}]} {
    %c0 = arith.constant 0 : index
    %c0_0 = arith.constant 0 : index
    %0 = vector.load %arg1[%c0, %c0_0] : memref<128x384xf32, #tpu.memory_space<vmem>>, vector<128x384xf32>
    %c0_1 = arith.constant 0 : index
    %c0_2 = arith.constant 0 : index
    %1 = vector.load %arg2[%c0_1, %c0_2] : memref<1x384xf32, #tpu.memory_space<vmem>>, vector<1x384xf32>
    %c0_3 = arith.constant 0 : index
    %c0_4 = arith.constant 0 : index
    %2 = vector.load %arg3[%c0_3, %c0_4] : memref<1x384xf32, #tpu.memory_space<vmem>>, vector<1x384xf32>
    %c0_5 = arith.constant 0 : index
    %c0_6 = arith.constant 0 : index
    %3 = vector.load %arg6[%c0_5, %c0_6] : memref<1x384xf32, #tpu.memory_space<vmem>>, vector<1x384xf32>
    %c0_7 = arith.constant 0 : index
    %c0_8 = arith.constant 0 : index
    %4 = vector.load %arg7[%c0_7, %c0_8] : memref<1x384xf32, #tpu.memory_space<vmem>>, vector<1x384xf32>
    %c0_9 = arith.constant 0 : index
    %c0_10 = arith.constant 0 : index
    %5 = vector.load %arg5[%c0_9, %c0_10] : memref<1x384xf32, #tpu.memory_space<vmem>>, vector<1x384xf32>
    %c0_11 = arith.constant 0 : index
    %c0_12 = arith.constant 0 : index
    %6 = vector.load %arg9[%c0_11, %c0_12] : memref<1x1536xf32, #tpu.memory_space<vmem>>, vector<1x1536xf32>
    %c0_13 = arith.constant 0 : index
    %c0_14 = arith.constant 0 : index
    %7 = vector.load %arg11[%c0_13, %c0_14] : memref<1x384xf32, #tpu.memory_space<vmem>>, vector<1x384xf32>
    %cst = arith.constant dense<0.000000e+00> : vector<128xf32>
    %8 = vector.multi_reduction <add>, %0, %cst [1] : vector<128x384xf32> to vector<128xf32>
    %9 = vector.shape_cast %8 : vector<128xf32> to vector<128x1xf32>
    %cst_15 = arith.constant 3.840000e+02 : f32
    %10 = vector.broadcast %cst_15 : f32 to vector<128x1xf32>
    %11 = arith.divf %9, %10 : vector<128x1xf32>
    %12 = vector.broadcast %11 : vector<128x1xf32> to vector<128x384xf32>
    %13 = arith.subf %0, %12 : vector<128x384xf32>
    %14 = arith.mulf %13, %13 : vector<128x384xf32>
    %cst_16 = arith.constant dense<0.000000e+00> : vector<128xf32>
    %15 = vector.multi_reduction <add>, %14, %cst_16 [1] : vector<128x384xf32> to vector<128xf32>
    %16 = vector.shape_cast %15 : vector<128xf32> to vector<128x1xf32>
    %cst_17 = arith.constant 3.840000e+02 : f32
    %17 = vector.broadcast %cst_17 : f32 to vector<128x1xf32>
    %18 = arith.divf %16, %17 : vector<128x1xf32>
    %cst_18 = arith.constant 9.99999974E-6 : f32
    %19 = vector.broadcast %cst_18 : f32 to vector<128x1xf32>
    %20 = arith.addf %18, %19 : vector<128x1xf32>
    %21 = math.rsqrt %20 : vector<128x1xf32>
    %22 = vector.broadcast %21 : vector<128x1xf32> to vector<128x384xf32>
    %23 = arith.mulf %13, %22 : vector<128x384xf32>
    %24 = vector.broadcast %1 : vector<1x384xf32> to vector<128x384xf32>
    %25 = arith.mulf %23, %24 : vector<128x384xf32>
    %26 = vector.broadcast %2 : vector<1x384xf32> to vector<128x384xf32>
    %27 = arith.addf %25, %26 : vector<128x384xf32>
    %28 = arith.truncf %27 : vector<128x384xf32> to vector<128x384xbf16>
    %c0_19 = arith.constant 0 : index
    %c0_20 = arith.constant 0 : index
    %29 = vector.load %arg4[%c0_19, %c0_20] : memref<384x384xbf16, #tpu.memory_space<vmem>>, vector<384x384xbf16>
    %cst_21 = arith.constant dense<0.000000e+00> : vector<128x384xf32>
    %30 = tpu.matmul %28, %29, %cst_21 {dimension_numbers = #tpu.dot_dimension_numbers<[1], [0], [0], [1], [0, 0, 1, 1], [], []>} : vector<128x384xbf16>, vector<384x384xbf16>, vector<128x384xf32> -> vector<128x384xf32>
    %31 = vector.broadcast %5 : vector<1x384xf32> to vector<128x384xf32>
    %32 = arith.addf %30, %31 : vector<128x384xf32>
    %33 = arith.addf %0, %32 : vector<128x384xf32>
    %cst_22 = arith.constant dense<0.000000e+00> : vector<128xf32>
    %34 = vector.multi_reduction <add>, %33, %cst_22 [1] : vector<128x384xf32> to vector<128xf32>
    %35 = vector.shape_cast %34 : vector<128xf32> to vector<128x1xf32>
    %cst_23 = arith.constant 3.840000e+02 : f32
    %36 = vector.broadcast %cst_23 : f32 to vector<128x1xf32>
    %37 = arith.divf %35, %36 : vector<128x1xf32>
    %38 = vector.broadcast %37 : vector<128x1xf32> to vector<128x384xf32>
    %39 = arith.subf %33, %38 : vector<128x384xf32>
    %40 = arith.mulf %39, %39 : vector<128x384xf32>
    %cst_24 = arith.constant dense<0.000000e+00> : vector<128xf32>
    %41 = vector.multi_reduction <add>, %40, %cst_24 [1] : vector<128x384xf32> to vector<128xf32>
    %42 = vector.shape_cast %41 : vector<128xf32> to vector<128x1xf32>
    %cst_25 = arith.constant 3.840000e+02 : f32
    %43 = vector.broadcast %cst_25 : f32 to vector<128x1xf32>
    %44 = arith.divf %42, %43 : vector<128x1xf32>
    %cst_26 = arith.constant 9.99999974E-6 : f32
    %45 = vector.broadcast %cst_26 : f32 to vector<128x1xf32>
    %46 = arith.addf %44, %45 : vector<128x1xf32>
    %47 = math.rsqrt %46 : vector<128x1xf32>
    %48 = vector.broadcast %47 : vector<128x1xf32> to vector<128x384xf32>
    %49 = arith.mulf %39, %48 : vector<128x384xf32>
    %50 = vector.broadcast %3 : vector<1x384xf32> to vector<128x384xf32>
    %51 = arith.mulf %49, %50 : vector<128x384xf32>
    %52 = vector.broadcast %4 : vector<1x384xf32> to vector<128x384xf32>
    %53 = arith.addf %51, %52 : vector<128x384xf32>
    %54 = arith.truncf %53 : vector<128x384xf32> to vector<128x384xbf16>
    %c0_27 = arith.constant 0 : index
    %c0_28 = arith.constant 0 : index
    %55 = vector.load %arg8[%c0_27, %c0_28] : memref<384x1536xbf16, #tpu.memory_space<vmem>>, vector<384x1536xbf16>
    %cst_29 = arith.constant dense<0.000000e+00> : vector<128x1536xf32>
    %56 = tpu.matmul %54, %55, %cst_29 {dimension_numbers = #tpu.dot_dimension_numbers<[1], [0], [0], [1], [0, 0, 1, 1], [], []>} : vector<128x384xbf16>, vector<384x1536xbf16>, vector<128x1536xf32> -> vector<128x1536xf32>
    %57 = vector.broadcast %6 : vector<1x1536xf32> to vector<128x1536xf32>
    %58 = arith.addf %56, %57 : vector<128x1536xf32>
    %cst_30 = arith.constant 0.000000e+00 : f32
    %59 = vector.broadcast %cst_30 : f32 to vector<128x1536xf32>
    %60 = arith.maximumf %58, %59 : vector<128x1536xf32>
    %61 = arith.truncf %60 : vector<128x1536xf32> to vector<128x1536xbf16>
    %c0_31 = arith.constant 0 : index
    %c0_32 = arith.constant 0 : index
    %62 = vector.load %arg10[%c0_31, %c0_32] : memref<1536x384xbf16, #tpu.memory_space<vmem>>, vector<1536x384xbf16>
    %cst_33 = arith.constant dense<0.000000e+00> : vector<128x384xf32>
    %63 = tpu.matmul %61, %62, %cst_33 {dimension_numbers = #tpu.dot_dimension_numbers<[1], [0], [0], [1], [0, 0, 1, 1], [], []>} : vector<128x1536xbf16>, vector<1536x384xbf16>, vector<128x384xf32> -> vector<128x384xf32>
    %64 = vector.broadcast %7 : vector<1x384xf32> to vector<128x384xf32>
    %65 = arith.addf %63, %64 : vector<128x384xf32>
    %66 = arith.addf %33, %65 : vector<128x384xf32>
    %c0_34 = arith.constant 0 : index
    %c0_35 = arith.constant 0 : index
    %67 = vector.load %arg12[%c0_34, %c0_35] : memref<128x384xf32, #tpu.memory_space<vmem>>, vector<128x384xf32>
    tpu.vector_store %arg12[%c0_34, %c0_35], %66 {strides = array<i32>} : memref<128x384xf32, #tpu.memory_space<vmem>>, vector<128x384xf32>,
    return
  }
  func.func @transform_0(%arg0: i32) -> (i32, i32) {
    %c0_i32 = arith.constant 0 : i32
    %c0_i32_0 = arith.constant 0 : i32
    return %arg0, %c0_i32 : i32, i32
  }
  func.func @transform_1(%arg0: i32) -> (i32, i32) {
    %c0_i32 = arith.constant 0 : i32
    %c0_i32_0 = arith.constant 0 : i32
    %c0_i32_1 = arith.constant 0 : i32
    return %c0_i32, %c0_i32_0 : i32, i32
  }
  func.func @transform_2(%arg0: i32) -> (i32, i32) {
    %c0_i32 = arith.constant 0 : i32
    %c0_i32_0 = arith.constant 0 : i32
    %c0_i32_1 = arith.constant 0 : i32
    return %c0_i32, %c0_i32_0 : i32, i32
  }
  func.func @transform_3(%arg0: i32) -> (i32, i32) {
    %c0_i32 = arith.constant 0 : i32
    %c0_i32_0 = arith.constant 0 : i32
    %c0_i32_1 = arith.constant 0 : i32
    return %c0_i32, %c0_i32_0 : i32, i32
  }
  func.func @transform_4(%arg0: i32) -> (i32, i32) {
    %c0_i32 = arith.constant 0 : i32
    %c0_i32_0 = arith.constant 0 : i32
    %c0_i32_1 = arith.constant 0 : i32
    return %c0_i32, %c0_i32_0 : i32, i32
  }
  func.func @transform_5(%arg0: i32) -> (i32, i32) {
    %c0_i32 = arith.constant 0 : i32
    %c0_i32_0 = arith.constant 0 : i32
    %c0_i32_1 = arith.constant 0 : i32
    return %c0_i32, %c0_i32_0 : i32, i32
  }
  func.func @transform_6(%arg0: i32) -> (i32, i32) {
    %c0_i32 = arith.constant 0 : i32
    %c0_i32_0 = arith.constant 0 : i32
    %c0_i32_1 = arith.constant 0 : i32
    return %c0_i32, %c0_i32_0 : i32, i32
  }
  func.func @transform_7(%arg0: i32) -> (i32, i32) {
    %c0_i32 = arith.constant 0 : i32
    %c0_i32_0 = arith.constant 0 : i32
    %c0_i32_1 = arith.constant 0 : i32
    return %c0_i32, %c0_i32_0 : i32, i32
  }
  func.func @transform_8(%arg0: i32) -> (i32, i32) {
    %c0_i32 = arith.constant 0 : i32
    %c0_i32_0 = arith.constant 0 : i32
    %c0_i32_1 = arith.constant 0 : i32
    return %c0_i32, %c0_i32_0 : i32, i32
  }
  func.func @transform_9(%arg0: i32) -> (i32, i32) {
    %c0_i32 = arith.constant 0 : i32
    %c0_i32_0 = arith.constant 0 : i32
    %c0_i32_1 = arith.constant 0 : i32
    return %c0_i32, %c0_i32_0 : i32, i32
  }
  func.func @transform_10(%arg0: i32) -> (i32, i32) {
    %c0_i32 = arith.constant 0 : i32
    %c0_i32_0 = arith.constant 0 : i32
    %c0_i32_1 = arith.constant 0 : i32
    return %c0_i32, %c0_i32_0 : i32, i32
  }
  func.func @transform_11(%arg0: i32) -> (i32, i32) {
    %c0_i32 = arith.constant 0 : i32
    %c0_i32_0 = arith.constant 0 : i32
    return %arg0, %c0_i32 : i32, i32
  }
}

</mosaic_0001>

<bundles_post_ra>
// kernel: tpu_custom_call.1
= control target key start
LH: loop header
LB: loop body
LE: loop exit
PB: predicated region body
PF: predicated region fallthrough
CT: control target
= control target key end

     0   :  { %16 = vsyncpa [#allocation3], 0  ;;  %s14771_s0 = inlined_call_operand.hbm [shape: f32[128,384], index: 0, kind: input, shape index: {}]   ;;  %s14772_s1 = inlined_call_operand.hbm [shape: f32[1,384], index: 1, kind: input, shape index: {}]   ;;  %s14773_s2 = inlined_call_operand.hbm [shape: f32[1,384], index: 2, kind: input, shape index: {}]   ;;  %s14774_s3 = inlined_call_operand.hbm [shape: bf16[384,384], index: 3, kind: input, shape index: {}]   ;;  %s14775_s4 = inlined_call_operand.hbm [shape: f32[1,384], index: 4, kind: input, shape index: {}]   ;;  %s14776_s5 = inlined_call_operand.hbm [shape: f32[1,384], index: 5, kind: input, shape index: {}]   ;;  %s14777_s6 = inlined_call_operand.hbm [shape: f32[1,384], index: 6, kind: input, shape index: {}]   ;;  %s14778_s7 = inlined_call_operand.hbm [shape: bf16[384,1536], index: 7, kind: input, shape index: {}]   ;;  %s14779_s8 = inlined_call_operand.hbm [shape: f32[1,1536], index: 8, kind: input, shape index: {}]   ;;  %s14780_s9 = inlined_call_operand.hbm [shape: bf16[1536,384], index: 9, kind: input, shape index: {}]   ;;  %s14781_s10 = inlined_call_operand.hbm [shape: f32[1,384], index: 10, kind: input, shape index: {}]   ;;  %s14782_s11 = inlined_call_operand.hbm [shape: f32[128,384], index: 11, kind: output, shape index: {}]  }
   0x1   :  { %17 = vsyncpa [#allocation6], 0 }
   0x2   :  { %18 = vsyncpa [#allocation9], 0 }
   0x3   :  { %19 = vsyncpa [#allocation12], 0 }
   0x4   :  { %20 = vsyncpa [#allocation15], 0 }
   0x5   :  { %21 = vsyncpa [#allocation18], 0 }
   0x6   :  { %22 = vsyncpa [#allocation4], 0  ;;  %s11406_s17 = smov [#allocation5]   ;;  %s11407_s19 = smov [#allocation8]  }
   0x7   :  { %s41_s18 = sshll.u32 %s11406_s17, 4  ;;  %s60_s20 = sshll.u32 %s11407_s19, 4  ;;  %s42_s18 = int_to_ptr.vmem [resolvable:$true] %s41_s18  ;;  %s61_s20 = int_to_ptr.vmem [resolvable:$true] %s60_s20 }
   0x8   :  { %s11160_s21 = scalar_lea.vmem %s42_s18, 48  ;;  %s11164_s22 = scalar_lea.vmem %s42_s18, 64 }
   0x9   :  { %p11161_p0 = scmp.ne.s32.totalorder %s42_s18, %s11160_s21  ;;  %p11165_p1 = scmp.lt.s32.totalorder %s42_s18, %s42_s18 }
   0xa   :  { %p11166_p2 = scmp.lt.s32.totalorder %s11164_s22, %s11160_s21 }
   0xc   :  { %p11167_p3 = por %p11166_p2, %p11165_p1 }
   0xe   :  { %p11168_p4 = pnand %p11167_p3, %p11161_p0 }
  0x10   :  { %11171 = shalt.err (!%p11168_p4)
}
  0x11   :  { %44 = dma.hbm_to_vmem [thread:$0]  %s14772_s1, 48, %s42_s18, [#allocation6]  }
  0x12   :  { %s11180_s25 = scalar_lea.vmem %s61_s20, 9216  ;;  %p11185_p6 = scmp.lt.s32.totalorder %s61_s20, %s61_s20 }
  0x13   :  { %p11181_p5 = scmp.ne.s32.totalorder %s61_s20, %s11180_s25  ;;  %p11186_p7 = scmp.lt.s32.totalorder %s11180_s25, %s11180_s25 }
  0x15   :  { %p11187_p8 = por %p11186_p7, %p11185_p6 }
  0x17   :  { %p11188_p9 = pnand %p11187_p8, %p11181_p5 }
  0x19   :  { %11191 = shalt.err (!%p11188_p9)
}
  0x1a   :  { %s11408_s26 = smov 192   ;;  %s11409_s27 = smov 12  }
  0x1b   :  { %66 = dma.hbm_to_vmem [thread:$0]  %s14774_s3, 9216, %s61_s20, [#allocation9], %s11408_s26, %s11408_s26, %s11409_s27  }
  0x1c   :  { %s11410_s30 = smov [#allocation11]   ;;  %s11411_s13 = smov [#allocation14]  }
  0x1d   :  { %s83_s12 = sshll.u32 %s11410_s30, 4  ;;  %s102_s1 = sshll.u32 %s11411_s13, 4  ;;  %s84_s12 = int_to_ptr.vmem [resolvable:$true] %s83_s12  ;;  %s103_s1 = int_to_ptr.vmem [resolvable:$true] %s102_s1 }
  0x1e   :  { %s11200_s14 = scalar_lea.vmem %s84_s12, 48  ;;  %s11204_s15 = scalar_lea.vmem %s84_s12, 64 }
  0x1f   :  { %p11201_p10 = scmp.ne.s32.totalorder %s84_s12, %s11200_s14  ;;  %p11205_p11 = scmp.lt.s32.totalorder %s84_s12, %s84_s12 }
  0x20   :  { %p11206_p12 = scmp.lt.s32.totalorder %s11204_s15, %s11200_s14 }
  0x22   :  { %p11207_p13 = por %p11206_p12, %p11205_p11 }
  0x24   :  { %p11208_p0 = pnand %p11207_p13, %p11201_p10 }
  0x26   :  { %11211 = shalt.err (!%p11208_p0)
}
  0x27   :  { %86 = dma.hbm_to_vmem [thread:$0]  %s14776_s5, 48, %s84_s12, [#allocation12]  }
  0x28   :  { %s11220_s18 = scalar_lea.vmem %s103_s1, 36864  ;;  %p11225_p2 = scmp.lt.s32.totalorder %s103_s1, %s103_s1 }
  0x29   :  { %p11221_p1 = scmp.ne.s32.totalorder %s103_s1, %s11220_s18  ;;  %p11226_p3 = scmp.lt.s32.totalorder %s11220_s18, %s11220_s18 }
  0x2b   :  { %p11227_p4 = por %p11226_p3, %p11225_p2 }
  0x2d   :  { %p11228_p5 = pnand %p11227_p4, %p11221_p1 }
  0x2f   :  { %11231 = shalt.err (!%p11228_p5)
}
  0x30   :  { %s11412_s3 = smov 768   ;;  %s11413_s19 = smov 48  }
  0x31   :  { %108 = dma.hbm_to_vmem [thread:$0]  %s14778_s7, 36864, %s103_s1, [#allocation15], %s11412_s3, %s11412_s3, %s11413_s19  }
  0x32   :  { %s11414_s22 = smov [#allocation17]   ;;  %s11415_s24 = smov [#allocation2]  }
  0x33   :  { %s124_s23 = sshll.u32 %s11414_s22, 4  ;;  %s28_s25 = sshll.u32 %s11415_s24, 4  ;;  %s125_s23 = int_to_ptr.vmem [resolvable:$true] %s124_s23  ;;  %s29_s25 = int_to_ptr.vmem [resolvable:$true] %s28_s25 }
  0x34   :  { %s11240_s5 = scalar_lea.vmem %s125_s23, 36864  ;;  %p11245_p7 = scmp.lt.s32.totalorder %s125_s23, %s125_s23 }
  0x35   :  { %p11241_p6 = scmp.ne.s32.totalorder %s125_s23, %s11240_s5  ;;  %p11246_p8 = scmp.lt.s32.totalorder %s11240_s5, %s11240_s5 }
  0x37   :  { %p11247_p9 = por %p11246_p8, %p11245_p7 }
  0x39   :  { %p11248_p10 = pnand %p11247_p9, %p11241_p6 }
  0x3b   :  { %11251 = shalt.err (!%p11248_p10)
}
  0x3c   :  { %130 = dma.hbm_to_vmem [thread:$0]  %s14780_s9, 36864, %s125_s23, [#allocation18], %s11408_s26, %s11408_s26, %s11409_s27  }
  0x3d   :  { %s11260_s7 = scalar_lea.vmem %s29_s25, 6144  ;;  %p11265_p12 = scmp.lt.s32.totalorder %s29_s25, %s29_s25 }
  0x3e   :  { %p11261_p11 = scmp.ne.s32.totalorder %s29_s25, %s11260_s7  ;;  %p11266_p13 = scmp.lt.s32.totalorder %s11260_s7, %s11260_s7 }
  0x40   :  { %p11267_p0 = por %p11266_p13, %p11265_p12 }
  0x42   :  { %p11268_p1 = pnand %p11267_p0, %p11261_p11 }
  0x44   :  { %11271 = shalt.err (!%p11268_p1)
}
  0x45   :  { %s11416_s30 = smov 384   ;;  %s11417_s12 = smov 24  }
  0x46   :  { %34 = dma.hbm_to_vmem [thread:$0]  %s14771_s0, 6144, %s29_s25, [#allocation3], %s11416_s30, %s11416_s30, %s11417_s12  }
  0x47   :  { %s11418_s14 = smov [#allocation7]   ;;  %s11419_s16 = smov [#allocation10]  }
  0x48   :  { %s51_s15 = sshll.u32 %s11418_s14, 4  ;;  %s73_s9 = sshll.u32 %s11419_s16, 4  ;;  %s52_s15 = int_to_ptr.vmem [resolvable:$true] %s51_s15  ;;  %s74_s9 = int_to_ptr.vmem [resolvable:$true] %s73_s9 }
  0x49   :  { %s11280_s26 = scalar_lea.vmem %s52_s15, 48  ;;  %s11284_s27 = scalar_lea.vmem %s52_s15, 64 }
  0x4a   :  { %p11281_p2 = scmp.ne.s32.totalorder %s52_s15, %s11280_s26  ;;  %p11285_p3 = scmp.lt.s32.totalorder %s52_s15, %s52_s15 }
  0x4b   :  { %p11286_p4 = scmp.lt.s32.totalorder %s11284_s27, %s11280_s26 }
  0x4d   :  { %p11287_p5 = por %p11286_p4, %p11285_p3 }
  0x4f   :  { %p11288_p6 = pnand %p11287_p5, %p11281_p2 }
  0x51   :  { %11291 = shalt.err (!%p11288_p6)
}
  0x52   :  { %54 = dma.hbm_to_vmem [thread:$0]  %s14773_s2, 48, %s52_s15, [#allocation6]  }
  0x53   :  { %s11300_s3 = scalar_lea.vmem %s74_s9, 48  ;;  %s11304_s0 = scalar_lea.vmem %s74_s9, 64 }
  0x54   :  { %p11301_p7 = scmp.ne.s32.totalorder %s74_s9, %s11300_s3  ;;  %p11305_p8 = scmp.lt.s32.totalorder %s74_s9, %s74_s9 }
  0x55   :  { %p11306_p9 = scmp.lt.s32.totalorder %s11304_s0, %s11300_s3 }
  0x57   :  { %p11307_p10 = por %p11306_p9, %p11305_p8 }
  0x59   :  { %p11308_p11 = pnand %p11307_p10, %p11301_p7 }
  0x5b   :  { %11311 = shalt.err (!%p11308_p11)
}
  0x5c   :  { %76 = dma.hbm_to_vmem [thread:$0]  %s14775_s4, 48, %s74_s9, [#allocation9]  }
  0x5d   :  { %s11420_s21 = smov [#allocation13]   ;;  %s11421_s23 = smov [#allocation16]  }
  0x5e   :  { %s93_s22 = sshll.u32 %s11420_s21, 4  ;;  %s115_s24 = sshll.u32 %s11421_s23, 4  ;;  %s94_s22 = int_to_ptr.vmem [resolvable:$true] %s93_s22  ;;  %s116_s24 = int_to_ptr.vmem [resolvable:$true] %s115_s24 }
  0x5f   :  { %s11320_s25 = scalar_lea.vmem %s94_s22, 48  ;;  %s11324_s2 = scalar_lea.vmem %s94_s22, 64 }
  0x60   :  { %p11321_p12 = scmp.ne.s32.totalorder %s94_s22, %s11320_s25  ;;  %p11325_p13 = scmp.lt.s32.totalorder %s94_s22, %s94_s22 }
  0x61   :  { %p11326_p0 = scmp.lt.s32.totalorder %s11324_s2, %s11320_s25 }
  0x63   :  { %p11327_p1 = por %p11326_p0, %p11325_p13 }
  0x65   :  { %p11328_p2 = pnand %p11327_p1, %p11321_p12 }
  0x67   :  { %11331 = shalt.err (!%p11328_p2)
}
  0x68   :  { %96 = dma.hbm_to_vmem [thread:$0]  %s14777_s6, 48, %s94_s22, [#allocation12]  }
  0x69   :  { %s11340_s29 = scalar_lea.vmem %s116_s24, 192  ;;  %p11345_p4 = scmp.lt.s32.totalorder %s116_s24, %s116_s24 }
  0x6a   :  { %p11341_p3 = scmp.ne.s32.totalorder %s116_s24, %s11340_s29  ;;  %p11346_p5 = scmp.lt.s32.totalorder %s11340_s29, %s11340_s29 }
  0x6c   :  { %p11347_p6 = por %p11346_p5, %p11345_p4 }
  0x6e   :  { %p11348_p7 = pnand %p11347_p6, %p11341_p3 }
  0x70   :  { %11351 = shalt.err (!%p11348_p7)
}
  0x71   :  { %118 = dma.hbm_to_vmem [thread:$0]  %s14779_s8, 192, %s116_s24, [#allocation15]  }
  0x72   :  { %s11422_s13 = smov [#allocation19]  }
  0x73   :  { %s137_s1 = sshll.u32 %s11422_s13, 4  ;;  %s138_s1 = int_to_ptr.vmem [resolvable:$true] %s137_s1 }
  0x74   :  { %s11360_s14 = scalar_lea.vmem %s138_s1, 48  ;;  %s11364_s15 = scalar_lea.vmem %s138_s1, 64 }
  0x75   :  { %p11361_p8 = scmp.ne.s32.totalorder %s138_s1, %s11360_s14  ;;  %p11365_p9 = scmp.lt.s32.totalorder %s138_s1, %s138_s1 }
  0x76   :  { %p11366_p10 = scmp.lt.s32.totalorder %s11364_s15, %s11360_s14 }
  0x78   :  { %p11367_p11 = por %p11366_p10, %p11365_p9 }
  0x7a   :  { %p11368_p12 = pnand %p11367_p11, %p11361_p8 }
  0x7c   :  { %11371 = shalt.err (!%p11368_p12)
}
  0x7d   :  { %140 = dma.hbm_to_vmem [thread:$0]  %s14781_s10, 48, %s138_s1, [#allocation18]  }
  0x7e   :  { %11392 = dma.done.wait [#allocation3], 6144  }
  0x7f   :  { %11393 = vsyncadd [#allocation3], 4294961152 }
  0x80   :  { %11394 = dma.done.wait [#allocation6], 96  }
  0x81   :  { %11395 = vsyncadd [#allocation6], 4294967200 }
  0x82   :  { %11396 = dma.done.wait [#allocation9], 9264  }
  0x83   :  { %11397 = vsyncadd [#allocation9], 4294958032 }
  0x84   :  { %11398 = dma.done.wait [#allocation12], 96  }
  0x85   :  { %11399 = vsyncadd [#allocation12], 4294967200 }
  0x86   :  { %11400 = dma.done.wait [#allocation15], 37056  }
  0x87   :  { %11401 = vsyncadd [#allocation15], 4294930240 }
  0x88   :  { %11402 = dma.done.wait [#allocation18], 36912  }
  0x89   :  { %11403 = vsyncadd [#allocation18], 4294930384  ;;  %v11527_v0 = vld [vmem:[#allocation2] sm:$0xff]  ;;  %v11529_v1 = vld [vmem:[#allocation2 + $0x8] sm:$0xff]  ;;  %s11424_s8 = smov [#allocation20]  }
  0x8a   :  { %v11531_v2 = vld [vmem:[#allocation2 + $0x10] sm:$0xff]  ;;  %v231_v3 = vadd.f32 %v11529_v1, %v11527_v0  ;;  %v11537_v5 = vld [vmem:[#allocation2 + $0x38] sm:$0xff]  ;;  %v11539_v6 = vld [vmem:[#allocation2 + $0x40] sm:$0xff]  ;;  %s8903_s10 = sshll.u32 %s11424_s8, 4  ;;  %s8904_s10 = int_to_ptr.vmem [resolvable:$true] %s8903_s10 }
  0x8b   :  { %v11535_v4 = vld [vmem:[#allocation2 + $0x30] sm:$0xff]  ;;  %v178_v8 = vld [vmem:[#allocation2 + $0x18] sm:$0xff]  ;;  %v179_v9 = vld [vmem:[#allocation2 + $0x20] sm:$0xff]  ;;  %s11372_s9 = scalar_lea.vmem %s8904_s10, 6144  ;;  %p11377_p0 = scmp.lt.s32.totalorder %s8904_s10, %s8904_s10 }
  0x8c   :  { %v239_v7 = vadd.f32 %v11537_v5, %v11535_v4  ;;  %v180_v10 = vld [vmem:[#allocation2 + $0x28] sm:$0xff]  ;;  %v232_v11 = vadd.f32 %v231_v3, %v11531_v2  ;;  %v235_v12 = vadd.f32 %v179_v9, %v178_v8  ;;  %v185_v14 = vld [vmem:[#allocation2 + $0x50] sm:$0xff]  ;;  %v186_v15 = vld [vmem:[#allocation2 + $0x58] sm:$0xff]  ;;  %p11373_p13 = scmp.ne.s32.totalorder %s8904_s10, %s11372_s9  ;;  %p11378_p1 = scmp.lt.s32.totalorder %s11372_s9, %s11372_s9 }
  0x8d   :  { %v184_v13 = vld [vmem:[#allocation2 + $0x48] sm:$0xff]  ;;  %v187_v18 = vld [vmem:[#allocation2 + $0x60] sm:$0xff]  ;;  %v190_v22 = vld [vmem:[#allocation2 + $0x78] sm:$0xff] }
  0x8e   :  { %v240_v16 = vadd.f32 %v239_v7, %v11539_v6  ;;  %v243_v17 = vadd.f32 %v185_v14, %v184_v13  ;;  %v188_v19 = vld [vmem:[#allocation2 + $0x68] sm:$0xff]  ;;  %233 = vadd.xlane.f32.xlu0 %v232_v11  ;;  %v236_v20 = vadd.f32 %v235_v12, %v180_v10  ;;  %v191_v23 = vld [vmem:[#allocation2 + $0x80] sm:$0xff]  ;;  %v189_v25 = vld [vmem:[#allocation2 + $0x70] sm:$0xff]  ;;  %p11379_p2 = por %p11378_p1, %p11377_p0 }
  0x8f   :  { %v247_v21 = vadd.f32 %v188_v19, %v187_v18  ;;  %v251_v26 = vadd.f32 %v191_v23, %v190_v22  ;;  %v193_v27 = vld [vmem:[#allocation2 + $0x90] sm:$0xff]  ;;  %v194_v28 = vld [vmem:[#allocation2 + $0x98] sm:$0xff]  ;;  %v192_v29 = vld [vmem:[#allocation2 + $0x88] sm:$0xff] }
  0x90   :  { %241 = vadd.xlane.f32.xlu1 %v240_v16  ;;  %v244_v24 = vadd.f32 %v243_v17, %v186_v15  ;;  %v196_v30 = vld [vmem:[#allocation2 + $0xa8] sm:$0xff]  ;;  %v197_v31 = vld [vmem:[#allocation2 + $0xb0] sm:$0xff]  ;;  %v255_v33 = vadd.f32 %v194_v28, %v193_v27  ;;  %v195_v35 = vld [vmem:[#allocation2 + $0xa0] sm:$0xff]  ;;  %p11380_p3 = pnand %p11379_p2, %p11373_p13 }
  0x91   :  { %v248_v32 = vadd.f32 %v247_v21, %v189_v25  ;;  %v252_v34 = vadd.f32 %v251_v26, %v192_v29  ;;  %v259_v36 = vadd.f32 %v197_v31, %v196_v30  ;;  %v199_v37 = vld [vmem:[#allocation2 + $0xc0] sm:$0xff]  ;;  %v200_v38 = vld [vmem:[#allocation2 + $0xc8] sm:$0xff]  ;;  %v198_v39 = vld [vmem:[#allocation2 + $0xb8] sm:$0xff] }
  0x92   :  { %237 = vadd.xlane.f32.xlu0 %v236_v20  ;;  %v202_v40 = vld [vmem:[#allocation2 + $0xd8] sm:$0xff]  ;;  %v203_v41 = vld [vmem:[#allocation2 + $0xe0] sm:$0xff]  ;;  %v256_v42 = vadd.f32 %v255_v33, %v195_v35  ;;  %v263_v43 = vadd.f32 %v200_v38, %v199_v37  ;;  %v201_v45 = vld [vmem:[#allocation2 + $0xd0] sm:$0xff] }
  0x93   :  { %v260_v44 = vadd.f32 %v259_v36, %v198_v39  ;;  %v267_v46 = vadd.f32 %v203_v41, %v202_v40  ;;  %v205_v47 = vld [vmem:[#allocation2 + $0xf0] sm:$0xff]  ;;  %v206_v48 = vld [vmem:[#allocation2 + $0xf8] sm:$0xff]  ;;  %v204_v49 = vld [vmem:[#allocation2 + $0xe8] sm:$0xff] }
  0x94   :  { %245 = vadd.xlane.f32.xlu1 %v244_v24  ;;  %v208_v50 = vld [vmem:[#allocation2 + $0x108] sm:$0xff]  ;;  %v209_v51 = vld [vmem:[#allocation2 + $0x110] sm:$0xff]  ;;  %v207_v52 = vld [vmem:[#allocation2 + $0x100] sm:$0xff]  ;;  %v264_v55 = vadd.f32 %v263_v43, %v201_v45  ;;  %v271_v56 = vadd.f32 %v206_v48, %v205_v47 }
  0x95   :  { %v211_v53 = vld [vmem:[#allocation2 + $0x120] sm:$0xff]  ;;  %v212_v54 = vld [vmem:[#allocation2 + $0x128] sm:$0xff]  ;;  %v210_v57 = vld [vmem:[#allocation2 + $0x118] sm:$0xff]  ;;  %v268_v60 = vadd.f32 %v267_v46, %v204_v49  ;;  %v275_v61 = vadd.f32 %v209_v51, %v208_v50 }
  0x96   :  { %249 = vadd.xlane.f32.xlu0 %v248_v32  ;;  %v214_v58 = vld [vmem:[#allocation2 + $0x138] sm:$0xff]  ;;  %v215_v59 = vld [vmem:[#allocation2 + $0x140] sm:$0xff]  ;;  %v213_v62 = vld [vmem:[#allocation2 + $0x130] sm:$0xff]  ;;  %v272_v7 = vadd.f32 %v271_v56, %v207_v52  ;;  %v279_v8 = vadd.f32 %v212_v54, %v211_v53 }
  0x97   :  { %v217_v63 = vld [vmem:[#allocation2 + $0x150] sm:$0xff]  ;;  %v218_v3 = vld [vmem:[#allocation2 + $0x158] sm:$0xff]  ;;  %v216_v9 = vld [vmem:[#allocation2 + $0x148] sm:$0xff]  ;;  %v276_v12 = vadd.f32 %v275_v61, %v210_v57  ;;  %v283_v13 = vadd.f32 %v215_v59, %v214_v58 }
  0x98   :  { %253 = vadd.xlane.f32.xlu1 %v252_v34  ;;  %v220_v10 = vld [vmem:[#allocation2 + $0x168] sm:$0xff]  ;;  %v221_v11 = vld [vmem:[#allocation2 + $0x170] sm:$0xff]  ;;  %v219_v14 = vld [vmem:[#allocation2 + $0x160] sm:$0xff]  ;;  %v280_v15 = vadd.f32 %v279_v8, %v213_v62  ;;  %v287_v16 = vadd.f32 %v218_v3, %v217_v63 }
  0x99   :  { %v222_v17 = vld [vmem:[#allocation2 + $0x178] sm:$0xff]  ;;  %v284_v18 = vadd.f32 %v283_v13, %v216_v9  ;;  %v291_v19 = vadd.f32 %v221_v11, %v220_v10  ;;  %v10083_v22 = vld [vmem:[#allocation8 + $0xac] ss:$12 sps:$4 sm:$0xff]   ;;  %v10089_v26 = vld [vmem:[#allocation8 + $0x7c] ss:$12 sps:$4 sm:$0xff]  }
  0x9a   :  { %257 = vadd.xlane.f32.xlu0 %v256_v42  ;;  %v288_v20 = vadd.f32 %v287_v16, %v219_v14  ;;  %v10085_v23 = vld [vmem:[#allocation8 + $0xa8] ss:$12 sps:$4 sm:$0xff]   ;;  %1216 = vmatprep.subr.bf16.mxu0 %v10083_v22  ;;  %v10088_v25 = vld [vmem:[#allocation8 + $0x90] ss:$12 sps:$4 sm:$0xff]   ;;  %v10091_v27 = vld [vmem:[#allocation8 + $0x78] ss:$12 sps:$4 sm:$0xff]  }
  0x9b   :  { %v292_v21 = vadd.f32 %v291_v19, %v222_v17  ;;  %v10086_v24 = vld [vmem:[#allocation8 + $0x94] ss:$12 sps:$4 sm:$0xff]   ;;  %1217 = vmatpush1.bf16.msra.mxu0 %v10085_v23  ;;  %v10107_v28 = vld [vmem:[#allocation8 + $0x22c] ss:$12 sps:$4 sm:$0xff]   ;;  %v10092_v30 = vld [vmem:[#allocation8 + $0x64] ss:$12 sps:$4 sm:$0xff]  }
  0x9c   :  { %261 = vadd.xlane.f32.xlu1 %v260_v44  ;;  %1218 = vmatprep.subr.bf16.mxu0 %v10086_v24  ;;  %v10109_v29 = vld [vmem:[#allocation8 + $0x228] ss:$12 sps:$4 sm:$0xff]   ;;  %v10094_v31 = vld [vmem:[#allocation8 + $0x60] ss:$12 sps:$4 sm:$0xff]   ;;  %v10100_v35 = vld [vmem:[#allocation8 + $0x30] ss:$12 sps:$4 sm:$0xff]  }
  0x9d   :  { %1329 = vmatprep.subr.bf16.mxu1 %v10107_v28  ;;  %v10095_v32 = vld [vmem:[#allocation8 + $0x4c] ss:$12 sps:$4 sm:$0xff]   ;;  %v10097_v33 = vld [vmem:[#allocation8 + $0x48] ss:$12 sps:$4 sm:$0xff]   ;;  %v10104_v38 = vld [vmem:[#allocation8 + $0x4] ss:$12 sps:$4 sm:$0xff]  }
  0x9e   :  { %265 = vadd.xlane.f32.xlu0 %v264_v55  ;;  %1330 = vmatpush1.bf16.msra.mxu1 %v10109_v29  ;;  %v10098_v34 = vld [vmem:[#allocation8 + $0x34] ss:$12 sps:$4 sm:$0xff]   ;;  %v10101_v36 = vld [vmem:[#allocation8 + $0x1c] ss:$12 sps:$4 sm:$0xff]   ;;  %v10103_v37 = vld [vmem:[#allocation8 + $0x18] ss:$12 sps:$4 sm:$0xff]  }
  0x9f   :  { %1219 = vmatpush1.bf16.msra.mxu0 %v10088_v25  ;;  %v10106_v39 = vld [vmem:[#allocation8] ss:$12 sps:$4 sm:$0xff]   ;;  %v11059_v55 = vld [vmem:[#allocation2 + $0x18] sm:$0xff]  ;;  %v11060_v57 = vld [vmem:[#allocation2 + $0x20] sm:$0xff] }
  0xa0   :  { %269 = vadd.xlane.f32.xlu1 %v268_v60  ;;  %1220 = vmatprep.subr.bf16.mxu0 %v10089_v26  ;;  %v10110_v40 = vld [vmem:[#allocation8 + $0x16c] ss:$12 sps:$4 sm:$0xff]   ;;  %v11061_v59 = vld [vmem:[#allocation2 + $0x28] sm:$0xff]  ;;  %v11064_v8 = vld [vmem:[#allocation2 + $0x58] sm:$0xff] }
  0xa1   :  { %v11062_v62 = vld [vmem:[#allocation2 + $0x48] sm:$0xff]  ;;  %v11063_v3 = vld [vmem:[#allocation2 + $0x50] sm:$0xff]  ;;  %v11068_v28 = vld [vmem:[#allocation2 + $0x78] sm:$0xff] }
  0xa2   :  { %273 = vadd.xlane.f32.xlu0 %v272_v7  ;;  %v11066_v23 = vld [vmem:[#allocation2 + $0x68] sm:$0xff]  ;;  %v11067_v25 = vld [vmem:[#allocation2 + $0x70] sm:$0xff] }
  0xa3   :  { %1221 = vmatpush1.bf16.msra.mxu0 %v10091_v27 }
  0xa4   :  { %277 = vadd.xlane.f32.xlu1 %v276_v12  ;;  %1222 = vmatprep.subr.bf16.mxu0 %v10092_v30  ;;  %v11069_v30 = vld [vmem:[#allocation2 + $0x80] sm:$0xff] }
  0xa6   :  { %281 = vadd.xlane.f32.xlu0 %v280_v15 }
  0xa7   :  { %1223 = vmatpush1.bf16.msra.mxu0 %v10094_v31 }
  0xa8   :  { %285 = vadd.xlane.f32.xlu1 %v284_v18  ;;  %1224 = vmatprep.subr.bf16.mxu0 %v10095_v32  ;;  %v11070_v32 = vld [vmem:[#allocation2 + $0x88] sm:$0xff] }
  0xaa   :  { %289 = vadd.xlane.f32.xlu0 %v288_v20 }
  0xab   :  { %1225 = vmatpush1.bf16.msra.mxu0 %v10097_v33 }
  0xac   :  { %293 = vadd.xlane.f32.xlu1 %v292_v21  ;;  %1226 = vmatprep.subr.bf16.mxu0 %v10098_v34  ;;  %v11065_v21 = vld [vmem:[#allocation2 + $0x60] sm:$0xff] }
  0xaf   :  { %1227 = vmatpush1.bf16.msra.mxu0 %v10100_v35 }
  0xb0   :  { %1228 = vmatprep.subr.bf16.mxu0 %v10101_v36 }
  0xb3   :  { %1229 = vmatpush1.bf16.msra.mxu0 %v10103_v37 }
  0xb4   :  { %1230 = vmatprep.subr.bf16.mxu0 %v10104_v38 }
  0xb7   :  { %1231 = vmatpush1.bf16.msra.mxu0 %v10106_v39 }
  0xb8   :  { %1232 = vmatprep.subr.bf16.mxu0 %v10110_v40 }
 0x117   :  { %v234_v41 = vpop.xlane.xlu0 %233 }
 0x118   :  { %v296_v42 = vmul.f32 0.0026041667, %v234_v41 }
 0x119   :  { %v242_v43 = vpop.xlane.xlu1 %241 }
 0x11a   :  { %v298_v44 = vmul.f32 0.0026041667, %v242_v43  ;;  %v11546_v45 = vsub.f32 %v11527_v0, %v296_v42  ;;  %v11549_v46 = vsub.f32 %v11529_v1, %v296_v42  ;;  %v11552_v47 = vsub.f32 %v11531_v2, %v296_v42 }
 0x11b   :  { %v238_v51 = vpop.xlane.xlu0 %237 }
 0x11c   :  { %v11555_v48 = vsub.f32 %v11535_v4, %v298_v44  ;;  %v11558_v49 = vsub.f32 %v11537_v5, %v298_v44  ;;  %v11561_v50 = vsub.f32 %v11539_v6, %v298_v44  ;;  %v297_v52 = vmul.f32 0.0026041667, %v238_v51  ;;  %v11071_v51 = vld [vmem:[#allocation2 + $0x90] sm:$0xff] }
 0x11d   :  { %v246_v53 = vpop.xlane.xlu1 %245  ;;  %v360_v0 = vmul.f32 %v11546_v45, %v11546_v45  ;;  %v361_v1 = vmul.f32 %v11549_v46, %v11549_v46  ;;  %v362_v2 = vmul.f32 %v11552_v47, %v11552_v47 }
 0x11e   :  { %v299_v4 = vmul.f32 0.0026041667, %v246_v53  ;;  %v366_v5 = vmul.f32 %v11555_v48, %v11555_v48  ;;  %v367_v6 = vmul.f32 %v11558_v49, %v11558_v49  ;;  %v368_v54 = vmul.f32 %v11561_v50, %v11561_v50  ;;  %v11072_v53 = vld [vmem:[#allocation2 + $0x98] sm:$0xff] }
 0x11f   :  { %v11575_v56 = vsub.f32 %v11059_v55, %v297_v52  ;;  %v11577_v58 = vsub.f32 %v11060_v57, %v297_v52  ;;  %v11579_v60 = vsub.f32 %v11061_v59, %v297_v52  ;;  %v408_v61 = vadd.f32 %v361_v1, %v360_v0  ;;  %v250_v10 = vpop.xlane.xlu0 %249  ;;  %v11073_v1 = vld [vmem:[#allocation2 + $0xa0] sm:$0xff]  ;;  %v11076_v55 = vld [vmem:[#allocation2 + $0xb8] sm:$0xff] }
 0x120   :  { %v11581_v63 = vsub.f32 %v11062_v62, %v299_v4  ;;  %v11583_v7 = vsub.f32 %v11063_v3, %v299_v4  ;;  %v11585_v9 = vsub.f32 %v11064_v8, %v299_v4  ;;  %v416_v11 = vadd.f32 %v367_v6, %v366_v5  ;;  %v11074_v4 = vld [vmem:[#allocation2 + $0xa8] sm:$0xff]  ;;  %v11075_v6 = vld [vmem:[#allocation2 + $0xb0] sm:$0xff] }
 0x121   :  { %v300_v12 = vmul.f32 0.0026041667, %v250_v10  ;;  %v409_v13 = vadd.f32 %v408_v61, %v362_v2  ;;  %v254_v14 = vpop.xlane.xlu1 %253  ;;  %v363_v15 = vmul.f32 %v11575_v56, %v11575_v56  ;;  %v364_v16 = vmul.f32 %v11577_v58, %v11577_v58 }
 0x122   :  { %v301_v17 = vmul.f32 0.0026041667, %v254_v14  ;;  %v417_v18 = vadd.f32 %v416_v11, %v368_v54  ;;  %v365_v19 = vmul.f32 %v11579_v60, %v11579_v60  ;;  %v369_v20 = vmul.f32 %v11581_v63, %v11581_v63 }
 0x123   :  { %v11595_v22 = vsub.f32 %v11065_v21, %v300_v12  ;;  %v11597_v24 = vsub.f32 %v11066_v23, %v300_v12  ;;  %v11599_v26 = vsub.f32 %v11067_v25, %v300_v12  ;;  %410 = vadd.xlane.f32.xlu0 %v409_v13  ;;  %v412_v27 = vadd.f32 %v364_v16, %v363_v15  ;;  %v258_v34 = vpop.xlane.xlu0 %257  ;;  %v11077_v16 = vld [vmem:[#allocation2 + $0xc0] sm:$0xff]  ;;  %v11080_v25 = vld [vmem:[#allocation2 + $0xd8] sm:$0xff] }
 0x124   :  { %v11601_v29 = vsub.f32 %v11068_v28, %v301_v17  ;;  %v11603_v31 = vsub.f32 %v11069_v30, %v301_v17  ;;  %v11605_v33 = vsub.f32 %v11070_v32, %v301_v17  ;;  %v370_v35 = vmul.f32 %v11583_v7, %v11583_v7  ;;  %v11081_v28 = vld [vmem:[#allocation2 + $0xe0] sm:$0xff]  ;;  %v11082_v32 = vld [vmem:[#allocation2 + $0xe8] sm:$0xff] }
 0x125   :  { %v302_v36 = vmul.f32 0.0026041667, %v258_v34  ;;  %v413_v37 = vadd.f32 %v412_v27, %v365_v19  ;;  %v262_v38 = vpop.xlane.xlu1 %261  ;;  %v371_v39 = vmul.f32 %v11585_v9, %v11585_v9  ;;  %v372_v40 = vmul.f32 %v11595_v22, %v11595_v22 }
 0x126   :  { %v303_v41 = vmul.f32 0.0026041667, %v262_v38  ;;  %v420_v42 = vadd.f32 %v370_v35, %v369_v20  ;;  %v373_v43 = vmul.f32 %v11597_v24, %v11597_v24  ;;  %v374_v44 = vmul.f32 %v11599_v26, %v11599_v26  ;;  %v11079_v20 = vld [vmem:[#allocation2 + $0xd0] sm:$0xff] }
 0x127   :  { %v11617_v52 = vsub.f32 %v11071_v51, %v302_v36  ;;  %v11619_v0 = vsub.f32 %v11072_v53, %v302_v36  ;;  %v11621_v2 = vsub.f32 %v11073_v1, %v302_v36  ;;  %418 = vadd.xlane.f32.xlu0 %v417_v18  ;;  %414 = vadd.xlane.f32.xlu1 %v413_v37  ;;  %v266_v59 = vpop.xlane.xlu0 %265  ;;  %v11078_v18 = vld [vmem:[#allocation2 + $0xc8] sm:$0xff]  ;;  %v11083_v53 = vld [vmem:[#allocation2 + $0xf0] sm:$0xff] }
 0x128   :  { %v11623_v5 = vsub.f32 %v11074_v4, %v303_v41  ;;  %v11625_v54 = vsub.f32 %v11075_v6, %v303_v41  ;;  %v11627_v57 = vsub.f32 %v11076_v55, %v303_v41  ;;  %v421_v61 = vadd.f32 %v420_v42, %v371_v39  ;;  %v11084_v4 = vld [vmem:[#allocation2 + $0xf8] sm:$0xff]  ;;  %v11085_v55 = vld [vmem:[#allocation2 + $0x100] sm:$0xff] }
 0x129   :  { %v304_v62 = vmul.f32 0.0026041667, %v266_v59  ;;  %v424_v3 = vadd.f32 %v373_v43, %v372_v40  ;;  %v270_v8 = vpop.xlane.xlu1 %269  ;;  %v375_v10 = vmul.f32 %v11601_v29, %v11601_v29  ;;  %v376_v11 = vmul.f32 %v11603_v31, %v11603_v31 }
 0x12a   :  { %v305_v12 = vmul.f32 0.0026041667, %v270_v8  ;;  %v377_v13 = vmul.f32 %v11605_v33, %v11605_v33  ;;  %v378_v14 = vmul.f32 %v11617_v52, %v11617_v52  ;;  %v379_v15 = vmul.f32 %v11619_v0, %v11619_v0  ;;  %v11087_v8 = vld [vmem:[#allocation2 + $0x110] sm:$0xff] }
 0x12b   :  { %v11639_v17 = vsub.f32 %v11077_v16, %v304_v62  ;;  %v11641_v19 = vsub.f32 %v11078_v18, %v304_v62  ;;  %v11643_v21 = vsub.f32 %v11079_v20, %v304_v62  ;;  %422 = vadd.xlane.f32.xlu1 %v421_v61  ;;  %v425_v23 = vadd.f32 %v424_v3, %v374_v44  ;;  %v274_v35 = vpop.xlane.xlu0 %273  ;;  %v11086_v62 = vld [vmem:[#allocation2 + $0x108] sm:$0xff] }
 0x12c   :  { %v11645_v27 = vsub.f32 %v11080_v25, %v305_v12  ;;  %v11647_v30 = vsub.f32 %v11081_v28, %v305_v12  ;;  %v11649_v34 = vsub.f32 %v11082_v32, %v305_v12  ;;  %v428_v36 = vadd.f32 %v376_v11, %v375_v10  ;;  %v11088_v11 = vld [vmem:[#allocation2 + $0x118] sm:$0xff] }
 0x12d   :  { %426 = vadd.xlane.f32.xlu0 %v425_v23  ;;  %v306_v37 = vmul.f32 0.0026041667, %v274_v35  ;;  %v380_v38 = vmul.f32 %v11621_v2, %v11621_v2  ;;  %v432_v39 = vadd.f32 %v379_v15, %v378_v14  ;;  %v278_v40 = vpop.xlane.xlu1 %277  ;;  %v381_v41 = vmul.f32 %v11623_v5, %v11623_v5  ;;  %v10112_v15 = vld [vmem:[#allocation8 + $0x168] ss:$12 sps:$4 sm:$0xff]   ;;  %v10115_v32 = vld [vmem:[#allocation8 + $0x210] ss:$12 sps:$4 sm:$0xff]  }
 0x12e   :  { %v429_v42 = vadd.f32 %v428_v36, %v377_v13  ;;  %v307_v43 = vmul.f32 0.0026041667, %v278_v40  ;;  %v382_v44 = vmul.f32 %v11625_v54, %v11625_v54  ;;  %v383_v51 = vmul.f32 %v11627_v57, %v11627_v57  ;;  %v10113_v28 = vld [vmem:[#allocation8 + $0x214] ss:$12 sps:$4 sm:$0xff]   ;;  %1233 = vmatpush2.bf16.msra.mxu0 %v10112_v15  ;;  %v11089_v40 = vld [vmem:[#allocation2 + $0x120] sm:$0xff] }
 0x12f   :  { %v11659_v1 = vsub.f32 %v11083_v53, %v306_v37  ;;  %v11661_v6 = vsub.f32 %v11084_v4, %v306_v37  ;;  %v11663_v59 = vsub.f32 %v11085_v55, %v306_v37  ;;  %v433_v61 = vadd.f32 %v432_v39, %v380_v38  ;;  %v282_v13 = vpop.xlane.xlu0 %281  ;;  %v10116_v39 = vld [vmem:[#allocation8 + $0x154] ss:$12 sps:$4 sm:$0xff]   ;;  %1331 = vmatprep.subr.bf16.mxu1 %v10113_v28  ;;  %v10118_v15 = vld [vmem:[#allocation8 + $0x150] ss:$12 sps:$4 sm:$0xff]  }
 0x130   :  { %430 = vadd.xlane.f32.xlu1 %v429_v42  ;;  %v11665_v3 = vsub.f32 %v11086_v62, %v307_v43  ;;  %v11667_v10 = vsub.f32 %v11087_v8, %v307_v43  ;;  %v11669_v12 = vsub.f32 %v11088_v11, %v307_v43  ;;  %v436_v14 = vadd.f32 %v382_v44, %v381_v41  ;;  %v11090_v42 = vld [vmem:[#allocation2 + $0x128] sm:$0xff]  ;;  %v11091_v44 = vld [vmem:[#allocation2 + $0x130] sm:$0xff] }
 0x131   :  { %14951 = vst [vmem:[#allocation28_spill] sm:$0xff] %v11659_v1  ;;  %14952 = vst [vmem:[#allocation29_spill] sm:$0xff] %v11663_v59  ;;  %434 = vadd.xlane.f32.xlu0 %v433_v61  ;;  %v308_v16 = vmul.f32 0.0026041667, %v282_v13  ;;  %v384_v18 = vmul.f32 %v11639_v17, %v11639_v17  ;;  %v385_v20 = vmul.f32 %v11641_v19, %v11641_v19  ;;  %v286_v25 = vpop.xlane.xlu1 %285  ;;  %v11093_v61 = vld [vmem:[#allocation2 + $0x140] sm:$0xff]  ;;  %v11094_v8 = vld [vmem:[#allocation2 + $0x148] sm:$0xff]  ;;  %1332 = vmatpush1.bf16.msra.mxu1 %v10115_v32 }
 0x132   :  { %14953 = vst [vmem:[#allocation30_spill] sm:$0xff] %v11665_v3  ;;  %v386_v23 = vmul.f32 %v11643_v21, %v11643_v21  ;;  %v437_v35 = vadd.f32 %v436_v14, %v383_v51  ;;  %v309_v36 = vmul.f32 0.0026041667, %v286_v25  ;;  %v387_v37 = vmul.f32 %v11645_v27, %v11645_v27  ;;  %v11092_v51 = vld [vmem:[#allocation2 + $0x138] sm:$0xff]  ;;  %1234 = vmatprep.subr.bf16.mxu0 %v10116_v39  ;;  %v11097_v39 = vld [vmem:[#allocation2 + $0x160] sm:$0xff] }
 0x133   :  { %v388_v38 = vmul.f32 %v11647_v30, %v11647_v30  ;;  %v11681_v41 = vsub.f32 %v11089_v40, %v308_v16  ;;  %v11683_v43 = vsub.f32 %v11090_v42, %v308_v16  ;;  %v11685_v53 = vsub.f32 %v11091_v44, %v308_v16  ;;  %v290_v13 = vpop.xlane.xlu0 %289  ;;  %1235 = vmatpush2.bf16.msra.mxu0 %v10118_v15  ;;  %v10121_v44 = vld [vmem:[#allocation8 + $0x1f8] ss:$12 sps:$4 sm:$0xff]  }
 0x134   :  { %v440_v4 = vadd.f32 %v385_v20, %v384_v18  ;;  %438 = vadd.xlane.f32.xlu1 %v437_v35  ;;  %v11687_v55 = vsub.f32 %v11092_v51, %v309_v36  ;;  %v11689_v62 = vsub.f32 %v11093_v61, %v309_v36  ;;  %v11691_v11 = vsub.f32 %v11094_v8, %v309_v36  ;;  %v10122_v8 = vld [vmem:[#allocation8 + $0x13c] ss:$12 sps:$4 sm:$0xff]  }
 0x135   :  { %14954 = vst [vmem:[#allocation31_spill] sm:$0xff] %v11681_v41  ;;  %14955 = vst [vmem:[#allocation32_spill] sm:$0xff] %v11685_v53  ;;  %v389_v14 = vmul.f32 %v11649_v34, %v11649_v34  ;;  %v310_v16 = vmul.f32 0.0026041667, %v290_v13  ;;  %v444_v40 = vadd.f32 %v388_v38, %v387_v37  ;;  %v390_v18 = vmul.f32 %v11659_v1, %v11659_v1  ;;  %v294_v20 = vpop.xlane.xlu1 %293  ;;  %v11095_v37 = vld [vmem:[#allocation2 + $0x150] sm:$0xff] }
 0x136   :  { %v441_v25 = vadd.f32 %v440_v4, %v386_v23  ;;  %v391_v28 = vmul.f32 %v11661_v6, %v11661_v6  ;;  %v392_v35 = vmul.f32 %v11663_v59, %v11663_v59  ;;  %v311_v36 = vmul.f32 0.0026041667, %v294_v20  ;;  %v10119_v23 = vld [vmem:[#allocation8 + $0x1fc] ss:$12 sps:$4 sm:$0xff]   ;;  %v11096_v4 = vld [vmem:[#allocation2 + $0x158] sm:$0xff]  ;;  %v11098_v20 = vld [vmem:[#allocation2 + $0x168] sm:$0xff]  ;;  %1236 = vmatprep.subr.bf16.mxu0 %v10122_v8 }
 0x137   :  { %v393_v42 = vmul.f32 %v11665_v3, %v11665_v3  ;;  %v11703_v38 = vsub.f32 %v11095_v37, %v310_v16  ;;  %v11705_v32 = vsub.f32 %v11096_v4, %v310_v16  ;;  %v11707_v51 = vsub.f32 %v11097_v39, %v310_v16  ;;  %v11099_v59 = vld [vmem:[#allocation2 + $0x170] sm:$0xff]  ;;  %v11100_v3 = vld [vmem:[#allocation2 + $0x178] sm:$0xff]  ;;  %1333 = vmatprep.subr.bf16.mxu1 %v10119_v23  ;;  %v10124_v37 = vld [vmem:[#allocation8 + $0x138] ss:$12 sps:$4 sm:$0xff]  }
 0x138   :  { %442 = vadd.xlane.f32.xlu0 %v441_v25  ;;  %v445_v61 = vadd.f32 %v444_v40, %v389_v14  ;;  %v448_v13 = vadd.f32 %v391_v28, %v390_v18  ;;  %v11709_v1 = vsub.f32 %v11098_v20, %v311_v36  ;;  %v11711_v15 = vsub.f32 %v11099_v59, %v311_v36 }
 0x139   :  { %14956 = vst [vmem:[#allocation33_spill] sm:$0xff] %v11703_v38  ;;  %14957 = vst [vmem:[#allocation34_spill] sm:$0xff] %v11705_v32  ;;  %v11713_v25 = vsub.f32 %v11100_v3, %v311_v36  ;;  %v394_v4 = vmul.f32 %v11667_v10, %v11667_v10  ;;  %v395_v14 = vmul.f32 %v11669_v12, %v11669_v12  ;;  %1334 = vmatpush1.bf16.msra.mxu1 %v10121_v44  ;;  %v10125_v36 = vld [vmem:[#allocation8 + $0x1e4] ss:$12 sps:$4 sm:$0xff]  }
 0x13a   :  { %14958 = vst [vmem:[#allocation35_spill] sm:$0xff] %v11707_v51  ;;  %14959 = vst [vmem:[#allocation36_spill] sm:$0xff] %v11709_v1  ;;  %446 = vadd.xlane.f32.xlu1 %v445_v61  ;;  %v396_v16 = vmul.f32 %v11681_v41, %v11681_v41  ;;  %v397_v40 = vmul.f32 %v11683_v43, %v11683_v43  ;;  %v449_v59 = vadd.f32 %v448_v13, %v392_v35  ;;  %v10127_v35 = vld [vmem:[#allocation8 + $0x1e0] ss:$12 sps:$4 sm:$0xff]   ;;  %v10128_v13 = vld [vmem:[#allocation8 + $0x124] ss:$12 sps:$4 sm:$0xff]  }
 0x13b   :  { %v398_v3 = vmul.f32 %v11685_v53, %v11685_v53  ;;  %v399_v18 = vmul.f32 %v11687_v55, %v11687_v55  ;;  %v400_v28 = vmul.f32 %v11689_v62, %v11689_v62  ;;  %v452_v23 = vadd.f32 %v394_v4, %v393_v42  ;;  %v10130_v4 = vld [vmem:[#allocation8 + $0x120] ss:$12 sps:$4 sm:$0xff]   ;;  %1237 = vmatpush2.bf16.msra.mxu0 %v10124_v37 }
 0x13c   :  { %v456_v39 = vadd.f32 %v397_v40, %v396_v16  ;;  %v401_v61 = vmul.f32 %v11691_v11, %v11691_v11  ;;  %v402_v20 = vmul.f32 %v11703_v38, %v11703_v38  ;;  %450 = vadd.xlane.f32.xlu0 %v449_v59  ;;  %v403_v53 = vmul.f32 %v11705_v32, %v11705_v32  ;;  %v10131_v59 = vld [vmem:[#allocation8 + $0x1cc] ss:$12 sps:$4 sm:$0xff]   ;;  %v10133_v32 = vld [vmem:[#allocation8 + $0x1c8] ss:$12 sps:$4 sm:$0xff]  }
 0x13d   :  { %v460_v41 = vadd.f32 %v400_v28, %v399_v18  ;;  %v404_v44 = vmul.f32 %v11707_v51, %v11707_v51  ;;  %v405_v42 = vmul.f32 %v11709_v1, %v11709_v1  ;;  %v453_v16 = vadd.f32 %v452_v23, %v395_v14  ;;  %1335 = vmatprep.subr.bf16.mxu1 %v10125_v36  ;;  %v10134_v1 = vld [vmem:[#allocation8 + $0x10c] ss:$12 sps:$4 sm:$0xff]   ;;  %v10137_v37 = vld [vmem:[#allocation8 + $0x1b4] ss:$12 sps:$4 sm:$0xff]   ;;  %v10139_v36 = vld [vmem:[#allocation8 + $0x1b0] ss:$12 sps:$4 sm:$0xff]  }
 0x13e   :  { %v457_v40 = vadd.f32 %v456_v39, %v398_v3  ;;  %v406_v38 = vmul.f32 %v11711_v15, %v11711_v15  ;;  %v464_v8 = vadd.f32 %v403_v53, %v402_v20  ;;  %1238 = vmatprep.subr.bf16.mxu0 %v10128_v13  ;;  %v407_v28 = vmul.f32 %v11713_v25, %v11713_v25  ;;  %v10136_v3 = vld [vmem:[#allocation8 + $0x108] ss:$12 sps:$4 sm:$0xff]   ;;  %v10145_v39 = vld [vmem:[#allocation8 + $0x198] ss:$12 sps:$4 sm:$0xff]  }
 0x13f   :  { %454 = vadd.xlane.f32.xlu1 %v453_v16  ;;  %v461_v18 = vadd.f32 %v460_v41, %v401_v61  ;;  %1336 = vmatpush1.bf16.msra.mxu1 %v10127_v35  ;;  %v10140_v23 = vld [vmem:[#allocation8 + $0xf4] ss:$12 sps:$4 sm:$0xff]   ;;  %v10142_v41 = vld [vmem:[#allocation8 + $0xf0] ss:$12 sps:$4 sm:$0xff]   ;;  %v10148_v20 = vld [vmem:[#allocation8 + $0xd8] ss:$12 sps:$4 sm:$0xff]  }
 0x140   :  { %v468_v51 = vadd.f32 %v406_v38, %v405_v42  ;;  %458 = vadd.xlane.f32.xlu0 %v457_v40  ;;  %v465_v14 = vadd.f32 %v464_v8, %v404_v44  ;;  %1337 = vmatprep.subr.bf16.mxu1 %v10131_v59  ;;  %v10143_v38 = vld [vmem:[#allocation8 + $0x19c] ss:$12 sps:$4 sm:$0xff]   ;;  %v10154_v35 = vld [vmem:[#allocation8 + $0xc0] ss:$12 sps:$4 sm:$0xff]   ;;  %v14792_v13 = vmov 0  }
 0x141   :  { %1239 = vmatpush2.bf16.msra.mxu0 %v10130_v4  ;;  %v10146_v61 = vld [vmem:[#allocation8 + $0xdc] ss:$12 sps:$4 sm:$0xff]   ;;  %1361 = vmatprep.mubr.bf16.mxu1 %v14792_v13  ;;  %v569_v4 = vlaneseq }
 0x142   :  { %1240 = vmatprep.subr.bf16.mxu0 %v10134_v1  ;;  %v469_v53 = vadd.f32 %v468_v51, %v407_v28  ;;  %v10149_v1 = vld [vmem:[#allocation8 + $0x184] ss:$12 sps:$4 sm:$0xff]   ;;  %v10151_v51 = vld [vmem:[#allocation8 + $0x180] ss:$12 sps:$4 sm:$0xff]  }
 0x143   :  { %462 = vadd.xlane.f32.xlu1 %v461_v18  ;;  %1338 = vmatpush1.bf16.msra.mxu1 %v10133_v32  ;;  %v10152_v32 = vld [vmem:[#allocation8 + $0xc4] ss:$12 sps:$4 sm:$0xff]   ;;  %v11747_v16 = vshrl.u32 %v569_v4, 7 }
 0x144   :  { %466 = vadd.xlane.f32.xlu0 %v465_v14  ;;  %1339 = vmatprep.subr.bf16.mxu1 %v10137_v37  ;;  %v10155_v44 = vld [vmem:[#allocation8 + $0x170] ss:$12 sps:$4 sm:$0xff]  }
 0x145   :  { %1241 = vmatpush2.bf16.msra.mxu0 %v10136_v3  ;;  %v11744_v42 = vld [vmem:[#allocation8 + $0x230] ss:$12 sps:$4 sm:$0xff]   ;;  %14960 = vst [vmem:[#allocation37_spill] sm:$0xff] %v11747_v16  ;;  %v11756_v4 = vsub.s32 0, %v11747_v16 }
 0x146   :  { %1242 = vmatprep.subr.bf16.mxu0 %v10140_v23 }
 0x147   :  { %470 = vadd.xlane.f32.xlu1 %v469_v53  ;;  %1340 = vmatpush1.bf16.msra.mxu1 %v10139_v36  ;;  %14963 = vst [vmem:[#allocation40_spill] sm:$0xff] %v11756_v4 }
 0x148   :  { %1341 = vmatprep.subr.bf16.mxu1 %v10143_v38 }
 0x149   :  { %1243 = vmatpush2.bf16.msra.mxu0 %v10142_v41 }
 0x14a   :  { %1244 = vmatprep.subr.bf16.mxu0 %v10146_v61 }
 0x14b   :  { %1342 = vmatpush1.bf16.msra.mxu1 %v10145_v39 }
 0x14c   :  { %1343 = vmatprep.subr.bf16.mxu1 %v10149_v1  ;;  %v11750_v1 = vsub.s32 1, %v11747_v16 }
 0x14d   :  { %1245 = vmatpush2.bf16.msra.mxu0 %v10148_v20 }
 0x14e   :  { %1246 = vmatprep.subr.bf16.mxu0 %v10152_v32  ;;  %14961 = vst [vmem:[#allocation38_spill] sm:$0xff] %v11750_v1 }
 0x14f   :  { %1344 = vmatpush1.bf16.msra.mxu1 %v10151_v51  ;;  %v11753_v51 = vsub.s32 2, %v11747_v16 }
 0x150   :  { %9568 = vmatprep.subr.bf16.mxu1 %v10155_v44  ;;  %v223_v44 = vld [vmem:[#allocation5] sm:$0x7] }
 0x151   :  { %1247 = vmatpush2.bf16.msra.mxu0 %v10154_v35  ;;  %14962 = vst [vmem:[#allocation39_spill] sm:$0xff] %v11753_v51 }
 0x152   :  { %10032 = vmatprep.subr.bf16.mxu0 %v11744_v42 }
 0x1ac   :  { %v411_v40 = vpop.xlane.xlu0 %410 }
 0x1ad   :  { %v472_v8 = vmul.f32 0.0026041667, %v411_v40 }
 0x1af   :  { %v488_v59 = vadd.f32 1e-05, %v472_v8 }
 0x1b0   :  { %v415_v18 = vpop.xlane.xlu1 %414  ;;  %v419_v28 = vpop.xlane.xlu0 %418 }
 0x1b1   :  { %10995 = vrsqrt.f32 %v488_v59  ;;  %v473_v14 = vmul.f32 0.0026041667, %v415_v18  ;;  %v474_v3 = vmul.f32 0.0026041667, %v419_v28  ;;  %v224_v18 = vld [vmem:[#allocation7] sm:$0x7]  ;;  %v11759_v28 = vrot.slane %v223_v44, %v11750_v1 }
 0x1b3   :  { %v489_v37 = vadd.f32 1e-05, %v473_v14  ;;  %v490_v53 = vadd.f32 1e-05, %v474_v3  ;;  %v11762_v14 = vrot.slane %v223_v44, %v11753_v51 }
 0x1b4   :  { %v423_v36 = vpop.xlane.xlu1 %422 }
 0x1b5   :  { %10997 = vrsqrt.f32 %v489_v37  ;;  %v475_v23 = vmul.f32 0.0026041667, %v423_v36  ;;  %v11765_v36 = vrot.slane %v223_v44, %v11756_v4  ;;  %v11776_v44 = vrot.slane %v224_v18, %v11753_v51 }
 0x1b6   :  { %10999 = vrsqrt.f32 %v490_v53  ;;  %v427_v41 = vpop.xlane.xlu0 %426 }
 0x1b7   :  { %v491_v38 = vadd.f32 1e-05, %v475_v23  ;;  %v476_v39 = vmul.f32 0.0026041667, %v427_v41 }
 0x1b9   :  { %11001 = vrsqrt.f32 %v491_v38  ;;  %v492_v61 = vadd.f32 1e-05, %v476_v39  ;;  %v431_v20 = vpop.xlane.xlu1 %430 }
 0x1ba   :  { %v477_v32 = vmul.f32 0.0026041667, %v431_v20  ;;  %v435_v35 = vpop.xlane.xlu0 %434  ;;  %v11771_v20 = vrot.slane %v224_v18, %v11750_v1 }
 0x1bb   :  { %v478_v40 = vmul.f32 0.0026041667, %v435_v35  ;;  %11003 = vrsqrt.f32 %v492_v61 }
 0x1bc   :  { %v493_v8 = vadd.f32 1e-05, %v477_v32 }
 0x1bd   :  { %v439_v59 = vpop.xlane.xlu1 %438  ;;  %v494_v37 = vadd.f32 1e-05, %v478_v40 }
 0x1be   :  { %v10996_v3 = vpop.eup %10995  ;;  %v479_v53 = vmul.f32 0.0026041667, %v439_v59  ;;  %11005 = vrsqrt.f32 %v493_v8 }
 0x1bf   :  { %v521_v23 = vmul.f32 %v10996_v3, %v11549_v46  ;;  %v522_v41 = vmul.f32 %v10996_v3, %v11552_v47  ;;  %v520_v38 = vmul.f32 %v10996_v3, %v11546_v45  ;;  %v11779_v46 = vrot.slane %v224_v18, %v11756_v4 }
 0x1c0   :  { %v495_v39 = vadd.f32 1e-05, %v479_v53  ;;  %11007 = vrsqrt.f32 %v494_v37 }
 0x1c1   :  { %v443_v61 = vpop.xlane.xlu0 %442  ;;  %v585_v35 = vmul.f32 %v11759_v28, %v521_v23  ;;  %v586_v40 = vmul.f32 %v11762_v14, %v522_v41  ;;  %v584_v53 = vmul.f32 %v11765_v36, %v520_v38 }
 0x1c2   :  { %v480_v32 = vmul.f32 0.0026041667, %v443_v61  ;;  %v10998_v8 = vpop.eup %10997  ;;  %11009 = vrsqrt.f32 %v495_v39 }
 0x1c3   :  { %v447_v59 = vpop.xlane.xlu1 %446  ;;  %v11000_v47 = vpop.eup %10999  ;;  %v524_v3 = vmul.f32 %v10998_v8, %v11577_v58  ;;  %v525_v23 = vmul.f32 %v10998_v8, %v11579_v60  ;;  %v523_v41 = vmul.f32 %v10998_v8, %v11575_v56  ;;  %v649_v51 = vadd.f32 %v11771_v20, %v585_v35 }
 0x1c4   :  { %v481_v45 = vmul.f32 0.0026041667, %v447_v59  ;;  %v496_v61 = vadd.f32 1e-05, %v480_v32  ;;  %v650_v18 = vadd.f32 %v11776_v44, %v586_v40  ;;  %v527_v37 = vmul.f32 %v11000_v47, %v11558_v49 }
 0x1c5   :  { %v451_v13 = vpop.xlane.xlu0 %450  ;;  %v588_v16 = vmul.f32 %v11759_v28, %v524_v3  ;;  %v589_v38 = vmul.f32 %v11762_v14, %v525_v23  ;;  %v587_v39 = vmul.f32 %v11765_v36, %v523_v41  ;;  %v528_v8 = vmul.f32 %v11000_v47, %v11561_v50 }
 0x1c6   :  { %v11002_v59 = vpop.eup %11001  ;;  %v497_v4 = vadd.f32 1e-05, %v481_v45  ;;  %v482_v58 = vmul.f32 0.0026041667, %v451_v13  ;;  %v591_v32 = vmul.f32 %v11759_v28, %v527_v37  ;;  %v648_v49 = vadd.f32 %v11779_v46, %v584_v53  ;;  %v10158_v53 = vld [vmem:[#allocation8 + $0x158] ss:$12 sps:$4 sm:$0xff]  }
 0x1c7   :  { %v652_v60 = vadd.f32 %v11771_v20, %v588_v16  ;;  %v530_v56 = vmul.f32 %v11002_v59, %v11583_v7  ;;  %v653_v40 = vadd.f32 %v11776_v44, %v589_v38  ;;  %v651_v45 = vadd.f32 %v11779_v46, %v587_v39  ;;  %v10156_v7 = vld [vmem:[#allocation8 + $0xb0] ss:$12 sps:$4 sm:$0xff]  }
 0x1c8   :  { %v455_v35 = vpop.xlane.xlu1 %454  ;;  %v531_v13 = vmul.f32 %v11002_v59, %v11585_v9  ;;  %v11799_v3 = vpop.eup %11003  ;;  %11011 = vrsqrt.f32 %v496_v61  ;;  %v498_v50 = vadd.f32 1e-05, %v482_v58  ;;  %v655_v9 = vadd.f32 %v11771_v20, %v591_v32 }
 0x1c9   :  { %v483_v23 = vmul.f32 0.0026041667, %v455_v35  ;;  %v11801_v16 = vpack.c.bf16 %v652_v60, %v649_v51  ;;  %v594_v41 = vmul.f32 %v11759_v28, %v530_v56  ;;  %11013 = vrsqrt.f32 %v497_v4  ;;  %v459_v37 = vpop.xlane.xlu0 %458  ;;  %v10160_v60 = vld [vmem:[#allocation8 + $0x218] ss:$12 sps:$4 sm:$0xff]  }
 0x1ca   :  { %v11804_v1 = vpack.c.bf16 %v653_v40, %v650_v18  ;;  %v11806_v38 = vpack.c.bf16 %v651_v45, %v648_v49  ;;  %v592_v51 = vmul.f32 %v11762_v14, %v528_v8  ;;  %v595_v39 = vmul.f32 %v11762_v14, %v531_v13  ;;  %v10159_v49 = vld [vmem:[#allocation8 + $0x98] ss:$12 sps:$4 sm:$0xff]  }
 0x1cb   :  { %1248 = vmatprep.mubr.bf16.mxu0 %v11801_v16  ;;  %v658_v61 = vadd.f32 %v11771_v20, %v594_v41  ;;  %v11006_v56 = vpop.eup %11005  ;;  %v499_v4 = vadd.f32 1e-05, %v483_v23  ;;  %v526_v18 = vmul.f32 %v11000_v47, %v11555_v48  ;;  %v529_v35 = vmul.f32 %v11002_v59, %v11581_v63  ;;  %v10161_v47 = vld [vmem:[#allocation8 + $0x140] ss:$12 sps:$4 sm:$0xff]  }
 0x1cc   :  { %v463_v58 = vpop.xlane.xlu1 %462  ;;  %1362 = vmatmul.mubr.bf16.vlgmr.msra.gmra.mxu1 %v11804_v1  ;;  %1249 = vmatmul.mubr.bf16.vlgmr.msra.gmra.mxu0 %v11806_v38  ;;  %v533_v32 = vmul.f32 %v11799_v3, %v11597_v24  ;;  %v484_v40 = vmul.f32 0.0026041667, %v459_v37  ;;  %v14964_v13 = vmov 0   ;;  %v659_v23 = vadd.f32 %v11776_v44, %v595_v39  ;;  %v10163_v63 = vld [vmem:[#allocation8 + $0x200] ss:$12 sps:$4 sm:$0xff]  }
 0x1cd   :  { %9569 = vmatpush3.bf16.msra.mxu1 %v10156_v7  ;;  %v11819_v8 = vpack.c.bf16 %v658_v61, %v655_v9  ;;  %10033 = vmatpush3.bf16.msra.mxu0 %v11744_v42  ;;  %v485_v45 = vmul.f32 0.0026041667, %v463_v58  ;;  %v590_v48 = vmul.f32 %v11765_v36, %v526_v18  ;;  %11015 = vrsqrt.f32 %v498_v50  ;;  %v11008_v7 = vpop.eup %11007  ;;  %v10162_v18 = vld [vmem:[#allocation8 + $0x80] ss:$12 sps:$4 sm:$0xff]  }
 0x1ce   :  { %1371 = vmatprep.mubr.bf16.mxu1 %v14964_v13  ;;  %9570 = vmatprep.subr.bf16.mxu1 %v10158_v53  ;;  %v593_v24 = vmul.f32 %v11765_v36, %v529_v35  ;;  %v536_v59 = vmul.f32 %v11006_v56, %v11603_v31  ;;  %v597_v42 = vmul.f32 %v11759_v28, %v533_v32  ;;  %11017 = vrsqrt.f32 %v499_v4 }
 0x1cf   :  { %1258 = vmatprep.mubr.bf16.mxu0 %v11819_v8  ;;  %10034 = vmatprep.subr.bf16.mxu0 %v10160_v60  ;;  %v656_v41 = vadd.f32 %v11776_v44, %v592_v51  ;;  %v534_v37 = vmul.f32 %v11799_v3, %v11599_v26  ;;  %v11010_v53 = vpop.eup %11009  ;;  %v500_v9 = vadd.f32 1e-05, %v484_v40  ;;  %v654_v50 = vadd.f32 %v11779_v46, %v590_v48  ;;  %v467_v26 = vpop.xlane.xlu0 %466 }
 0x1d0   :  { %v657_v61 = vadd.f32 %v11779_v46, %v593_v24  ;;  %v600_v39 = vmul.f32 %v11759_v28, %v536_v59  ;;  %v501_v31 = vadd.f32 1e-05, %v485_v45  ;;  %v661_v4 = vadd.f32 %v11771_v20, %v597_v42  ;;  %v471_v45 = vpop.xlane.xlu1 %470 }
 0x1d1   :  { %9571 = vmatpush3.bf16.msra.mxu1 %v10159_v49  ;;  %10035 = vmatpush3.bf16.msra.mxu0 %v10160_v60  ;;  %v11835_v58 = vpack.c.bf16 %v659_v23, %v656_v41  ;;  %v537_v51 = vmul.f32 %v11006_v56, %v11605_v33  ;;  %v598_v40 = vmul.f32 %v11762_v14, %v534_v37  ;;  %v10164_v49 = vld [vmem:[#allocation8 + $0x128] ss:$12 sps:$4 sm:$0xff]   ;;  %11019 = vrsqrt.f32 %v500_v9 }
 0x1d2   :  { %9572 = vmatprep.subr.bf16.mxu1 %v10161_v47  ;;  %10036 = vmatprep.subr.bf16.mxu0 %v10163_v63  ;;  %v11839_v35 = vpack.c.bf16 %v657_v61, %v654_v50  ;;  %v664_v32 = vadd.f32 %v11771_v20, %v600_v39  ;;  %v532_v60 = vmul.f32 %v11799_v3, %v11595_v22  ;;  %v10166_v47 = vld [vmem:[#allocation8 + $0x1e8] ss:$12 sps:$4 sm:$0xff]   ;;  %v486_v42 = vmul.f32 0.0026041667, %v467_v26 }
 0x1d3   :  { %v601_v23 = vmul.f32 %v11762_v14, %v537_v51  ;;  %v535_v33 = vmul.f32 %v11006_v56, %v11601_v29  ;;  %v539_v48 = vmul.f32 %v11008_v7, %v11619_v0  ;;  %v542_v3 = vmul.f32 %v11010_v53, %v11625_v54  ;;  %v10165_v56 = vld [vmem:[#allocation8 + $0x68] ss:$12 sps:$4 sm:$0xff]  }
 0x1d4   :  { %1372 = vmatmul.mubr.bf16.gmra.mxu1 %v11835_v58  ;;  %1259 = vmatmul.mubr.bf16.gmra.mxu0 %v11839_v35  ;;  %v11850_v24 = vpack.c.bf16 %v664_v32, %v661_v4  ;;  %v596_v22 = vmul.f32 %v11765_v36, %v532_v60  ;;  %11021 = vrsqrt.f32 %v501_v31  ;;  %v487_v9 = vmul.f32 0.0026041667, %v471_v45 }
 0x1d5   :  { %1381 = vmatprep.mubr.bf16.mxu1 %v14964_v13  ;;  %v11855_v59 = vpop.eup %11011  ;;  %v665_v41 = vadd.f32 %v11776_v44, %v601_v23  ;;  %9573 = vmatpush3.bf16.msra.mxu1 %v10162_v18  ;;  %v599_v29 = vmul.f32 %v11765_v36, %v535_v33  ;;  %v603_v0 = vmul.f32 %v11759_v28, %v539_v48  ;;  %v10168_v33 = vld [vmem:[#allocation8 + $0x50] ss:$12 sps:$4 sm:$0xff]   ;;  %v502_v48 = vadd.f32 1e-05, %v486_v42 }
 0x1d6   :  { %10037 = vmatpush3.bf16.msra.mxu0 %v10163_v63  ;;  %v11014_v37 = vpop.eup %11013  ;;  %1268 = vmatprep.mubr.bf16.mxu0 %v11850_v24  ;;  %v662_v50 = vadd.f32 %v11776_v44, %v598_v40  ;;  %v606_v54 = vmul.f32 %v11759_v28, %v542_v3  ;;  %v660_v61 = vadd.f32 %v11779_v46, %v596_v22  ;;  %v10167_v63 = vld [vmem:[#allocation8 + $0x110] ss:$12 sps:$4 sm:$0xff]   ;;  %v10170_v22 = vld [vmem:[#allocation8 + $0xf8] ss:$12 sps:$4 sm:$0xff]  }
 0x1d7   :  { %9574 = vmatprep.subr.bf16.mxu1 %v10164_v49  ;;  %v663_v39 = vadd.f32 %v11779_v46, %v599_v29  ;;  %v540_v4 = vmul.f32 %v11008_v7, %v11621_v2  ;;  %v543_v51 = vmul.f32 %v11010_v53, %v11627_v57  ;;  %10038 = vmatprep.subr.bf16.mxu0 %v10166_v47  ;;  %v503_v49 = vadd.f32 1e-05, %v487_v9  ;;  %v10171_v9 = vld [vmem:[#allocation8 + $0x38] ss:$12 sps:$4 sm:$0xff]  }
 0x1d8   :  { %v11867_v18 = vpack.c.bf16 %v665_v41, %v662_v50  ;;  %v670_v31 = vadd.f32 %v11771_v20, %v606_v54  ;;  %v538_v26 = vmul.f32 %v11008_v7, %v11617_v52  ;;  %v541_v32 = vmul.f32 %v11010_v53, %v11623_v5 }
 0x1d9   :  { %v667_v40 = vadd.f32 %v11771_v20, %v603_v0  ;;  %v607_v60 = vmul.f32 %v11762_v14, %v543_v51  ;;  %9575 = vmatpush3.bf16.msra.mxu1 %v10165_v56  ;;  %v545_v2 = vmul.f32 %v11855_v59, %v11641_v19  ;;  %v548_v57 = vmul.f32 %v11014_v37, %v11647_v30  ;;  %v10169_v19 = vld [vmem:[#allocation8 + $0x1d0] ss:$12 sps:$4 sm:$0xff]   ;;  %v10172_v0 = vld [vmem:[#allocation8 + $0x1b8] ss:$12 sps:$4 sm:$0xff]  }
 0x1da   :  { %v11877_v45 = vpack.c.bf16 %v663_v39, %v660_v61  ;;  %v605_v23 = vmul.f32 %v11765_v36, %v541_v32  ;;  %10039 = vmatpush3.bf16.msra.mxu0 %v10166_v47  ;;  %v11880_v52 = vpop.eup %11015  ;;  %v604_v7 = vmul.f32 %v11762_v14, %v540_v4  ;;  %9576 = vmatprep.subr.bf16.mxu1 %v10167_v63  ;;  %11023 = vrsqrt.f32 %v503_v49 }
 0x1db   :  { %v11883_v5 = vpack.c.bf16 %v670_v31, %v667_v40  ;;  %v612_v53 = vmul.f32 %v11759_v28, %v548_v57  ;;  %v11018_v30 = vpop.eup %11017  ;;  %v602_v47 = vmul.f32 %v11765_v36, %v538_v26  ;;  %v671_v3 = vadd.f32 %v11776_v44, %v607_v60  ;;  %10040 = vmatprep.subr.bf16.mxu0 %v10169_v19  ;;  %v10174_v60 = vld [vmem:[#allocation8 + $0x20] ss:$12 sps:$4 sm:$0xff]  }
 0x1dc   :  { %1382 = vmatmul.mubr.bf16.gmra.mxu1 %v11867_v18  ;;  %1269 = vmatmul.mubr.bf16.gmra.mxu0 %v11877_v45  ;;  %v609_v41 = vmul.f32 %v11759_v28, %v545_v2  ;;  %v549_v29 = vmul.f32 %v11014_v37, %v11649_v34  ;;  %v669_v56 = vadd.f32 %v11779_v46, %v605_v23  ;;  %11025 = vrsqrt.f32 %v502_v48  ;;  %v10175_v2 = vld [vmem:[#allocation8 + $0x1a0] ss:$12 sps:$4 sm:$0xff]  }
 0x1dd   :  { %1391 = vmatprep.mubr.bf16.mxu1 %v14964_v13  ;;  %1278 = vmatprep.mubr.bf16.mxu0 %v11883_v5  ;;  %v547_v42 = vmul.f32 %v11014_v37, %v11645_v27  ;;  %v668_v50 = vadd.f32 %v11776_v44, %v604_v7  ;;  %v676_v54 = vadd.f32 %v11771_v20, %v612_v53  ;;  %v14965_v53 = vld [vmem:[#allocation30_spill] sm:$0xff] }
 0x1de   :  { %9577 = vmatpush3.bf16.msra.mxu1 %v10168_v33  ;;  %v546_v61 = vmul.f32 %v11855_v59, %v11643_v21  ;;  %v554_v39 = vmul.f32 %v11018_v30, %v11667_v10  ;;  %v666_v34 = vadd.f32 %v11779_v46, %v602_v47  ;;  %v544_v4 = vmul.f32 %v11855_v59, %v11639_v17  ;;  %v11904_v27 = vpop.eup %11019  ;;  %v10173_v17 = vld [vmem:[#allocation8 + $0xe0] ss:$12 sps:$4 sm:$0xff]   ;;  %v10176_v33 = vld [vmem:[#allocation8 + $0xc8] ss:$12 sps:$4 sm:$0xff]  }
 0x1df   :  { %10041 = vmatpush3.bf16.msra.mxu0 %v10169_v19  ;;  %9578 = vmatprep.subr.bf16.mxu1 %v10170_v22  ;;  %v11906_v37 = vpack.c.bf16 %v671_v3, %v668_v50  ;;  %v673_v51 = vadd.f32 %v11771_v20, %v609_v41  ;;  %v613_v63 = vmul.f32 %v11762_v14, %v549_v29  ;;  %v14966_v22 = vld [vmem:[#allocation29_spill] sm:$0xff] }
 0x1e0   :  { %v551_v21 = vmul.f32 %v11880_v52, %v11661_v6  ;;  %10042 = vmatprep.subr.bf16.mxu0 %v10172_v0  ;;  %v11912_v10 = vpack.c.bf16 %v669_v56, %v666_v34  ;;  %v611_v31 = vmul.f32 %v11765_v36, %v547_v42  ;;  %v610_v32 = vmul.f32 %v11762_v14, %v546_v61 }
 0x1e1   :  { %v11022_v59 = vpop.eup %11021  ;;  %v11916_v26 = vpack.c.bf16 %v676_v54, %v673_v51  ;;  %v618_v40 = vmul.f32 %v11759_v28, %v554_v39  ;;  %v608_v6 = vmul.f32 %v11765_v36, %v544_v4  ;;  %v677_v57 = vadd.f32 %v11776_v44, %v613_v63  ;;  %v10177_v54 = vld [vmem:[#allocation8 + $0x8] ss:$12 sps:$4 sm:$0xff]  }
 0x1e2   :  { %9579 = vmatpush3.bf16.msra.mxu1 %v10171_v9  ;;  %v615_v49 = vmul.f32 %v11759_v28, %v551_v21  ;;  %v555_v23 = vmul.f32 %v11018_v30, %v11669_v12  ;;  %v675_v7 = vadd.f32 %v11779_v46, %v611_v31  ;;  %v553_v19 = vmul.f32 %v11018_v30, %v14965_v53  ;;  %v14967_v12 = vld [vmem:[#allocation28_spill] sm:$0xff]  ;;  %v10178_v4 = vld [vmem:[#allocation8 + $0x188] ss:$12 sps:$4 sm:$0xff]  }
 0x1e3   :  { %10043 = vmatpush3.bf16.msra.mxu0 %v10172_v0  ;;  %9580 = vmatprep.subr.bf16.mxu1 %v10173_v17  ;;  %v674_v48 = vadd.f32 %v11776_v44, %v610_v32  ;;  %v682_v47 = vadd.f32 %v11771_v20, %v618_v40  ;;  %v552_v3 = vmul.f32 %v11880_v52, %v14966_v22 }
 0x1e4   :  { %1392 = vmatmul.mubr.bf16.gmra.mxu1 %v11906_v37  ;;  %1279 = vmatmul.mubr.bf16.gmra.mxu0 %v11912_v10  ;;  %v560_v41 = vmul.f32 %v11022_v59, %v11689_v62  ;;  %v672_v29 = vadd.f32 %v11779_v46, %v608_v6  ;;  %v550_v56 = vmul.f32 %v11880_v52, %v14967_v12  ;;  %v14968_v6 = vld [vmem:[#allocation32_spill] sm:$0xff] }
 0x1e5   :  { %1401 = vmatprep.mubr.bf16.mxu1 %v14964_v13  ;;  %1288 = vmatprep.mubr.bf16.mxu0 %v11916_v26  ;;  %v11937_v42 = vpack.c.bf16 %v677_v57, %v674_v48  ;;  %v679_v30 = vadd.f32 %v11771_v20, %v615_v49  ;;  %v619_v0 = vmul.f32 %v11762_v14, %v555_v23  ;;  %v14969_v23 = vld [vmem:[#allocation31_spill] sm:$0xff] }
 0x1e6   :  { %9581 = vmatpush3.bf16.msra.mxu1 %v10174_v60  ;;  %10044 = vmatprep.subr.bf16.mxu0 %v10175_v2  ;;  %v557_v9 = vmul.f32 %v11904_v27, %v11683_v43  ;;  %v11943_v50 = vpack.c.bf16 %v675_v7, %v672_v29  ;;  %v617_v62 = vmul.f32 %v11765_v36, %v553_v19  ;;  %v14970_v7 = vld [vmem:[#allocation34_spill] sm:$0xff] }
 0x1e7   :  { %9582 = vmatprep.subr.bf16.mxu1 %v10176_v33  ;;  %10045 = vmatpush3.bf16.msra.mxu0 %v10175_v2  ;;  %v11024_v61 = vpop.eup %11023  ;;  %v11947_v52 = vpack.c.bf16 %v682_v47, %v679_v30  ;;  %v616_v39 = vmul.f32 %v11762_v14, %v552_v3  ;;  %v624_v34 = vmul.f32 %v11759_v28, %v560_v41 }
 0x1e8   :  { %v614_v43 = vmul.f32 %v11765_v36, %v550_v56  ;;  %v683_v63 = vadd.f32 %v11776_v44, %v619_v0  ;;  %v621_v21 = vmul.f32 %v11759_v28, %v557_v9  ;;  %v561_v31 = vmul.f32 %v11022_v59, %v11691_v11  ;;  %10046 = vmatprep.subr.bf16.mxu0 %v10178_v4  ;;  %v14971_v56 = vld [vmem:[#allocation36_spill] sm:$0xff] }
 0x1e9   :  { %v11026_v51 = vpop.eup %11025  ;;  %v681_v17 = vadd.f32 %v11779_v46, %v617_v62  ;;  %v559_v32 = vmul.f32 %v11022_v59, %v11687_v55  ;;  %v680_v40 = vadd.f32 %v11776_v44, %v616_v39  ;;  %v688_v60 = vadd.f32 %v11771_v20, %v624_v34  ;;  %v14972_v62 = vld [vmem:[#allocation35_spill] sm:$0xff]  ;;  %v14973_v34 = vld [vmem:[#allocation33_spill] sm:$0xff] }
 0x1ea   :  { %9583 = vmatpush3.bf16.msra.mxu1 %v10177_v54  ;;  %v558_v2 = vmul.f32 %v11904_v27, %v14968_v6  ;;  %v566_v57 = vmul.f32 %v11024_v61, %v11711_v15  ;;  %v678_v49 = vadd.f32 %v11779_v46, %v614_v43  ;;  %v556_v11 = vmul.f32 %v11904_v27, %v14969_v23 }
 0x1eb   :  { %10047 = vmatpush3.bf16.msra.mxu0 %v10178_v4  ;;  %v713_v33 = vpack.c.bf16 %v683_v63, %v680_v40  ;;  %v685_v55 = vadd.f32 %v11771_v20, %v621_v21  ;;  %v625_v59 = vmul.f32 %v11762_v14, %v561_v31  ;;  %v563_v53 = vmul.f32 %v11026_v51, %v14970_v7 }
 0x1ec   :  { %1402 = vmatmul.mubr.bf16.gmra.mxu1 %v11937_v42  ;;  %1289 = vmatmul.mubr.bf16.gmra.mxu0 %v11943_v50  ;;  %v711_v19 = vpack.c.bf16 %v681_v17, %v678_v49  ;;  %v623_v48 = vmul.f32 %v11765_v36, %v559_v32  ;;  %v622_v15 = vmul.f32 %v11762_v14, %v558_v2 }
 0x1ed   :  { %1411 = vmatprep.mubr.bf16.mxu1 %v14964_v13  ;;  %1298 = vmatprep.mubr.bf16.mxu0 %v11947_v52  ;;  %v715_v47 = vpack.c.bf16 %v688_v60, %v685_v55  ;;  %v630_v22 = vmul.f32 %v11759_v28, %v566_v57  ;;  %v620_v27 = vmul.f32 %v11765_v36, %v556_v11 }
 0x1ee   :  { %v689_v3 = vadd.f32 %v11776_v44, %v625_v59  ;;  %v627_v41 = vmul.f32 %v11759_v28, %v563_v53  ;;  %v567_v29 = vmul.f32 %v11024_v61, %v11713_v25  ;;  %v687_v12 = vadd.f32 %v11779_v46, %v623_v48 }
 0x1ef   :  { %v565_v30 = vmul.f32 %v11024_v61, %v14971_v56  ;;  %v686_v0 = vadd.f32 %v11776_v44, %v622_v15  ;;  %v694_v9 = vadd.f32 %v11771_v20, %v630_v22  ;;  %v564_v54 = vmul.f32 %v11026_v51, %v14972_v62 }
 0x1f0   :  { %v684_v39 = vadd.f32 %v11779_v46, %v620_v27  ;;  %v562_v4 = vmul.f32 %v11026_v51, %v14973_v34  ;;  %v691_v63 = vadd.f32 %v11771_v20, %v627_v41  ;;  %v631_v28 = vmul.f32 %v11762_v14, %v567_v29 }
 0x1f1   :  { %v716_v43 = vpack.c.bf16 %v689_v3, %v686_v0  ;;  %v629_v21 = vmul.f32 %v11765_v36, %v565_v30  ;;  %v628_v31 = vmul.f32 %v11762_v14, %v564_v54 }
 0x1f2   :  { %v714_v25 = vpack.c.bf16 %v687_v12, %v684_v39  ;;  %v718_v61 = vpack.c.bf16 %v694_v9, %v691_v63  ;;  %v626_v17 = vmul.f32 %v11765_v36, %v562_v4  ;;  %v695_v51 = vadd.f32 %v11776_v44, %v631_v28 }
 0x1f3   :  { %v693_v32 = vadd.f32 %v11779_v46, %v629_v21  ;;  %v692_v20 = vadd.f32 %v11776_v44, %v628_v31  ;;  %v227_v31 = vld [vmem:[#allocation10] sm:$0x7] }
 0x1f4   :  { %1412 = vmatmul.mubr.bf16.gmra.mxu1 %v713_v33  ;;  %1299 = vmatmul.mubr.bf16.gmra.mxu0 %v711_v19  ;;  %v690_v40 = vadd.f32 %v11779_v46, %v626_v17 }
 0x1f5   :  { %1421 = vmatprep.mubr.bf16.mxu1 %v14964_v13  ;;  %1308 = vmatprep.mubr.bf16.mxu0 %v715_v47  ;;  %v719_v60 = vpack.c.bf16 %v695_v51, %v692_v20  ;;  %v14983_v51 = vld [vmem:[#allocation38_spill] sm:$0xff] }
 0x1f6   :  { %v717_v6 = vpack.c.bf16 %v693_v32, %v690_v40  ;;  %v12124_v32 = vrot.slane %v227_v31, %v14983_v51 }
 0x1fc   :  { %1422 = vmatmul.mubr.bf16.gmra.mxu1 %v716_v43  ;;  %1309 = vmatmul.mubr.bf16.gmra.mxu0 %v714_v25 }
 0x1fd   :  { %1431 = vmatprep.mubr.bf16.mxu1 %v14964_v13  ;;  %1318 = vmatprep.mubr.bf16.mxu0 %v718_v61 }
 0x204   :  { %1432 = vmatmul.mubr.bf16.gmra.mxu1 %v719_v60  ;;  %1319 = vmatmul.mubr.bf16.gmra.mxu0 %v717_v6 }
 0x205   :  { %1474 = vmatprep.mubr.bf16.mxu1 %v11801_v16  ;;  %10048 = vmatprep.mubr.bf16.mxu0 %v11804_v1 }
 0x20c   :  { %1475 = vmatmul.mubr.bf16.vlgmr.msra.gmra.mxu1 %v11806_v38  ;;  %10049 = vmatmul.mubr.bf16.vlgmr.msra.gmra.mxu0 %v11835_v58 }
 0x20d   :  { %1482 = vmatprep.mubr.bf16.mxu1 %v11819_v8  ;;  %10052 = vmatprep.mubr.bf16.mxu0 %v11867_v18 }
 0x214   :  { %1483 = vmatmul.mubr.bf16.gmra.mxu1 %v11839_v35  ;;  %10053 = vmatmul.mubr.bf16.gmra.mxu0 %v11906_v37 }
 0x215   :  { %1490 = vmatprep.mubr.bf16.mxu1 %v11850_v24  ;;  %10056 = vmatprep.mubr.bf16.mxu0 %v11937_v42 }
 0x21c   :  { %1491 = vmatmul.mubr.bf16.gmra.mxu1 %v11877_v45  ;;  %10057 = vmatmul.mubr.bf16.gmra.mxu0 %v713_v33 }
 0x21d   :  { %1498 = vmatprep.mubr.bf16.mxu1 %v11883_v5  ;;  %10060 = vmatprep.mubr.bf16.mxu0 %v716_v43 }
 0x224   :  { %1499 = vmatmul.mubr.bf16.gmra.mxu1 %v11912_v10  ;;  %10061 = vmatmul.mubr.bf16.gmra.mxu0 %v719_v60  ;;  %v14986_v60 = vld [vmem:[#allocation40_spill] sm:$0xff] }
 0x225   :  { %1506 = vmatprep.mubr.bf16.mxu1 %v11916_v26  ;;  %4107 = vmatprep.mubr.bf16.mxu0 %v14964_v13 }
 0x22c   :  { %1507 = vmatmul.mubr.bf16.gmra.mxu1 %v11943_v50 }
 0x22d   :  { %1514 = vmatprep.mubr.bf16.mxu1 %v11947_v52 }
 0x234   :  { %1515 = vmatmul.mubr.bf16.gmra.mxu1 %v711_v19 }
 0x235   :  { %1522 = vmatprep.mubr.bf16.mxu1 %v715_v47 }
 0x23c   :  { %1523 = vmatmul.mubr.bf16.gmra.mxu1 %v714_v25 }
 0x23d   :  { %1530 = vmatprep.mubr.bf16.mxu1 %v718_v61 }
 0x244   :  { %1531 = vmatmul.mubr.bf16.gmra.mxu1 %v717_v6  ;;  %v12131_v6 = vrot.slane %v227_v31, %v14986_v60 }
 0x28c   :  { %v12013_v1 = vpop.f32.mrf.mxu1  ;;  %v12015_v14 = vpop.f32.mrf.mxu0 }
 0x28d   :  { %v1251_v51 = vadd.f32 %v12015_v14, %v12131_v6 }
 0x28e   :  { %v12017_v36 = vpop.f32.mrf.mxu1  ;;  %v1252_v44 = vpop.f32.mrf.mxu0 }
 0x290   :  { %v12019_v46 = vpop.f32.mrf.mxu1  ;;  %v12021_v16 = vpop.f32.mrf.mxu0 }
 0x292   :  { %v12023_v38 = vpop.f32.mrf.mxu1  ;;  %v12025_v8 = vpop.f32.mrf.mxu0 }
 0x294   :  { %v12027_v58 = vpop.f32.mrf.mxu1  ;;  %v12029_v35 = vpop.f32.mrf.mxu0 }
 0x296   :  { %v12031_v24 = vpop.f32.mrf.mxu1  ;;  %v12033_v18 = vpop.f32.mrf.mxu0 }
 0x298   :  { %v12035_v45 = vpop.f32.mrf.mxu1  ;;  %v12037_v5 = vpop.f32.mrf.mxu0 }
 0x29a   :  { %v12039_v37 = vpop.f32.mrf.mxu1  ;;  %v12041_v10 = vpop.f32.mrf.mxu0 }
 0x29c   :  { %v12043_v26 = vpop.f32.mrf.mxu1  ;;  %v12045_v42 = vpop.f32.mrf.mxu0 }
 0x29e   :  { %v12047_v50 = vpop.f32.mrf.mxu1  ;;  %v12049_v52 = vpop.f32.mrf.mxu0 }
 0x2a0   :  { %v12051_v2 = vpop.f32.mrf.mxu1  ;;  %v12053_v57 = vpop.f32.mrf.mxu0 }
 0x2a2   :  { %v12055_v49 = vpop.f32.mrf.mxu1  ;;  %v12057_v23 = vpop.f32.mrf.mxu0 }
 0x2a4   :  { %v12059_v11 = vpop.f32.mrf.mxu1  ;;  %v12061_v33 = vpop.f32.mrf.mxu0 }
 0x2a6   :  { %v12063_v55 = vpop.f32.mrf.mxu1  ;;  %v12065_v59 = vpop.f32.mrf.mxu0 }
 0x2a8   :  { %v12067_v7 = vpop.f32.mrf.mxu1  ;;  %v12069_v53 = vpop.f32.mrf.mxu0 }
 0x2aa   :  { %v12071_v19 = vpop.f32.mrf.mxu1  ;;  %v12073_v48 = vpop.f32.mrf.mxu0 }
 0x2ac   :  { %v12075_v47 = vpop.f32.mrf.mxu1  ;;  %v12077_v15 = vpop.f32.mrf.mxu0 }
 0x2ae   :  { %v12079_v22 = vpop.f32.mrf.mxu1  ;;  %v12081_v27 = vpop.f32.mrf.mxu0 }
 0x2b0   :  { %v12083_v3 = vpop.f32.mrf.mxu1  ;;  %v12085_v41 = vpop.f32.mrf.mxu0 }
 0x2b2   :  { %v12087_v29 = vpop.f32.mrf.mxu1  ;;  %v12089_v12 = vpop.f32.mrf.mxu0 }
 0x2b4   :  { %v12091_v56 = vpop.f32.mrf.mxu1  ;;  %v12093_v30 = vpop.f32.mrf.mxu0 }
 0x2b6   :  { %v12095_v0 = vpop.f32.mrf.mxu1  ;;  %v12097_v9 = vpop.f32.mrf.mxu0 }
 0x2b8   :  { %v12099_v62 = vpop.f32.mrf.mxu1  ;;  %v12101_v54 = vpop.f32.mrf.mxu0 }
 0x2b9   :  { %14974 = vst [vmem:[#allocation30_spill] sm:$0xff] %v12099_v62 }
 0x2ba   :  { %v12103_v39 = vpop.f32.mrf.mxu1  ;;  %v12105_v34 = vpop.f32.mrf.mxu0 }
 0x2bb   :  { %14975 = vst [vmem:[#allocation29_spill] sm:$0xff] %v12103_v39 }
 0x2bc   :  { %v12107_v4 = vpop.f32.mrf.mxu1  ;;  %v12109_v43 = vpop.f32.mrf.mxu0 }
 0x2bd   :  { %14976 = vst [vmem:[#allocation28_spill] sm:$0xff] %v12107_v4  ;;  %14977 = vst [vmem:[#allocation32_spill] sm:$0xff] %v12109_v43  ;;  %v11101_v43 = vld [vmem:[#allocation2 + $0x8] sm:$0xff] }
 0x2be   :  { %v12111_v63 = vpop.f32.mrf.mxu1  ;;  %v12113_v28 = vpop.f32.mrf.mxu0 }
 0x2bf   :  { %14978 = vst [vmem:[#allocation31_spill] sm:$0xff] %v12111_v63  ;;  %v14993_v63 = vld [vmem:[#allocation39_spill] sm:$0xff] }
 0x2c0   :  { %v12115_v25 = vpop.f32.mrf.mxu1  ;;  %v12117_v21 = vpop.f32.mrf.mxu0 }
 0x2c1   :  { %14979 = vst [vmem:[#allocation34_spill] sm:$0xff] %v12115_v25  ;;  %14980 = vst [vmem:[#allocation36_spill] sm:$0xff] %v12117_v21  ;;  %v1253_v21 = vadd.f32 %v1252_v44, %v12124_v32  ;;  %v12152_v44 = vrot.slane %v227_v31, %v14993_v63  ;;  %v11102_v63 = vld [vmem:[#allocation2] sm:$0xff] }
 0x2c2   :  { %v12119_v61 = vpop.f32.mrf.mxu1  ;;  %v12121_v17 = vpop.f32.mrf.mxu0 }
 0x2c3   :  { %14981 = vst [vmem:[#allocation35_spill] sm:$0xff] %v12119_v61  ;;  %14982 = vst [vmem:[#allocation33_spill] sm:$0xff] %v12121_v17  ;;  %v1366_v60 = vadd.f32 %v12017_v36, %v1253_v21 }
 0x2c4   :  { %v12126_v20 = vpop.f32.mrf.mxu1  ;;  %v12128_v40 = vpop.f32.mrf.mxu0 }
 0x2c5   :  { %14984 = vst [vmem:[#allocation41_spill] sm:$0xff] %v12126_v20  ;;  %14985 = vst [vmem:[#allocation42_spill] sm:$0xff] %v12128_v40 }
 0x2c6   :  { %v12133_v13 = vpop.f32.mrf.mxu1  ;;  %v12135_v25 = vpop.f32.mrf.mxu0 }
 0x2c7   :  { %14987 = vst [vmem:[#allocation43_spill] sm:$0xff] %v12133_v13  ;;  %14988 = vst [vmem:[#allocation44_spill] sm:$0xff] %v12135_v25  ;;  %v1257_v13 = vadd.f32 %v12025_v8, %v12124_v32  ;;  %v1263_v8 = vadd.f32 %v12033_v18, %v12124_v32 }
 0x2c8   :  { %v12138_v61 = vpop.f32.mrf.mxu1  ;;  %v12140_v4 = vpop.f32.mrf.mxu0 }
 0x2c9   :  { %14989 = vst [vmem:[#allocation45_spill] sm:$0xff] %v12138_v61  ;;  %14990 = vst [vmem:[#allocation46_spill] sm:$0xff] %v12140_v4  ;;  %v1364_v61 = vadd.f32 %v12013_v1, %v1251_v51  ;;  %v1255_v4 = vadd.f32 %v12021_v16, %v12131_v6  ;;  %v1370_v36 = vadd.f32 %v12023_v38, %v1257_v13 }
 0x2ca   :  { %v12144_v17 = vpop.f32.mrf.mxu1  ;;  %v12146_v20 = vpop.f32.mrf.mxu0  ;;  %v1261_v16 = vadd.f32 %v12029_v35, %v12131_v6 }
 0x2cb   :  { %14991 = vst [vmem:[#allocation47_spill] sm:$0xff] %v12144_v17  ;;  %14992 = vst [vmem:[#allocation48_spill] sm:$0xff] %v12146_v20  ;;  %v12157_v20 = vadd.f32 %v11101_v43, %v1366_v60  ;;  %v12163_v39 = vadd.f32 %v11102_v63, %v1364_v61  ;;  %v1368_v1 = vadd.f32 %v12019_v46, %v1255_v4  ;;  %v11104_v46 = vld [vmem:[#allocation2 + $0x10] sm:$0xff]  ;;  %v11105_v61 = vld [vmem:[#allocation2 + $0x18] sm:$0xff] }
 0x2cc   :  { %v9584_v40 = vpop.f32.mrf.mxu1  ;;  %v10050_v25 = vpop.f32.mrf.mxu0  ;;  %v1267_v63 = vadd.f32 %v12041_v10, %v12124_v32  ;;  %v1273_v10 = vadd.f32 %v12049_v52, %v12124_v32  ;;  %v1271_v52 = vadd.f32 %v12045_v42, %v12131_v6 }
 0x2cd   :  { %14994 = vst [vmem:[#allocation49_spill] sm:$0xff] %v12157_v20  ;;  %14995 = vst [vmem:[#allocation50_spill] sm:$0xff] %v12163_v39  ;;  %v1684_v18 = vadd.f32 %v12157_v20, %v12163_v39 }
 0x2ce   :  { %v9585_v14 = vpop.f32.mrf.mxu1  ;;  %v1573_v17 = vpop.f32.mrf.mxu0 }
 0x2cf   :  { %v9586_v62 = vadd.f32 %v9585_v14, %v9584_v40  ;;  %v11103_v14 = vld [vmem:[#allocation2 + $0x20] sm:$0xff] }
 0x2d0   :  { %v9587_v21 = vpop.f32.mrf.mxu1  ;;  %v10051_v51 = vpop.f32.mrf.mxu0  ;;  %v12168_v13 = vadd.f32 %v11103_v14, %v1370_v36  ;;  %v1374_v36 = vadd.f32 %v12027_v58, %v1261_v16  ;;  %v1380_v58 = vadd.f32 %v12039_v37, %v1267_v63  ;;  %v11107_v16 = vld [vmem:[#allocation2 + $0x28] sm:$0xff]  ;;  %v1386_v63 = vadd.f32 %v12047_v50, %v1273_v10 }
 0x2d1   :  { %v1477_v31 = vadd.f32 %v9586_v62, %v12152_v44  ;;  %v1376_v62 = vadd.f32 %v12031_v24, %v1263_v8  ;;  %v1275_v50 = vadd.f32 %v12053_v57, %v12131_v6  ;;  %v11111_v10 = vld [vmem:[#allocation2 + $0x48] sm:$0xff] }
 0x2d2   :  { %v9588_v40 = vpop.f32.mrf.mxu1  ;;  %14996 = vst [vmem:[#allocation51_spill] sm:$0xff] %v12168_v13 }
 0x2d3   :  { %v1574_v43 = vadd.f32 %v1573_v17, %v1477_v31  ;;  %v9589_v60 = vadd.f32 %v9588_v40, %v9587_v21  ;;  %v12178_v17 = vadd.f32 %v11105_v61, %v1368_v1  ;;  %v1576_v21 = vpop.f32.mrf.mxu0  ;;  %v1265_v40 = vadd.f32 %v12037_v5, %v12131_v6  ;;  %v11106_v1 = vld [vmem:[#allocation2 + $0x38] sm:$0xff] }
 0x2d4   :  { %v9590_v38 = vpop.f32.mrf.mxu1 }
 0x2d5   :  { %v12175_v4 = vadd.f32 %v11104_v46, %v1574_v43  ;;  %v1480_v35 = vadd.f32 %v9589_v60, %v12152_v44  ;;  %14998 = vst [vmem:[#allocation53_spill] sm:$0xff] %v12178_v17  ;;  %v1688_v60 = vadd.f32 %v12168_v13, %v12178_v17  ;;  %v12188_v46 = vadd.f32 %v11106_v1, %v1376_v62 }
 0x2d6   :  { %v9591_v31 = vpop.f32.mrf.mxu1  ;;  %v1378_v62 = vadd.f32 %v12035_v45, %v1265_v40 }
 0x2d7   :  { %14997 = vst [vmem:[#allocation52_spill] sm:$0xff] %v12175_v4  ;;  %v1577_v14 = vadd.f32 %v1576_v21, %v1480_v35  ;;  %v9592_v24 = vadd.f32 %v9591_v31, %v9590_v38  ;;  %v1685_v8 = vadd.f32 %v1684_v18, %v12175_v4  ;;  %14999 = vst [vmem:[#allocation54_spill] sm:$0xff] %v12188_v46  ;;  %v11108_v38 = vld [vmem:[#allocation2 + $0x30] sm:$0xff]  ;;  %v12198_v35 = vpop.f32.mrf.mxu0 }
 0x2d8   :  { %v9593_v43 = vpop.f32.mrf.mxu1  ;;  %v12194_v18 = vadd.f32 %v11108_v38, %v1374_v36  ;;  %v11109_v36 = vld [vmem:[#allocation2 + $0x50] sm:$0xff] }
 0x2d9   :  { %v12191_v61 = vadd.f32 %v11107_v16, %v1577_v14  ;;  %v1485_v5 = vadd.f32 %v9592_v24, %v12152_v44  ;;  %1686 = vadd.xlane.f32.xlu0 %v1685_v8  ;;  %v1277_v14 = vadd.f32 %v12057_v23, %v12124_v32  ;;  %v12205_v8 = vadd.f32 %v11109_v36, %v1380_v58  ;;  %v11110_v16 = vld [vmem:[#allocation2 + $0x40] sm:$0xff]  ;;  %v1589_v40 = vpop.f32.mrf.mxu0 }
 0x2da   :  { %15001 = vst [vmem:[#allocation56_spill] sm:$0xff] %v12194_v18  ;;  %v9594_v21 = vpop.f32.mrf.mxu1  ;;  %v1692_v45 = vadd.f32 %v12188_v46, %v12194_v18 }
 0x2db   :  { %15000 = vst [vmem:[#allocation55_spill] sm:$0xff] %v12191_v61  ;;  %v1582_v31 = vadd.f32 %v10050_v25, %v1485_v5  ;;  %v9595_v1 = vadd.f32 %v9594_v21, %v9593_v43  ;;  %v1689_v37 = vadd.f32 %v1688_v60, %v12191_v61  ;;  %15002 = vst [vmem:[#allocation57_spill] sm:$0xff] %v12205_v8  ;;  %v11112_v21 = vld [vmem:[#allocation2 + $0x68] sm:$0xff] }
 0x2dc   :  { %v9596_v24 = vpop.f32.mrf.mxu1  ;;  %v1384_v25 = vadd.f32 %v12043_v26, %v1271_v52  ;;  %v12215_v43 = vadd.f32 %v11111_v10, %v1378_v62  ;;  %v1283_v26 = vadd.f32 %v12065_v59, %v12124_v32  ;;  %v11113_v52 = vld [vmem:[#allocation2 + $0x58] sm:$0xff]  ;;  %v11114_v62 = vld [vmem:[#allocation2 + $0x60] sm:$0xff] }
 0x2dd   :  { %v1488_v42 = vadd.f32 %v9595_v1, %v12152_v44  ;;  %1690 = vadd.xlane.f32.xlu1 %v1689_v37  ;;  %v12208_v38 = vadd.f32 %v11110_v16, %v1582_v31  ;;  %v12218_v31 = vadd.f32 %v11112_v21, %v1386_v63  ;;  %v1390_v1 = vadd.f32 %v12055_v49, %v1277_v14  ;;  %v10055_v14 = vpop.f32.mrf.mxu0 }
 0x2de   :  { %v9597_v23 = vpop.f32.mrf.mxu1  ;;  %15004 = vst [vmem:[#allocation59_spill] sm:$0xff] %v12215_v43  ;;  %v1388_v63 = vadd.f32 %v12051_v2, %v1275_v50  ;;  %v1281_v49 = vadd.f32 %v12061_v33, %v12131_v6  ;;  %v1287_v2 = vadd.f32 %v12073_v48, %v12124_v32  ;;  %v11116_v50 = vld [vmem:[#allocation2 + $0x70] sm:$0xff] }
 0x2df   :  { %15003 = vst [vmem:[#allocation58_spill] sm:$0xff] %v12208_v38  ;;  %v1585_v60 = vadd.f32 %v10051_v51, %v1488_v42  ;;  %v9598_v58 = vadd.f32 %v9597_v23, %v9596_v24  ;;  %v1693_v5 = vadd.f32 %v1692_v45, %v12208_v38  ;;  %15005 = vst [vmem:[#allocation60_spill] sm:$0xff] %v12218_v31  ;;  %v11115_v23 = vld [vmem:[#allocation2 + $0x80] sm:$0xff] }
 0x2e0   :  { %v9599_v37 = vpop.f32.mrf.mxu1  ;;  %v1696_v51 = vadd.f32 %v12205_v8, %v12215_v43  ;;  %v12228_v24 = vadd.f32 %v11114_v62, %v1384_v25  ;;  %v12234_v10 = vadd.f32 %v11115_v23, %v1390_v1  ;;  %v1396_v25 = vadd.f32 %v12063_v55, %v1283_v26 }
 0x2e1   :  { %v1493_v57 = vadd.f32 %v9598_v58, %v12152_v44  ;;  %1694 = vadd.xlane.f32.xlu0 %v1693_v5  ;;  %v12224_v36 = vadd.f32 %v11113_v52, %v1585_v60  ;;  %v11117_v5 = vld [vmem:[#allocation2 + $0x78] sm:$0xff]  ;;  %v1394_v1 = vadd.f32 %v12059_v11, %v1281_v49  ;;  %v1285_v52 = vadd.f32 %v12069_v53, %v12131_v6  ;;  %v11119_v53 = vld [vmem:[#allocation2 + $0x88] sm:$0xff] }
 0x2e2   :  { %15007 = vst [vmem:[#allocation62_spill] sm:$0xff] %v12228_v24  ;;  %v9600_v42 = vpop.f32.mrf.mxu1  ;;  %15008 = vst [vmem:[#allocation63_spill] sm:$0xff] %v12234_v10  ;;  %v1700_v58 = vadd.f32 %v12218_v31, %v12228_v24  ;;  %v12244_v21 = vadd.f32 %v11117_v5, %v1388_v63  ;;  %v11118_v63 = vld [vmem:[#allocation2 + $0x98] sm:$0xff]  ;;  %v1400_v11 = vadd.f32 %v12071_v19, %v1287_v2 }
 0x2e3   :  { %15006 = vst [vmem:[#allocation61_spill] sm:$0xff] %v12224_v36  ;;  %v1590_v59 = vadd.f32 %v1589_v40, %v1493_v57  ;;  %v9601_v16 = vadd.f32 %v9600_v42, %v9599_v37  ;;  %v1697_v45 = vadd.f32 %v1696_v51, %v12224_v36  ;;  %v1592_v37 = vpop.f32.mrf.mxu0  ;;  %v1293_v51 = vadd.f32 %v12081_v27, %v12124_v32 }
 0x2e4   :  { %v9602_v60 = vpop.f32.mrf.mxu1  ;;  %15010 = vst [vmem:[#allocation65_spill] sm:$0xff] %v12244_v21  ;;  %v1704_v42 = vadd.f32 %v12234_v10, %v12244_v21  ;;  %v1291_v27 = vadd.f32 %v12077_v15, %v12131_v6  ;;  %v1297_v5 = vadd.f32 %v12089_v12, %v12124_v32 }
 0x2e5   :  { %v1496_v33 = vadd.f32 %v9601_v16, %v12152_v44  ;;  %1698 = vadd.xlane.f32.xlu1 %v1697_v45  ;;  %v12242_v40 = vadd.f32 %v11116_v50, %v1590_v59  ;;  %v12254_v59 = vadd.f32 %v11118_v63, %v1396_v25  ;;  %v11120_v45 = vld [vmem:[#allocation2 + $0x90] sm:$0xff]  ;;  %v1398_v25 = vadd.f32 %v12067_v7, %v1285_v52 }
 0x2e6   :  { %v9603_v57 = vpop.f32.mrf.mxu1  ;;  %v12260_v23 = vadd.f32 %v11120_v45, %v1394_v1  ;;  %v1406_v50 = vadd.f32 %v12079_v22, %v1293_v51  ;;  %v1295_v22 = vadd.f32 %v12085_v41, %v12131_v6 }
 0x2e7   :  { %15009 = vst [vmem:[#allocation64_spill] sm:$0xff] %v12242_v40  ;;  %v1593_v55 = vadd.f32 %v1592_v37, %v1496_v33  ;;  %v9604_v26 = vadd.f32 %v9603_v57, %v9602_v60  ;;  %v1701_v48 = vadd.f32 %v1700_v58, %v12242_v40  ;;  %15011 = vst [vmem:[#allocation66_spill] sm:$0xff] %v12254_v59  ;;  %v12264_v60 = vpop.f32.mrf.mxu0  ;;  %v11121_v37 = vld [vmem:[#allocation2 + $0xb0] sm:$0xff] }
 0x2e8   :  { %v9605_v62 = vpop.f32.mrf.mxu1  ;;  %15013 = vst [vmem:[#allocation68_spill] sm:$0xff] %v12260_v23  ;;  %v12272_v57 = vadd.f32 %v11121_v37, %v1400_v11  ;;  %v1708_v7 = vadd.f32 %v12254_v59, %v12260_v23  ;;  %v11124_v11 = vld [vmem:[#allocation2 + $0xc8] sm:$0xff]  ;;  %v11127_v37 = vld [vmem:[#allocation2 + $0xe0] sm:$0xff] }
 0x2e9   :  { %v1501_v49 = vadd.f32 %v9604_v26, %v12152_v44  ;;  %1702 = vadd.xlane.f32.xlu0 %v1701_v48  ;;  %v12258_v16 = vadd.f32 %v11119_v53, %v1593_v55  ;;  %v11122_v55 = vld [vmem:[#allocation2 + $0xa0] sm:$0xff]  ;;  %v1605_v52 = vpop.f32.mrf.mxu0  ;;  %v11123_v48 = vld [vmem:[#allocation2 + $0xa8] sm:$0xff]  ;;  %v1410_v53 = vadd.f32 %v12087_v29, %v1297_v5  ;;  %v1301_v29 = vadd.f32 %v12093_v30, %v12131_v6 }
 0x2ea   :  { %v9606_v58 = vpop.f32.mrf.mxu1  ;;  %15014 = vst [vmem:[#allocation69_spill] sm:$0xff] %v12272_v57  ;;  %v12282_v51 = vadd.f32 %v11123_v48, %v1398_v25  ;;  %v11126_v25 = vld [vmem:[#allocation2 + $0xc0] sm:$0xff] }
 0x2eb   :  { %15012 = vst [vmem:[#allocation67_spill] sm:$0xff] %v12258_v16  ;;  %v1598_v33 = vadd.f32 %v12198_v35, %v1501_v49  ;;  %v9607_v19 = vadd.f32 %v9606_v58, %v9605_v62  ;;  %v1705_v2 = vadd.f32 %v1704_v42, %v12258_v16  ;;  %v1404_v35 = vadd.f32 %v12075_v47, %v1291_v27  ;;  %v11125_v27 = vld [vmem:[#allocation2 + $0xb8] sm:$0xff] }
 0x2ec   :  { %v9608_v1 = vpop.f32.mrf.mxu1  ;;  %15016 = vst [vmem:[#allocation71_spill] sm:$0xff] %v12282_v51  ;;  %v12285_v49 = vadd.f32 %v11124_v11, %v1406_v50  ;;  %v1303_v47 = vadd.f32 %v12097_v9, %v12124_v32  ;;  %v1305_v11 = vadd.f32 %v12101_v54, %v12131_v6  ;;  %v11131_v54 = vld [vmem:[#allocation2 + $0xe8] sm:$0xff] }
 0x2ed   :  { %v1504_v15 = vadd.f32 %v9607_v19, %v12152_v44  ;;  %1706 = vadd.xlane.f32.xlu1 %v1705_v2  ;;  %v12275_v26 = vadd.f32 %v11122_v55, %v1598_v33  ;;  %v12295_v33 = vadd.f32 %v11126_v25, %v1404_v35  ;;  %v1408_v19 = vadd.f32 %v12083_v3, %v1295_v22  ;;  %v10059_v2 = vpop.f32.mrf.mxu0  ;;  %v11128_v22 = vld [vmem:[#allocation2 + $0xd0] sm:$0xff] }
 0x2ee   :  { %v9609_v12 = vpop.f32.mrf.mxu1  ;;  %15017 = vst [vmem:[#allocation72_spill] sm:$0xff] %v12285_v49  ;;  %v1416_v35 = vadd.f32 %v12095_v0, %v1303_v47  ;;  %v1307_v3 = vadd.f32 %v12105_v34, %v12124_v32 }
 0x2ef   :  { %15015 = vst [vmem:[#allocation70_spill] sm:$0xff] %v12275_v26  ;;  %v1601_v62 = vadd.f32 %v10055_v14, %v1504_v15  ;;  %v9610_v42 = vadd.f32 %v9609_v12, %v9608_v1  ;;  %v1709_v63 = vadd.f32 %v1708_v7, %v12275_v26  ;;  %v1712_v14 = vadd.f32 %v12272_v57, %v12282_v51  ;;  %v11129_v12 = vld [vmem:[#allocation2 + $0xd8] sm:$0xff] }
 0x2f0   :  { %v9611_v45 = vpop.f32.mrf.mxu1  ;;  %15019 = vst [vmem:[#allocation74_spill] sm:$0xff] %v12295_v33  ;;  %v12301_v15 = vadd.f32 %v11127_v37, %v1410_v53  ;;  %v1716_v7 = vadd.f32 %v12285_v49, %v12295_v33  ;;  %v12311_v48 = vadd.f32 %v11129_v12, %v1408_v19 }
 0x2f1   :  { %v1509_v41 = vadd.f32 %v9610_v42, %v12152_v44  ;;  %1710 = vadd.xlane.f32.xlu0 %v1709_v63  ;;  %v12291_v58 = vadd.f32 %v11125_v27, %v1601_v62  ;;  %v1414_v62 = vadd.f32 %v12091_v56, %v1301_v29  ;;  %v1608_v42 = vpop.f32.mrf.mxu0  ;;  %v11130_v27 = vld [vmem:[#allocation2 + $0xf8] sm:$0xff]  ;;  %v15024_v56 = vld [vmem:[#allocation29_spill] sm:$0xff] }
 0x2f2   :  { %v9612_v50 = vpop.f32.mrf.mxu1  ;;  %15020 = vst [vmem:[#allocation75_spill] sm:$0xff] %v12301_v15  ;;  %15022 = vst [vmem:[#allocation77_spill] sm:$0xff] %v12311_v48  ;;  %v1420_v25 = vadd.f32 %v15024_v56, %v1307_v3 }
 0x2f3   :  { %15018 = vst [vmem:[#allocation73_spill] sm:$0xff] %v12291_v58  ;;  %v1606_v9 = vadd.f32 %v1605_v52, %v1509_v41  ;;  %v9613_v5 = vadd.f32 %v9612_v50, %v9611_v45  ;;  %v1713_v1 = vadd.f32 %v1712_v14, %v12291_v58  ;;  %v1313_v45 = vadd.f32 %v12113_v28, %v12124_v32  ;;  %v11132_v50 = vld [vmem:[#allocation2 + $0xf0] sm:$0xff]  ;;  %v15027_v28 = vld [vmem:[#allocation32_spill] sm:$0xff] }
 0x2f4   :  { %v9614_v55 = vpop.f32.mrf.mxu1  ;;  %v1720_v41 = vadd.f32 %v12301_v15, %v12311_v48  ;;  %v12321_v14 = vadd.f32 %v11130_v27, %v1416_v35  ;;  %v11134_v27 = vld [vmem:[#allocation2 + $0x100] sm:$0xff] }
 0x2f5   :  { %v1512_v30 = vadd.f32 %v9613_v5, %v12152_v44  ;;  %1714 = vadd.xlane.f32.xlu1 %v1713_v1  ;;  %v12309_v52 = vadd.f32 %v11128_v22, %v1606_v9  ;;  %v12327_v9 = vadd.f32 %v11132_v50, %v1414_v62  ;;  %v1311_v5 = vadd.f32 %v15027_v28, %v12131_v6  ;;  %v12331_v1 = vpop.f32.mrf.mxu0  ;;  %v15029_v22 = vld [vmem:[#allocation31_spill] sm:$0xff]  ;;  %v11135_v50 = vld [vmem:[#allocation2 + $0x108] sm:$0xff] }
 0x2f6   :  { %v9615_v63 = vpop.f32.mrf.mxu1  ;;  %15023 = vst [vmem:[#allocation78_spill] sm:$0xff] %v12321_v14  ;;  %v1426_v12 = vadd.f32 %v15029_v22, %v1313_v45  ;;  %v15034_v45 = vld [vmem:[#allocation36_spill] sm:$0xff] }
 0x2f7   :  { %15021 = vst [vmem:[#allocation76_spill] sm:$0xff] %v12309_v52  ;;  %v1609_v0 = vadd.f32 %v1608_v42, %v1512_v30  ;;  %v9616_v53 = vadd.f32 %v9615_v63, %v9614_v55  ;;  %v1717_v34 = vadd.f32 %v1716_v7, %v12309_v52  ;;  %15026 = vst [vmem:[#allocation79_spill] sm:$0xff] %v12327_v9  ;;  %v15028_v55 = vld [vmem:[#allocation30_spill] sm:$0xff]  ;;  %v15030_v42 = vld [vmem:[#allocation33_spill] sm:$0xff] }
 0x2f8   :  { %v9617_v47 = vpop.f32.mrf.mxu1  ;;  %v1418_v7 = vadd.f32 %v15028_v55, %v1305_v11  ;;  %v1317_v63 = vadd.f32 %v15030_v42, %v12124_v32  ;;  %v15033_v11 = vld [vmem:[#allocation28_spill] sm:$0xff] }
 0x2f9   :  { %v1517_v19 = vadd.f32 %v9616_v53, %v12152_v44  ;;  %1718 = vadd.xlane.f32.xlu0 %v1717_v34  ;;  %v12325_v29 = vadd.f32 %v11131_v54, %v1609_v0  ;;  %v11133_v0 = vld [vmem:[#allocation2 + $0x110] sm:$0xff] }
 0x2fa   :  { %v9618_v37 = vpop.f32.mrf.mxu1  ;;  %v12339_v53 = vadd.f32 %v11133_v0, %v1420_v25  ;;  %v12349_v28 = vadd.f32 %v11135_v50, %v1418_v7  ;;  %v11138_v7 = vld [vmem:[#allocation2 + $0x120] sm:$0xff] }
 0x2fb   :  { %15025 = vst [vmem:[#allocation29_spill] sm:$0xff] %v12325_v29  ;;  %v1614_v35 = vadd.f32 %v12264_v60, %v1517_v19  ;;  %v9619_v3 = vadd.f32 %v9618_v37, %v9617_v47  ;;  %v1721_v30 = vadd.f32 %v1720_v41, %v12325_v29  ;;  %v1724_v60 = vadd.f32 %v12321_v14, %v12327_v9  ;;  %v1621_v19 = vpop.f32.mrf.mxu0 }
 0x2fc   :  { %v9620_v62 = vpop.f32.mrf.mxu1  ;;  %15031 = vst [vmem:[#allocation32_spill] sm:$0xff] %v12339_v53  ;;  %v1424_v47 = vadd.f32 %v15033_v11, %v1311_v5  ;;  %v1315_v41 = vadd.f32 %v15034_v45, %v12131_v6  ;;  %15035 = vst [vmem:[#allocation31_spill] sm:$0xff] %v12349_v28  ;;  %v15038_v5 = vld [vmem:[#allocation44_spill] sm:$0xff]  ;;  %v11137_v11 = vld [vmem:[#allocation2 + $0x118] sm:$0xff] }
 0x2fd   :  { %v1520_v34 = vadd.f32 %v9619_v3, %v12152_v44  ;;  %1722 = vadd.xlane.f32.xlu1 %v1721_v30  ;;  %v12342_v56 = vadd.f32 %v11134_v27, %v1614_v35  ;;  %v11136_v3 = vld [vmem:[#allocation2 + $0x128] sm:$0xff]  ;;  %v15037_v30 = vld [vmem:[#allocation35_spill] sm:$0xff]  ;;  %v1323_v0 = vadd.f32 %v15038_v5, %v12124_v32 }
 0x2fe   :  { %v9621_v54 = vpop.f32.mrf.mxu1  ;;  %v12352_v35 = vadd.f32 %v11136_v3, %v1426_v12  ;;  %v1430_v22 = vadd.f32 %v15037_v30, %v1317_v63  ;;  %v15041_v12 = vld [vmem:[#allocation34_spill] sm:$0xff] }
 0x2ff   :  { %15032 = vst [vmem:[#allocation30_spill] sm:$0xff] %v12342_v56  ;;  %v1617_v25 = vadd.f32 %v10059_v2, %v1520_v34  ;;  %v9622_v37 = vadd.f32 %v9621_v54, %v9620_v62  ;;  %v1725_v55 = vadd.f32 %v1724_v60, %v12342_v56  ;;  %v1728_v2 = vadd.f32 %v12339_v53, %v12349_v28  ;;  %v15042_v63 = vld [vmem:[#allocation42_spill] sm:$0xff]  ;;  %v10063_v54 = vpop.f32.mrf.mxu0 }
 0x300   :  { %15036 = vst [vmem:[#allocation33_spill] sm:$0xff] %v12352_v35  ;;  %v9623_v42 = vpop.f32.mrf.mxu1  ;;  %v12362_v62 = vadd.f32 %v11138_v7, %v1424_v47  ;;  %v1428_v34 = vadd.f32 %v15041_v12, %v1315_v41  ;;  %v1321_v60 = vadd.f32 %v15042_v63, %v12131_v6  ;;  %v15044_v47 = vld [vmem:[#allocation43_spill] sm:$0xff]  ;;  %v15045_v41 = vld [vmem:[#allocation48_spill] sm:$0xff]  ;;  %v11140_v53 = vld [vmem:[#allocation2 + $0x130] sm:$0xff] }
 0x301   :  { %v1525_v27 = vadd.f32 %v9622_v37, %v12152_v44  ;;  %1726 = vadd.xlane.f32.xlu0 %v1725_v55  ;;  %v12358_v45 = vadd.f32 %v11137_v11, %v1617_v25  ;;  %v11139_v55 = vld [vmem:[#allocation2 + $0x140] sm:$0xff]  ;;  %v1436_v7 = vadd.f32 %v15044_v47, %v1323_v0  ;;  %v1327_v12 = vadd.f32 %v15045_v41, %v12124_v32 }
 0x302   :  { %15040 = vst [vmem:[#allocation36_spill] sm:$0xff] %v12362_v62  ;;  %v9624_v50 = vpop.f32.mrf.mxu1  ;;  %v12368_v25 = vadd.f32 %v11139_v55, %v1430_v22  ;;  %v1732_v11 = vadd.f32 %v12352_v35, %v12362_v62  ;;  %v15048_v22 = vld [vmem:[#allocation41_spill] sm:$0xff]  ;;  %v15049_v35 = vld [vmem:[#allocation46_spill] sm:$0xff] }
 0x303   :  { %15039 = vst [vmem:[#allocation28_spill] sm:$0xff] %v12358_v45  ;;  %v1622_v3 = vadd.f32 %v1621_v19, %v1525_v27  ;;  %v9625_v30 = vadd.f32 %v9624_v50, %v9623_v42  ;;  %v1729_v37 = vadd.f32 %v1728_v2, %v12358_v45  ;;  %v11141_v42 = vld [vmem:[#allocation2 + $0x138] sm:$0xff]  ;;  %v1434_v2 = vadd.f32 %v15048_v22, %v1321_v60  ;;  %v1624_v50 = vpop.f32.mrf.mxu0 }
 0x304   :  { %15043 = vst [vmem:[#allocation35_spill] sm:$0xff] %v12368_v25  ;;  %v9626_v5 = vpop.f32.mrf.mxu1  ;;  %v12378_v27 = vadd.f32 %v11141_v42, %v1428_v34  ;;  %v1325_v62 = vadd.f32 %v15049_v35, %v12131_v6  ;;  %v15051_v34 = vld [vmem:[#allocation47_spill] sm:$0xff]  ;;  %v11143_v42 = vld [vmem:[#allocation2 + $0x148] sm:$0xff]  ;;  %v11144_v6 = vld [vmem:[#allocation2 + $0x150] sm:$0xff] }
 0x305   :  { %v1528_v63 = vadd.f32 %v9625_v30, %v12152_v44  ;;  %1730 = vadd.xlane.f32.xlu1 %v1729_v37  ;;  %v12376_v19 = vadd.f32 %v11140_v53, %v1622_v3  ;;  %v11142_v53 = vld [vmem:[#allocation2 + $0x158] sm:$0xff]  ;;  %v1440_v37 = vadd.f32 %v15051_v34, %v1327_v12  ;;  %v12392_v35 = vadd.f32 %v11144_v6, %v1434_v2 }
 0x306   :  { %15047 = vst [vmem:[#allocation34_spill] sm:$0xff] %v12378_v27  ;;  %v9627_v55 = vpop.f32.mrf.mxu1  ;;  %v1736_v30 = vadd.f32 %v12368_v25, %v12378_v27  ;;  %v12386_v3 = vadd.f32 %v11142_v53, %v1436_v7  ;;  %v11145_v53 = vld [vmem:[#allocation2 + $0x170] sm:$0xff]  ;;  %v10184_v6 = vld [vmem:[#allocation14 + $0x244] ss:$48 sps:$4 sm:$0xff]  }
 0x307   :  { %15046 = vst [vmem:[#allocation44_spill] sm:$0xff] %v12376_v19  ;;  %v1625_v0 = vadd.f32 %v1624_v50, %v1528_v63  ;;  %v9628_v47 = vadd.f32 %v9627_v55, %v9626_v5  ;;  %v1733_v32 = vadd.f32 %v1732_v11, %v12376_v19  ;;  %15053 = vst [vmem:[#allocation48_spill] sm:$0xff] %v12392_v35  ;;  %v15054_v11 = vld [vmem:[#allocation45_spill] sm:$0xff] }
 0x308   :  { %v9629_v41 = vpop.f32.mrf.mxu1  ;;  %15050 = vst [vmem:[#allocation42_spill] sm:$0xff] %v12386_v3  ;;  %v1438_v63 = vadd.f32 %v15054_v11, %v1325_v62  ;;  %v12397_v25 = vadd.f32 %v11145_v53, %v1440_v37  ;;  %v1740_v2 = vadd.f32 %v12386_v3, %v12392_v35  ;;  %v10203_v11 = vld [vmem:[#allocation14 + $0x8a0] ss:$48 sps:$4 sm:$0xff]   ;;  %v10193_v53 = vld [vmem:[#allocation14 + $0x124] ss:$48 sps:$4 sm:$0xff]  }
 0x309   :  { %v1533_v60 = vadd.f32 %v9628_v47, %v12152_v44  ;;  %1734 = vadd.xlane.f32.xlu0 %v1733_v32  ;;  %v12390_v22 = vadd.f32 %v11143_v42, %v1625_v0  ;;  %v11146_v47 = vld [vmem:[#allocation2 + $0x160] sm:$0xff]  ;;  %v11147_v32 = vld [vmem:[#allocation2 + $0x168] sm:$0xff] }
 0x30a   :  { %v9630_v5 = vpop.f32.mrf.mxu1  ;;  %15055 = vst [vmem:[#allocation41_spill] sm:$0xff] %v12397_v25  ;;  %v12404_v34 = vadd.f32 %v11147_v32, %v1438_v63  ;;  %v10181_v42 = vld [vmem:[#allocation14 + $0x2a4] ss:$48 sps:$4 sm:$0xff]  }
 0x30b   :  { %15052 = vst [vmem:[#allocation43_spill] sm:$0xff] %v12390_v22  ;;  %v1630_v50 = vadd.f32 %v12331_v1, %v1533_v60  ;;  %v9631_v55 = vadd.f32 %v9630_v5, %v9629_v41  ;;  %v1737_v7 = vadd.f32 %v1736_v30, %v12390_v22  ;;  %v11148_v41 = vld [vmem:[#allocation2 + $0x178] sm:$0xff]  ;;  %v10179_v60 = vld [vmem:[#allocation14 + $0x2a0] ss:$48 sps:$4 sm:$0xff]   ;;  %3962 = vmatprep.subr.bf16.mxu1 %v10181_v42 }
 0x30c   :  { %15057 = vst [vmem:[#allocation47_spill] sm:$0xff] %v12404_v34  ;;  %3963 = vmatpush1.bf16.msra.mxu1 %v10179_v60  ;;  %v10182_v5 = vld [vmem:[#allocation14 + $0x240] ss:$48 sps:$4 sm:$0xff]   ;;  %v10205_v63 = vld [vmem:[#allocation14 + $0x8a4] ss:$48 sps:$4 sm:$0xff]  }
 0x30d   :  { %v1536_v12 = vadd.f32 %v9631_v55, %v12152_v44  ;;  %1738 = vadd.xlane.f32.xlu1 %v1737_v7  ;;  %v12400_v0 = vadd.f32 %v11146_v47, %v1630_v50  ;;  %v1744_v44 = vadd.f32 %v12397_v25, %v12404_v34  ;;  %3964 = vmatprep.subr.bf16.mxu1 %v10184_v6  ;;  %v10185_v50 = vld [vmem:[#allocation14 + $0x1e0] ss:$48 sps:$4 sm:$0xff]   ;;  %v10190_v55 = vld [vmem:[#allocation14 + $0x184] ss:$48 sps:$4 sm:$0xff]  }
 0x30e   :  { %4075 = vmatprep.subr.bf16.mxu0 %v10205_v63  ;;  %v10188_v7 = vld [vmem:[#allocation14 + $0x180] ss:$48 sps:$4 sm:$0xff]   ;;  %v10196_v47 = vld [vmem:[#allocation14 + $0xc4] ss:$48 sps:$4 sm:$0xff]  }
 0x30f   :  { %15056 = vst [vmem:[#allocation46_spill] sm:$0xff] %v12400_v0  ;;  %v1633_v62 = vadd.f32 %v10063_v54, %v1536_v12  ;;  %v1741_v1 = vadd.f32 %v1740_v2, %v12400_v0  ;;  %v10187_v54 = vld [vmem:[#allocation14 + $0x1e4] ss:$48 sps:$4 sm:$0xff]   ;;  %4076 = vmatpush1.bf16.msra.mxu0 %v10203_v11  ;;  %v10191_v12 = vld [vmem:[#allocation14 + $0x120] ss:$48 sps:$4 sm:$0xff]  }
 0x310   :  { %3965 = vmatpush1.bf16.msra.mxu1 %v10182_v5  ;;  %v10194_v2 = vld [vmem:[#allocation14 + $0xc0] ss:$48 sps:$4 sm:$0xff]   ;;  %v10199_v32 = vld [vmem:[#allocation14 + $0x64] ss:$48 sps:$4 sm:$0xff]  }
 0x311   :  { %1742 = vadd.xlane.f32.xlu0 %v1741_v1  ;;  %v12407_v30 = vadd.f32 %v11148_v41, %v1633_v62  ;;  %3966 = vmatprep.subr.bf16.mxu1 %v10187_v54  ;;  %v10197_v62 = vld [vmem:[#allocation14 + $0x60] ss:$48 sps:$4 sm:$0xff]   ;;  %v10202_v1 = vld [vmem:[#allocation14 + $0x4] ss:$48 sps:$4 sm:$0xff]  }
 0x312   :  { %v10200_v41 = vld [vmem:[#allocation14] ss:$48 sps:$4 sm:$0xff]  }
 0x313   :  { %15058 = vst [vmem:[#allocation45_spill] sm:$0xff] %v12407_v30  ;;  %v1745_v37 = vadd.f32 %v1744_v44, %v12407_v30  ;;  %v10208_v44 = vld [vmem:[#allocation14 + $0x5a4] ss:$48 sps:$4 sm:$0xff]  }
 0x314   :  { %3967 = vmatpush1.bf16.msra.mxu1 %v10185_v50 }
 0x315   :  { %1746 = vadd.xlane.f32.xlu1 %v1745_v37  ;;  %3968 = vmatprep.subr.bf16.mxu1 %v10190_v55  ;;  %v10206_v37 = vld [vmem:[#allocation14 + $0x5a0] ss:$48 sps:$4 sm:$0xff]  }
 0x318   :  { %3969 = vmatpush1.bf16.msra.mxu1 %v10188_v7 }
 0x319   :  { %3970 = vmatprep.subr.bf16.mxu1 %v10193_v53 }
 0x31c   :  { %3971 = vmatpush1.bf16.msra.mxu1 %v10191_v12 }
 0x31d   :  { %3972 = vmatprep.subr.bf16.mxu1 %v10196_v47 }
 0x320   :  { %3973 = vmatpush1.bf16.msra.mxu1 %v10194_v2 }
 0x321   :  { %3974 = vmatprep.subr.bf16.mxu1 %v10199_v32 }
 0x324   :  { %3975 = vmatpush1.bf16.msra.mxu1 %v10197_v62 }
 0x325   :  { %3976 = vmatprep.subr.bf16.mxu1 %v10202_v1 }
 0x328   :  { %3977 = vmatpush1.bf16.msra.mxu1 %v10200_v41 }
 0x329   :  { %3978 = vmatprep.subr.bf16.mxu1 %v10208_v44 }
 0x32c   :  { %3979 = vmatpush2.bf16.msra.mxu1 %v10206_v37 }
 0x362   :  { %v1687_v60 = vpop.xlane.xlu0 %1686 }
 0x363   :  { %v1748_v42 = vmul.f32 0.0026041667, %v1687_v60 }
 0x365   :  { %v12413_v6 = vsub.f32 %v12163_v39, %v1748_v42  ;;  %v12416_v5 = vsub.f32 %v12157_v20, %v1748_v42  ;;  %v12419_v54 = vsub.f32 %v12175_v4, %v1748_v42  ;;  %v10247_v20 = vld [vmem:[#allocation14 + $0x604] ss:$48 sps:$4 sm:$0xff]  }
 0x366   :  { %v1691_v11 = vpop.xlane.xlu1 %1690 }
 0x367   :  { %v1749_v63 = vmul.f32 0.0026041667, %v1691_v11  ;;  %v1812_v50 = vmul.f32 %v12413_v6, %v12413_v6  ;;  %v1813_v55 = vmul.f32 %v12416_v5, %v12416_v5  ;;  %v1814_v7 = vmul.f32 %v12419_v54, %v12419_v54 }
 0x369   :  { %v12428_v53 = vsub.f32 %v12178_v17, %v1749_v63  ;;  %v12431_v12 = vsub.f32 %v12168_v13, %v1749_v63  ;;  %v12434_v47 = vsub.f32 %v12191_v61, %v1749_v63  ;;  %v1860_v2 = vadd.f32 %v1813_v55, %v1812_v50  ;;  %v10214_v13 = vld [vmem:[#allocation14 + $0x544] ss:$48 sps:$4 sm:$0xff]  }
 0x36a   :  { %v1695_v32 = vpop.xlane.xlu0 %1694  ;;  %3980 = vmatprep.subr.bf16.mxu1 %v10214_v13  ;;  %v10217_v17 = vld [vmem:[#allocation14 + $0x7e4] ss:$48 sps:$4 sm:$0xff]  }
 0x36b   :  { %v1750_v62 = vmul.f32 0.0026041667, %v1695_v32  ;;  %v1861_v1 = vadd.f32 %v1860_v2, %v1814_v7  ;;  %v1815_v41 = vmul.f32 %v12428_v53, %v12428_v53  ;;  %v1816_v44 = vmul.f32 %v12431_v12, %v12431_v12 }
 0x36c   :  { %v1817_v37 = vmul.f32 %v12434_v47, %v12434_v47 }
 0x36d   :  { %v12443_v60 = vsub.f32 %v12194_v18, %v1750_v62  ;;  %v12446_v42 = vsub.f32 %v12188_v46, %v1750_v62  ;;  %v12449_v11 = vsub.f32 %v12208_v38, %v1750_v62  ;;  %1862 = vadd.xlane.f32.xlu0 %v1861_v1  ;;  %v1864_v63 = vadd.f32 %v1816_v44, %v1815_v41  ;;  %v10209_v46 = vld [vmem:[#allocation14 + $0x840] ss:$48 sps:$4 sm:$0xff]  }
 0x36e   :  { %v1699_v50 = vpop.xlane.xlu1 %1698  ;;  %v10212_v18 = vld [vmem:[#allocation14 + $0x540] ss:$48 sps:$4 sm:$0xff]  }
 0x36f   :  { %v1751_v55 = vmul.f32 0.0026041667, %v1699_v50  ;;  %v1865_v7 = vadd.f32 %v1864_v63, %v1817_v37  ;;  %v1818_v2 = vmul.f32 %v12443_v60, %v12443_v60  ;;  %v1819_v32 = vmul.f32 %v12446_v42, %v12446_v42  ;;  %3981 = vmatpush2.bf16.msra.mxu1 %v10212_v18 }
 0x370   :  { %v1820_v61 = vmul.f32 %v12449_v11, %v12449_v11 }
 0x371   :  { %v12458_v4 = vsub.f32 %v12215_v43, %v1751_v55  ;;  %v12461_v62 = vsub.f32 %v12205_v8, %v1751_v55  ;;  %v12464_v1 = vsub.f32 %v12224_v36, %v1751_v55  ;;  %1866 = vadd.xlane.f32.xlu1 %v1865_v7  ;;  %v1868_v41 = vadd.f32 %v1819_v32, %v1818_v2 }
 0x372   :  { %v1703_v44 = vpop.xlane.xlu0 %1702 }
 0x373   :  { %v1752_v37 = vmul.f32 0.0026041667, %v1703_v44  ;;  %v1869_v63 = vadd.f32 %v1868_v41, %v1820_v61  ;;  %v1821_v50 = vmul.f32 %v12458_v4, %v12458_v4  ;;  %v1822_v38 = vmul.f32 %v12461_v62, %v12461_v62 }
 0x374   :  { %v1823_v43 = vmul.f32 %v12464_v1, %v12464_v1 }
 0x375   :  { %v12473_v8 = vsub.f32 %v12228_v24, %v1752_v37  ;;  %v12476_v55 = vsub.f32 %v12218_v31, %v1752_v37  ;;  %v12479_v7 = vsub.f32 %v12242_v40, %v1752_v37  ;;  %1870 = vadd.xlane.f32.xlu0 %v1869_v63  ;;  %v1872_v61 = vadd.f32 %v1822_v38, %v1821_v50 }
 0x376   :  { %v1707_v2 = vpop.xlane.xlu1 %1706 }
 0x377   :  { %v1753_v32 = vmul.f32 0.0026041667, %v1707_v2  ;;  %v1873_v41 = vadd.f32 %v1872_v61, %v1823_v43  ;;  %v1824_v44 = vmul.f32 %v12473_v8, %v12473_v8  ;;  %v1825_v36 = vmul.f32 %v12476_v55, %v12476_v55 }
 0x378   :  { %v1826_v24 = vmul.f32 %v12479_v7, %v12479_v7 }
 0x379   :  { %v12488_v31 = vsub.f32 %v12244_v21, %v1753_v32  ;;  %v12491_v37 = vsub.f32 %v12234_v10, %v1753_v32  ;;  %v12494_v38 = vsub.f32 %v12258_v16, %v1753_v32  ;;  %1874 = vadd.xlane.f32.xlu1 %v1873_v41  ;;  %v1876_v43 = vadd.f32 %v1825_v36, %v1824_v44  ;;  %v10211_v21 = vld [vmem:[#allocation14 + $0x844] ss:$48 sps:$4 sm:$0xff]  }
 0x37a   :  { %v1711_v63 = vpop.xlane.xlu0 %1710  ;;  %4077 = vmatprep.subr.bf16.mxu0 %v10211_v21 }
 0x37b   :  { %v1754_v50 = vmul.f32 0.0026041667, %v1711_v63  ;;  %v1877_v61 = vadd.f32 %v1876_v43, %v1826_v24  ;;  %v1827_v2 = vmul.f32 %v12488_v31, %v12488_v31  ;;  %v1828_v40 = vmul.f32 %v12491_v37, %v12491_v37  ;;  %4078 = vmatpush1.bf16.msra.mxu0 %v10209_v46 }
 0x37c   :  { %v1829_v10 = vmul.f32 %v12494_v38, %v12494_v38  ;;  %4079 = vmatprep.subr.bf16.mxu0 %v10217_v17 }
 0x37d   :  { %v12503_v32 = vsub.f32 %v12260_v23, %v1754_v50  ;;  %v12506_v36 = vsub.f32 %v12254_v59, %v1754_v50  ;;  %v12509_v24 = vsub.f32 %v12275_v26, %v1754_v50  ;;  %1878 = vadd.xlane.f32.xlu0 %v1877_v61  ;;  %v1880_v41 = vadd.f32 %v1828_v40, %v1827_v2  ;;  %v10215_v59 = vld [vmem:[#allocation14 + $0x7e0] ss:$48 sps:$4 sm:$0xff]   ;;  %v10220_v40 = vld [vmem:[#allocation14 + $0x4e4] ss:$48 sps:$4 sm:$0xff]  }
 0x37e   :  { %v1715_v44 = vpop.xlane.xlu1 %1714  ;;  %v10218_v61 = vld [vmem:[#allocation14 + $0x4e0] ss:$48 sps:$4 sm:$0xff]   ;;  %3982 = vmatprep.subr.bf16.mxu1 %v10220_v40 }
 0x37f   :  { %v1755_v43 = vmul.f32 0.0026041667, %v1715_v44  ;;  %v1881_v63 = vadd.f32 %v1880_v41, %v1829_v10  ;;  %v1830_v16 = vmul.f32 %v12503_v32, %v12503_v32  ;;  %v1831_v23 = vmul.f32 %v12506_v36, %v12506_v36  ;;  %4080 = vmatpush1.bf16.msra.mxu0 %v10215_v59  ;;  %3983 = vmatpush2.bf16.msra.mxu1 %v10218_v61 }
 0x380   :  { %v1832_v50 = vmul.f32 %v12509_v24, %v12509_v24 }
 0x381   :  { %v12518_v21 = vsub.f32 %v12282_v51, %v1755_v43  ;;  %v12521_v13 = vsub.f32 %v12272_v57, %v1755_v43  ;;  %v12524_v10 = vsub.f32 %v12291_v58, %v1755_v43  ;;  %1882 = vadd.xlane.f32.xlu1 %v1881_v63  ;;  %v1884_v2 = vadd.f32 %v1831_v23, %v1830_v16  ;;  %v10221_v57 = vld [vmem:[#allocation14 + $0x780] ss:$48 sps:$4 sm:$0xff]   ;;  %v10223_v51 = vld [vmem:[#allocation14 + $0x784] ss:$48 sps:$4 sm:$0xff]  }
 0x382   :  { %v1719_v46 = vpop.xlane.xlu0 %1718  ;;  %v10224_v63 = vld [vmem:[#allocation14 + $0x480] ss:$48 sps:$4 sm:$0xff]   ;;  %v10226_v16 = vld [vmem:[#allocation14 + $0x484] ss:$48 sps:$4 sm:$0xff]   ;;  %4081 = vmatprep.subr.bf16.mxu0 %v10223_v51 }
 0x383   :  { %v1756_v18 = vmul.f32 0.0026041667, %v1719_v46  ;;  %v1885_v41 = vadd.f32 %v1884_v2, %v1832_v50  ;;  %v1833_v44 = vmul.f32 %v12518_v21, %v12518_v21  ;;  %v1834_v26 = vmul.f32 %v12521_v13, %v12521_v13  ;;  %3984 = vmatprep.subr.bf16.mxu1 %v10226_v16  ;;  %4082 = vmatpush1.bf16.msra.mxu0 %v10221_v57 }
 0x384   :  { %v1835_v43 = vmul.f32 %v12524_v10, %v12524_v10  ;;  %3985 = vmatpush2.bf16.msra.mxu1 %v10224_v63 }
 0x385   :  { %v12533_v17 = vsub.f32 %v12295_v33, %v1756_v18  ;;  %v12536_v23 = vsub.f32 %v12285_v49, %v1756_v18  ;;  %v12539_v50 = vsub.f32 %v12309_v52, %v1756_v18  ;;  %1886 = vadd.xlane.f32.xlu0 %v1885_v41  ;;  %v1888_v40 = vadd.f32 %v1834_v26, %v1833_v44  ;;  %v10227_v49 = vld [vmem:[#allocation14 + $0x720] ss:$48 sps:$4 sm:$0xff]   ;;  %v10229_v33 = vld [vmem:[#allocation14 + $0x724] ss:$48 sps:$4 sm:$0xff]  }
 0x386   :  { %v1723_v59 = vpop.xlane.xlu1 %1722  ;;  %v10230_v41 = vld [vmem:[#allocation14 + $0x420] ss:$48 sps:$4 sm:$0xff]   ;;  %v10232_v26 = vld [vmem:[#allocation14 + $0x424] ss:$48 sps:$4 sm:$0xff]   ;;  %4083 = vmatprep.subr.bf16.mxu0 %v10229_v33 }
 0x387   :  { %v1757_v61 = vmul.f32 0.0026041667, %v1723_v59  ;;  %v1889_v2 = vadd.f32 %v1888_v40, %v1835_v43  ;;  %v1836_v46 = vmul.f32 %v12533_v17, %v12533_v17  ;;  %v1837_v58 = vmul.f32 %v12536_v23, %v12536_v23  ;;  %3986 = vmatprep.subr.bf16.mxu1 %v10232_v26  ;;  %4084 = vmatpush1.bf16.msra.mxu0 %v10227_v49 }
 0x388   :  { %v1838_v18 = vmul.f32 %v12539_v50, %v12539_v50  ;;  %3987 = vmatpush2.bf16.msra.mxu1 %v10230_v41 }
 0x389   :  { %v12548_v51 = vsub.f32 %v12311_v48, %v1757_v61  ;;  %v12551_v44 = vsub.f32 %v12301_v15, %v1757_v61  ;;  %v12554_v43 = vsub.f32 %v12325_v29, %v1757_v61  ;;  %1890 = vadd.xlane.f32.xlu1 %v1889_v2  ;;  %v1892_v16 = vadd.f32 %v1837_v58, %v1836_v46  ;;  %v10233_v15 = vld [vmem:[#allocation14 + $0x6c0] ss:$48 sps:$4 sm:$0xff]   ;;  %v10235_v48 = vld [vmem:[#allocation14 + $0x6c4] ss:$48 sps:$4 sm:$0xff]  }
 0x38a   :  { %v1727_v57 = vpop.xlane.xlu0 %1726  ;;  %v10236_v2 = vld [vmem:[#allocation14 + $0x3c0] ss:$48 sps:$4 sm:$0xff]   ;;  %v10238_v58 = vld [vmem:[#allocation14 + $0x3c4] ss:$48 sps:$4 sm:$0xff]   ;;  %4085 = vmatprep.subr.bf16.mxu0 %v10235_v48 }
 0x38b   :  { %v1758_v63 = vmul.f32 0.0026041667, %v1727_v57  ;;  %v1893_v40 = vadd.f32 %v1892_v16, %v1838_v18  ;;  %v1839_v59 = vmul.f32 %v12548_v51, %v12548_v51  ;;  %v1840_v52 = vmul.f32 %v12551_v44, %v12551_v44  ;;  %3988 = vmatprep.subr.bf16.mxu1 %v10238_v58  ;;  %4086 = vmatpush1.bf16.msra.mxu0 %v10233_v15 }
 0x38c   :  { %v1841_v61 = vmul.f32 %v12554_v43, %v12554_v43  ;;  %3989 = vmatpush2.bf16.msra.mxu1 %v10236_v2 }
 0x38d   :  { %v12563_v33 = vsub.f32 %v12327_v9, %v1758_v63  ;;  %v12566_v46 = vsub.f32 %v12321_v14, %v1758_v63  ;;  %v12569_v18 = vsub.f32 %v12342_v56, %v1758_v63  ;;  %1894 = vadd.xlane.f32.xlu0 %v1893_v40  ;;  %v1896_v26 = vadd.f32 %v1840_v52, %v1839_v59  ;;  %v10239_v14 = vld [vmem:[#allocation14 + $0x660] ss:$48 sps:$4 sm:$0xff]   ;;  %v10241_v9 = vld [vmem:[#allocation14 + $0x664] ss:$48 sps:$4 sm:$0xff]  }
 0x38e   :  { %v1731_v49 = vpop.xlane.xlu1 %1730  ;;  %v10242_v40 = vld [vmem:[#allocation14 + $0x360] ss:$48 sps:$4 sm:$0xff]   ;;  %v10244_v52 = vld [vmem:[#allocation14 + $0x364] ss:$48 sps:$4 sm:$0xff]   ;;  %4087 = vmatprep.subr.bf16.mxu0 %v10241_v9 }
 0x38f   :  { %v1759_v41 = vmul.f32 0.0026041667, %v1731_v49  ;;  %v1897_v16 = vadd.f32 %v1896_v26, %v1841_v61  ;;  %v1842_v57 = vmul.f32 %v12563_v33, %v12563_v33  ;;  %v1843_v29 = vmul.f32 %v12566_v46, %v12566_v46  ;;  %v15059_v59 = vld [vmem:[#allocation32_spill] sm:$0xff]  ;;  %3990 = vmatprep.subr.bf16.mxu1 %v10244_v52  ;;  %4088 = vmatpush1.bf16.msra.mxu0 %v10239_v14  ;;  %v15061_v52 = vld [vmem:[#allocation33_spill] sm:$0xff] }
 0x390   :  { %v1844_v63 = vmul.f32 %v12569_v18, %v12569_v18  ;;  %3991 = vmatpush2.bf16.msra.mxu1 %v10242_v40  ;;  %4089 = vmatprep.subr.bf16.mxu0 %v10247_v20 }
 0x391   :  { %v12578_v48 = vsub.f32 %v12349_v28, %v1759_v41  ;;  %v12581_v61 = vsub.f32 %v15059_v59, %v1759_v41  ;;  %v12584_v58 = vsub.f32 %v12358_v45, %v1759_v41  ;;  %1898 = vadd.xlane.f32.xlu1 %v1897_v16  ;;  %v1900_v26 = vadd.f32 %v1843_v29, %v1842_v57  ;;  %v10245_v59 = vld [vmem:[#allocation14 + $0x600] ss:$48 sps:$4 sm:$0xff]   ;;  %v10250_v29 = vld [vmem:[#allocation14 + $0x304] ss:$48 sps:$4 sm:$0xff]  }
 0x392   :  { %v1735_v15 = vpop.xlane.xlu0 %1734  ;;  %v10248_v16 = vld [vmem:[#allocation14 + $0x300] ss:$48 sps:$4 sm:$0xff]   ;;  %3992 = vmatprep.subr.bf16.mxu1 %v10250_v29  ;;  %v10256_v29 = vld [vmem:[#allocation14 + $0x8ac] ss:$48 sps:$4 sm:$0xff]  }
 0x393   :  { %v1760_v2 = vmul.f32 0.0026041667, %v1735_v15  ;;  %v1901_v49 = vadd.f32 %v1900_v26, %v1844_v63  ;;  %v1845_v56 = vmul.f32 %v12578_v48, %v12578_v48  ;;  %v1846_v28 = vmul.f32 %v12581_v61, %v12581_v61  ;;  %v15060_v57 = vld [vmem:[#allocation36_spill] sm:$0xff]  ;;  %4090 = vmatpush1.bf16.msra.mxu0 %v10245_v59 }
 0x394   :  { %v1847_v41 = vmul.f32 %v12584_v58, %v12584_v58  ;;  %3993 = vmatpush2.bf16.msra.mxu1 %v10248_v16 }
 0x395   :  { %v12593_v9 = vsub.f32 %v15060_v57, %v1760_v2  ;;  %v12596_v63 = vsub.f32 %v15061_v52, %v1760_v2  ;;  %v12599_v26 = vsub.f32 %v12376_v19, %v1760_v2  ;;  %1902 = vadd.xlane.f32.xlu0 %v1901_v49  ;;  %v1904_v15 = vadd.f32 %v1846_v28, %v1845_v56  ;;  %v10253_v52 = vld [vmem:[#allocation14 + $0x2ac] ss:$48 sps:$4 sm:$0xff]  }
 0x396   :  { %v1739_v14 = vpop.xlane.xlu1 %1738  ;;  %v15063_v56 = vld [vmem:[#allocation35_spill] sm:$0xff]  ;;  %4188 = vmatprep.subr.bf16.mxu0 %v10253_v52  ;;  %4301 = vmatprep.subr.bf16.mxu1 %v10256_v29 }
 0x397   :  { %v1761_v40 = vmul.f32 0.0026041667, %v1739_v14  ;;  %v1905_v45 = vadd.f32 %v1904_v15, %v1847_v41  ;;  %v1848_v39 = vmul.f32 %v12593_v9, %v12593_v9  ;;  %v1849_v57 = vmul.f32 %v12596_v63, %v12596_v63 }
 0x398   :  { %v1850_v2 = vmul.f32 %v12599_v26, %v12599_v26 }
 0x399   :  { %v12608_v49 = vsub.f32 %v12378_v27, %v1761_v40  ;;  %v12611_v20 = vsub.f32 %v15063_v56, %v1761_v40  ;;  %v12614_v28 = vsub.f32 %v12390_v22, %v1761_v40  ;;  %1906 = vadd.xlane.f32.xlu1 %v1905_v45  ;;  %v1908_v41 = vadd.f32 %v1849_v57, %v1848_v39 }
 0x39a   :  { %v1743_v15 = vpop.xlane.xlu0 %1742 }
 0x39b   :  { %15062 = vst [vmem:[#allocation80_spill] sm:$0xff] %v12608_v49  ;;  %v1762_v59 = vmul.f32 0.0026041667, %v1743_v15  ;;  %v1909_v16 = vadd.f32 %v1908_v41, %v1850_v2  ;;  %v1851_v14 = vmul.f32 %v12608_v49, %v12608_v49  ;;  %v1852_v19 = vmul.f32 %v12611_v20, %v12611_v20 }
 0x39c   :  { %v1853_v56 = vmul.f32 %v12614_v28, %v12614_v28 }
 0x39d   :  { %v12623_v40 = vsub.f32 %v12392_v35, %v1762_v59  ;;  %v12626_v39 = vsub.f32 %v12386_v3, %v1762_v59  ;;  %v12629_v45 = vsub.f32 %v12400_v0, %v1762_v59  ;;  %1910 = vadd.xlane.f32.xlu0 %v1909_v16  ;;  %v1912_v57 = vadd.f32 %v1852_v19, %v1851_v14 }
 0x39e   :  { %v1747_v52 = vpop.xlane.xlu1 %1746 }
 0x39f   :  { %15064 = vst [vmem:[#allocation81_spill] sm:$0xff] %v12623_v40  ;;  %15065 = vst [vmem:[#allocation82_spill] sm:$0xff] %v12626_v39  ;;  %v1763_v2 = vmul.f32 0.0026041667, %v1747_v52  ;;  %v1913_v41 = vadd.f32 %v1912_v57, %v1853_v56  ;;  %v1854_v29 = vmul.f32 %v12623_v40, %v12623_v40  ;;  %v1855_v15 = vmul.f32 %v12626_v39, %v12626_v39 }
 0x3a0   :  { %15066 = vst [vmem:[#allocation83_spill] sm:$0xff] %v12629_v45  ;;  %v1856_v22 = vmul.f32 %v12629_v45, %v12629_v45 }
 0x3a1   :  { %v12638_v3 = vsub.f32 %v12404_v34, %v1763_v2  ;;  %v12641_v59 = vsub.f32 %v12397_v25, %v1763_v2  ;;  %v12644_v19 = vsub.f32 %v12407_v30, %v1763_v2  ;;  %1914 = vadd.xlane.f32.xlu1 %v1913_v41  ;;  %v1916_v56 = vadd.f32 %v1855_v15, %v1854_v29 }
 0x3a3   :  { %15067 = vst [vmem:[#allocation84_spill] sm:$0xff] %v12638_v3  ;;  %15068 = vst [vmem:[#allocation85_spill] sm:$0xff] %v12641_v59  ;;  %v1917_v16 = vadd.f32 %v1916_v56, %v1856_v22  ;;  %v1857_v14 = vmul.f32 %v12638_v3, %v12638_v3  ;;  %v1858_v57 = vmul.f32 %v12641_v59, %v12641_v59  ;;  %v225_v59 = vld [vmem:[#allocation11] sm:$0x7] }
 0x3a4   :  { %15069 = vst [vmem:[#allocation86_spill] sm:$0xff] %v12644_v19  ;;  %v1859_v52 = vmul.f32 %v12644_v19, %v12644_v19 }
 0x3a5   :  { %1918 = vadd.xlane.f32.xlu0 %v1917_v16  ;;  %v1920_v0 = vadd.f32 %v1858_v57, %v1857_v14  ;;  %v15070_v14 = vld [vmem:[#allocation38_spill] sm:$0xff] }
 0x3a7   :  { %v1921_v34 = vadd.f32 %v1920_v0, %v1859_v52  ;;  %v226_v52 = vld [vmem:[#allocation13] sm:$0x7] }
 0x3a9   :  { %1922 = vadd.xlane.f32.xlu1 %v1921_v34 }
 0x3f6   :  { %v1863_v25 = vpop.xlane.xlu0 %1862 }
 0x3f7   :  { %v1924_v35 = vmul.f32 0.0026041667, %v1863_v25  ;;  %v12653_v25 = vrot.slane %v225_v59, %v15070_v14 }
 0x3f9   :  { %v1940_v2 = vadd.f32 1e-05, %v1924_v35  ;;  %v15071_v35 = vld [vmem:[#allocation39_spill] sm:$0xff] }
 0x3fa   :  { %v1867_v30 = vpop.xlane.xlu1 %1866  ;;  %v12656_v57 = vrot.slane %v225_v59, %v15071_v35 }
 0x3fb   :  { %11027 = vrsqrt.f32 %v1940_v2  ;;  %v1925_v41 = vmul.f32 0.0026041667, %v1867_v30 }
 0x3fd   :  { %v1941_v22 = vadd.f32 1e-05, %v1925_v41 }
 0x3fe   :  { %v1871_v29 = vpop.xlane.xlu0 %1870 }
 0x3ff   :  { %11029 = vrsqrt.f32 %v1941_v22  ;;  %v1926_v15 = vmul.f32 0.0026041667, %v1871_v29  ;;  %v15072_v29 = vld [vmem:[#allocation40_spill] sm:$0xff] }
 0x401   :  { %v1942_v56 = vadd.f32 1e-05, %v1926_v15  ;;  %v12662_v15 = vrot.slane %v225_v59, %v15072_v29 }
 0x402   :  { %v1875_v27 = vpop.xlane.xlu1 %1874 }
 0x403   :  { %11031 = vrsqrt.f32 %v1942_v56  ;;  %v1927_v16 = vmul.f32 0.0026041667, %v1875_v27 }
 0x405   :  { %v1943_v3 = vadd.f32 1e-05, %v1927_v16  ;;  %v12666_v16 = vrot.slane %v226_v52, %v15070_v14 }
 0x406   :  { %v1879_v19 = vpop.xlane.xlu0 %1878 }
 0x407   :  { %11033 = vrsqrt.f32 %v1943_v3  ;;  %v1928_v0 = vmul.f32 0.0026041667, %v1879_v19 }
 0x408   :  { %v11028_v34 = vpop.eup %11027 }
 0x409   :  { %v1944_v30 = vadd.f32 1e-05, %v1928_v0  ;;  %v1973_v2 = vmul.f32 %v11028_v34, %v12416_v5  ;;  %v1974_v41 = vmul.f32 %v11028_v34, %v12419_v54  ;;  %v1972_v27 = vmul.f32 %v11028_v34, %v12413_v6 }
 0x40a   :  { %v1883_v22 = vpop.xlane.xlu1 %1882  ;;  %v12670_v5 = vrot.slane %v226_v52, %v15071_v35 }
 0x40b   :  { %11035 = vrsqrt.f32 %v1944_v30  ;;  %v1929_v3 = vmul.f32 0.0026041667, %v1883_v22  ;;  %v2037_v56 = vmul.f32 %v12653_v25, %v1973_v2  ;;  %v2038_v0 = vmul.f32 %v12656_v57, %v1974_v41 }
 0x40c   :  { %v11030_v19 = vpop.eup %11029  ;;  %v2036_v30 = vmul.f32 %v12662_v15, %v1972_v27  ;;  %v12677_v2 = vrot.slane %v226_v52, %v15072_v29 }
 0x40d   :  { %v1945_v54 = vadd.f32 1e-05, %v1929_v3  ;;  %v1976_v40 = vmul.f32 %v11030_v19, %v12431_v12  ;;  %v1977_v6 = vmul.f32 %v11030_v19, %v12434_v47  ;;  %v1975_v34 = vmul.f32 %v11030_v19, %v12428_v53 }
 0x40e   :  { %v1887_v59 = vpop.xlane.xlu0 %1886  ;;  %v2101_v3 = vadd.f32 %v12666_v16, %v2037_v56  ;;  %v2102_v12 = vadd.f32 %v12670_v5, %v2038_v0 }
 0x40f   :  { %11037 = vrsqrt.f32 %v1945_v54  ;;  %v1930_v22 = vmul.f32 0.0026041667, %v1887_v59  ;;  %v2040_v41 = vmul.f32 %v12653_v25, %v1976_v40  ;;  %v2041_v35 = vmul.f32 %v12656_v57, %v1977_v6  ;;  %v10251_v54 = vld [vmem:[#allocation14 + $0x2a8] ss:$48 sps:$4 sm:$0xff]  }
 0x410   :  { %v11032_v14 = vpop.eup %11031  ;;  %v2039_v47 = vmul.f32 %v12662_v15, %v1975_v34  ;;  %v2100_v40 = vadd.f32 %v12677_v2, %v2036_v30 }
 0x411   :  { %v1946_v45 = vadd.f32 1e-05, %v1930_v22  ;;  %v2104_v53 = vadd.f32 %v12666_v16, %v2040_v41  ;;  %v2105_v27 = vadd.f32 %v12670_v5, %v2041_v35  ;;  %v1979_v52 = vmul.f32 %v11032_v14, %v12446_v42  ;;  %v10254_v41 = vld [vmem:[#allocation14 + $0x8a8] ss:$48 sps:$4 sm:$0xff]   ;;  %v10259_v35 = vld [vmem:[#allocation14 + $0x24c] ss:$48 sps:$4 sm:$0xff]  }
 0x412   :  { %v1891_v19 = vpop.xlane.xlu1 %1890  ;;  %v2103_v6 = vadd.f32 %v12677_v2, %v2039_v47  ;;  %v1980_v59 = vmul.f32 %v11032_v14, %v12449_v11  ;;  %v1978_v56 = vmul.f32 %v11032_v14, %v12443_v60  ;;  %v10265_v47 = vld [vmem:[#allocation14 + $0x84c] ss:$48 sps:$4 sm:$0xff]  }
 0x413   :  { %11039 = vrsqrt.f32 %v1946_v45  ;;  %v1931_v0 = vmul.f32 0.0026041667, %v1891_v19  ;;  %v12691_v34 = vpack.c.bf16 %v2104_v53, %v2101_v3  ;;  %v12693_v22 = vpack.c.bf16 %v2105_v27, %v2102_v12  ;;  %v10257_v3 = vld [vmem:[#allocation14 + $0x248] ss:$48 sps:$4 sm:$0xff]   ;;  %v10262_v27 = vld [vmem:[#allocation14 + $0x1ec] ss:$48 sps:$4 sm:$0xff]  }
 0x414   :  { %v11034_v29 = vpop.eup %11033  ;;  %v12695_v42 = vpack.c.bf16 %v2103_v6, %v2100_v40  ;;  %v2043_v39 = vmul.f32 %v12653_v25, %v1979_v52  ;;  %v2044_v30 = vmul.f32 %v12656_v57, %v1980_v59  ;;  %v2042_v12 = vmul.f32 %v12662_v15, %v1978_v56  ;;  %v10263_v19 = vld [vmem:[#allocation14 + $0x848] ss:$48 sps:$4 sm:$0xff]  }
 0x415   :  { %v1947_v49 = vadd.f32 1e-05, %v1931_v0  ;;  %3994 = vmatprep.mubr.bf16.mxu1 %v12691_v34  ;;  %4108 = vmatmul.mubr.bf16.vlgmr.msra.gmra.mxu0 %v12693_v22  ;;  %v1982_v60 = vmul.f32 %v11034_v29, %v12461_v62  ;;  %v1983_v11 = vmul.f32 %v11034_v29, %v12464_v1  ;;  %v1981_v45 = vmul.f32 %v11034_v29, %v12458_v4 }
 0x416   :  { %4189 = vmatpush1.bf16.msra.mxu0 %v10251_v54  ;;  %3995 = vmatmul.mubr.bf16.vlgmr.msra.gmra.mxu1 %v12695_v42  ;;  %v1895_v14 = vpop.xlane.xlu0 %1894  ;;  %v15073_v40 = vmov 0   ;;  %v2107_v4 = vadd.f32 %v12666_v16, %v2043_v39  ;;  %v2108_v29 = vadd.f32 %v12670_v5, %v2044_v30 }
 0x417   :  { %11041 = vrsqrt.f32 %v1947_v49  ;;  %v1932_v53 = vmul.f32 0.0026041667, %v1895_v14  ;;  %4302 = vmatpush1.bf16.msra.mxu1 %v10254_v41  ;;  %4190 = vmatprep.subr.bf16.mxu0 %v10259_v35  ;;  %v2046_v52 = vmul.f32 %v12653_v25, %v1982_v60  ;;  %v2047_v62 = vmul.f32 %v12656_v57, %v1983_v11  ;;  %v10274_v49 = vld [vmem:[#allocation14 + $0x7ec] ss:$48 sps:$4 sm:$0xff]   ;;  %v10260_v35 = vld [vmem:[#allocation14 + $0x1e8] ss:$48 sps:$4 sm:$0xff]  }
 0x418   :  { %v11036_v1 = vpop.eup %11035  ;;  %4117 = vmatprep.mubr.bf16.mxu0 %v15073_v40  ;;  %v2045_v54 = vmul.f32 %v12662_v15, %v1981_v45  ;;  %4303 = vmatprep.subr.bf16.mxu1 %v10265_v47  ;;  %v2106_v60 = vadd.f32 %v12677_v2, %v2042_v12 }
 0x419   :  { %v1948_v6 = vadd.f32 1e-05, %v1932_v53  ;;  %v2110_v59 = vadd.f32 %v12666_v16, %v2046_v52  ;;  %v2111_v56 = vadd.f32 %v12670_v5, %v2047_v62  ;;  %v1985_v0 = vmul.f32 %v11036_v1, %v12476_v55  ;;  %v10268_v55 = vld [vmem:[#allocation14 + $0x18c] ss:$48 sps:$4 sm:$0xff]   ;;  %v10272_v62 = vld [vmem:[#allocation14 + $0x7e8] ss:$48 sps:$4 sm:$0xff]  }
 0x41a   :  { %4191 = vmatpush1.bf16.msra.mxu0 %v10257_v3  ;;  %v1899_v41 = vpop.xlane.xlu1 %1898  ;;  %v2109_v39 = vadd.f32 %v12677_v2, %v2045_v54  ;;  %v1986_v30 = vmul.f32 %v11036_v1, %v12479_v7  ;;  %v1984_v11 = vmul.f32 %v11036_v1, %v12473_v8  ;;  %v10283_v1 = vld [vmem:[#allocation14 + $0x78c] ss:$48 sps:$4 sm:$0xff]  }
 0x41b   :  { %11043 = vrsqrt.f32 %v1948_v6  ;;  %v1933_v47 = vmul.f32 0.0026041667, %v1899_v41  ;;  %4192 = vmatprep.subr.bf16.mxu0 %v10262_v27  ;;  %v12719_v45 = vpack.c.bf16 %v2110_v59, %v2107_v4  ;;  %v12721_v14 = vpack.c.bf16 %v2111_v56, %v2108_v29  ;;  %4304 = vmatpush1.bf16.msra.mxu1 %v10263_v19  ;;  %v10266_v29 = vld [vmem:[#allocation14 + $0x188] ss:$48 sps:$4 sm:$0xff]   ;;  %v10271_v6 = vld [vmem:[#allocation14 + $0x12c] ss:$48 sps:$4 sm:$0xff]  }
 0x41c   :  { %v11038_v3 = vpop.eup %11037  ;;  %v12723_v53 = vpack.c.bf16 %v2109_v39, %v2106_v60  ;;  %v2049_v12 = vmul.f32 %v12653_v25, %v1985_v0  ;;  %v2050_v52 = vmul.f32 %v12656_v57, %v1986_v30  ;;  %4305 = vmatprep.subr.bf16.mxu1 %v10274_v49  ;;  %v2048_v54 = vmul.f32 %v12662_v15, %v1984_v11  ;;  %v10281_v41 = vld [vmem:[#allocation14 + $0x788] ss:$48 sps:$4 sm:$0xff]  }
 0x41d   :  { %v1949_v7 = vadd.f32 1e-05, %v1933_v47  ;;  %4004 = vmatprep.mubr.bf16.mxu1 %v12719_v45  ;;  %4118 = vmatmul.mubr.bf16.gmra.mxu0 %v12721_v14  ;;  %v1988_v8 = vmul.f32 %v11038_v3, %v12491_v37  ;;  %v1989_v27 = vmul.f32 %v11038_v3, %v12494_v38  ;;  %v1987_v19 = vmul.f32 %v11038_v3, %v12488_v31  ;;  %v10269_v47 = vld [vmem:[#allocation14 + $0x128] ss:$48 sps:$4 sm:$0xff]  }
 0x41e   :  { %4193 = vmatpush1.bf16.msra.mxu0 %v10260_v35  ;;  %4005 = vmatmul.mubr.bf16.gmra.mxu1 %v12723_v53  ;;  %v1903_v4 = vpop.xlane.xlu0 %1902  ;;  %v2113_v31 = vadd.f32 %v12666_v16, %v2049_v12  ;;  %v2114_v56 = vadd.f32 %v12670_v5, %v2050_v52 }
 0x41f   :  { %11045 = vrsqrt.f32 %v1949_v7  ;;  %v1934_v49 = vmul.f32 0.0026041667, %v1903_v4  ;;  %4194 = vmatprep.subr.bf16.mxu0 %v10268_v55  ;;  %4127 = vmatprep.mubr.bf16.mxu0 %v15073_v40  ;;  %v2052_v37 = vmul.f32 %v12653_v25, %v1988_v8  ;;  %v2053_v38 = vmul.f32 %v12656_v57, %v1989_v27 }
 0x420   :  { %v11040_v59 = vpop.eup %11039  ;;  %v2051_v0 = vmul.f32 %v12662_v15, %v1987_v19  ;;  %4306 = vmatpush1.bf16.msra.mxu1 %v10272_v62  ;;  %v2112_v55 = vadd.f32 %v12677_v2, %v2048_v54 }
 0x421   :  { %v1950_v35 = vadd.f32 1e-05, %v1934_v49  ;;  %v2116_v60 = vadd.f32 %v12666_v16, %v2052_v37  ;;  %v2117_v39 = vadd.f32 %v12670_v5, %v2053_v38  ;;  %v1991_v30 = vmul.f32 %v11040_v59, %v12506_v36  ;;  %4307 = vmatprep.subr.bf16.mxu1 %v10283_v1  ;;  %v10277_v36 = vld [vmem:[#allocation14 + $0xcc] ss:$48 sps:$4 sm:$0xff]   ;;  %v10290_v37 = vld [vmem:[#allocation14 + $0x728] ss:$48 sps:$4 sm:$0xff]  }
 0x422   :  { %4195 = vmatpush1.bf16.msra.mxu0 %v10266_v29  ;;  %v1907_v11 = vpop.xlane.xlu1 %1906  ;;  %v2115_v3 = vadd.f32 %v12677_v2, %v2051_v0  ;;  %v1992_v12 = vmul.f32 %v11040_v59, %v12509_v24  ;;  %v1990_v52 = vmul.f32 %v11040_v59, %v12503_v32  ;;  %v10292_v24 = vld [vmem:[#allocation14 + $0x72c] ss:$48 sps:$4 sm:$0xff]   ;;  %v10275_v59 = vld [vmem:[#allocation14 + $0xc8] ss:$48 sps:$4 sm:$0xff]  }
 0x423   :  { %11047 = vrsqrt.f32 %v1950_v35  ;;  %v1935_v62 = vmul.f32 0.0026041667, %v1907_v11  ;;  %4196 = vmatprep.subr.bf16.mxu0 %v10271_v6  ;;  %v12747_v7 = vpack.c.bf16 %v2116_v60, %v2113_v31  ;;  %v12749_v8 = vpack.c.bf16 %v2117_v39, %v2114_v56  ;;  %v10301_v31 = vld [vmem:[#allocation14 + $0x6cc] ss:$48 sps:$4 sm:$0xff]  }
 0x424   :  { %v11042_v27 = vpop.eup %11041  ;;  %v12751_v19 = vpack.c.bf16 %v2115_v3, %v2112_v55  ;;  %v2055_v1 = vmul.f32 %v12653_v25, %v1991_v30  ;;  %v2056_v4 = vmul.f32 %v12656_v57, %v1992_v12  ;;  %v2054_v29 = vmul.f32 %v12662_v15, %v1990_v52  ;;  %4308 = vmatpush1.bf16.msra.mxu1 %v10281_v41  ;;  %v10280_v0 = vld [vmem:[#allocation14 + $0x6c] ss:$48 sps:$4 sm:$0xff]   ;;  %v10278_v12 = vld [vmem:[#allocation14 + $0x68] ss:$48 sps:$4 sm:$0xff]  }
 0x425   :  { %v1951_v32 = vadd.f32 1e-05, %v1935_v62  ;;  %4014 = vmatprep.mubr.bf16.mxu1 %v12747_v7  ;;  %4128 = vmatmul.mubr.bf16.gmra.mxu0 %v12749_v8  ;;  %v1994_v54 = vmul.f32 %v11042_v27, %v12521_v13  ;;  %v1995_v49 = vmul.f32 %v11042_v27, %v12524_v10  ;;  %v1993_v6 = vmul.f32 %v11042_v27, %v12518_v21 }
 0x426   :  { %4197 = vmatpush1.bf16.msra.mxu0 %v10269_v47  ;;  %4015 = vmatmul.mubr.bf16.gmra.mxu1 %v12751_v19  ;;  %v1911_v38 = vpop.xlane.xlu0 %1910  ;;  %v2119_v21 = vadd.f32 %v12666_v16, %v2055_v1  ;;  %v2120_v35 = vadd.f32 %v12670_v5, %v2056_v4  ;;  %v2118_v39 = vadd.f32 %v12677_v2, %v2054_v29  ;;  %v10286_v29 = vld [vmem:[#allocation14 + $0xc] ss:$48 sps:$4 sm:$0xff]  }
 0x427   :  { %11049 = vrsqrt.f32 %v1951_v32  ;;  %v1936_v56 = vmul.f32 0.0026041667, %v1911_v38  ;;  %4198 = vmatprep.subr.bf16.mxu0 %v10277_v36  ;;  %4137 = vmatprep.mubr.bf16.mxu0 %v15073_v40  ;;  %v2058_v41 = vmul.f32 %v12653_v25, %v1994_v54  ;;  %v2059_v13 = vmul.f32 %v12656_v57, %v1995_v49  ;;  %v10299_v49 = vld [vmem:[#allocation14 + $0x6c8] ss:$48 sps:$4 sm:$0xff]   ;;  %v10310_v38 = vld [vmem:[#allocation14 + $0x66c] ss:$48 sps:$4 sm:$0xff]  }
 0x428   :  { %v11044_v10 = vpop.eup %11043  ;;  %v2057_v60 = vmul.f32 %v12662_v15, %v1993_v6  ;;  %4309 = vmatprep.subr.bf16.mxu1 %v10292_v24 }
 0x429   :  { %v1952_v30 = vadd.f32 1e-05, %v1936_v56  ;;  %v2122_v11 = vadd.f32 %v12666_v16, %v2058_v41  ;;  %v2123_v47 = vadd.f32 %v12670_v5, %v2059_v13  ;;  %v1997_v55 = vmul.f32 %v11044_v10, %v12536_v23  ;;  %4310 = vmatpush1.bf16.msra.mxu1 %v10290_v37  ;;  %v10289_v41 = vld [vmem:[#allocation14 + $0x5ac] ss:$48 sps:$4 sm:$0xff]  }
 0x42a   :  { %4199 = vmatpush1.bf16.msra.mxu0 %v10275_v59  ;;  %v1915_v3 = vpop.xlane.xlu1 %1914  ;;  %v2121_v52 = vadd.f32 %v12677_v2, %v2057_v60  ;;  %v1998_v62 = vmul.f32 %v11044_v10, %v12539_v50  ;;  %v1996_v36 = vmul.f32 %v11044_v10, %v12533_v17  ;;  %4311 = vmatprep.subr.bf16.mxu1 %v10301_v31  ;;  %v10284_v31 = vld [vmem:[#allocation14 + $0x8] ss:$48 sps:$4 sm:$0xff]  }
 0x42b   :  { %11051 = vrsqrt.f32 %v1952_v30  ;;  %v1937_v27 = vmul.f32 0.0026041667, %v1915_v3  ;;  %4200 = vmatprep.subr.bf16.mxu0 %v10280_v0  ;;  %v12775_v1 = vpack.c.bf16 %v2122_v11, %v2119_v21  ;;  %v12777_v4 = vpack.c.bf16 %v2123_v47, %v2120_v35  ;;  %v10308_v35 = vld [vmem:[#allocation14 + $0x668] ss:$48 sps:$4 sm:$0xff]  }
 0x42c   :  { %v11046_v23 = vpop.eup %11045  ;;  %v12779_v24 = vpack.c.bf16 %v2121_v52, %v2118_v39  ;;  %v2061_v32 = vmul.f32 %v12653_v25, %v1997_v55  ;;  %v2062_v54 = vmul.f32 %v12656_v57, %v1998_v62  ;;  %v2060_v56 = vmul.f32 %v12662_v15, %v1996_v36  ;;  %v10287_v55 = vld [vmem:[#allocation14 + $0x5a8] ss:$48 sps:$4 sm:$0xff]  }
 0x42d   :  { %v1953_v50 = vadd.f32 1e-05, %v1937_v27  ;;  %4024 = vmatprep.mubr.bf16.mxu1 %v12775_v1  ;;  %4138 = vmatmul.mubr.bf16.gmra.mxu0 %v12777_v4  ;;  %v2000_v17 = vmul.f32 %v11046_v23, %v12551_v44  ;;  %v2001_v6 = vmul.f32 %v11046_v23, %v12554_v43  ;;  %v1999_v37 = vmul.f32 %v11046_v23, %v12548_v51 }
 0x42e   :  { %4201 = vmatpush1.bf16.msra.mxu0 %v10278_v12  ;;  %4025 = vmatmul.mubr.bf16.gmra.mxu1 %v12779_v24  ;;  %v1919_v59 = vpop.xlane.xlu0 %1918  ;;  %v2125_v51 = vadd.f32 %v12666_v16, %v2061_v32  ;;  %v2126_v10 = vadd.f32 %v12670_v5, %v2062_v54  ;;  %v2124_v3 = vadd.f32 %v12677_v2, %v2060_v56  ;;  %v10298_v56 = vld [vmem:[#allocation14 + $0x4ec] ss:$48 sps:$4 sm:$0xff]  }
 0x42f   :  { %11053 = vrsqrt.f32 %v1953_v50  ;;  %v1938_v0 = vmul.f32 0.0026041667, %v1919_v59  ;;  %4202 = vmatprep.subr.bf16.mxu0 %v10286_v29  ;;  %4147 = vmatprep.mubr.bf16.mxu0 %v15073_v40  ;;  %v2064_v44 = vmul.f32 %v12653_v25, %v2000_v17  ;;  %v2065_v43 = vmul.f32 %v12656_v57, %v2001_v6  ;;  %v10293_v59 = vld [vmem:[#allocation14 + $0x548] ss:$48 sps:$4 sm:$0xff]  }
 0x430   :  { %v11048_v13 = vpop.eup %11047  ;;  %v2063_v21 = vmul.f32 %v12662_v15, %v1999_v37  ;;  %4312 = vmatpush1.bf16.msra.mxu1 %v10299_v49 }
 0x431   :  { %v1954_v60 = vadd.f32 1e-05, %v1938_v0  ;;  %v2128_v39 = vadd.f32 %v12666_v16, %v2064_v44  ;;  %v2129_v30 = vadd.f32 %v12670_v5, %v2065_v43  ;;  %v2003_v11 = vmul.f32 %v11048_v13, %v12566_v46  ;;  %4313 = vmatprep.subr.bf16.mxu1 %v10310_v38  ;;  %v10295_v46 = vld [vmem:[#allocation14 + $0x54c] ss:$48 sps:$4 sm:$0xff]   ;;  %v10317_v38 = vld [vmem:[#allocation14 + $0x608] ss:$48 sps:$4 sm:$0xff]  }
 0x432   :  { %4203 = vmatpush1.bf16.msra.mxu0 %v10284_v31  ;;  %v1923_v47 = vpop.xlane.xlu1 %1922  ;;  %v2127_v12 = vadd.f32 %v12677_v2, %v2063_v21  ;;  %v2004_v52 = vmul.f32 %v11048_v13, %v12569_v18  ;;  %v2002_v62 = vmul.f32 %v11048_v13, %v12563_v33  ;;  %v10319_v18 = vld [vmem:[#allocation14 + $0x60c] ss:$48 sps:$4 sm:$0xff]   ;;  %v10328_v31 = vld [vmem:[#allocation14 + $0x8b4] ss:$48 sps:$4 sm:$0xff]  }
 0x433   :  { %11055 = vrsqrt.f32 %v1954_v60  ;;  %v1939_v36 = vmul.f32 0.0026041667, %v1923_v47  ;;  %4204 = vmatprep.subr.bf16.mxu0 %v10289_v41  ;;  %v12803_v27 = vpack.c.bf16 %v2128_v39, %v2125_v51  ;;  %v12805_v29 = vpack.c.bf16 %v2129_v30, %v2126_v10 }
 0x434   :  { %v11050_v23 = vpop.eup %11049  ;;  %v12807_v32 = vpack.c.bf16 %v2127_v12, %v2124_v3  ;;  %v2067_v54 = vmul.f32 %v12653_v25, %v2003_v11  ;;  %v2068_v49 = vmul.f32 %v12656_v57, %v2004_v52  ;;  %v2066_v50 = vmul.f32 %v12662_v15, %v2002_v62  ;;  %4314 = vmatpush1.bf16.msra.mxu1 %v10308_v35  ;;  %v10296_v35 = vld [vmem:[#allocation14 + $0x4e8] ss:$48 sps:$4 sm:$0xff]   ;;  %v15074_v62 = vld [vmem:[#allocation80_spill] sm:$0xff] }
 0x435   :  { %v1955_v33 = vadd.f32 1e-05, %v1939_v36  ;;  %4034 = vmatprep.mubr.bf16.mxu1 %v12803_v27  ;;  %4148 = vmatmul.mubr.bf16.gmra.mxu0 %v12805_v29  ;;  %v2006_v17 = vmul.f32 %v11050_v23, %v12581_v61  ;;  %v2007_v6 = vmul.f32 %v11050_v23, %v12584_v58  ;;  %v2005_v37 = vmul.f32 %v11050_v23, %v12578_v48  ;;  %v10302_v52 = vld [vmem:[#allocation14 + $0x488] ss:$48 sps:$4 sm:$0xff]   ;;  %v10307_v23 = vld [vmem:[#allocation14 + $0x42c] ss:$48 sps:$4 sm:$0xff]  }
 0x436   :  { %4205 = vmatpush2.bf16.msra.mxu0 %v10287_v55  ;;  %4035 = vmatmul.mubr.bf16.gmra.mxu1 %v12807_v32  ;;  %v2131_v48 = vadd.f32 %v12666_v16, %v2067_v54  ;;  %v2132_v44 = vadd.f32 %v12670_v5, %v2068_v49  ;;  %v2130_v43 = vadd.f32 %v12677_v2, %v2066_v50  ;;  %v10304_v55 = vld [vmem:[#allocation14 + $0x48c] ss:$48 sps:$4 sm:$0xff]  }
 0x437   :  { %11057 = vrsqrt.f32 %v1955_v33  ;;  %4206 = vmatprep.subr.bf16.mxu0 %v10295_v46  ;;  %4157 = vmatprep.mubr.bf16.mxu0 %v15073_v40  ;;  %v2070_v0 = vmul.f32 %v12653_v25, %v2006_v17  ;;  %v2071_v41 = vmul.f32 %v12656_v57, %v2007_v6  ;;  %v2069_v61 = vmul.f32 %v12662_v15, %v2005_v37  ;;  %v15075_v6 = vld [vmem:[#allocation82_spill] sm:$0xff] }
 0x438   :  { %v11052_v58 = vpop.eup %11051  ;;  %4315 = vmatprep.subr.bf16.mxu1 %v10319_v18 }
 0x439   :  { %v2134_v13 = vadd.f32 %v12666_v16, %v2070_v0  ;;  %v2135_v51 = vadd.f32 %v12670_v5, %v2071_v41  ;;  %v2133_v10 = vadd.f32 %v12677_v2, %v2069_v61  ;;  %v2009_v21 = vmul.f32 %v11052_v58, %v12596_v63  ;;  %4316 = vmatpush1.bf16.msra.mxu1 %v10317_v38  ;;  %v15076_v38 = vld [vmem:[#allocation83_spill] sm:$0xff]  ;;  %v15077_v41 = vld [vmem:[#allocation81_spill] sm:$0xff] }
 0x43a   :  { %4207 = vmatpush2.bf16.msra.mxu0 %v10293_v59  ;;  %v2010_v60 = vmul.f32 %v11052_v58, %v12599_v26  ;;  %v2008_v39 = vmul.f32 %v11052_v58, %v12593_v9  ;;  %4527 = vmatprep.subr.bf16.mxu1 %v10328_v31  ;;  %v10305_v31 = vld [vmem:[#allocation14 + $0x428] ss:$48 sps:$4 sm:$0xff]  }
 0x43b   :  { %4208 = vmatprep.subr.bf16.mxu0 %v10298_v56  ;;  %v12831_v30 = vpack.c.bf16 %v2134_v13, %v2131_v48  ;;  %v12833_v11 = vpack.c.bf16 %v2135_v51, %v2132_v44  ;;  %v12835_v47 = vpack.c.bf16 %v2133_v10, %v2130_v43  ;;  %v2073_v12 = vmul.f32 %v12653_v25, %v2009_v21  ;;  %v10313_v44 = vld [vmem:[#allocation14 + $0x3cc] ss:$48 sps:$4 sm:$0xff]  }
 0x43c   :  { %v11054_v3 = vpop.eup %11053  ;;  %v2074_v63 = vmul.f32 %v12656_v57, %v2010_v60  ;;  %v2072_v46 = vmul.f32 %v12662_v15, %v2008_v39  ;;  %v15078_v10 = vld [vmem:[#allocation85_spill] sm:$0xff] }
 0x43d   :  { %4044 = vmatprep.mubr.bf16.mxu1 %v12831_v30  ;;  %4158 = vmatmul.mubr.bf16.gmra.mxu0 %v12833_v11  ;;  %v2012_v9 = vmul.f32 %v11054_v3, %v12611_v20  ;;  %v2013_v26 = vmul.f32 %v11054_v3, %v12614_v28  ;;  %v2011_v36 = vmul.f32 %v11054_v3, %v15074_v62  ;;  %v15080_v3 = vld [vmem:[#allocation84_spill] sm:$0xff] }
 0x43e   :  { %4209 = vmatpush2.bf16.msra.mxu0 %v10296_v35  ;;  %4045 = vmatmul.mubr.bf16.gmra.mxu1 %v12835_v47  ;;  %v2137_v20 = vadd.f32 %v12666_v16, %v2073_v12  ;;  %v2138_v28 = vadd.f32 %v12670_v5, %v2074_v63  ;;  %v2136_v56 = vadd.f32 %v12677_v2, %v2072_v46  ;;  %v15079_v35 = vld [vmem:[#allocation86_spill] sm:$0xff] }
 0x43f   :  { %4210 = vmatprep.subr.bf16.mxu0 %v10304_v55  ;;  %4167 = vmatprep.mubr.bf16.mxu0 %v15073_v40  ;;  %v2076_v54 = vmul.f32 %v12653_v25, %v2012_v9  ;;  %v2077_v49 = vmul.f32 %v12656_v57, %v2013_v26  ;;  %v2075_v18 = vmul.f32 %v12662_v15, %v2011_v36  ;;  %v10311_v55 = vld [vmem:[#allocation14 + $0x3c8] ss:$48 sps:$4 sm:$0xff]   ;;  %v10316_v9 = vld [vmem:[#allocation14 + $0x36c] ss:$48 sps:$4 sm:$0xff]  }
 0x440   :  { %v11056_v50 = vpop.eup %11055 }
 0x441   :  { %v2140_v33 = vadd.f32 %v12666_v16, %v2076_v54  ;;  %v2141_v17 = vadd.f32 %v12670_v5, %v2077_v49  ;;  %v2015_v37 = vmul.f32 %v11056_v50, %v15075_v6  ;;  %v2016_v59 = vmul.f32 %v11056_v50, %v15076_v38  ;;  %v10314_v49 = vld [vmem:[#allocation14 + $0x368] ss:$48 sps:$4 sm:$0xff]   ;;  %v10329_v6 = vld [vmem:[#allocation14 + $0x250] ss:$48 sps:$4 sm:$0xff]  }
 0x442   :  { %4211 = vmatpush2.bf16.msra.mxu0 %v10302_v52  ;;  %v2139_v0 = vadd.f32 %v12677_v2, %v2075_v18  ;;  %v2014_v61 = vmul.f32 %v11056_v50, %v15077_v41  ;;  %v10331_v18 = vld [vmem:[#allocation14 + $0x254] ss:$48 sps:$4 sm:$0xff]   ;;  %v10335_v38 = vld [vmem:[#allocation14 + $0x850] ss:$48 sps:$4 sm:$0xff]  }
 0x443   :  { %4212 = vmatprep.subr.bf16.mxu0 %v10307_v23  ;;  %v12859_v58 = vpack.c.bf16 %v2140_v33, %v2137_v20  ;;  %v12861_v48 = vpack.c.bf16 %v2141_v17, %v2138_v28  ;;  %v2079_v51 = vmul.f32 %v12653_v25, %v2015_v37  ;;  %v2080_v39 = vmul.f32 %v12656_v57, %v2016_v59  ;;  %v10326_v33 = vld [vmem:[#allocation14 + $0x8b0] ss:$48 sps:$4 sm:$0xff]   ;;  %v10337_v17 = vld [vmem:[#allocation14 + $0x854] ss:$48 sps:$4 sm:$0xff]  }
 0x444   :  { %v11058_v43 = vpop.eup %11057  ;;  %v12863_v13 = vpack.c.bf16 %v2139_v0, %v2136_v56  ;;  %v2078_v63 = vmul.f32 %v12662_v15, %v2014_v61  ;;  %v10334_v37 = vld [vmem:[#allocation14 + $0x1f4] ss:$48 sps:$4 sm:$0xff]   ;;  %v10344_v0 = vld [vmem:[#allocation14 + $0x7f0] ss:$48 sps:$4 sm:$0xff]  }
 0x445   :  { %4054 = vmatprep.mubr.bf16.mxu1 %v12859_v58  ;;  %4168 = vmatmul.mubr.bf16.gmra.mxu0 %v12861_v48  ;;  %v2018_v21 = vmul.f32 %v11058_v43, %v15078_v10  ;;  %v2019_v60 = vmul.f32 %v11058_v43, %v15079_v35  ;;  %v2017_v12 = vmul.f32 %v11058_v43, %v15080_v3  ;;  %v10346_v59 = vld [vmem:[#allocation14 + $0x7f4] ss:$48 sps:$4 sm:$0xff]   ;;  %v10338_v61 = vld [vmem:[#allocation14 + $0x190] ss:$48 sps:$4 sm:$0xff]  }
 0x446   :  { %4213 = vmatpush2.bf16.msra.mxu0 %v10305_v31  ;;  %4055 = vmatmul.mubr.bf16.gmra.mxu1 %v12863_v13  ;;  %v2143_v36 = vadd.f32 %v12666_v16, %v2079_v51  ;;  %v2144_v23 = vadd.f32 %v12670_v5, %v2080_v39  ;;  %v2142_v50 = vadd.f32 %v12677_v2, %v2078_v63  ;;  %v10332_v31 = vld [vmem:[#allocation14 + $0x1f0] ss:$48 sps:$4 sm:$0xff]   ;;  %v10340_v56 = vld [vmem:[#allocation14 + $0x194] ss:$48 sps:$4 sm:$0xff]  }
 0x447   :  { %4214 = vmatprep.subr.bf16.mxu0 %v10313_v44  ;;  %4177 = vmatprep.mubr.bf16.mxu0 %v15073_v40  ;;  %v2082_v26 = vmul.f32 %v12653_v25, %v2018_v21  ;;  %v2083_v52 = vmul.f32 %v12656_v57, %v2019_v60  ;;  %v2081_v62 = vmul.f32 %v12662_v15, %v2017_v12  ;;  %v10322_v15 = vld [vmem:[#allocation14 + $0x30c] ss:$48 sps:$4 sm:$0xff]   ;;  %v10355_v41 = vld [vmem:[#allocation14 + $0x794] ss:$48 sps:$4 sm:$0xff]   ;;  %v10353_v43 = vld [vmem:[#allocation14 + $0x790] ss:$48 sps:$4 sm:$0xff]  }
 0x448   :  { %v10343_v44 = vld [vmem:[#allocation14 + $0x134] ss:$48 sps:$4 sm:$0xff]   ;;  %v10341_v10 = vld [vmem:[#allocation14 + $0x130] ss:$48 sps:$4 sm:$0xff]  }
 0x449   :  { %v2146_v46 = vadd.f32 %v12666_v16, %v2082_v26  ;;  %v2147_v54 = vadd.f32 %v12670_v5, %v2083_v52  ;;  %v2145_v20 = vadd.f32 %v12677_v2, %v2081_v62  ;;  %v10320_v16 = vld [vmem:[#allocation14 + $0x308] ss:$48 sps:$4 sm:$0xff]   ;;  %v10325_v5 = vld [vmem:[#allocation14 + $0x2b4] ss:$48 sps:$4 sm:$0xff]   ;;  %v10323_v2 = vld [vmem:[#allocation14 + $0x2b0] ss:$48 sps:$4 sm:$0xff]  }
 0x44a   :  { %4215 = vmatpush2.bf16.msra.mxu0 %v10311_v55  ;;  %v10364_v51 = vld [vmem:[#allocation14 + $0x734] ss:$48 sps:$4 sm:$0xff]   ;;  %v10362_v35 = vld [vmem:[#allocation14 + $0x730] ss:$48 sps:$4 sm:$0xff]  }
 0x44b   :  { %4216 = vmatprep.subr.bf16.mxu0 %v10316_v9  ;;  %v12884_v25 = vpack.c.bf16 %v2146_v46, %v2143_v36  ;;  %v12886_v57 = vpack.c.bf16 %v2147_v54, %v2144_v23  ;;  %v12888_v28 = vpack.c.bf16 %v2145_v20, %v2142_v50  ;;  %v10349_v21 = vld [vmem:[#allocation14 + $0xd4] ss:$48 sps:$4 sm:$0xff]   ;;  %v10347_v39 = vld [vmem:[#allocation14 + $0xd0] ss:$48 sps:$4 sm:$0xff]   ;;  %v10400_v23 = vld [vmem:[#allocation14 + $0x8bc] ss:$48 sps:$4 sm:$0xff]  }
 0x44c   :  { %v10373_v60 = vld [vmem:[#allocation14 + $0x6d4] ss:$48 sps:$4 sm:$0xff]   ;;  %v10371_v3 = vld [vmem:[#allocation14 + $0x6d0] ss:$48 sps:$4 sm:$0xff]  }
 0x44d   :  { %4064 = vmatprep.mubr.bf16.mxu1 %v12884_v25  ;;  %4178 = vmatmul.mubr.bf16.gmra.mxu0 %v12886_v57  ;;  %v10352_v55 = vld [vmem:[#allocation14 + $0x74] ss:$48 sps:$4 sm:$0xff]   ;;  %v10350_v63 = vld [vmem:[#allocation14 + $0x70] ss:$48 sps:$4 sm:$0xff]  }
 0x44e   :  { %4217 = vmatpush2.bf16.msra.mxu0 %v10314_v49  ;;  %4065 = vmatmul.mubr.bf16.gmra.mxu1 %v12888_v28  ;;  %v10382_v12 = vld [vmem:[#allocation14 + $0x674] ss:$48 sps:$4 sm:$0xff]   ;;  %v10380_v26 = vld [vmem:[#allocation14 + $0x670] ss:$48 sps:$4 sm:$0xff]  }
 0x44f   :  { %4220 = vmatprep.mubr.bf16.mxu0 %v12691_v34  ;;  %4218 = vmatprep.subr.bf16.mxu0 %v10322_v15  ;;  %v10358_v9 = vld [vmem:[#allocation14 + $0x14] ss:$48 sps:$4 sm:$0xff]   ;;  %v10356_v62 = vld [vmem:[#allocation14 + $0x10] ss:$48 sps:$4 sm:$0xff]  }
 0x450   :  { %4333 = vmatprep.mubr.bf16.mxu1 %v15073_v40  ;;  %v10391_v52 = vld [vmem:[#allocation14 + $0x614] ss:$48 sps:$4 sm:$0xff]   ;;  %v10389_v46 = vld [vmem:[#allocation14 + $0x610] ss:$48 sps:$4 sm:$0xff]  }
 0x451   :  { %v10361_v36 = vld [vmem:[#allocation14 + $0x5b4] ss:$48 sps:$4 sm:$0xff]   ;;  %v10359_v54 = vld [vmem:[#allocation14 + $0x5b0] ss:$48 sps:$4 sm:$0xff]  }
 0x452   :  { %4219 = vmatpush2.bf16.msra.mxu0 %v10320_v16  ;;  %v10367_v49 = vld [vmem:[#allocation14 + $0x554] ss:$48 sps:$4 sm:$0xff]   ;;  %v10365_v50 = vld [vmem:[#allocation14 + $0x550] ss:$48 sps:$4 sm:$0xff]  }
 0x453   :  { %4414 = vmatprep.subr.bf16.mxu0 %v10325_v5  ;;  %v10370_v20 = vld [vmem:[#allocation14 + $0x4f4] ss:$48 sps:$4 sm:$0xff]   ;;  %v10368_v15 = vld [vmem:[#allocation14 + $0x4f0] ss:$48 sps:$4 sm:$0xff]  }
 0x454   :  { %v10376_v16 = vld [vmem:[#allocation14 + $0x494] ss:$48 sps:$4 sm:$0xff]   ;;  %v10374_v5 = vld [vmem:[#allocation14 + $0x490] ss:$48 sps:$4 sm:$0xff]  }
 0x455   :  { %4221 = vmatmul.mubr.bf16.vlgmr.msra.gmra.mxu0 %v12695_v42 }
 0x456   :  { %4415 = vmatpush1.bf16.msra.mxu0 %v10323_v2  ;;  %4230 = vmatprep.mubr.bf16.mxu0 %v12719_v45  ;;  %v10379_v2 = vld [vmem:[#allocation14 + $0x434] ss:$48 sps:$4 sm:$0xff]  }
 0x457   :  { %4334 = vmatmul.mubr.bf16.vlgmr.msra.gmra.mxu1 %v12693_v22  ;;  %4416 = vmatprep.subr.bf16.mxu0 %v10331_v18  ;;  %v10377_v18 = vld [vmem:[#allocation14 + $0x430] ss:$48 sps:$4 sm:$0xff]  }
 0x458   :  { %4528 = vmatpush1.bf16.msra.mxu1 %v10326_v33  ;;  %4343 = vmatprep.mubr.bf16.mxu1 %v15073_v40  ;;  %v10385_v33 = vld [vmem:[#allocation14 + $0x3d4] ss:$48 sps:$4 sm:$0xff]  }
 0x459   :  { %4529 = vmatprep.subr.bf16.mxu1 %v10337_v17  ;;  %v10383_v17 = vld [vmem:[#allocation14 + $0x3d0] ss:$48 sps:$4 sm:$0xff]  }
 0x45a   :  { %4417 = vmatpush1.bf16.msra.mxu0 %v10329_v6  ;;  %v10388_v6 = vld [vmem:[#allocation14 + $0x374] ss:$48 sps:$4 sm:$0xff]  }
 0x45b   :  { %4418 = vmatprep.subr.bf16.mxu0 %v10334_v37  ;;  %v10386_v37 = vld [vmem:[#allocation14 + $0x370] ss:$48 sps:$4 sm:$0xff]  }
 0x45c   :  { %4530 = vmatpush1.bf16.msra.mxu1 %v10335_v38  ;;  %v10394_v38 = vld [vmem:[#allocation14 + $0x314] ss:$48 sps:$4 sm:$0xff]  }
 0x45d   :  { %4231 = vmatmul.mubr.bf16.gmra.mxu0 %v12723_v53  ;;  %4531 = vmatprep.subr.bf16.mxu1 %v10346_v59  ;;  %v10392_v59 = vld [vmem:[#allocation14 + $0x310] ss:$48 sps:$4 sm:$0xff]  }
 0x45e   :  { %4419 = vmatpush1.bf16.msra.mxu0 %v10332_v31  ;;  %4240 = vmatprep.mubr.bf16.mxu0 %v12747_v7  ;;  %v10397_v31 = vld [vmem:[#allocation14 + $0x2bc] ss:$48 sps:$4 sm:$0xff]  }
 0x45f   :  { %4344 = vmatmul.mubr.bf16.gmra.mxu1 %v12721_v14  ;;  %4420 = vmatprep.subr.bf16.mxu0 %v10340_v56  ;;  %v10395_v56 = vld [vmem:[#allocation14 + $0x2b8] ss:$48 sps:$4 sm:$0xff]  }
 0x460   :  { %4353 = vmatprep.mubr.bf16.mxu1 %v15073_v40  ;;  %4532 = vmatpush1.bf16.msra.mxu1 %v10344_v0  ;;  %v10403_v0 = vld [vmem:[#allocation14 + $0x25c] ss:$48 sps:$4 sm:$0xff]  }
 0x461   :  { %4533 = vmatprep.subr.bf16.mxu1 %v10355_v41  ;;  %v10398_v41 = vld [vmem:[#allocation14 + $0x8b8] ss:$48 sps:$4 sm:$0xff]  }
 0x462   :  { %4421 = vmatpush1.bf16.msra.mxu0 %v10338_v61  ;;  %v10409_v61 = vld [vmem:[#allocation14 + $0x85c] ss:$48 sps:$4 sm:$0xff]  }
 0x463   :  { %4422 = vmatprep.subr.bf16.mxu0 %v10343_v44  ;;  %v10401_v44 = vld [vmem:[#allocation14 + $0x258] ss:$48 sps:$4 sm:$0xff]  }
 0x464   :  { %4534 = vmatpush1.bf16.msra.mxu1 %v10353_v43  ;;  %v10406_v43 = vld [vmem:[#allocation14 + $0x1fc] ss:$48 sps:$4 sm:$0xff]  }
 0x465   :  { %4241 = vmatmul.mubr.bf16.gmra.mxu0 %v12751_v19  ;;  %4535 = vmatprep.subr.bf16.mxu1 %v10364_v51  ;;  %v10407_v51 = vld [vmem:[#allocation14 + $0x858] ss:$48 sps:$4 sm:$0xff]  }
 0x466   :  { %4423 = vmatpush1.bf16.msra.mxu0 %v10341_v10  ;;  %4250 = vmatprep.mubr.bf16.mxu0 %v12775_v1  ;;  %v10418_v10 = vld [vmem:[#allocation14 + $0x7fc] ss:$48 sps:$4 sm:$0xff]  }
 0x467   :  { %4354 = vmatmul.mubr.bf16.gmra.mxu1 %v12749_v8  ;;  %4424 = vmatprep.subr.bf16.mxu0 %v10349_v21  ;;  %v10404_v21 = vld [vmem:[#allocation14 + $0x1f8] ss:$48 sps:$4 sm:$0xff]  }
 0x468   :  { %4363 = vmatprep.mubr.bf16.mxu1 %v15073_v40  ;;  %4536 = vmatpush1.bf16.msra.mxu1 %v10362_v35  ;;  %v10412_v35 = vld [vmem:[#allocation14 + $0x19c] ss:$48 sps:$4 sm:$0xff]  }
 0x469   :  { %4537 = vmatprep.subr.bf16.mxu1 %v10373_v60  ;;  %v10416_v60 = vld [vmem:[#allocation14 + $0x7f8] ss:$48 sps:$4 sm:$0xff]  }
 0x46a   :  { %4425 = vmatpush1.bf16.msra.mxu0 %v10347_v39  ;;  %v10427_v39 = vld [vmem:[#allocation14 + $0x79c] ss:$48 sps:$4 sm:$0xff]  }
 0x46b   :  { %4426 = vmatprep.subr.bf16.mxu0 %v10352_v55  ;;  %v10410_v55 = vld [vmem:[#allocation14 + $0x198] ss:$48 sps:$4 sm:$0xff]  }
 0x46c   :  { %4538 = vmatpush1.bf16.msra.mxu1 %v10371_v3  ;;  %v10415_v3 = vld [vmem:[#allocation14 + $0x13c] ss:$48 sps:$4 sm:$0xff]  }
 0x46d   :  { %4251 = vmatmul.mubr.bf16.gmra.mxu0 %v12779_v24  ;;  %4539 = vmatprep.subr.bf16.mxu1 %v10382_v12  ;;  %v10425_v12 = vld [vmem:[#allocation14 + $0x798] ss:$48 sps:$4 sm:$0xff]  }
 0x46e   :  { %4427 = vmatpush1.bf16.msra.mxu0 %v10350_v63  ;;  %4260 = vmatprep.mubr.bf16.mxu0 %v12803_v27  ;;  %v10436_v63 = vld [vmem:[#allocation14 + $0x73c] ss:$48 sps:$4 sm:$0xff]  }
 0x46f   :  { %4364 = vmatmul.mubr.bf16.gmra.mxu1 %v12777_v4  ;;  %4428 = vmatprep.subr.bf16.mxu0 %v10358_v9  ;;  %v10413_v9 = vld [vmem:[#allocation14 + $0x138] ss:$48 sps:$4 sm:$0xff]  }
 0x470   :  { %4373 = vmatprep.mubr.bf16.mxu1 %v15073_v40  ;;  %4540 = vmatpush1.bf16.msra.mxu1 %v10380_v26  ;;  %v10421_v26 = vld [vmem:[#allocation14 + $0xdc] ss:$48 sps:$4 sm:$0xff]  }
 0x471   :  { %4541 = vmatprep.subr.bf16.mxu1 %v10391_v52  ;;  %v10434_v52 = vld [vmem:[#allocation14 + $0x738] ss:$48 sps:$4 sm:$0xff]  }
 0x472   :  { %4429 = vmatpush1.bf16.msra.mxu0 %v10356_v62  ;;  %v10445_v62 = vld [vmem:[#allocation14 + $0x6dc] ss:$48 sps:$4 sm:$0xff]  }
 0x473   :  { %4430 = vmatprep.subr.bf16.mxu0 %v10361_v36  ;;  %v10419_v36 = vld [vmem:[#allocation14 + $0xd8] ss:$48 sps:$4 sm:$0xff]  }
 0x474   :  { %4542 = vmatpush1.bf16.msra.mxu1 %v10389_v46  ;;  %v10424_v46 = vld [vmem:[#allocation14 + $0x7c] ss:$48 sps:$4 sm:$0xff]  }
 0x475   :  { %4261 = vmatmul.mubr.bf16.gmra.mxu0 %v12807_v32  ;;  %4753 = vmatprep.subr.bf16.mxu1 %v10400_v23  ;;  %v10443_v23 = vld [vmem:[#allocation14 + $0x6d8] ss:$48 sps:$4 sm:$0xff]  }
 0x476   :  { %4431 = vmatpush2.bf16.msra.mxu0 %v10359_v54  ;;  %4270 = vmatprep.mubr.bf16.mxu0 %v12831_v30  ;;  %v10454_v54 = vld [vmem:[#allocation14 + $0x67c] ss:$48 sps:$4 sm:$0xff]  }
 0x477   :  { %4374 = vmatmul.mubr.bf16.gmra.mxu1 %v12805_v29  ;;  %4432 = vmatprep.subr.bf16.mxu0 %v10367_v49  ;;  %v10422_v49 = vld [vmem:[#allocation14 + $0x78] ss:$48 sps:$4 sm:$0xff]  }
 0x478   :  { %4383 = vmatprep.mubr.bf16.mxu1 %v15073_v40 }
 0x47a   :  { %4433 = vmatpush2.bf16.msra.mxu0 %v10365_v50  ;;  %v10430_v50 = vld [vmem:[#allocation14 + $0x1c] ss:$48 sps:$4 sm:$0xff]  }
 0x47b   :  { %4434 = vmatprep.subr.bf16.mxu0 %v10370_v20  ;;  %v10452_v20 = vld [vmem:[#allocation14 + $0x678] ss:$48 sps:$4 sm:$0xff]  }
 0x47d   :  { %4271 = vmatmul.mubr.bf16.gmra.mxu0 %v12835_v47 }
 0x47e   :  { %4435 = vmatpush2.bf16.msra.mxu0 %v10368_v15  ;;  %4280 = vmatprep.mubr.bf16.mxu0 %v12859_v58  ;;  %v10463_v15 = vld [vmem:[#allocation14 + $0x61c] ss:$48 sps:$4 sm:$0xff]  }
 0x47f   :  { %4384 = vmatmul.mubr.bf16.gmra.mxu1 %v12833_v11  ;;  %4436 = vmatprep.subr.bf16.mxu0 %v10376_v16  ;;  %v10428_v16 = vld [vmem:[#allocation14 + $0x18] ss:$48 sps:$4 sm:$0xff]  }
 0x480   :  { %4393 = vmatprep.mubr.bf16.mxu1 %v15073_v40 }
 0x482   :  { %4437 = vmatpush2.bf16.msra.mxu0 %v10374_v5  ;;  %v10433_v5 = vld [vmem:[#allocation14 + $0x5bc] ss:$48 sps:$4 sm:$0xff]  }
 0x483   :  { %4438 = vmatprep.subr.bf16.mxu0 %v10379_v2  ;;  %v10461_v2 = vld [vmem:[#allocation14 + $0x618] ss:$48 sps:$4 sm:$0xff]  }
 0x485   :  { %4281 = vmatmul.mubr.bf16.gmra.mxu0 %v12863_v13 }
 0x486   :  { %4439 = vmatpush2.bf16.msra.mxu0 %v10377_v18  ;;  %4290 = vmatprep.mubr.bf16.mxu0 %v12884_v25  ;;  %v10472_v18 = vld [vmem:[#allocation14 + $0x8c4] ss:$48 sps:$4 sm:$0xff]  }
 0x487   :  { %4394 = vmatmul.mubr.bf16.gmra.mxu1 %v12861_v48  ;;  %4440 = vmatprep.subr.bf16.mxu0 %v10385_v33  ;;  %v10431_v33 = vld [vmem:[#allocation14 + $0x5b8] ss:$48 sps:$4 sm:$0xff]  }
 0x488   :  { %4403 = vmatprep.mubr.bf16.mxu1 %v15073_v40 }
 0x48a   :  { %4441 = vmatpush2.bf16.msra.mxu0 %v10383_v17  ;;  %v10439_v17 = vld [vmem:[#allocation14 + $0x55c] ss:$48 sps:$4 sm:$0xff]  }
 0x48b   :  { %4442 = vmatprep.subr.bf16.mxu0 %v10388_v6  ;;  %v10437_v6 = vld [vmem:[#allocation14 + $0x558] ss:$48 sps:$4 sm:$0xff]  }
 0x48d   :  { %4291 = vmatmul.mubr.bf16.gmra.mxu0 %v12888_v28 }
 0x48e   :  { %4443 = vmatpush2.bf16.msra.mxu0 %v10386_v37  ;;  %4446 = vmatprep.mubr.bf16.mxu0 %v12691_v34  ;;  %v10442_v37 = vld [vmem:[#allocation14 + $0x4fc] ss:$48 sps:$4 sm:$0xff]  }
 0x48f   :  { %4404 = vmatmul.mubr.bf16.gmra.mxu1 %v12886_v57  ;;  %4444 = vmatprep.subr.bf16.mxu0 %v10394_v38  ;;  %v10440_v38 = vld [vmem:[#allocation14 + $0x4f8] ss:$48 sps:$4 sm:$0xff]  }
 0x490   :  { %4559 = vmatprep.mubr.bf16.mxu1 %v15073_v40 }
 0x492   :  { %4445 = vmatpush2.bf16.msra.mxu0 %v10392_v59  ;;  %v10448_v59 = vld [vmem:[#allocation14 + $0x49c] ss:$48 sps:$4 sm:$0xff]  }
 0x493   :  { %4640 = vmatprep.subr.bf16.mxu0 %v10397_v31  ;;  %v10446_v31 = vld [vmem:[#allocation14 + $0x498] ss:$48 sps:$4 sm:$0xff]  }
 0x495   :  { %4447 = vmatmul.mubr.bf16.vlgmr.msra.gmra.mxu0 %v12695_v42 }
 0x496   :  { %4641 = vmatpush1.bf16.msra.mxu0 %v10395_v56  ;;  %4456 = vmatprep.mubr.bf16.mxu0 %v12719_v45  ;;  %v10451_v56 = vld [vmem:[#allocation14 + $0x43c] ss:$48 sps:$4 sm:$0xff]  }
 0x497   :  { %4560 = vmatmul.mubr.bf16.vlgmr.msra.gmra.mxu1 %v12693_v22  ;;  %4642 = vmatprep.subr.bf16.mxu0 %v10403_v0  ;;  %v10449_v0 = vld [vmem:[#allocation14 + $0x438] ss:$48 sps:$4 sm:$0xff]  }
 0x498   :  { %4754 = vmatpush1.bf16.msra.mxu1 %v10398_v41  ;;  %4569 = vmatprep.mubr.bf16.mxu1 %v15073_v40  ;;  %v10457_v41 = vld [vmem:[#allocation14 + $0x3dc] ss:$48 sps:$4 sm:$0xff]  }
 0x499   :  { %4755 = vmatprep.subr.bf16.mxu1 %v10409_v61  ;;  %v10455_v61 = vld [vmem:[#allocation14 + $0x3d8] ss:$48 sps:$4 sm:$0xff]  }
 0x49a   :  { %4643 = vmatpush1.bf16.msra.mxu0 %v10401_v44  ;;  %v10460_v44 = vld [vmem:[#allocation14 + $0x37c] ss:$48 sps:$4 sm:$0xff]  }
 0x49b   :  { %4644 = vmatprep.subr.bf16.mxu0 %v10406_v43  ;;  %v10458_v43 = vld [vmem:[#allocation14 + $0x378] ss:$48 sps:$4 sm:$0xff]  }
 0x49c   :  { %4756 = vmatpush1.bf16.msra.mxu1 %v10407_v51  ;;  %v10466_v51 = vld [vmem:[#allocation14 + $0x31c] ss:$48 sps:$4 sm:$0xff]  }
 0x49d   :  { %4457 = vmatmul.mubr.bf16.gmra.mxu0 %v12723_v53  ;;  %4757 = vmatprep.subr.bf16.mxu1 %v10418_v10  ;;  %v10464_v10 = vld [vmem:[#allocation14 + $0x318] ss:$48 sps:$4 sm:$0xff]  }
 0x49e   :  { %4645 = vmatpush1.bf16.msra.mxu0 %v10404_v21  ;;  %4466 = vmatprep.mubr.bf16.mxu0 %v12747_v7  ;;  %v10469_v21 = vld [vmem:[#allocation14 + $0x2c4] ss:$48 sps:$4 sm:$0xff]  }
 0x49f   :  { %4570 = vmatmul.mubr.bf16.gmra.mxu1 %v12721_v14  ;;  %4646 = vmatprep.subr.bf16.mxu0 %v10412_v35  ;;  %v12959_v35 = vld [vmem:[#allocation16] sm:$0xff] }
 0x4a0   :  { %4579 = vmatprep.mubr.bf16.mxu1 %v15073_v40  ;;  %4758 = vmatpush1.bf16.msra.mxu1 %v10416_v60  ;;  %v10467_v60 = vld [vmem:[#allocation14 + $0x2c0] ss:$48 sps:$4 sm:$0xff]  }
 0x4a1   :  { %4759 = vmatprep.subr.bf16.mxu1 %v10427_v39  ;;  %v15081_v39 = vld [vmem:[#allocation40_spill] sm:$0xff] }
 0x4a2   :  { %4647 = vmatpush1.bf16.msra.mxu0 %v10410_v55  ;;  %v12963_v55 = vrot.slane %v12959_v35, %v15081_v39 }
 0x4a3   :  { %4648 = vmatprep.subr.bf16.mxu0 %v10415_v3  ;;  %v10475_v3 = vld [vmem:[#allocation14 + $0x264] ss:$48 sps:$4 sm:$0xff]  }
 0x4a4   :  { %4760 = vmatpush1.bf16.msra.mxu1 %v10425_v12  ;;  %v10470_v12 = vld [vmem:[#allocation14 + $0x8c0] ss:$48 sps:$4 sm:$0xff]  }
 0x4a5   :  { %4467 = vmatmul.mubr.bf16.gmra.mxu0 %v12751_v19  ;;  %4761 = vmatprep.subr.bf16.mxu1 %v10436_v63 }
 0x4a6   :  { %4649 = vmatpush1.bf16.msra.mxu0 %v10413_v9  ;;  %4476 = vmatprep.mubr.bf16.mxu0 %v12775_v1  ;;  %v15082_v9 = vld [vmem:[#allocation38_spill] sm:$0xff] }
 0x4a7   :  { %4580 = vmatmul.mubr.bf16.gmra.mxu1 %v12749_v8  ;;  %4650 = vmatprep.subr.bf16.mxu0 %v10421_v26  ;;  %v12968_v26 = vrot.slane %v12959_v35, %v15082_v9 }
 0x4a8   :  { %4589 = vmatprep.mubr.bf16.mxu1 %v15073_v40  ;;  %4762 = vmatpush1.bf16.msra.mxu1 %v10434_v52  ;;  %v10481_v52 = vld [vmem:[#allocation14 + $0x864] ss:$48 sps:$4 sm:$0xff]  }
 0x4a9   :  { %4763 = vmatprep.subr.bf16.mxu1 %v10445_v62 }
 0x4aa   :  { %4651 = vmatpush1.bf16.msra.mxu0 %v10419_v36  ;;  %v10473_v36 = vld [vmem:[#allocation14 + $0x260] ss:$48 sps:$4 sm:$0xff]  }
 0x4ab   :  { %4652 = vmatprep.subr.bf16.mxu0 %v10424_v46 }
 0x4ac   :  { %4764 = vmatpush1.bf16.msra.mxu1 %v10443_v23 }
 0x4ad   :  { %4477 = vmatmul.mubr.bf16.gmra.mxu0 %v12779_v24  ;;  %4765 = vmatprep.subr.bf16.mxu1 %v10454_v54  ;;  %v10478_v54 = vld [vmem:[#allocation14 + $0x204] ss:$48 sps:$4 sm:$0xff]  }
 0x4ae   :  { %4653 = vmatpush1.bf16.msra.mxu0 %v10422_v49  ;;  %4486 = vmatprep.mubr.bf16.mxu0 %v12803_v27 }
 0x4af   :  { %4590 = vmatmul.mubr.bf16.gmra.mxu1 %v12777_v4  ;;  %4654 = vmatprep.subr.bf16.mxu0 %v10430_v50  ;;  %v10479_v50 = vld [vmem:[#allocation14 + $0x860] ss:$48 sps:$4 sm:$0xff]  }
 0x4b0   :  { %4599 = vmatprep.mubr.bf16.mxu1 %v15073_v40  ;;  %4766 = vmatpush1.bf16.msra.mxu1 %v10452_v20 }
 0x4b1   :  { %4767 = vmatprep.subr.bf16.mxu1 %v10463_v15 }
 0x4b2   :  { %4655 = vmatpush1.bf16.msra.mxu0 %v10428_v16 }
 0x4b3   :  { %4656 = vmatprep.subr.bf16.mxu0 %v10433_v5  ;;  %v10490_v5 = vld [vmem:[#allocation14 + $0x804] ss:$48 sps:$4 sm:$0xff]  }
 0x4b4   :  { %4768 = vmatpush1.bf16.msra.mxu1 %v10461_v2 }
 0x4b5   :  { %4487 = vmatmul.mubr.bf16.gmra.mxu0 %v12807_v32  ;;  %4979 = vmatprep.subr.bf16.mxu1 %v10472_v18  ;;  %v10476_v18 = vld [vmem:[#allocation14 + $0x200] ss:$48 sps:$4 sm:$0xff]  }
 0x4b6   :  { %4657 = vmatpush2.bf16.msra.mxu0 %v10431_v33  ;;  %4496 = vmatprep.mubr.bf16.mxu0 %v12831_v30 }
 0x4b7   :  { %4600 = vmatmul.mubr.bf16.gmra.mxu1 %v12805_v29  ;;  %4658 = vmatprep.subr.bf16.mxu0 %v10439_v17 }
 0x4b8   :  { %4609 = vmatprep.mubr.bf16.mxu1 %v15073_v40 }
 0x4ba   :  { %4659 = vmatpush2.bf16.msra.mxu0 %v10437_v6 }
 0x4bb   :  { %4660 = vmatprep.subr.bf16.mxu0 %v10442_v37  ;;  %v10484_v37 = vld [vmem:[#allocation14 + $0x1a4] ss:$48 sps:$4 sm:$0xff]  }
 0x4bd   :  { %4497 = vmatmul.mubr.bf16.gmra.mxu0 %v12835_v47 }
 0x4be   :  { %4661 = vmatpush2.bf16.msra.mxu0 %v10440_v38  ;;  %4506 = vmatprep.mubr.bf16.mxu0 %v12859_v58 }
 0x4bf   :  { %4610 = vmatmul.mubr.bf16.gmra.mxu1 %v12833_v11  ;;  %4662 = vmatprep.subr.bf16.mxu0 %v10448_v59  ;;  %v10488_v59 = vld [vmem:[#allocation14 + $0x800] ss:$48 sps:$4 sm:$0xff]  }
 0x4c0   :  { %4619 = vmatprep.mubr.bf16.mxu1 %v15073_v40 }
 0x4c2   :  { %4663 = vmatpush2.bf16.msra.mxu0 %v10446_v31 }
 0x4c3   :  { %4664 = vmatprep.subr.bf16.mxu0 %v10451_v56 }
 0x4c5   :  { %4507 = vmatmul.mubr.bf16.gmra.mxu0 %v12863_v13 }
 0x4c6   :  { %4665 = vmatpush2.bf16.msra.mxu0 %v10449_v0  ;;  %4516 = vmatprep.mubr.bf16.mxu0 %v12884_v25 }
 0x4c7   :  { %4620 = vmatmul.mubr.bf16.gmra.mxu1 %v12861_v48  ;;  %4666 = vmatprep.subr.bf16.mxu0 %v10457_v41  ;;  %v10499_v41 = vld [vmem:[#allocation14 + $0x7a4] ss:$48 sps:$4 sm:$0xff]  }
 0x4c8   :  { %4629 = vmatprep.mubr.bf16.mxu1 %v15073_v40 }
 0x4ca   :  { %4667 = vmatpush2.bf16.msra.mxu0 %v10455_v61 }
 0x4cb   :  { %4668 = vmatprep.subr.bf16.mxu0 %v10460_v44  ;;  %v10482_v44 = vld [vmem:[#allocation14 + $0x1a0] ss:$48 sps:$4 sm:$0xff]  }
 0x4cd   :  { %4517 = vmatmul.mubr.bf16.gmra.mxu0 %v12888_v28 }
 0x4ce   :  { %4669 = vmatpush2.bf16.msra.mxu0 %v10458_v43  ;;  %4672 = vmatprep.mubr.bf16.mxu0 %v12691_v34 }
 0x4cf   :  { %4630 = vmatmul.mubr.bf16.gmra.mxu1 %v12886_v57  ;;  %4670 = vmatprep.subr.bf16.mxu0 %v10466_v51 }
 0x4d0   :  { %4785 = vmatprep.mubr.bf16.mxu1 %v15073_v40 }
 0x4d2   :  { %4671 = vmatpush2.bf16.msra.mxu0 %v10464_v10 }
 0x4d3   :  { %4866 = vmatprep.subr.bf16.mxu0 %v10469_v21 }
 0x4d5   :  { %v4109_v63 = vpop.f32.mrf.mxu0  ;;  %4673 = vmatmul.mubr.bf16.vlgmr.msra.gmra.mxu0 %v12695_v42 }
 0x4d6   :  { %4867 = vmatpush1.bf16.msra.mxu0 %v10467_v60  ;;  %v3996_v62 = vpop.f32.mrf.mxu1  ;;  %4682 = vmatprep.mubr.bf16.mxu0 %v12719_v45 }
 0x4d7   :  { %v3997_v46 = vadd.f32 %v3996_v62, %v12963_v55  ;;  %4786 = vmatmul.mubr.bf16.vlgmr.msra.gmra.mxu1 %v12693_v22  ;;  %v4111_v23 = vpop.f32.mrf.mxu0  ;;  %4868 = vmatprep.subr.bf16.mxu0 %v10475_v3  ;;  %v10487_v3 = vld [vmem:[#allocation14 + $0x144] ss:$48 sps:$4 sm:$0xff]  }
 0x4d8   :  { %4980 = vmatpush1.bf16.msra.mxu1 %v10470_v12  ;;  %v3998_v49 = vpop.f32.mrf.mxu1  ;;  %4795 = vmatprep.mubr.bf16.mxu1 %v15073_v40 }
 0x4d9   :  { %v4110_v20 = vadd.f32 %v4109_v63, %v3997_v46  ;;  %v3999_v15 = vadd.f32 %v3998_v49, %v12968_v26  ;;  %v4113_v16 = vpop.f32.mrf.mxu0  ;;  %4981 = vmatprep.subr.bf16.mxu1 %v10481_v52  ;;  %v10497_v52 = vld [vmem:[#allocation14 + $0x7a0] ss:$48 sps:$4 sm:$0xff]   ;;  %v10508_v49 = vld [vmem:[#allocation14 + $0x744] ss:$48 sps:$4 sm:$0xff]  }
 0x4da   :  { %4869 = vmatpush1.bf16.msra.mxu0 %v10473_v36  ;;  %v4000_v2 = vpop.f32.mrf.mxu1 }
 0x4db   :  { %v4112_v33 = vadd.f32 %v4111_v23, %v3999_v15  ;;  %v4001_v17 = vadd.f32 %v4000_v2, %v12963_v55  ;;  %v4115_v6 = vpop.f32.mrf.mxu0  ;;  %4870 = vmatprep.subr.bf16.mxu0 %v10478_v54  ;;  %v5318_v43 = vmax.f32 %v4110_v20, 0.0  ;;  %v10485_v20 = vld [vmem:[#allocation14 + $0x140] ss:$48 sps:$4 sm:$0xff]   ;;  %v10493_v2 = vld [vmem:[#allocation14 + $0xe4] ss:$48 sps:$4 sm:$0xff]  }
 0x4dc   :  { %v4002_v38 = vpop.f32.mrf.mxu1  ;;  %4982 = vmatpush1.bf16.msra.mxu1 %v10479_v50 }
 0x4dd   :  { %v4114_v31 = vadd.f32 %v4113_v16, %v4001_v17  ;;  %v4003_v56 = vadd.f32 %v4002_v38, %v12968_v26  ;;  %v4119_v0 = vpop.f32.mrf.mxu0  ;;  %4683 = vmatmul.mubr.bf16.gmra.mxu0 %v12723_v53  ;;  %4983 = vmatprep.subr.bf16.mxu1 %v10490_v5  ;;  %v5319_v12 = vmax.f32 %v4112_v33, 0.0  ;;  %v10506_v17 = vld [vmem:[#allocation14 + $0x740] ss:$48 sps:$4 sm:$0xff]  }
 0x4de   :  { %4871 = vmatpush1.bf16.msra.mxu0 %v10476_v18  ;;  %v4006_v61 = vpop.f32.mrf.mxu1  ;;  %4692 = vmatprep.mubr.bf16.mxu0 %v12747_v7 }
 0x4df   :  { %v5330_v51 = vmax.f32 %v4114_v31, 0.0  ;;  %v4116_v10 = vadd.f32 %v4115_v6, %v4003_v56  ;;  %v4007_v21 = vadd.f32 %v4006_v61, %v12963_v55  ;;  %4796 = vmatmul.mubr.bf16.gmra.mxu1 %v12721_v14  ;;  %v4121_v60 = vpop.f32.mrf.mxu0  ;;  %4872 = vmatprep.subr.bf16.mxu0 %v10484_v37  ;;  %v10491_v56 = vld [vmem:[#allocation14 + $0xe0] ss:$48 sps:$4 sm:$0xff]  }
 0x4e0   :  { %v4008_v63 = vpop.f32.mrf.mxu1  ;;  %4805 = vmatprep.mubr.bf16.mxu1 %v15073_v40  ;;  %4984 = vmatpush1.bf16.msra.mxu1 %v10488_v59  ;;  %v10517_v59 = vld [vmem:[#allocation14 + $0x6e4] ss:$48 sps:$4 sm:$0xff]  }
 0x4e1   :  { %v12982_v62 = vpack.c.bf16 %v5330_v51, %v5318_v43  ;;  %v5331_v36 = vmax.f32 %v4116_v10, 0.0  ;;  %v4120_v46 = vadd.f32 %v4119_v0, %v4007_v21  ;;  %v4009_v23 = vadd.f32 %v4008_v63, %v12968_v26  ;;  %v4123_v54 = vpop.f32.mrf.mxu0  ;;  %4985 = vmatprep.subr.bf16.mxu1 %v10499_v41  ;;  %v10496_v51 = vld [vmem:[#allocation14 + $0x84] ss:$48 sps:$4 sm:$0xff]  }
 0x4e2   :  { %4873 = vmatpush1.bf16.msra.mxu0 %v10482_v44  ;;  %v4010_v50 = vpop.f32.mrf.mxu1 }
 0x4e3   :  { %15083 = vst [vmem:[#allocation80_spill] sm:$0xff] %v12982_v62  ;;  %v4122_v15 = vadd.f32 %v4121_v60, %v4009_v23  ;;  %v4011_v16 = vadd.f32 %v4010_v50, %v12963_v55  ;;  %v4125_v5 = vpop.f32.mrf.mxu0  ;;  %4874 = vmatprep.subr.bf16.mxu0 %v10487_v3  ;;  %v12986_v18 = vpack.c.bf16 %v5331_v36, %v5319_v12  ;;  %v5342_v0 = vmax.f32 %v4120_v46, 0.0  ;;  %v10515_v60 = vld [vmem:[#allocation14 + $0x6e0] ss:$48 sps:$4 sm:$0xff]   ;;  %v10526_v46 = vld [vmem:[#allocation14 + $0x684] ss:$48 sps:$4 sm:$0xff]  }
 0x4e4   :  { %v4012_v33 = vpop.f32.mrf.mxu1  ;;  %4986 = vmatpush1.bf16.msra.mxu1 %v10497_v52 }
 0x4e5   :  { %15084 = vst [vmem:[#allocation82_spill] sm:$0xff] %v12986_v18  ;;  %v4124_v6 = vadd.f32 %v4123_v54, %v4011_v16  ;;  %v4013_v37 = vadd.f32 %v4012_v33, %v12968_v26  ;;  %v4129_v38 = vpop.f32.mrf.mxu0  ;;  %4693 = vmatmul.mubr.bf16.gmra.mxu0 %v12751_v19  ;;  %4987 = vmatprep.subr.bf16.mxu1 %v10508_v49  ;;  %v5343_v10 = vmax.f32 %v4122_v15, 0.0  ;;  %v10494_v54 = vld [vmem:[#allocation14 + $0x80] ss:$48 sps:$4 sm:$0xff]   ;;  %v10502_v15 = vld [vmem:[#allocation14 + $0x24] ss:$48 sps:$4 sm:$0xff]  }
 0x4e6   :  { %4875 = vmatpush1.bf16.msra.mxu0 %v10485_v20  ;;  %v4016_v31 = vpop.f32.mrf.mxu1  ;;  %4702 = vmatprep.mubr.bf16.mxu0 %v12775_v1 }
 0x4e7   :  { %v5354_v41 = vmax.f32 %v4124_v6, 0.0  ;;  %v4126_v61 = vadd.f32 %v4125_v5, %v4013_v37  ;;  %v4017_v44 = vadd.f32 %v4016_v31, %v12963_v55  ;;  %4806 = vmatmul.mubr.bf16.gmra.mxu1 %v12749_v8  ;;  %v4131_v43 = vpop.f32.mrf.mxu0  ;;  %4876 = vmatprep.subr.bf16.mxu0 %v10493_v2  ;;  %v10524_v2 = vld [vmem:[#allocation14 + $0x680] ss:$48 sps:$4 sm:$0xff]   ;;  %v10535_v37 = vld [vmem:[#allocation14 + $0x624] ss:$48 sps:$4 sm:$0xff]  }
 0x4e8   :  { %v4018_v21 = vpop.f32.mrf.mxu1  ;;  %4815 = vmatprep.mubr.bf16.mxu1 %v15073_v40  ;;  %4988 = vmatpush1.bf16.msra.mxu1 %v10506_v17 }
 0x4e9   :  { %v12994_v3 = vpack.c.bf16 %v5354_v41, %v5342_v0  ;;  %v5355_v12 = vmax.f32 %v4126_v61, 0.0  ;;  %v4130_v63 = vadd.f32 %v4129_v38, %v4017_v44  ;;  %v4019_v52 = vadd.f32 %v4018_v21, %v12968_v26  ;;  %v4133_v36 = vpop.f32.mrf.mxu0  ;;  %4989 = vmatprep.subr.bf16.mxu1 %v10517_v59  ;;  %v10500_v59 = vld [vmem:[#allocation14 + $0x20] ss:$48 sps:$4 sm:$0xff]   ;;  %v10505_v44 = vld [vmem:[#allocation14 + $0x5c4] ss:$48 sps:$4 sm:$0xff]  }
 0x4ea   :  { %4877 = vmatpush1.bf16.msra.mxu0 %v10491_v56  ;;  %v4020_v23 = vpop.f32.mrf.mxu1 }
 0x4eb   :  { %15085 = vst [vmem:[#allocation83_spill] sm:$0xff] %v12994_v3  ;;  %v4132_v49 = vadd.f32 %v4131_v43, %v4019_v52  ;;  %v4021_v50 = vadd.f32 %v4020_v23, %v12963_v55  ;;  %v4135_v20 = vpop.f32.mrf.mxu0  ;;  %4878 = vmatprep.subr.bf16.mxu0 %v10496_v51  ;;  %v12998_v16 = vpack.c.bf16 %v5355_v12, %v5343_v10  ;;  %v5366_v31 = vmax.f32 %v4130_v63, 0.0  ;;  %v10533_v10 = vld [vmem:[#allocation14 + $0x620] ss:$48 sps:$4 sm:$0xff]  }
 0x4ec   :  { %v4022_v5 = vpop.f32.mrf.mxu1  ;;  %4990 = vmatpush1.bf16.msra.mxu1 %v10515_v60  ;;  %v10503_v23 = vld [vmem:[#allocation14 + $0x5c0] ss:$48 sps:$4 sm:$0xff]  }
 0x4ed   :  { %15086 = vst [vmem:[#allocation81_spill] sm:$0xff] %v12998_v16  ;;  %v4134_v33 = vadd.f32 %v4133_v36, %v4021_v50  ;;  %v4023_v17 = vadd.f32 %v4022_v5, %v12968_v26  ;;  %v4139_v6 = vpop.f32.mrf.mxu0  ;;  %4703 = vmatmul.mubr.bf16.gmra.mxu0 %v12779_v24  ;;  %4991 = vmatprep.subr.bf16.mxu1 %v10526_v46  ;;  %v5367_v43 = vmax.f32 %v4132_v49, 0.0  ;;  %v10544_v36 = vld [vmem:[#allocation14 + $0x8cc] ss:$48 sps:$4 sm:$0xff]  }
 0x4ee   :  { %4879 = vmatpush1.bf16.msra.mxu0 %v10494_v54  ;;  %v4026_v38 = vpop.f32.mrf.mxu1  ;;  %4712 = vmatprep.mubr.bf16.mxu0 %v12803_v27 }
 0x4ef   :  { %v5378_v56 = vmax.f32 %v4134_v33, 0.0  ;;  %v4136_v0 = vadd.f32 %v4135_v20, %v4023_v17  ;;  %v4027_v41 = vadd.f32 %v4026_v38, %v12963_v55  ;;  %4816 = vmatmul.mubr.bf16.gmra.mxu1 %v12777_v4  ;;  %v4141_v61 = vpop.f32.mrf.mxu0  ;;  %4880 = vmatprep.subr.bf16.mxu0 %v10502_v15  ;;  %v10511_v20 = vld [vmem:[#allocation14 + $0x564] ss:$48 sps:$4 sm:$0xff]  }
 0x4f0   :  { %v4028_v51 = vpop.f32.mrf.mxu1  ;;  %4825 = vmatprep.mubr.bf16.mxu1 %v15073_v40  ;;  %4992 = vmatpush1.bf16.msra.mxu1 %v10524_v2 }
 0x4f1   :  { %v13006_v21 = vpack.c.bf16 %v5378_v56, %v5366_v31  ;;  %v5379_v60 = vmax.f32 %v4136_v0, 0.0  ;;  %v4140_v12 = vadd.f32 %v4139_v6, %v4027_v41  ;;  %v4029_v63 = vadd.f32 %v4028_v51, %v12968_v26  ;;  %v4143_v52 = vpop.f32.mrf.mxu0  ;;  %4993 = vmatprep.subr.bf16.mxu1 %v10535_v37  ;;  %v10509_v37 = vld [vmem:[#allocation14 + $0x560] ss:$48 sps:$4 sm:$0xff]   ;;  %v10514_v41 = vld [vmem:[#allocation14 + $0x504] ss:$48 sps:$4 sm:$0xff]  }
 0x4f2   :  { %4881 = vmatpush1.bf16.msra.mxu0 %v10500_v59  ;;  %v4030_v46 = vpop.f32.mrf.mxu1 }
 0x4f3   :  { %15087 = vst [vmem:[#allocation85_spill] sm:$0xff] %v13006_v21  ;;  %v4142_v54 = vadd.f32 %v4141_v61, %v4029_v63  ;;  %v4031_v49 = vadd.f32 %v4030_v46, %v12963_v55  ;;  %v4145_v50 = vpop.f32.mrf.mxu0  ;;  %4882 = vmatprep.subr.bf16.mxu0 %v10505_v44  ;;  %v13010_v15 = vpack.c.bf16 %v5379_v60, %v5367_v43  ;;  %v5390_v38 = vmax.f32 %v4140_v12, 0.0 }
 0x4f4   :  { %v4032_v5 = vpop.f32.mrf.mxu1  ;;  %4994 = vmatpush1.bf16.msra.mxu1 %v10533_v10 }
 0x4f5   :  { %15088 = vst [vmem:[#allocation86_spill] sm:$0xff] %v13010_v15  ;;  %v4144_v2 = vadd.f32 %v4143_v52, %v4031_v49  ;;  %v4033_v33 = vadd.f32 %v4032_v5, %v12968_v26  ;;  %v4149_v17 = vpop.f32.mrf.mxu0  ;;  %4713 = vmatmul.mubr.bf16.gmra.mxu0 %v12807_v32  ;;  %5205 = vmatprep.subr.bf16.mxu1 %v10544_v36  ;;  %v5391_v61 = vmax.f32 %v4142_v54, 0.0  ;;  %v10512_v52 = vld [vmem:[#allocation14 + $0x500] ss:$48 sps:$4 sm:$0xff]   ;;  %v10520_v49 = vld [vmem:[#allocation14 + $0x4a4] ss:$48 sps:$4 sm:$0xff]  }
 0x4f6   :  { %4883 = vmatpush2.bf16.msra.mxu0 %v10503_v23  ;;  %v4036_v6 = vpop.f32.mrf.mxu1  ;;  %4722 = vmatprep.mubr.bf16.mxu0 %v12831_v30 }
 0x4f7   :  { %v5402_v59 = vmax.f32 %v4144_v2, 0.0  ;;  %v4146_v31 = vadd.f32 %v4145_v50, %v4033_v33  ;;  %v4037_v56 = vadd.f32 %v4036_v6, %v12963_v55  ;;  %4826 = vmatmul.mubr.bf16.gmra.mxu1 %v12805_v29  ;;  %v4151_v0 = vpop.f32.mrf.mxu0  ;;  %4884 = vmatprep.subr.bf16.mxu0 %v10511_v20 }
 0x4f8   :  { %v4038_v44 = vpop.f32.mrf.mxu1  ;;  %4835 = vmatprep.mubr.bf16.mxu1 %v15073_v40 }
 0x4f9   :  { %v13018_v43 = vpack.c.bf16 %v5402_v59, %v5390_v38  ;;  %v5403_v51 = vmax.f32 %v4146_v31, 0.0  ;;  %v4150_v10 = vadd.f32 %v4149_v17, %v4037_v56  ;;  %v4039_v60 = vadd.f32 %v4038_v44, %v12968_v26  ;;  %v4153_v12 = vpop.f32.mrf.mxu0  ;;  %v10518_v17 = vld [vmem:[#allocation14 + $0x4a0] ss:$48 sps:$4 sm:$0xff]   ;;  %v10523_v56 = vld [vmem:[#allocation14 + $0x444] ss:$48 sps:$4 sm:$0xff]  }
 0x4fa   :  { %4885 = vmatpush2.bf16.msra.mxu0 %v10509_v37  ;;  %v4040_v63 = vpop.f32.mrf.mxu1 }
 0x4fb   :  { %15089 = vst [vmem:[#allocation84_spill] sm:$0xff] %v13018_v43  ;;  %v4152_v36 = vadd.f32 %v4151_v0, %v4039_v60  ;;  %v4041_v46 = vadd.f32 %v4040_v63, %v12963_v55  ;;  %v4155_v23 = vpop.f32.mrf.mxu0  ;;  %4886 = vmatprep.subr.bf16.mxu0 %v10514_v41  ;;  %v13022_v54 = vpack.c.bf16 %v5403_v51, %v5391_v61  ;;  %v5414_v6 = vmax.f32 %v4150_v10, 0.0  ;;  %v10521_v63 = vld [vmem:[#allocation14 + $0x440] ss:$48 sps:$4 sm:$0xff]  }
 0x4fc   :  { %v4042_v50 = vpop.f32.mrf.mxu1 }
 0x4fd   :  { %15090 = vst [vmem:[#allocation87_spill] sm:$0xff] %v13022_v54  ;;  %v4154_v20 = vadd.f32 %v4153_v12, %v4041_v46  ;;  %v4043_v5 = vadd.f32 %v4042_v50, %v12968_v26  ;;  %v4159_v2 = vpop.f32.mrf.mxu0  ;;  %4723 = vmatmul.mubr.bf16.gmra.mxu0 %v12835_v47  ;;  %v5415_v0 = vmax.f32 %v4152_v36, 0.0 }
 0x4fe   :  { %4887 = vmatpush2.bf16.msra.mxu0 %v10512_v52  ;;  %v4046_v33 = vpop.f32.mrf.mxu1  ;;  %4732 = vmatprep.mubr.bf16.mxu0 %v12859_v58 }
 0x4ff   :  { %v5426_v37 = vmax.f32 %v4154_v20, 0.0  ;;  %v4156_v38 = vadd.f32 %v4155_v23, %v4043_v5  ;;  %v4047_v59 = vadd.f32 %v4046_v33, %v12963_v55  ;;  %4836 = vmatmul.mubr.bf16.gmra.mxu1 %v12833_v11  ;;  %v4161_v31 = vpop.f32.mrf.mxu0  ;;  %4888 = vmatprep.subr.bf16.mxu0 %v10520_v49  ;;  %v10529_v49 = vld [vmem:[#allocation14 + $0x3e4] ss:$48 sps:$4 sm:$0xff]  }
 0x500   :  { %v4048_v41 = vpop.f32.mrf.mxu1  ;;  %4845 = vmatprep.mubr.bf16.mxu1 %v15073_v40 }
 0x501   :  { %v13030_v61 = vpack.c.bf16 %v5426_v37, %v5414_v6  ;;  %v5427_v44 = vmax.f32 %v4156_v38, 0.0  ;;  %v4160_v51 = vadd.f32 %v4159_v2, %v4047_v59  ;;  %v4049_v60 = vadd.f32 %v4048_v41, %v12968_v26  ;;  %v4163_v10 = vpop.f32.mrf.mxu0 }
 0x502   :  { %4889 = vmatpush2.bf16.msra.mxu0 %v10518_v17  ;;  %v4050_v12 = vpop.f32.mrf.mxu1  ;;  %v10527_v17 = vld [vmem:[#allocation14 + $0x3e0] ss:$48 sps:$4 sm:$0xff]  }
 0x503   :  { %15091 = vst [vmem:[#allocation88_spill] sm:$0xff] %v13030_v61  ;;  %v4162_v52 = vadd.f32 %v4161_v31, %v4049_v60  ;;  %v4051_v46 = vadd.f32 %v4050_v12, %v12963_v55  ;;  %v4165_v23 = vpop.f32.mrf.mxu0  ;;  %4890 = vmatprep.subr.bf16.mxu0 %v10523_v56  ;;  %v13034_v36 = vpack.c.bf16 %v5427_v44, %v5415_v0  ;;  %v5438_v6 = vmax.f32 %v4160_v51, 0.0  ;;  %v10532_v56 = vld [vmem:[#allocation14 + $0x384] ss:$48 sps:$4 sm:$0xff]  }
 0x504   :  { %v4052_v50 = vpop.f32.mrf.mxu1 }
 0x505   :  { %15092 = vst [vmem:[#allocation89_spill] sm:$0xff] %v13034_v36  ;;  %v4164_v20 = vadd.f32 %v4163_v10, %v4051_v46  ;;  %v4053_v5 = vadd.f32 %v4052_v50, %v12968_v26  ;;  %v4169_v33 = vpop.f32.mrf.mxu0  ;;  %4733 = vmatmul.mubr.bf16.gmra.mxu0 %v12863_v13  ;;  %v5439_v0 = vmax.f32 %v4162_v52, 0.0  ;;  %v10530_v46 = vld [vmem:[#allocation14 + $0x380] ss:$48 sps:$4 sm:$0xff]  }
 0x506   :  { %4891 = vmatpush2.bf16.msra.mxu0 %v10521_v63  ;;  %v4056_v2 = vpop.f32.mrf.mxu1  ;;  %4742 = vmatprep.mubr.bf16.mxu0 %v12884_v25 }
 0x507   :  { %v5450_v37 = vmax.f32 %v4164_v20, 0.0  ;;  %v4166_v38 = vadd.f32 %v4165_v23, %v4053_v5  ;;  %v4057_v59 = vadd.f32 %v4056_v2, %v12963_v55  ;;  %4846 = vmatmul.mubr.bf16.gmra.mxu1 %v12861_v48  ;;  %v4171_v31 = vpop.f32.mrf.mxu0  ;;  %4892 = vmatprep.subr.bf16.mxu0 %v10529_v49  ;;  %v10538_v49 = vld [vmem:[#allocation14 + $0x324] ss:$48 sps:$4 sm:$0xff]  }
 0x508   :  { %v4058_v41 = vpop.f32.mrf.mxu1  ;;  %4855 = vmatprep.mubr.bf16.mxu1 %v15073_v40 }
 0x509   :  { %v13042_v44 = vpack.c.bf16 %v5450_v37, %v5438_v6  ;;  %v5451_v60 = vmax.f32 %v4166_v38, 0.0  ;;  %v4170_v10 = vadd.f32 %v4169_v33, %v4057_v59  ;;  %v4059_v12 = vadd.f32 %v4058_v41, %v12968_v26  ;;  %v4173_v51 = vpop.f32.mrf.mxu0  ;;  %v10541_v41 = vld [vmem:[#allocation14 + $0x2cc] ss:$48 sps:$4 sm:$0xff]  }
 0x50a   :  { %4893 = vmatpush2.bf16.msra.mxu0 %v10527_v17  ;;  %v4060_v63 = vpop.f32.mrf.mxu1  ;;  %v10536_v17 = vld [vmem:[#allocation14 + $0x320] ss:$48 sps:$4 sm:$0xff]  }
 0x50b   :  { %15093 = vst [vmem:[#allocation90_spill] sm:$0xff] %v13042_v44  ;;  %v4172_v23 = vadd.f32 %v4171_v31, %v4059_v12  ;;  %v4061_v50 = vadd.f32 %v4060_v63, %v12963_v55  ;;  %v4175_v20 = vpop.f32.mrf.mxu0  ;;  %4894 = vmatprep.subr.bf16.mxu0 %v10532_v56  ;;  %v13046_v52 = vpack.c.bf16 %v5451_v60, %v5439_v0  ;;  %v5462_v38 = vmax.f32 %v4170_v10, 0.0  ;;  %v10547_v63 = vld [vmem:[#allocation14 + $0x26c] ss:$48 sps:$4 sm:$0xff]  }
 0x50c   :  { %v4062_v5 = vpop.f32.mrf.mxu1 }
 0x50d   :  { %15094 = vst [vmem:[#allocation91_spill] sm:$0xff] %v13046_v52  ;;  %v4174_v2 = vadd.f32 %v4173_v51, %v4061_v50  ;;  %v4063_v6 = vadd.f32 %v4062_v5, %v12968_v26  ;;  %v4179_v37 = vpop.f32.mrf.mxu0  ;;  %4743 = vmatmul.mubr.bf16.gmra.mxu0 %v12888_v28  ;;  %v5463_v60 = vmax.f32 %v4172_v23, 0.0  ;;  %v15095_v51 = vld [vmem:[#allocation37_spill] sm:$0xff] }
 0x50e   :  { %4895 = vmatpush2.bf16.msra.mxu0 %v10530_v46  ;;  %v4066_v33 = vpop.f32.mrf.mxu1  ;;  %4898 = vmatprep.mubr.bf16.mxu0 %v12691_v34 }
 0x50f   :  { %v5474_v59 = vmax.f32 %v4174_v2, 0.0  ;;  %v4176_v31 = vadd.f32 %v4175_v20, %v4063_v6  ;;  %v4067_v56 = vadd.f32 %v4066_v33, %v12963_v55  ;;  %4856 = vmatmul.mubr.bf16.gmra.mxu1 %v12886_v57  ;;  %v4181_v0 = vpop.f32.mrf.mxu0  ;;  %4896 = vmatprep.subr.bf16.mxu0 %v10538_v49  ;;  %v10539_v6 = vld [vmem:[#allocation14 + $0x2c8] ss:$48 sps:$4 sm:$0xff]  }
 0x510   :  { %v4068_v12 = vpop.f32.mrf.mxu1  ;;  %5011 = vmatprep.mubr.bf16.mxu1 %v15073_v40  ;;  %v15097_v33 = vld [vmem:[#allocation39_spill] sm:$0xff] }
 0x511   :  { %v13055_v46 = vpack.c.bf16 %v5474_v59, %v5462_v38  ;;  %v5475_v50 = vmax.f32 %v4176_v31, 0.0  ;;  %v4180_v5 = vadd.f32 %v4179_v37, %v4067_v56  ;;  %v4069_v10 = vadd.f32 %v4068_v12, %v12968_v26  ;;  %v4183_v20 = vpop.f32.mrf.mxu0  ;;  %v10542_v37 = vld [vmem:[#allocation14 + $0x8c8] ss:$48 sps:$4 sm:$0xff]  }
 0x512   :  { %4897 = vmatpush2.bf16.msra.mxu0 %v10536_v17  ;;  %v4070_v2 = vpop.f32.mrf.mxu1  ;;  %v13060_v49 = vrot.slane %v12959_v35, %v15097_v33  ;;  %v15099_v31 = vsub.s32 3, %v15095_v51 }
 0x513   :  { %15096 = vst [vmem:[#allocation92_spill] sm:$0xff] %v13055_v46  ;;  %v4182_v23 = vadd.f32 %v4181_v0, %v4069_v10  ;;  %v4071_v39 = vadd.f32 %v4070_v2, %v12963_v55  ;;  %v4185_v9 = vpop.f32.mrf.mxu0  ;;  %5092 = vmatprep.subr.bf16.mxu0 %v10541_v41  ;;  %v13063_v38 = vpack.c.bf16 %v5475_v50, %v5463_v60  ;;  %v10553_v0 = vld [vmem:[#allocation14 + $0x86c] ss:$48 sps:$4 sm:$0xff]   ;;  %v10545_v41 = vld [vmem:[#allocation14 + $0x268] ss:$48 sps:$4 sm:$0xff]   ;;  %v5486_v60 = vmax.f32 %v4180_v5, 0.0 }
 0x514   :  { %v4072_v59 = vpop.f32.mrf.mxu1  ;;  %v13068_v17 = vrot.slane %v12959_v35, %v15099_v31 }
 0x515   :  { %15098 = vst [vmem:[#allocation93_spill] sm:$0xff] %v13063_v38  ;;  %v4184_v56 = vadd.f32 %v4183_v20, %v4071_v39  ;;  %v4073_v12 = vadd.f32 %v4072_v59, %v12968_v26  ;;  %v4222_v33 = vpop.f32.mrf.mxu0  ;;  %4899 = vmatmul.mubr.bf16.vlgmr.msra.gmra.mxu0 %v12695_v42  ;;  %v10550_v39 = vld [vmem:[#allocation14 + $0x20c] ss:$48 sps:$4 sm:$0xff]  }
 0x516   :  { %v4223_v55 = vadd.f32 %v4222_v33, %v13060_v49  ;;  %5093 = vmatpush1.bf16.msra.mxu0 %v10539_v6  ;;  %4908 = vmatprep.mubr.bf16.mxu0 %v12719_v45  ;;  %v10551_v33 = vld [vmem:[#allocation14 + $0x868] ss:$48 sps:$4 sm:$0xff]   ;;  %v5487_v6 = vmax.f32 %v4182_v23, 0.0 }
 0x517   :  { %v5498_v50 = vmax.f32 %v4184_v56, 0.0  ;;  %v4186_v10 = vadd.f32 %v4185_v9, %v4073_v12  ;;  %v4335_v2 = vpop.f32.mrf.mxu1  ;;  %5012 = vmatmul.mubr.bf16.vlgmr.msra.gmra.mxu1 %v12693_v22  ;;  %v4224_v35 = vpop.f32.mrf.mxu0  ;;  %5094 = vmatprep.subr.bf16.mxu0 %v10547_v63  ;;  %v10562_v9 = vld [vmem:[#allocation14 + $0x80c] ss:$48 sps:$4 sm:$0xff]   ;;  %v10548_v63 = vld [vmem:[#allocation14 + $0x208] ss:$48 sps:$4 sm:$0xff]  }
 0x518   :  { %v4336_v26 = vadd.f32 %v4335_v2, %v4223_v55  ;;  %v4225_v20 = vadd.f32 %v4224_v35, %v13068_v17  ;;  %5206 = vmatpush1.bf16.msra.mxu1 %v10542_v37  ;;  %5021 = vmatprep.mubr.bf16.mxu1 %v15073_v40  ;;  %v10556_v37 = vld [vmem:[#allocation14 + $0x1ac] ss:$48 sps:$4 sm:$0xff]  }
 0x519   :  { %v13077_v59 = vpack.c.bf16 %v5498_v50, %v5486_v60  ;;  %v5499_v31 = vmax.f32 %v4186_v10, 0.0  ;;  %v4337_v5 = vpop.f32.mrf.mxu1  ;;  %v4226_v56 = vpop.f32.mrf.mxu0  ;;  %5207 = vmatprep.subr.bf16.mxu1 %v10553_v0  ;;  %v10560_v60 = vld [vmem:[#allocation14 + $0x808] ss:$48 sps:$4 sm:$0xff]   ;;  %v10571_v0 = vld [vmem:[#allocation14 + $0x7ac] ss:$48 sps:$4 sm:$0xff]  }
 0x51a   :  { %v4338_v12 = vadd.f32 %v4337_v5, %v4225_v20  ;;  %v4227_v46 = vadd.f32 %v4226_v56, %v13060_v49  ;;  %5095 = vmatpush1.bf16.msra.mxu0 %v10545_v41  ;;  %v5320_v20 = vmax.f32 %v4336_v26, 0.0  ;;  %v10569_v26 = vld [vmem:[#allocation14 + $0x7a8] ss:$48 sps:$4 sm:$0xff]  }
 0x51b   :  { %15100 = vst [vmem:[#allocation94_spill] sm:$0xff] %v13077_v59  ;;  %v4339_v55 = vpop.f32.mrf.mxu1  ;;  %v4228_v2 = vpop.f32.mrf.mxu0  ;;  %5096 = vmatprep.subr.bf16.mxu0 %v10550_v39  ;;  %v13080_v35 = vpack.c.bf16 %v5499_v31, %v5487_v6  ;;  %v10554_v39 = vld [vmem:[#allocation14 + $0x1a8] ss:$48 sps:$4 sm:$0xff]   ;;  %v10559_v31 = vld [vmem:[#allocation14 + $0x14c] ss:$48 sps:$4 sm:$0xff]  }
 0x51c   :  { %v4340_v38 = vadd.f32 %v4339_v55, %v4227_v46  ;;  %v4229_v23 = vadd.f32 %v4228_v2, %v13068_v17  ;;  %5208 = vmatpush1.bf16.msra.mxu1 %v10551_v33  ;;  %v5321_v46 = vmax.f32 %v4338_v12, 0.0  ;;  %v10580_v12 = vld [vmem:[#allocation14 + $0x74c] ss:$48 sps:$4 sm:$0xff]  }
 0x51d   :  { %15101 = vst [vmem:[#allocation95_spill] sm:$0xff] %v13080_v35  ;;  %v4341_v50 = vpop.f32.mrf.mxu1  ;;  %v4232_v10 = vpop.f32.mrf.mxu0  ;;  %4909 = vmatmul.mubr.bf16.gmra.mxu0 %v12723_v53  ;;  %5209 = vmatprep.subr.bf16.mxu1 %v10562_v9 }
 0x51e   :  { %v5332_v41 = vmax.f32 %v4340_v38, 0.0  ;;  %v4342_v5 = vadd.f32 %v4341_v50, %v4229_v23  ;;  %v4233_v56 = vadd.f32 %v4232_v10, %v13060_v49  ;;  %5097 = vmatpush1.bf16.msra.mxu0 %v10548_v63  ;;  %4918 = vmatprep.mubr.bf16.mxu0 %v12747_v7 }
 0x51f   :  { %v4345_v6 = vpop.f32.mrf.mxu1  ;;  %5022 = vmatmul.mubr.bf16.gmra.mxu1 %v12721_v14  ;;  %v4234_v33 = vpop.f32.mrf.mxu0  ;;  %5098 = vmatprep.subr.bf16.mxu0 %v10556_v37  ;;  %v10557_v37 = vld [vmem:[#allocation14 + $0x148] ss:$48 sps:$4 sm:$0xff]  }
 0x520   :  { %v13087_v55 = vpack.c.bf16 %v5332_v41, %v5320_v20  ;;  %v5333_v9 = vmax.f32 %v4342_v5, 0.0  ;;  %v4346_v2 = vadd.f32 %v4345_v6, %v4233_v56  ;;  %v4235_v38 = vadd.f32 %v4234_v33, %v13068_v17  ;;  %5031 = vmatprep.mubr.bf16.mxu1 %v15073_v40  ;;  %5210 = vmatpush1.bf16.msra.mxu1 %v10560_v60  ;;  %v10565_v5 = vld [vmem:[#allocation14 + $0xec] ss:$48 sps:$4 sm:$0xff]   ;;  %v10578_v60 = vld [vmem:[#allocation14 + $0x748] ss:$48 sps:$4 sm:$0xff]  }
 0x521   :  { %v4347_v63 = vpop.f32.mrf.mxu1  ;;  %v4236_v23 = vpop.f32.mrf.mxu0  ;;  %5211 = vmatprep.subr.bf16.mxu1 %v10571_v0  ;;  %v10589_v0 = vld [vmem:[#allocation14 + $0x6ec] ss:$48 sps:$4 sm:$0xff]  }
 0x522   :  { %15102 = vst [vmem:[#allocation96_spill] sm:$0xff] %v13087_v55  ;;  %v4348_v50 = vadd.f32 %v4347_v63, %v4235_v38  ;;  %v4237_v10 = vadd.f32 %v4236_v23, %v13060_v49  ;;  %5099 = vmatpush1.bf16.msra.mxu0 %v10554_v39  ;;  %v13092_v59 = vpack.c.bf16 %v5333_v9, %v5321_v46  ;;  %v5344_v38 = vmax.f32 %v4346_v2, 0.0 }
 0x523   :  { %v4349_v20 = vpop.f32.mrf.mxu1  ;;  %v4238_v41 = vpop.f32.mrf.mxu0  ;;  %5100 = vmatprep.subr.bf16.mxu0 %v10559_v31  ;;  %v10563_v31 = vld [vmem:[#allocation14 + $0xe8] ss:$48 sps:$4 sm:$0xff]  }
 0x524   :  { %15103 = vst [vmem:[#allocation97_spill] sm:$0xff] %v13092_v59  ;;  %v4350_v56 = vadd.f32 %v4349_v20, %v4237_v10  ;;  %v4239_v6 = vadd.f32 %v4238_v41, %v13068_v17  ;;  %5212 = vmatpush1.bf16.msra.mxu1 %v10569_v26  ;;  %v5345_v9 = vmax.f32 %v4348_v50, 0.0  ;;  %v10568_v10 = vld [vmem:[#allocation14 + $0x8c] ss:$48 sps:$4 sm:$0xff]  }
 0x525   :  { %v4351_v33 = vpop.f32.mrf.mxu1  ;;  %v4242_v35 = vpop.f32.mrf.mxu0  ;;  %4919 = vmatmul.mubr.bf16.gmra.mxu0 %v12751_v19  ;;  %5213 = vmatprep.subr.bf16.mxu1 %v10580_v12  ;;  %v10598_v50 = vld [vmem:[#allocation14 + $0x68c] ss:$48 sps:$4 sm:$0xff]  }
 0x526   :  { %v5356_v39 = vmax.f32 %v4350_v56, 0.0  ;;  %v4352_v63 = vadd.f32 %v4351_v33, %v4239_v6  ;;  %v4243_v46 = vadd.f32 %v4242_v35, %v13060_v49  ;;  %5101 = vmatpush1.bf16.msra.mxu0 %v10557_v37  ;;  %4928 = vmatprep.mubr.bf16.mxu0 %v12775_v1  ;;  %v10587_v35 = vld [vmem:[#allocation14 + $0x6e8] ss:$48 sps:$4 sm:$0xff]  }
 0x527   :  { %v4355_v23 = vpop.f32.mrf.mxu1  ;;  %5032 = vmatmul.mubr.bf16.gmra.mxu1 %v12749_v8  ;;  %v4244_v26 = vpop.f32.mrf.mxu0  ;;  %5102 = vmatprep.subr.bf16.mxu0 %v10565_v5  ;;  %v10566_v5 = vld [vmem:[#allocation14 + $0x88] ss:$48 sps:$4 sm:$0xff]  }
 0x528   :  { %v13099_v20 = vpack.c.bf16 %v5356_v39, %v5344_v38  ;;  %v5357_v12 = vmax.f32 %v4352_v63, 0.0  ;;  %v4356_v41 = vadd.f32 %v4355_v23, %v4243_v46  ;;  %v4245_v2 = vadd.f32 %v4244_v26, %v13068_v17  ;;  %5041 = vmatprep.mubr.bf16.mxu1 %v15073_v40  ;;  %5214 = vmatpush1.bf16.msra.mxu1 %v10578_v60  ;;  %v10574_v63 = vld [vmem:[#allocation14 + $0x2c] ss:$48 sps:$4 sm:$0xff]   ;;  %v10596_v60 = vld [vmem:[#allocation14 + $0x688] ss:$48 sps:$4 sm:$0xff]  }
 0x529   :  { %v4357_v37 = vpop.f32.mrf.mxu1  ;;  %v4246_v56 = vpop.f32.mrf.mxu0  ;;  %5215 = vmatprep.subr.bf16.mxu1 %v10589_v0  ;;  %v10607_v0 = vld [vmem:[#allocation14 + $0x62c] ss:$48 sps:$4 sm:$0xff]  }
 0x52a   :  { %15104 = vst [vmem:[#allocation98_spill] sm:$0xff] %v13099_v20  ;;  %v4358_v6 = vadd.f32 %v4357_v37, %v4245_v2  ;;  %v4247_v33 = vadd.f32 %v4246_v56, %v13060_v49  ;;  %5103 = vmatpush1.bf16.msra.mxu0 %v10563_v31  ;;  %v13104_v44 = vpack.c.bf16 %v5357_v12, %v5345_v9  ;;  %v5368_v2 = vmax.f32 %v4356_v41, 0.0 }
 0x52b   :  { %v4359_v38 = vpop.f32.mrf.mxu1  ;;  %v4248_v39 = vpop.f32.mrf.mxu0  ;;  %5104 = vmatprep.subr.bf16.mxu0 %v10568_v10  ;;  %v10572_v10 = vld [vmem:[#allocation14 + $0x28] ss:$48 sps:$4 sm:$0xff]  }
 0x52c   :  { %15105 = vst [vmem:[#allocation99_spill] sm:$0xff] %v13104_v44  ;;  %v4360_v46 = vadd.f32 %v4359_v38, %v4247_v33  ;;  %v4249_v23 = vadd.f32 %v4248_v39, %v13068_v17  ;;  %5216 = vmatpush1.bf16.msra.mxu1 %v10587_v35  ;;  %v5369_v12 = vmax.f32 %v4358_v6, 0.0  ;;  %v10577_v33 = vld [vmem:[#allocation14 + $0x5cc] ss:$48 sps:$4 sm:$0xff]   ;;  %v10616_v6 = vld [vmem:[#allocation17 + $0x22c] ss:$12 sps:$4 sm:$0xff]  }
 0x52d   :  { %v4361_v26 = vpop.f32.mrf.mxu1  ;;  %v4252_v52 = vpop.f32.mrf.mxu0  ;;  %4929 = vmatmul.mubr.bf16.gmra.mxu0 %v12779_v24  ;;  %5217 = vmatprep.subr.bf16.mxu1 %v10598_v50 }
 0x52e   :  { %v5380_v31 = vmax.f32 %v4360_v46, 0.0  ;;  %v4362_v37 = vadd.f32 %v4361_v26, %v4249_v23  ;;  %v4253_v9 = vadd.f32 %v4252_v52, %v13060_v49  ;;  %5105 = vmatpush1.bf16.msra.mxu0 %v10566_v5  ;;  %4938 = vmatprep.mubr.bf16.mxu0 %v12803_v27  ;;  %v10605_v52 = vld [vmem:[#allocation14 + $0x628] ss:$48 sps:$4 sm:$0xff]  }
 0x52f   :  { %v4365_v56 = vpop.f32.mrf.mxu1  ;;  %5042 = vmatmul.mubr.bf16.gmra.mxu1 %v12777_v4  ;;  %v4254_v35 = vpop.f32.mrf.mxu0  ;;  %5106 = vmatprep.subr.bf16.mxu0 %v10574_v63  ;;  %v10575_v63 = vld [vmem:[#allocation14 + $0x5c8] ss:$48 sps:$4 sm:$0xff]  }
 0x530   :  { %v13111_v38 = vpack.c.bf16 %v5380_v31, %v5368_v2  ;;  %v5381_v50 = vmax.f32 %v4362_v37, 0.0  ;;  %v4366_v39 = vadd.f32 %v4365_v56, %v4253_v9  ;;  %v4255_v41 = vadd.f32 %v4254_v35, %v13068_v17  ;;  %5051 = vmatprep.mubr.bf16.mxu1 %v15073_v40  ;;  %5218 = vmatpush1.bf16.msra.mxu1 %v10596_v60  ;;  %v10583_v37 = vld [vmem:[#allocation14 + $0x56c] ss:$48 sps:$4 sm:$0xff]  }
 0x531   :  { %v4367_v5 = vpop.f32.mrf.mxu1  ;;  %v4256_v46 = vpop.f32.mrf.mxu0  ;;  %5219 = vmatprep.subr.bf16.mxu1 %v10607_v0 }
 0x532   :  { %15106 = vst [vmem:[#allocation100_spill] sm:$0xff] %v13111_v38  ;;  %v4368_v23 = vadd.f32 %v4367_v5, %v4255_v41  ;;  %v4257_v26 = vadd.f32 %v4256_v46, %v13060_v49  ;;  %5107 = vmatpush1.bf16.msra.mxu0 %v10572_v10  ;;  %v13116_v61 = vpack.c.bf16 %v5381_v50, %v5369_v12  ;;  %v5392_v0 = vmax.f32 %v4366_v39, 0.0  ;;  %v10581_v12 = vld [vmem:[#allocation14 + $0x568] ss:$48 sps:$4 sm:$0xff]  }
 0x533   :  { %v4369_v2 = vpop.f32.mrf.mxu1  ;;  %v4258_v31 = vpop.f32.mrf.mxu0  ;;  %5108 = vmatprep.subr.bf16.mxu0 %v10577_v33 }
 0x534   :  { %15107 = vst [vmem:[#allocation101_spill] sm:$0xff] %v13116_v61  ;;  %v4370_v9 = vadd.f32 %v4369_v2, %v4257_v26  ;;  %v4259_v56 = vadd.f32 %v4258_v31, %v13068_v17  ;;  %5220 = vmatpush1.bf16.msra.mxu1 %v10605_v52  ;;  %v5393_v33 = vmax.f32 %v4368_v23, 0.0  ;;  %v10586_v52 = vld [vmem:[#allocation14 + $0x50c] ss:$48 sps:$4 sm:$0xff]   ;;  %v10584_v23 = vld [vmem:[#allocation14 + $0x508] ss:$48 sps:$4 sm:$0xff]  }
 0x535   :  { %v4371_v60 = vpop.f32.mrf.mxu1  ;;  %v4262_v35 = vpop.f32.mrf.mxu0  ;;  %4939 = vmatmul.mubr.bf16.gmra.mxu0 %v12807_v32  ;;  %7655 = vmatprep.subr.bf16.mxu1 %v10616_v6 }
 0x536   :  { %v5404_v41 = vmax.f32 %v4370_v9, 0.0  ;;  %v4372_v5 = vadd.f32 %v4371_v60, %v4259_v56  ;;  %v4263_v10 = vadd.f32 %v4262_v35, %v13060_v49  ;;  %5109 = vmatpush2.bf16.msra.mxu0 %v10575_v63  ;;  %4948 = vmatprep.mubr.bf16.mxu0 %v12831_v30 }
 0x537   :  { %v4375_v50 = vpop.f32.mrf.mxu1  ;;  %5052 = vmatmul.mubr.bf16.gmra.mxu1 %v12805_v29  ;;  %v4264_v46 = vpop.f32.mrf.mxu0  ;;  %5110 = vmatprep.subr.bf16.mxu0 %v10583_v37 }
 0x538   :  { %v13123_v26 = vpack.c.bf16 %v5404_v41, %v5392_v0  ;;  %v5405_v2 = vmax.f32 %v4372_v5, 0.0  ;;  %v4376_v6 = vadd.f32 %v4375_v50, %v4263_v10  ;;  %v4265_v39 = vadd.f32 %v4264_v46, %v13068_v17  ;;  %5061 = vmatprep.mubr.bf16.mxu1 %v15073_v40  ;;  %v10592_v0 = vld [vmem:[#allocation14 + $0x4ac] ss:$48 sps:$4 sm:$0xff]  }
 0x539   :  { %v4377_v31 = vpop.f32.mrf.mxu1  ;;  %v4266_v63 = vpop.f32.mrf.mxu0 }
 0x53a   :  { %15108 = vst [vmem:[#allocation102_spill] sm:$0xff] %v13123_v26  ;;  %v4378_v9 = vadd.f32 %v4377_v31, %v4265_v39  ;;  %v4267_v56 = vadd.f32 %v4266_v63, %v13060_v49  ;;  %5111 = vmatpush2.bf16.msra.mxu0 %v10581_v12  ;;  %v13128_v60 = vpack.c.bf16 %v5405_v2, %v5393_v33  ;;  %v5416_v46 = vmax.f32 %v4376_v6, 0.0  ;;  %v10590_v12 = vld [vmem:[#allocation14 + $0x4a8] ss:$48 sps:$4 sm:$0xff]   ;;  %v10595_v63 = vld [vmem:[#allocation14 + $0x44c] ss:$48 sps:$4 sm:$0xff]  }
 0x53b   :  { %v4379_v35 = vpop.f32.mrf.mxu1  ;;  %v4268_v37 = vpop.f32.mrf.mxu0  ;;  %5112 = vmatprep.subr.bf16.mxu0 %v10586_v52 }
 0x53c   :  { %15109 = vst [vmem:[#allocation103_spill] sm:$0xff] %v13128_v60  ;;  %v4380_v41 = vadd.f32 %v4379_v35, %v4267_v56  ;;  %v4269_v5 = vadd.f32 %v4268_v37, %v13068_v17  ;;  %v5417_v33 = vmax.f32 %v4378_v9, 0.0  ;;  %v10593_v9 = vld [vmem:[#allocation14 + $0x448] ss:$48 sps:$4 sm:$0xff]  }
 0x53d   :  { %v4381_v10 = vpop.f32.mrf.mxu1  ;;  %v4272_v50 = vpop.f32.mrf.mxu0  ;;  %4949 = vmatmul.mubr.bf16.gmra.mxu0 %v12835_v47 }
 0x53e   :  { %v5428_v26 = vmax.f32 %v4380_v41, 0.0  ;;  %v4382_v39 = vadd.f32 %v4381_v10, %v4269_v5  ;;  %v4273_v31 = vadd.f32 %v4272_v50, %v13060_v49  ;;  %5113 = vmatpush2.bf16.msra.mxu0 %v10584_v23  ;;  %4958 = vmatprep.mubr.bf16.mxu0 %v12859_v58 }
 0x53f   :  { %v4385_v2 = vpop.f32.mrf.mxu1  ;;  %5062 = vmatmul.mubr.bf16.gmra.mxu1 %v12833_v11  ;;  %v4274_v52 = vpop.f32.mrf.mxu0  ;;  %5114 = vmatprep.subr.bf16.mxu0 %v10592_v0 }
 0x540   :  { %v13135_v56 = vpack.c.bf16 %v5428_v26, %v5416_v46  ;;  %v5429_v35 = vmax.f32 %v4382_v39, 0.0  ;;  %v4386_v37 = vadd.f32 %v4385_v2, %v4273_v31  ;;  %v4275_v6 = vadd.f32 %v4274_v52, %v13068_v17  ;;  %5071 = vmatprep.mubr.bf16.mxu1 %v15073_v40  ;;  %v10601_v26 = vld [vmem:[#allocation14 + $0x3ec] ss:$48 sps:$4 sm:$0xff]  }
 0x541   :  { %v4387_v41 = vpop.f32.mrf.mxu1  ;;  %v4276_v23 = vpop.f32.mrf.mxu0 }
 0x542   :  { %15110 = vst [vmem:[#allocation104_spill] sm:$0xff] %v13135_v56  ;;  %v4388_v5 = vadd.f32 %v4387_v41, %v4275_v6  ;;  %v4277_v10 = vadd.f32 %v4276_v23, %v13060_v49  ;;  %5115 = vmatpush2.bf16.msra.mxu0 %v10590_v12  ;;  %v13140_v50 = vpack.c.bf16 %v5429_v35, %v5417_v33  ;;  %v5440_v52 = vmax.f32 %v4386_v37, 0.0  ;;  %v10599_v12 = vld [vmem:[#allocation14 + $0x3e8] ss:$48 sps:$4 sm:$0xff]  }
 0x543   :  { %v4389_v36 = vpop.f32.mrf.mxu1  ;;  %v4278_v0 = vpop.f32.mrf.mxu0  ;;  %5116 = vmatprep.subr.bf16.mxu0 %v10595_v63  ;;  %v10604_v63 = vld [vmem:[#allocation14 + $0x38c] ss:$48 sps:$4 sm:$0xff]  }
 0x544   :  { %15111 = vst [vmem:[#allocation105_spill] sm:$0xff] %v13140_v50  ;;  %v4390_v46 = vadd.f32 %v4389_v36, %v4277_v10  ;;  %v4279_v39 = vadd.f32 %v4278_v0, %v13068_v17  ;;  %v5441_v33 = vmax.f32 %v4388_v5, 0.0  ;;  %v10602_v5 = vld [vmem:[#allocation14 + $0x388] ss:$48 sps:$4 sm:$0xff]  }
 0x545   :  { %v4391_v31 = vpop.f32.mrf.mxu1  ;;  %v4282_v2 = vpop.f32.mrf.mxu0  ;;  %4959 = vmatmul.mubr.bf16.gmra.mxu0 %v12863_v13 }
 0x546   :  { %v5452_v56 = vmax.f32 %v4390_v46, 0.0  ;;  %v4392_v6 = vadd.f32 %v4391_v31, %v4279_v39  ;;  %v4283_v41 = vadd.f32 %v4282_v2, %v13060_v49  ;;  %5117 = vmatpush2.bf16.msra.mxu0 %v10593_v9  ;;  %4968 = vmatprep.mubr.bf16.mxu0 %v12884_v25 }
 0x547   :  { %v4395_v35 = vpop.f32.mrf.mxu1  ;;  %5072 = vmatmul.mubr.bf16.gmra.mxu1 %v12861_v48  ;;  %v4284_v36 = vpop.f32.mrf.mxu0  ;;  %5118 = vmatprep.subr.bf16.mxu0 %v10601_v26 }
 0x548   :  { %v13147_v23 = vpack.c.bf16 %v5452_v56, %v5440_v52  ;;  %v5453_v10 = vmax.f32 %v4392_v6, 0.0  ;;  %v4396_v0 = vadd.f32 %v4395_v35, %v4283_v41  ;;  %v4285_v37 = vadd.f32 %v4284_v36, %v13068_v17  ;;  %5081 = vmatprep.mubr.bf16.mxu1 %v15073_v40  ;;  %v10610_v56 = vld [vmem:[#allocation14 + $0x32c] ss:$48 sps:$4 sm:$0xff]  }
 0x549   :  { %v4397_v46 = vpop.f32.mrf.mxu1  ;;  %v4286_v9 = vpop.f32.mrf.mxu0  ;;  %v2480_v36 = vsub.s32 4, %v15095_v51 }
 0x54a   :  { %15112 = vst [vmem:[#allocation106_spill] sm:$0xff] %v13147_v23  ;;  %v4398_v39 = vadd.f32 %v4397_v46, %v4285_v37  ;;  %v4287_v31 = vadd.f32 %v4286_v9, %v13060_v49  ;;  %5119 = vmatpush2.bf16.msra.mxu0 %v10599_v12  ;;  %v13152_v2 = vpack.c.bf16 %v5453_v10, %v5441_v33  ;;  %v5464_v37 = vmax.f32 %v4396_v0, 0.0  ;;  %v10608_v33 = vld [vmem:[#allocation14 + $0x328] ss:$48 sps:$4 sm:$0xff]  }
 0x54b   :  { %v4399_v50 = vpop.f32.mrf.mxu1  ;;  %v4288_v26 = vpop.f32.mrf.mxu0  ;;  %5120 = vmatprep.subr.bf16.mxu0 %v10604_v63 }
 0x54c   :  { %15113 = vst [vmem:[#allocation107_spill] sm:$0xff] %v13152_v2  ;;  %v4400_v52 = vadd.f32 %v4399_v50, %v4287_v31  ;;  %v4289_v6 = vadd.f32 %v4288_v26, %v13068_v17  ;;  %v5465_v63 = vmax.f32 %v4398_v39, 0.0  ;;  %v10613_v31 = vld [vmem:[#allocation17 + $0xac] ss:$12 sps:$4 sm:$0xff]   ;;  %v2484_v26 = vsub.s32 5, %v15095_v51 }
 0x54d   :  { %v4401_v41 = vpop.f32.mrf.mxu1  ;;  %v4292_v35 = vpop.f32.mrf.mxu0  ;;  %4969 = vmatmul.mubr.bf16.gmra.mxu0 %v12888_v28  ;;  %v10611_v51 = vld [vmem:[#allocation17 + $0xa8] ss:$12 sps:$4 sm:$0xff]  }
 0x54e   :  { %v5476_v46 = vmax.f32 %v4400_v52, 0.0  ;;  %v4402_v9 = vadd.f32 %v4401_v41, %v4289_v6  ;;  %v4293_v12 = vadd.f32 %v4292_v35, %v13060_v49  ;;  %5121 = vmatpush2.bf16.msra.mxu0 %v10602_v5  ;;  %5124 = vmatprep.mubr.bf16.mxu0 %v12691_v34  ;;  %v13166_v35 = vld [vmem:[#allocation16] sm:$0xff] }
 0x54f   :  { %v4405_v10 = vpop.f32.mrf.mxu1  ;;  %5082 = vmatmul.mubr.bf16.gmra.mxu1 %v12886_v57  ;;  %v4294_v50 = vpop.f32.mrf.mxu0  ;;  %5122 = vmatprep.subr.bf16.mxu0 %v10610_v56  ;;  %v13169_v56 = vrot.slane %v13166_v35, %v2480_v36  ;;  %v10622_v36 = vld [vmem:[#allocation17 + $0x214] ss:$12 sps:$4 sm:$0xff]  }
 0x550   :  { %v13161_v23 = vpack.c.bf16 %v5476_v46, %v5464_v37  ;;  %v5477_v0 = vmax.f32 %v4402_v9, 0.0  ;;  %v4406_v52 = vadd.f32 %v4405_v10, %v4293_v12  ;;  %v4295_v6 = vadd.f32 %v4294_v50, %v13068_v17  ;;  %5237 = vmatprep.mubr.bf16.mxu1 %v15073_v40  ;;  %v10619_v12 = vld [vmem:[#allocation17 + $0x94] ss:$12 sps:$4 sm:$0xff]  }
 0x551   :  { %v4407_v5 = vpop.f32.mrf.mxu1  ;;  %v4296_v34 = vpop.f32.mrf.mxu0 }
 0x552   :  { %15114 = vst [vmem:[#allocation108_spill] sm:$0xff] %v13161_v23  ;;  %v4408_v41 = vadd.f32 %v4407_v5, %v4295_v6  ;;  %v4297_v39 = vadd.f32 %v4296_v34, %v13060_v49  ;;  %5123 = vmatpush2.bf16.msra.mxu0 %v10608_v33  ;;  %v13171_v37 = vpack.c.bf16 %v5477_v0, %v5465_v63  ;;  %v10614_v23 = vld [vmem:[#allocation17 + $0x228] ss:$12 sps:$4 sm:$0xff]   ;;  %v5488_v5 = vmax.f32 %v4406_v52, 0.0 }
 0x553   :  { %v4409_v46 = vpop.f32.mrf.mxu1  ;;  %v4298_v9 = vpop.f32.mrf.mxu0  ;;  %7542 = vmatprep.subr.bf16.mxu0 %v10613_v31  ;;  %v13175_v6 = vrot.slane %v13166_v35, %v2484_v26  ;;  %v10617_v31 = vld [vmem:[#allocation17 + $0x90] ss:$12 sps:$4 sm:$0xff]  }
 0x554   :  { %15115 = vst [vmem:[#allocation109_spill] sm:$0xff] %v13171_v37  ;;  %v4410_v10 = vadd.f32 %v4409_v46, %v4297_v39  ;;  %v4299_v50 = vadd.f32 %v4298_v9, %v13068_v17  ;;  %v5489_v39 = vmax.f32 %v4408_v41, 0.0  ;;  %v10625_v46 = vld [vmem:[#allocation17 + $0x7c] ss:$12 sps:$4 sm:$0xff]  }
 0x555   :  { %v4411_v49 = vpop.f32.mrf.mxu1  ;;  %v4448_v33 = vpop.f32.mrf.mxu0  ;;  %5125 = vmatmul.mubr.bf16.vlgmr.msra.gmra.mxu0 %v12695_v42  ;;  %v10628_v41 = vld [vmem:[#allocation17 + $0x1fc] ss:$12 sps:$4 sm:$0xff]  }
 0x556   :  { %v5500_v34 = vmax.f32 %v4410_v10, 0.0  ;;  %v4412_v63 = vadd.f32 %v4411_v49, %v4299_v50  ;;  %v4449_v0 = vadd.f32 %v4448_v33, %v13169_v56  ;;  %5134 = vmatprep.mubr.bf16.mxu0 %v12719_v45  ;;  %7543 = vmatpush1.bf16.msra.mxu0 %v10611_v51  ;;  %v10620_v10 = vld [vmem:[#allocation17 + $0x210] ss:$12 sps:$4 sm:$0xff]  }
 0x557   :  { %v4561_v17 = vpop.f32.mrf.mxu1  ;;  %5238 = vmatmul.mubr.bf16.vlgmr.msra.gmra.mxu1 %v12693_v22  ;;  %v4450_v26 = vpop.f32.mrf.mxu0  ;;  %7544 = vmatprep.subr.bf16.mxu0 %v10619_v12  ;;  %v10623_v12 = vld [vmem:[#allocation17 + $0x78] ss:$12 sps:$4 sm:$0xff]  }
 0x558   :  { %v13181_v9 = vpack.c.bf16 %v5500_v34, %v5488_v5  ;;  %v5501_v42 = vmax.f32 %v4412_v63, 0.0  ;;  %v4562_v37 = vadd.f32 %v4561_v17, %v4449_v0  ;;  %v4451_v52 = vadd.f32 %v4450_v26, %v13175_v6  ;;  %7656 = vmatpush1.bf16.msra.mxu1 %v10614_v23  ;;  %5247 = vmatprep.mubr.bf16.mxu1 %v15073_v40  ;;  %v10631_v34 = vld [vmem:[#allocation17 + $0x64] ss:$12 sps:$4 sm:$0xff]  }
 0x559   :  { %v4563_v45 = vpop.f32.mrf.mxu1  ;;  %v4452_v51 = vpop.f32.mrf.mxu0  ;;  %7657 = vmatprep.subr.bf16.mxu1 %v10622_v36  ;;  %v10626_v0 = vld [vmem:[#allocation17 + $0x1f8] ss:$12 sps:$4 sm:$0xff]  }
 0x55a   :  { %15116 = vst [vmem:[#allocation110_spill] sm:$0xff] %v13181_v9  ;;  %v4564_v50 = vadd.f32 %v4563_v45, %v4451_v52  ;;  %v4453_v22 = vadd.f32 %v4452_v51, %v13169_v56  ;;  %7545 = vmatpush1.bf16.msra.mxu0 %v10617_v31  ;;  %v13186_v49 = vpack.c.bf16 %v5501_v42, %v5489_v39  ;;  %v10634_v36 = vld [vmem:[#allocation17 + $0x1e4] ss:$12 sps:$4 sm:$0xff]   ;;  %v5322_v52 = vmax.f32 %v4562_v37, 0.0 }
 0x55b   :  { %v4565_v33 = vpop.f32.mrf.mxu1  ;;  %v4454_v5 = vpop.f32.mrf.mxu0  ;;  %7546 = vmatprep.subr.bf16.mxu0 %v10625_v46  ;;  %v10629_v46 = vld [vmem:[#allocation17 + $0x60] ss:$12 sps:$4 sm:$0xff]  }
 0x55c   :  { %15117 = vst [vmem:[#allocation111_spill] sm:$0xff] %v13186_v49  ;;  %v4566_v63 = vadd.f32 %v4565_v33, %v4453_v22  ;;  %v4455_v23 = vadd.f32 %v4454_v5, %v13175_v6  ;;  %7658 = vmatpush1.bf16.msra.mxu1 %v10620_v10  ;;  %v5323_v42 = vmax.f32 %v4564_v50, 0.0  ;;  %v10637_v22 = vld [vmem:[#allocation17 + $0x4c] ss:$12 sps:$4 sm:$0xff]  }
 0x55d   :  { %v4567_v17 = vpop.f32.mrf.mxu1  ;;  %v4458_v26 = vpop.f32.mrf.mxu0  ;;  %5135 = vmatmul.mubr.bf16.gmra.mxu0 %v12723_v53  ;;  %7659 = vmatprep.subr.bf16.mxu1 %v10628_v41  ;;  %v10632_v5 = vld [vmem:[#allocation17 + $0x1e0] ss:$12 sps:$4 sm:$0xff]  }
 0x55e   :  { %v5334_v31 = vmax.f32 %v4566_v63, 0.0  ;;  %v4568_v45 = vadd.f32 %v4567_v17, %v4455_v23  ;;  %v4459_v39 = vadd.f32 %v4458_v26, %v13169_v56  ;;  %5144 = vmatprep.mubr.bf16.mxu0 %v12747_v7  ;;  %7547 = vmatpush1.bf16.msra.mxu0 %v10623_v12  ;;  %v10640_v50 = vld [vmem:[#allocation17 + $0x1cc] ss:$12 sps:$4 sm:$0xff]  }
 0x55f   :  { %v4571_v51 = vpop.f32.mrf.mxu1  ;;  %5248 = vmatmul.mubr.bf16.gmra.mxu1 %v12721_v14  ;;  %v4460_v10 = vpop.f32.mrf.mxu0  ;;  %7548 = vmatprep.subr.bf16.mxu0 %v10631_v34  ;;  %v10635_v34 = vld [vmem:[#allocation17 + $0x48] ss:$12 sps:$4 sm:$0xff]  }
 0x560   :  { %v13193_v33 = vpack.c.bf16 %v5334_v31, %v5322_v52  ;;  %v5335_v53 = vmax.f32 %v4568_v45, 0.0  ;;  %v4572_v41 = vadd.f32 %v4571_v51, %v4459_v39  ;;  %v4461_v37 = vadd.f32 %v4460_v10, %v13175_v6  ;;  %7660 = vmatpush1.bf16.msra.mxu1 %v10626_v0  ;;  %5257 = vmatprep.mubr.bf16.mxu1 %v15073_v40  ;;  %v10643_v52 = vld [vmem:[#allocation17 + $0x34] ss:$12 sps:$4 sm:$0xff]  }
 0x561   :  { %v4573_v7 = vpop.f32.mrf.mxu1  ;;  %v4462_v12 = vpop.f32.mrf.mxu0  ;;  %7661 = vmatprep.subr.bf16.mxu1 %v10634_v36  ;;  %v10638_v45 = vld [vmem:[#allocation17 + $0x1c8] ss:$12 sps:$4 sm:$0xff]  }
 0x562   :  { %15118 = vst [vmem:[#allocation112_spill] sm:$0xff] %v13193_v33  ;;  %v4574_v63 = vadd.f32 %v4573_v7, %v4461_v37  ;;  %v4463_v14 = vadd.f32 %v4462_v12, %v13169_v56  ;;  %7549 = vmatpush1.bf16.msra.mxu0 %v10629_v46  ;;  %v13198_v23 = vpack.c.bf16 %v5335_v53, %v5323_v42  ;;  %v10646_v36 = vld [vmem:[#allocation17 + $0x1b4] ss:$12 sps:$4 sm:$0xff]   ;;  %v5346_v10 = vmax.f32 %v4572_v41, 0.0  ;;  %v10649_v12 = vld [vmem:[#allocation17 + $0x1c] ss:$12 sps:$4 sm:$0xff]  }
 0x563   :  { %v4575_v17 = vpop.f32.mrf.mxu1  ;;  %v4464_v26 = vpop.f32.mrf.mxu0  ;;  %7550 = vmatprep.subr.bf16.mxu0 %v10637_v22  ;;  %v10641_v22 = vld [vmem:[#allocation17 + $0x30] ss:$12 sps:$4 sm:$0xff]  }
 0x564   :  { %15119 = vst [vmem:[#allocation113_spill] sm:$0xff] %v13198_v23  ;;  %v4576_v31 = vadd.f32 %v4575_v17, %v4463_v14  ;;  %v4465_v0 = vadd.f32 %v4464_v26, %v13175_v6  ;;  %7662 = vmatpush1.bf16.msra.mxu1 %v10632_v5  ;;  %v5347_v53 = vmax.f32 %v4574_v63, 0.0  ;;  %v10644_v17 = vld [vmem:[#allocation17 + $0x1b0] ss:$12 sps:$4 sm:$0xff]  }
 0x565   :  { %v4577_v39 = vpop.f32.mrf.mxu1  ;;  %v4468_v51 = vpop.f32.mrf.mxu0  ;;  %5145 = vmatmul.mubr.bf16.gmra.mxu0 %v12751_v19  ;;  %7663 = vmatprep.subr.bf16.mxu1 %v10640_v50  ;;  %v10652_v63 = vld [vmem:[#allocation17 + $0x19c] ss:$12 sps:$4 sm:$0xff]  }
 0x566   :  { %v5358_v46 = vmax.f32 %v4576_v31, 0.0  ;;  %v4578_v37 = vadd.f32 %v4577_v39, %v4465_v0  ;;  %v4469_v42 = vadd.f32 %v4468_v51, %v13169_v56  ;;  %5154 = vmatprep.mubr.bf16.mxu0 %v12775_v1  ;;  %7551 = vmatpush1.bf16.msra.mxu0 %v10635_v34  ;;  %v10655_v51 = vld [vmem:[#allocation17 + $0x4] ss:$12 sps:$4 sm:$0xff]  }
 0x567   :  { %v4581_v7 = vpop.f32.mrf.mxu1  ;;  %5258 = vmatmul.mubr.bf16.gmra.mxu1 %v12749_v8  ;;  %v4470_v5 = vpop.f32.mrf.mxu0  ;;  %7552 = vmatprep.subr.bf16.mxu0 %v10643_v52  ;;  %v10647_v52 = vld [vmem:[#allocation17 + $0x18] ss:$12 sps:$4 sm:$0xff]  }
 0x568   :  { %v13205_v14 = vpack.c.bf16 %v5358_v46, %v5346_v10  ;;  %v5359_v19 = vmax.f32 %v4578_v37, 0.0  ;;  %v4582_v50 = vadd.f32 %v4581_v7, %v4469_v42  ;;  %v4471_v41 = vadd.f32 %v4470_v5, %v13175_v6  ;;  %7664 = vmatpush1.bf16.msra.mxu1 %v10638_v45  ;;  %5267 = vmatprep.mubr.bf16.mxu1 %v15073_v40  ;;  %v10650_v46 = vld [vmem:[#allocation17 + $0x198] ss:$12 sps:$4 sm:$0xff]  }
 0x569   :  { %v4583_v1 = vpop.f32.mrf.mxu1  ;;  %v4472_v34 = vpop.f32.mrf.mxu0  ;;  %7665 = vmatprep.subr.bf16.mxu1 %v10646_v36  ;;  %v10658_v36 = vld [vmem:[#allocation17 + $0x184] ss:$12 sps:$4 sm:$0xff]  }
 0x56a   :  { %15120 = vst [vmem:[#allocation114_spill] sm:$0xff] %v13205_v14  ;;  %v4584_v26 = vadd.f32 %v4583_v1, %v4471_v41  ;;  %v4473_v8 = vadd.f32 %v4472_v34, %v13169_v56  ;;  %7553 = vmatpush1.bf16.msra.mxu0 %v10641_v22  ;;  %v13210_v31 = vpack.c.bf16 %v5359_v19, %v5347_v53  ;;  %v5370_v7 = vmax.f32 %v4582_v50, 0.0  ;;  %v10661_v1 = vld [vmem:[#allocation17 + $0x16c] ss:$12 sps:$4 sm:$0xff]  }
 0x56b   :  { %v4585_v0 = vpop.f32.mrf.mxu1  ;;  %v4474_v39 = vpop.f32.mrf.mxu0  ;;  %7554 = vmatprep.subr.bf16.mxu0 %v10649_v12  ;;  %v10653_v12 = vld [vmem:[#allocation17] ss:$12 sps:$4 sm:$0xff]  }
 0x56c   :  { %15121 = vst [vmem:[#allocation115_spill] sm:$0xff] %v13210_v31  ;;  %v4586_v10 = vadd.f32 %v4585_v0, %v4473_v8  ;;  %v4475_v45 = vadd.f32 %v4474_v39, %v13175_v6  ;;  %7666 = vmatpush1.bf16.msra.mxu1 %v10644_v17  ;;  %v5371_v19 = vmax.f32 %v4584_v26, 0.0  ;;  %v10656_v8 = vld [vmem:[#allocation17 + $0x180] ss:$12 sps:$4 sm:$0xff]   ;;  %v10659_v39 = vld [vmem:[#allocation17 + $0x168] ss:$12 sps:$4 sm:$0xff]  }
 0x56d   :  { %v4587_v37 = vpop.f32.mrf.mxu1  ;;  %v4478_v42 = vpop.f32.mrf.mxu0  ;;  %5155 = vmatmul.mubr.bf16.gmra.mxu0 %v12779_v24  ;;  %7667 = vmatprep.subr.bf16.mxu1 %v10652_v63  ;;  %v10664_v26 = vld [vmem:[#allocation17 + $0x2ec] ss:$12 sps:$4 sm:$0xff]  }
 0x56e   :  { %v5382_v22 = vmax.f32 %v4586_v10, 0.0  ;;  %v4588_v5 = vadd.f32 %v4587_v37, %v4475_v45  ;;  %v4479_v53 = vadd.f32 %v4478_v42, %v13169_v56  ;;  %5164 = vmatprep.mubr.bf16.mxu0 %v12803_v27  ;;  %7555 = vmatpush1.bf16.msra.mxu0 %v10647_v52  ;;  %v10667_v37 = vld [vmem:[#allocation17 + $0x154] ss:$12 sps:$4 sm:$0xff]  }
 0x56f   :  { %v4591_v41 = vpop.f32.mrf.mxu1  ;;  %5268 = vmatmul.mubr.bf16.gmra.mxu1 %v12777_v4  ;;  %v4480_v17 = vpop.f32.mrf.mxu0  ;;  %7556 = vmatprep.subr.bf16.mxu0 %v10655_v51 }
 0x570   :  { %v13217_v34 = vpack.c.bf16 %v5382_v22, %v5370_v7  ;;  %v5383_v24 = vmax.f32 %v4588_v5, 0.0  ;;  %v4592_v63 = vadd.f32 %v4591_v41, %v4479_v53  ;;  %v4481_v50 = vadd.f32 %v4480_v17, %v13175_v6  ;;  %7668 = vmatpush1.bf16.msra.mxu1 %v10650_v46  ;;  %5277 = vmatprep.mubr.bf16.mxu1 %v15073_v40  ;;  %v10662_v7 = vld [vmem:[#allocation17 + $0x2e8] ss:$12 sps:$4 sm:$0xff]   ;;  %v10665_v17 = vld [vmem:[#allocation17 + $0x150] ss:$12 sps:$4 sm:$0xff]  }
 0x571   :  { %v4593_v27 = vpop.f32.mrf.mxu1  ;;  %v4482_v52 = vpop.f32.mrf.mxu0  ;;  %7669 = vmatprep.subr.bf16.mxu1 %v10658_v36  ;;  %v10670_v36 = vld [vmem:[#allocation17 + $0x2d4] ss:$12 sps:$4 sm:$0xff]  }
 0x572   :  { %15122 = vst [vmem:[#allocation116_spill] sm:$0xff] %v13217_v34  ;;  %v4594_v0 = vadd.f32 %v4593_v27, %v4481_v50  ;;  %v4483_v4 = vadd.f32 %v4482_v52, %v13169_v56  ;;  %7557 = vmatpush1.bf16.msra.mxu0 %v10653_v12  ;;  %v13222_v51 = vpack.c.bf16 %v5383_v24, %v5371_v19  ;;  %v5394_v53 = vmax.f32 %v4592_v63, 0.0 }
 0x573   :  { %v4595_v10 = vpop.f32.mrf.mxu1  ;;  %v4484_v45 = vpop.f32.mrf.mxu0  ;;  %7558 = vmatprep.subr.bf16.mxu0 %v10661_v1 }
 0x574   :  { %15123 = vst [vmem:[#allocation117_spill] sm:$0xff] %v13222_v51  ;;  %v4596_v42 = vadd.f32 %v4595_v10, %v4483_v4  ;;  %v4485_v46 = vadd.f32 %v4484_v45, %v13175_v6  ;;  %7670 = vmatpush1.bf16.msra.mxu1 %v10656_v8  ;;  %v5395_v1 = vmax.f32 %v4594_v0, 0.0  ;;  %v10673_v8 = vld [vmem:[#allocation17 + $0x13c] ss:$12 sps:$4 sm:$0xff]   ;;  %v10671_v10 = vld [vmem:[#allocation17 + $0x138] ss:$12 sps:$4 sm:$0xff]  }
 0x575   :  { %v4597_v22 = vpop.f32.mrf.mxu1  ;;  %v4488_v5 = vpop.f32.mrf.mxu0  ;;  %5165 = vmatmul.mubr.bf16.gmra.mxu0 %v12807_v32  ;;  %7671 = vmatprep.subr.bf16.mxu1 %v10664_v26  ;;  %v10668_v26 = vld [vmem:[#allocation17 + $0x2d0] ss:$12 sps:$4 sm:$0xff]  }
 0x576   :  { %v5406_v12 = vmax.f32 %v4596_v42, 0.0  ;;  %v4598_v41 = vadd.f32 %v4597_v22, %v4485_v46  ;;  %v4489_v19 = vadd.f32 %v4488_v5, %v13169_v56  ;;  %5174 = vmatprep.mubr.bf16.mxu0 %v12831_v30  ;;  %7559 = vmatpush2.bf16.msra.mxu0 %v10659_v39  ;;  %v10676_v0 = vld [vmem:[#allocation17 + $0x2bc] ss:$12 sps:$4 sm:$0xff]   ;;  %v10679_v46 = vld [vmem:[#allocation17 + $0x124] ss:$12 sps:$4 sm:$0xff]  }
 0x577   :  { %v4601_v24 = vpop.f32.mrf.mxu1  ;;  %5278 = vmatmul.mubr.bf16.gmra.mxu1 %v12805_v29  ;;  %v4490_v50 = vpop.f32.mrf.mxu0  ;;  %7560 = vmatprep.subr.bf16.mxu0 %v10667_v37  ;;  %v10674_v5 = vld [vmem:[#allocation17 + $0x2b8] ss:$12 sps:$4 sm:$0xff]  }
 0x578   :  { %v13229_v27 = vpack.c.bf16 %v5406_v12, %v5394_v53  ;;  %v5407_v32 = vmax.f32 %v4598_v41, 0.0  ;;  %v4602_v52 = vadd.f32 %v4601_v24, %v4489_v19  ;;  %v4491_v63 = vadd.f32 %v4490_v50, %v13175_v6  ;;  %7672 = vmatpush2.bf16.msra.mxu1 %v10662_v7  ;;  %5287 = vmatprep.mubr.bf16.mxu1 %v15073_v40  ;;  %v10677_v24 = vld [vmem:[#allocation17 + $0x120] ss:$12 sps:$4 sm:$0xff]  }
 0x579   :  { %v4603_v30 = vpop.f32.mrf.mxu1  ;;  %v4492_v4 = vpop.f32.mrf.mxu0  ;;  %7673 = vmatprep.subr.bf16.mxu1 %v10670_v36  ;;  %v10682_v36 = vld [vmem:[#allocation17 + $0x2a4] ss:$12 sps:$4 sm:$0xff]  }
 0x57a   :  { %15124 = vst [vmem:[#allocation118_spill] sm:$0xff] %v13229_v27  ;;  %v4604_v39 = vadd.f32 %v4603_v30, %v4491_v63  ;;  %v4493_v29 = vadd.f32 %v4492_v4, %v13169_v56  ;;  %7561 = vmatpush2.bf16.msra.mxu0 %v10665_v17  ;;  %v13234_v45 = vpack.c.bf16 %v5407_v32, %v5395_v1  ;;  %v5418_v41 = vmax.f32 %v4602_v52, 0.0  ;;  %v10685_v63 = vld [vmem:[#allocation17 + $0x10c] ss:$12 sps:$4 sm:$0xff]  }
 0x57b   :  { %v4605_v37 = vpop.f32.mrf.mxu1  ;;  %v4494_v42 = vpop.f32.mrf.mxu0  ;;  %7562 = vmatprep.subr.bf16.mxu0 %v10673_v8  ;;  %v10680_v4 = vld [vmem:[#allocation17 + $0x2a0] ss:$12 sps:$4 sm:$0xff]  }
 0x57c   :  { %15125 = vst [vmem:[#allocation119_spill] sm:$0xff] %v13234_v45  ;;  %v4606_v22 = vadd.f32 %v4605_v37, %v4493_v29  ;;  %v4495_v7 = vadd.f32 %v4494_v42, %v13175_v6  ;;  %7674 = vmatpush2.bf16.msra.mxu1 %v10668_v26  ;;  %v5419_v50 = vmax.f32 %v4604_v39, 0.0  ;;  %v10688_v39 = vld [vmem:[#allocation17 + $0x28c] ss:$12 sps:$4 sm:$0xff]  }
 0x57d   :  { %v4607_v53 = vpop.f32.mrf.mxu1  ;;  %v4498_v12 = vpop.f32.mrf.mxu0  ;;  %5175 = vmatmul.mubr.bf16.gmra.mxu0 %v12835_v47  ;;  %7675 = vmatprep.subr.bf16.mxu1 %v10676_v0 }
 0x57e   :  { %v5430_v19 = vmax.f32 %v4606_v22, 0.0  ;;  %v4608_v17 = vadd.f32 %v4607_v53, %v4495_v7  ;;  %v4499_v1 = vadd.f32 %v4498_v12, %v13169_v56  ;;  %5184 = vmatprep.mubr.bf16.mxu0 %v12859_v58  ;;  %7563 = vmatpush2.bf16.msra.mxu0 %v10671_v10  ;;  %v10683_v10 = vld [vmem:[#allocation17 + $0x108] ss:$12 sps:$4 sm:$0xff]  }
 0x57f   :  { %v4611_v8 = vpop.f32.mrf.mxu1  ;;  %5288 = vmatmul.mubr.bf16.gmra.mxu1 %v12833_v11  ;;  %v4500_v32 = vpop.f32.mrf.mxu0  ;;  %7564 = vmatprep.subr.bf16.mxu0 %v10679_v46  ;;  %v10691_v22 = vld [vmem:[#allocation17 + $0xf4] ss:$12 sps:$4 sm:$0xff]  }
 0x580   :  { %v13241_v26 = vpack.c.bf16 %v5430_v19, %v5418_v41  ;;  %v5431_v47 = vmax.f32 %v4608_v17, 0.0  ;;  %v4612_v30 = vadd.f32 %v4611_v8, %v4499_v1  ;;  %v4501_v52 = vadd.f32 %v4500_v32, %v13175_v6  ;;  %7676 = vmatpush2.bf16.msra.mxu1 %v10674_v5  ;;  %5297 = vmatprep.mubr.bf16.mxu1 %v15073_v40  ;;  %v10686_v53 = vld [vmem:[#allocation17 + $0x288] ss:$12 sps:$4 sm:$0xff]  }
 0x581   :  { %v4613_v58 = vpop.f32.mrf.mxu1  ;;  %v4502_v0 = vpop.f32.mrf.mxu0  ;;  %7677 = vmatprep.subr.bf16.mxu1 %v10682_v36  ;;  %v10694_v36 = vld [vmem:[#allocation17 + $0x274] ss:$12 sps:$4 sm:$0xff]  }
 0x582   :  { %15126 = vst [vmem:[#allocation120_spill] sm:$0xff] %v13241_v26  ;;  %v4614_v29 = vadd.f32 %v4613_v58, %v4501_v52  ;;  %v4503_v11 = vadd.f32 %v4502_v0, %v13169_v56  ;;  %7565 = vmatpush2.bf16.msra.mxu0 %v10677_v24  ;;  %v13246_v37 = vpack.c.bf16 %v5431_v47, %v5419_v50  ;;  %v5442_v19 = vmax.f32 %v4612_v30, 0.0  ;;  %v10689_v50 = vld [vmem:[#allocation17 + $0xf0] ss:$12 sps:$4 sm:$0xff]   ;;  %v15145_v26 = vld [vmem:[#allocation90_spill] sm:$0xff] }
 0x583   :  { %v4615_v42 = vpop.f32.mrf.mxu1  ;;  %v4504_v46 = vpop.f32.mrf.mxu0  ;;  %7566 = vmatprep.subr.bf16.mxu0 %v10685_v63  ;;  %v10697_v47 = vld [vmem:[#allocation17 + $0xdc] ss:$12 sps:$4 sm:$0xff]  }
 0x584   :  { %15127 = vst [vmem:[#allocation121_spill] sm:$0xff] %v13246_v37  ;;  %v4616_v7 = vadd.f32 %v4615_v42, %v4503_v11  ;;  %v4505_v5 = vadd.f32 %v4504_v46, %v13175_v6  ;;  %7678 = vmatpush2.bf16.msra.mxu1 %v10680_v4  ;;  %v5443_v8 = vmax.f32 %v4614_v29, 0.0  ;;  %v10692_v58 = vld [vmem:[#allocation17 + $0x270] ss:$12 sps:$4 sm:$0xff]   ;;  %v10695_v11 = vld [vmem:[#allocation17 + $0xd8] ss:$12 sps:$4 sm:$0xff]  }
 0x585   :  { %v4617_v12 = vpop.f32.mrf.mxu1  ;;  %v4508_v41 = vpop.f32.mrf.mxu0  ;;  %5185 = vmatmul.mubr.bf16.gmra.mxu0 %v12863_v13  ;;  %7679 = vmatprep.subr.bf16.mxu1 %v10688_v39  ;;  %v10700_v39 = vld [vmem:[#allocation17 + $0x25c] ss:$12 sps:$4 sm:$0xff]  }
 0x586   :  { %v5454_v17 = vmax.f32 %v4616_v7, 0.0  ;;  %v4618_v1 = vadd.f32 %v4617_v12, %v4505_v5  ;;  %v4509_v24 = vadd.f32 %v4508_v41, %v13169_v56  ;;  %5194 = vmatprep.mubr.bf16.mxu0 %v12884_v25  ;;  %7567 = vmatpush2.bf16.msra.mxu0 %v10683_v10  ;;  %v10706_v41 = vld [vmem:[#allocation17 + $0x244] ss:$12 sps:$4 sm:$0xff]  }
 0x587   :  { %v4621_v32 = vpop.f32.mrf.mxu1  ;;  %5298 = vmatmul.mubr.bf16.gmra.mxu1 %v12861_v48  ;;  %v4510_v63 = vpop.f32.mrf.mxu0  ;;  %7568 = vmatprep.subr.bf16.mxu0 %v10691_v22  ;;  %v10703_v22 = vld [vmem:[#allocation17 + $0xc4] ss:$12 sps:$4 sm:$0xff]  }
 0x588   :  { %v13253_v52 = vpack.c.bf16 %v5454_v17, %v5442_v19  ;;  %v5455_v13 = vmax.f32 %v4618_v1, 0.0  ;;  %v4622_v4 = vadd.f32 %v4621_v32, %v4509_v24  ;;  %v4511_v30 = vadd.f32 %v4510_v63, %v13175_v6  ;;  %7680 = vmatpush2.bf16.msra.mxu1 %v10686_v53  ;;  %5307 = vmatprep.mubr.bf16.mxu1 %v15073_v40  ;;  %v10698_v40 = vld [vmem:[#allocation17 + $0x258] ss:$12 sps:$4 sm:$0xff]   ;;  %v10701_v24 = vld [vmem:[#allocation17 + $0xc0] ss:$12 sps:$4 sm:$0xff]  }
 0x589   :  { %v4623_v25 = vpop.f32.mrf.mxu1  ;;  %v4512_v0 = vpop.f32.mrf.mxu0  ;;  %7681 = vmatprep.subr.bf16.mxu1 %v10694_v36  ;;  %v10709_v63 = vld [vmem:[#allocation17 + $0x3ac] ss:$12 sps:$4 sm:$0xff]  }
 0x58a   :  { %15128 = vst [vmem:[#allocation122_spill] sm:$0xff] %v13253_v52  ;;  %v4624_v29 = vadd.f32 %v4623_v25, %v4511_v30  ;;  %v4513_v48 = vadd.f32 %v4512_v0, %v13169_v56  ;;  %7569 = vmatpush2.bf16.msra.mxu0 %v10689_v50  ;;  %v13258_v10 = vpack.c.bf16 %v5455_v13, %v5443_v8  ;;  %v5466_v36 = vmax.f32 %v4622_v4, 0.0  ;;  %v10704_v30 = vld [vmem:[#allocation17 + $0x240] ss:$12 sps:$4 sm:$0xff]  }
 0x58b   :  { %v4625_v42 = vpop.f32.mrf.mxu1  ;;  %v4514_v46 = vpop.f32.mrf.mxu0  ;;  %7570 = vmatprep.subr.bf16.mxu0 %v10697_v47  ;;  %v10712_v0 = vld [vmem:[#allocation17 + $0x52c] ss:$12 sps:$4 sm:$0xff]  }
 0x58c   :  { %15129 = vst [vmem:[#allocation123_spill] sm:$0xff] %v13258_v10  ;;  %v4626_v7 = vadd.f32 %v4625_v42, %v4513_v48  ;;  %v4515_v5 = vadd.f32 %v4514_v46, %v13175_v6  ;;  %7682 = vmatpush2.bf16.msra.mxu1 %v10692_v58  ;;  %v5467_v50 = vmax.f32 %v4624_v29, 0.0  ;;  %v10707_v29 = vld [vmem:[#allocation17 + $0x3a8] ss:$12 sps:$4 sm:$0xff]  }
 0x58d   :  { %v4627_v53 = vpop.f32.mrf.mxu1  ;;  %v4518_v12 = vpop.f32.mrf.mxu0  ;;  %5195 = vmatmul.mubr.bf16.gmra.mxu0 %v12888_v28  ;;  %7683 = vmatprep.subr.bf16.mxu1 %v10700_v39  ;;  %v10715_v46 = vld [vmem:[#allocation17 + $0x394] ss:$12 sps:$4 sm:$0xff]  }
 0x58e   :  { %v5478_v19 = vmax.f32 %v4626_v7, 0.0  ;;  %v4628_v17 = vadd.f32 %v4627_v53, %v4515_v5  ;;  %v4519_v1 = vadd.f32 %v4518_v12, %v13169_v56  ;;  %7571 = vmatpush2.bf16.msra.mxu0 %v10695_v11  ;;  %7574 = vmatprep.mubr.bf16.mxu0 %v12986_v18  ;;  %v10710_v5 = vld [vmem:[#allocation17 + $0x528] ss:$12 sps:$4 sm:$0xff]  }
 0x58f   :  { %v4631_v8 = vpop.f32.mrf.mxu1  ;;  %5308 = vmatmul.mubr.bf16.gmra.mxu1 %v12886_v57  ;;  %v4520_v32 = vpop.f32.mrf.mxu0  ;;  %7572 = vmatprep.subr.bf16.mxu0 %v10703_v22 }
 0x590   :  { %v13265_v47 = vpack.c.bf16 %v5478_v19, %v5466_v36  ;;  %v5479_v28 = vmax.f32 %v4628_v17, 0.0  ;;  %v4632_v13 = vadd.f32 %v4631_v8, %v4519_v1  ;;  %v4521_v4 = vadd.f32 %v4520_v32, %v13175_v6  ;;  %7684 = vmatpush2.bf16.msra.mxu1 %v10698_v40  ;;  %7687 = vmatprep.mubr.bf16.mxu1 %v13092_v59  ;;  %v10713_v19 = vld [vmem:[#allocation17 + $0x390] ss:$12 sps:$4 sm:$0xff]   ;;  %v10752_v59 = vld [vmem:[#allocation17 + $0x480] ss:$12 sps:$4 sm:$0xff]  }
 0x591   :  { %v4633_v58 = vpop.f32.mrf.mxu1  ;;  %v4522_v25 = vpop.f32.mrf.mxu0  ;;  %7685 = vmatprep.subr.bf16.mxu1 %v10706_v41  ;;  %v10721_v1 = vld [vmem:[#allocation17 + $0x37c] ss:$12 sps:$4 sm:$0xff]  }
 0x592   :  { %15130 = vst [vmem:[#allocation124_spill] sm:$0xff] %v13265_v47  ;;  %v4634_v39 = vadd.f32 %v4633_v58, %v4521_v4  ;;  %v4523_v57 = vadd.f32 %v4522_v25, %v13169_v56  ;;  %7573 = vmatpush2.bf16.msra.mxu0 %v10701_v24  ;;  %v13270_v48 = vpack.c.bf16 %v5479_v28, %v5467_v50  ;;  %v10718_v56 = vld [vmem:[#allocation17 + $0x514] ss:$12 sps:$4 sm:$0xff]   ;;  %v5490_v12 = vmax.f32 %v4632_v13, 0.0  ;;  %v10716_v32 = vld [vmem:[#allocation17 + $0x510] ss:$12 sps:$4 sm:$0xff]  }
 0x593   :  { %v4635_v11 = vpop.f32.mrf.mxu1  ;;  %v4524_v42 = vpop.f32.mrf.mxu0  ;;  %7768 = vmatprep.subr.bf16.mxu0 %v10709_v63  ;;  %v10724_v13 = vld [vmem:[#allocation17 + $0x4fc] ss:$12 sps:$4 sm:$0xff]   ;;  %v10719_v4 = vld [vmem:[#allocation17 + $0x378] ss:$12 sps:$4 sm:$0xff]  }
 0x594   :  { %15131 = vst [vmem:[#allocation125_spill] sm:$0xff] %v13270_v48  ;;  %v4636_v22 = vadd.f32 %v4635_v11, %v4523_v57  ;;  %v4525_v7 = vadd.f32 %v4524_v42, %v13175_v6  ;;  %7686 = vmatpush2.bf16.msra.mxu1 %v10704_v30  ;;  %v5491_v24 = vmax.f32 %v4634_v39, 0.0  ;;  %v10722_v39 = vld [vmem:[#allocation17 + $0x4f8] ss:$12 sps:$4 sm:$0xff]   ;;  %v10725_v42 = vld [vmem:[#allocation17 + $0x360] ss:$12 sps:$4 sm:$0xff]  }
 0x595   :  { %v4637_v40 = vpop.f32.mrf.mxu1  ;;  %v13273_v53 = vpop.f32.mrf.mxu0  ;;  %7575 = vmatmul.mubr.bf16.vlgmr.msra.gmra.mxu0 %v12982_v62  ;;  %7881 = vmatprep.subr.bf16.mxu1 %v10712_v0  ;;  %v10727_v0 = vld [vmem:[#allocation17 + $0x364] ss:$12 sps:$4 sm:$0xff]   ;;  %v10766_v62 = vld [vmem:[#allocation17 + $0x5d4] ss:$12 sps:$4 sm:$0xff]  }
 0x596   :  { %v5502_v41 = vmax.f32 %v4636_v22, 0.0  ;;  %v4638_v36 = vadd.f32 %v4637_v40, %v4525_v7  ;;  %7584 = vmatprep.mubr.bf16.mxu0 %v12998_v16  ;;  %7769 = vmatpush1.bf16.msra.mxu0 %v10707_v29  ;;  %v10730_v11 = vld [vmem:[#allocation17 + $0x4e4] ss:$12 sps:$4 sm:$0xff]   ;;  %v10733_v7 = vld [vmem:[#allocation17 + $0x34c] ss:$12 sps:$4 sm:$0xff]  }
 0x597   :  { %v13277_v17 = vpop.f32.mrf.mxu1  ;;  %7688 = vmatmul.mubr.bf16.vlgmr.msra.gmra.mxu1 %v13087_v55  ;;  %v13280_v6 = vpop.f32.mrf.mxu0  ;;  %7770 = vmatprep.subr.bf16.mxu0 %v10715_v46  ;;  %v15135_v55 = vld [vmem:[#allocation102_spill] sm:$0xff] }
 0x598   :  { %v13282_v50 = vpack.c.bf16 %v5502_v41, %v5490_v12  ;;  %v5503_v8 = vmax.f32 %v4638_v36, 0.0  ;;  %7697 = vmatprep.mubr.bf16.mxu1 %v13104_v44  ;;  %7882 = vmatpush1.bf16.msra.mxu1 %v10710_v5  ;;  %v10728_v5 = vld [vmem:[#allocation17 + $0x4e0] ss:$12 sps:$4 sm:$0xff]   ;;  %v10731_v41 = vld [vmem:[#allocation17 + $0x348] ss:$12 sps:$4 sm:$0xff]  }
 0x599   :  { %v13285_v63 = vpop.f32.mrf.mxu1  ;;  %v13287_v28 = vpop.f32.mrf.mxu0  ;;  %7883 = vmatprep.subr.bf16.mxu1 %v10718_v56  ;;  %v10736_v12 = vld [vmem:[#allocation17 + $0x4cc] ss:$12 sps:$4 sm:$0xff]  }
 0x59a   :  { %15132 = vst [vmem:[#allocation126_spill] sm:$0xff] %v13282_v50  ;;  %7771 = vmatpush1.bf16.msra.mxu0 %v10713_v19  ;;  %v13289_v30 = vpack.c.bf16 %v5503_v8, %v5491_v24  ;;  %v10734_v24 = vld [vmem:[#allocation17 + $0x4c8] ss:$12 sps:$4 sm:$0xff]  }
 0x59b   :  { %v13291_v58 = vpop.f32.mrf.mxu1  ;;  %v13293_v25 = vpop.f32.mrf.mxu0  ;;  %7772 = vmatprep.subr.bf16.mxu0 %v10721_v1  ;;  %v10739_v1 = vld [vmem:[#allocation17 + $0x334] ss:$12 sps:$4 sm:$0xff]   ;;  %v15141_v50 = vld [vmem:[#allocation104_spill] sm:$0xff] }
 0x59c   :  { %15133 = vst [vmem:[#allocation127_spill] sm:$0xff] %v13289_v30  ;;  %7884 = vmatpush1.bf16.msra.mxu1 %v10716_v32  ;;  %v10764_v30 = vld [vmem:[#allocation17 + $0x5d0] ss:$12 sps:$4 sm:$0xff]  }
 0x59d   :  { %v13295_v57 = vpop.f32.mrf.mxu1  ;;  %v13297_v29 = vpop.f32.mrf.mxu0  ;;  %7585 = vmatmul.mubr.bf16.gmra.mxu0 %v12994_v3  ;;  %7885 = vmatprep.subr.bf16.mxu1 %v10724_v13  ;;  %v10742_v13 = vld [vmem:[#allocation17 + $0x4b4] ss:$12 sps:$4 sm:$0xff]  }
 0x59e   :  { %7594 = vmatprep.mubr.bf16.mxu0 %v13010_v15  ;;  %7773 = vmatpush1.bf16.msra.mxu0 %v10719_v4  ;;  %v10737_v4 = vld [vmem:[#allocation17 + $0x330] ss:$12 sps:$4 sm:$0xff]  }
 0x59f   :  { %v13301_v46 = vpop.f32.mrf.mxu1  ;;  %7698 = vmatmul.mubr.bf16.gmra.mxu1 %v13099_v20  ;;  %v13304_v22 = vpop.f32.mrf.mxu0  ;;  %7774 = vmatprep.subr.bf16.mxu0 %v10727_v0 }
 0x5a0   :  { %7707 = vmatprep.mubr.bf16.mxu1 %v13116_v61  ;;  %7886 = vmatpush1.bf16.msra.mxu1 %v10722_v39 }
 0x5a1   :  { %v13307_v40 = vpop.f32.mrf.mxu1  ;;  %v13309_v56 = vpop.f32.mrf.mxu0  ;;  %7887 = vmatprep.subr.bf16.mxu1 %v10730_v11  ;;  %v10745_v11 = vld [vmem:[#allocation17 + $0x31c] ss:$12 sps:$4 sm:$0xff]  }
 0x5a2   :  { %7775 = vmatpush1.bf16.msra.mxu0 %v10725_v42  ;;  %v10740_v42 = vld [vmem:[#allocation17 + $0x4b0] ss:$12 sps:$4 sm:$0xff]  }
 0x5a3   :  { %v13311_v36 = vpop.f32.mrf.mxu1  ;;  %v13313_v19 = vpop.f32.mrf.mxu0  ;;  %7776 = vmatprep.subr.bf16.mxu0 %v10733_v7 }
 0x5a4   :  { %7888 = vmatpush1.bf16.msra.mxu1 %v10728_v5 }
 0x5a5   :  { %v13315_v8 = vpop.f32.mrf.mxu1  ;;  %v13317_v32 = vpop.f32.mrf.mxu0  ;;  %7595 = vmatmul.mubr.bf16.gmra.mxu0 %v13006_v21  ;;  %7889 = vmatprep.subr.bf16.mxu1 %v10736_v12  ;;  %v10748_v12 = vld [vmem:[#allocation17 + $0x49c] ss:$12 sps:$4 sm:$0xff]   ;;  %v15136_v21 = vld [vmem:[#allocation105_spill] sm:$0xff] }
 0x5a6   :  { %7604 = vmatprep.mubr.bf16.mxu0 %v13022_v54  ;;  %7777 = vmatpush1.bf16.msra.mxu0 %v10731_v41  ;;  %v10743_v41 = vld [vmem:[#allocation17 + $0x318] ss:$12 sps:$4 sm:$0xff]  }
 0x5a7   :  { %v13321_v0 = vpop.f32.mrf.mxu1  ;;  %7708 = vmatmul.mubr.bf16.gmra.mxu1 %v13111_v38  ;;  %v13324_v39 = vpop.f32.mrf.mxu0  ;;  %7778 = vmatprep.subr.bf16.mxu0 %v10739_v1  ;;  %v10751_v38 = vld [vmem:[#allocation17 + $0x304] ss:$12 sps:$4 sm:$0xff]  }
 0x5a8   :  { %7717 = vmatprep.mubr.bf16.mxu1 %v13128_v60  ;;  %7890 = vmatpush1.bf16.msra.mxu1 %v10734_v24  ;;  %v10746_v1 = vld [vmem:[#allocation17 + $0x498] ss:$12 sps:$4 sm:$0xff]  }
 0x5a9   :  { %v13327_v7 = vpop.f32.mrf.mxu1  ;;  %v13329_v5 = vpop.f32.mrf.mxu0  ;;  %7891 = vmatprep.subr.bf16.mxu1 %v10742_v13  ;;  %v10754_v60 = vld [vmem:[#allocation17 + $0x484] ss:$12 sps:$4 sm:$0xff]  }
 0x5aa   :  { %7779 = vmatpush1.bf16.msra.mxu0 %v10737_v4  ;;  %v15134_v13 = vld [vmem:[#allocation89_spill] sm:$0xff] }
 0x5ab   :  { %v13331_v61 = vpop.f32.mrf.mxu1  ;;  %v13333_v20 = vpop.f32.mrf.mxu0  ;;  %7780 = vmatprep.subr.bf16.mxu0 %v10745_v11  ;;  %v10749_v4 = vld [vmem:[#allocation17 + $0x300] ss:$12 sps:$4 sm:$0xff]  }
 0x5ac   :  { %7892 = vmatpush1.bf16.msra.mxu1 %v10740_v42  ;;  %v10757_v42 = vld [vmem:[#allocation17 + $0x46c] ss:$12 sps:$4 sm:$0xff]  }
 0x5ad   :  { %v13335_v44 = vpop.f32.mrf.mxu1  ;;  %v13337_v24 = vpop.f32.mrf.mxu0  ;;  %7605 = vmatmul.mubr.bf16.gmra.mxu0 %v13018_v43  ;;  %7893 = vmatprep.subr.bf16.mxu1 %v10748_v12 }
 0x5ae   :  { %7614 = vmatprep.mubr.bf16.mxu0 %v15134_v13  ;;  %7781 = vmatpush1.bf16.msra.mxu0 %v10743_v41  ;;  %v10760_v13 = vld [vmem:[#allocation17 + $0x5ec] ss:$12 sps:$4 sm:$0xff]   ;;  %v10755_v41 = vld [vmem:[#allocation17 + $0x468] ss:$12 sps:$4 sm:$0xff]  }
 0x5af   :  { %v13341_v54 = vpop.f32.mrf.mxu1  ;;  %7718 = vmatmul.mubr.bf16.gmra.mxu1 %v15135_v55  ;;  %v13344_v11 = vpop.f32.mrf.mxu0  ;;  %7782 = vmatprep.subr.bf16.mxu0 %v10751_v38  ;;  %v10763_v55 = vld [vmem:[#allocation17 + $0x454] ss:$12 sps:$4 sm:$0xff]  }
 0x5b0   :  { %7727 = vmatprep.mubr.bf16.mxu1 %v15136_v21  ;;  %7894 = vmatpush1.bf16.msra.mxu1 %v10746_v1  ;;  %v10758_v38 = vld [vmem:[#allocation17 + $0x5e8] ss:$12 sps:$4 sm:$0xff]  }
 0x5b1   :  { %v13347_v15 = vpop.f32.mrf.mxu1  ;;  %v13349_v12 = vpop.f32.mrf.mxu0  ;;  %7895 = vmatprep.subr.bf16.mxu1 %v10754_v60  ;;  %v15138_v21 = vld [vmem:[#allocation88_spill] sm:$0xff]  ;;  %v15139_v60 = vld [vmem:[#allocation91_spill] sm:$0xff] }
 0x5b2   :  { %7783 = vmatpush1.bf16.msra.mxu0 %v10749_v4  ;;  %v10761_v4 = vld [vmem:[#allocation17 + $0x450] ss:$12 sps:$4 sm:$0xff]  }
 0x5b3   :  { %v13351_v43 = vpop.f32.mrf.mxu1  ;;  %v13353_v3 = vpop.f32.mrf.mxu0  ;;  %7784 = vmatprep.subr.bf16.mxu0 %v10757_v42 }
 0x5b4   :  { %7896 = vmatpush1.bf16.msra.mxu1 %v10752_v59  ;;  %v10769_v59 = vld [vmem:[#allocation17 + $0x43c] ss:$12 sps:$4 sm:$0xff]  }
 0x5b5   :  { %v13355_v16 = vpop.f32.mrf.mxu1  ;;  %v13357_v1 = vpop.f32.mrf.mxu0  ;;  %7615 = vmatmul.mubr.bf16.gmra.mxu0 %v15138_v21  ;;  %7897 = vmatprep.subr.bf16.mxu1 %v10760_v13 }
 0x5b6   :  { %15137 = vst [vmem:[#allocation128_spill] sm:$0xff] %v13357_v1  ;;  %7624 = vmatprep.mubr.bf16.mxu0 %v15139_v60  ;;  %7785 = vmatpush2.bf16.msra.mxu0 %v10755_v41  ;;  %v10772_v60 = vld [vmem:[#allocation17 + $0x5bc] ss:$12 sps:$4 sm:$0xff]   ;;  %v10767_v41 = vld [vmem:[#allocation17 + $0x438] ss:$12 sps:$4 sm:$0xff]  }
 0x5b7   :  { %v13361_v18 = vpop.f32.mrf.mxu1  ;;  %7728 = vmatmul.mubr.bf16.gmra.mxu1 %v15141_v50  ;;  %v13364_v42 = vpop.f32.mrf.mxu0  ;;  %7786 = vmatprep.subr.bf16.mxu0 %v10763_v55  ;;  %v10775_v50 = vld [vmem:[#allocation17 + $0x424] ss:$12 sps:$4 sm:$0xff]  }
 0x5b8   :  { %15140 = vst [vmem:[#allocation129_spill] sm:$0xff] %v13361_v18  ;;  %7737 = vmatprep.mubr.bf16.mxu1 %v13152_v2  ;;  %7898 = vmatpush2.bf16.msra.mxu1 %v10758_v38  ;;  %v15143_v55 = vld [vmem:[#allocation37_spill] sm:$0xff]  ;;  %v10770_v2 = vld [vmem:[#allocation17 + $0x5b8] ss:$12 sps:$4 sm:$0xff]  }
 0x5b9   :  { %v13367_v47 = vpop.f32.mrf.mxu1  ;;  %v13369_v13 = vpop.f32.mrf.mxu0  ;;  %7899 = vmatprep.subr.bf16.mxu1 %v10766_v62  ;;  %v2492_v52 = vsub.s32 7, %v15143_v55  ;;  %v10778_v62 = vld [vmem:[#allocation17 + $0x5a4] ss:$12 sps:$4 sm:$0xff]   ;;  %v10773_v18 = vld [vmem:[#allocation17 + $0x420] ss:$12 sps:$4 sm:$0xff]  }
 0x5ba   :  { %7787 = vmatpush2.bf16.msra.mxu0 %v10761_v4  ;;  %v15146_v4 = vld [vmem:[#allocation93_spill] sm:$0xff] }
 0x5bb   :  { %v13371_v21 = vpop.f32.mrf.mxu1  ;;  %v13373_v48 = vpop.f32.mrf.mxu0  ;;  %7788 = vmatprep.subr.bf16.mxu0 %v10769_v59  ;;  %v15148_v59 = vld [vmem:[#allocation106_spill] sm:$0xff] }
 0x5bc   :  { %15142 = vst [vmem:[#allocation130_spill] sm:$0xff] %v13371_v21  ;;  %7900 = vmatpush2.bf16.msra.mxu1 %v10764_v30  ;;  %v10781_v30 = vld [vmem:[#allocation17 + $0x40c] ss:$12 sps:$4 sm:$0xff]   ;;  %v13388_v21 = vrot.slane %v13166_v35, %v2492_v52 }
 0x5bd   :  { %v13376_v38 = vpop.f32.mrf.mxu1  ;;  %v13378_v10 = vpop.f32.mrf.mxu0  ;;  %7625 = vmatmul.mubr.bf16.gmra.mxu0 %v15145_v26  ;;  %7901 = vmatprep.subr.bf16.mxu1 %v10772_v60  ;;  %v10776_v60 = vld [vmem:[#allocation17 + $0x5a0] ss:$12 sps:$4 sm:$0xff]  }
 0x5be   :  { %15144 = vst [vmem:[#allocation131_spill] sm:$0xff] %v13378_v10  ;;  %7634 = vmatprep.mubr.bf16.mxu0 %v15146_v4  ;;  %7789 = vmatpush2.bf16.msra.mxu0 %v10767_v41  ;;  %v15150_v10 = vld [vmem:[#allocation109_spill] sm:$0xff]  ;;  %v4677_v52 = vadd.f32 %v13280_v6, %v13388_v21 }
 0x5bf   :  { %v13382_v37 = vpop.f32.mrf.mxu1  ;;  %7738 = vmatmul.mubr.bf16.gmra.mxu1 %v15148_v59  ;;  %v13385_v27 = vpop.f32.mrf.mxu0  ;;  %7790 = vmatprep.subr.bf16.mxu0 %v10775_v50  ;;  %v10784_v41 = vld [vmem:[#allocation17 + $0x58c] ss:$12 sps:$4 sm:$0xff]   ;;  %v4681_v59 = vadd.f32 %v13293_v25, %v13388_v21  ;;  %v2488_v50 = vsub.s32 6, %v15143_v55  ;;  %v15156_v25 = vld [vmem:[#allocation92_spill] sm:$0xff] }
 0x5c0   :  { %15147 = vst [vmem:[#allocation132_spill] sm:$0xff] %v13382_v37  ;;  %15149 = vst [vmem:[#allocation133_spill] sm:$0xff] %v13385_v27  ;;  %7747 = vmatprep.mubr.bf16.mxu1 %v15150_v10  ;;  %7902 = vmatpush2.bf16.msra.mxu1 %v10770_v2  ;;  %v10779_v37 = vld [vmem:[#allocation17 + $0x408] ss:$12 sps:$4 sm:$0xff]  }
 0x5c1   :  { %v13391_v26 = vpop.f32.mrf.mxu1  ;;  %v13393_v4 = vpop.f32.mrf.mxu0  ;;  %7903 = vmatprep.subr.bf16.mxu1 %v10778_v62  ;;  %v10787_v2 = vld [vmem:[#allocation17 + $0x3f4] ss:$12 sps:$4 sm:$0xff]   ;;  %v4794_v55 = vadd.f32 %v13295_v57, %v4681_v59  ;;  %v10788_v57 = vld [vmem:[#allocation17 + $0x570] ss:$12 sps:$4 sm:$0xff]  }
 0x5c2   :  { %15151 = vst [vmem:[#allocation134_spill] sm:$0xff] %v13391_v26  ;;  %15152 = vst [vmem:[#allocation135_spill] sm:$0xff] %v13393_v4  ;;  %7791 = vmatpush2.bf16.msra.mxu0 %v10773_v18  ;;  %v10782_v10 = vld [vmem:[#allocation17 + $0x588] ss:$12 sps:$4 sm:$0xff]  }
 0x5c3   :  { %v13398_v27 = vpop.f32.mrf.mxu1  ;;  %v13400_v35 = vpop.f32.mrf.mxu0  ;;  %7792 = vmatprep.subr.bf16.mxu0 %v10781_v30  ;;  %v10790_v18 = vld [vmem:[#allocation17 + $0x574] ss:$12 sps:$4 sm:$0xff]   ;;  %v10785_v30 = vld [vmem:[#allocation17 + $0x3f0] ss:$12 sps:$4 sm:$0xff]  }
 0x5c4   :  { %15153 = vst [vmem:[#allocation136_spill] sm:$0xff] %v13398_v27  ;;  %7904 = vmatpush2.bf16.msra.mxu1 %v10776_v60  ;;  %v15157_v27 = vld [vmem:[#allocation95_spill] sm:$0xff]  ;;  %v11150_v26 = vld [vmem:[#allocation16] sm:$0xff]  ;;  %v15159_v60 = vld [vmem:[#allocation108_spill] sm:$0xff] }
 0x5c5   :  { %v13404_v62 = vpop.f32.mrf.mxu1  ;;  %v13406_v4 = vpop.f32.mrf.mxu0  ;;  %7635 = vmatmul.mubr.bf16.gmra.mxu0 %v15156_v25  ;;  %7905 = vmatprep.subr.bf16.mxu1 %v10784_v41  ;;  %v13411_v1 = vrot.slane %v11150_v26, %v2488_v50  ;;  %v4790_v41 = vadd.f32 %v13285_v63, %v4677_v52  ;;  %v10796_v50 = vld [vmem:[#allocation17 + $0x55c] ss:$12 sps:$4 sm:$0xff]  }
 0x5c6   :  { %15154 = vst [vmem:[#allocation137_spill] sm:$0xff] %v13404_v62  ;;  %15155 = vst [vmem:[#allocation138_spill] sm:$0xff] %v13406_v4  ;;  %7644 = vmatprep.mubr.bf16.mxu0 %v15157_v27  ;;  %7793 = vmatpush2.bf16.msra.mxu0 %v10779_v37  ;;  %v10793_v4 = vld [vmem:[#allocation17 + $0x3dc] ss:$12 sps:$4 sm:$0xff]   ;;  %v10791_v27 = vld [vmem:[#allocation17 + $0x3d8] ss:$12 sps:$4 sm:$0xff]  }
 0x5c7   :  { %v13413_v6 = vpop.f32.mrf.mxu1  ;;  %7748 = vmatmul.mubr.bf16.gmra.mxu1 %v15159_v60  ;;  %v13416_v62 = vpop.f32.mrf.mxu0  ;;  %7794 = vmatprep.subr.bf16.mxu0 %v10787_v2  ;;  %v4679_v37 = vadd.f32 %v13287_v28, %v13411_v1  ;;  %v5337_v60 = vmax.f32 %v4794_v55, 0.0  ;;  %v4691_v2 = vadd.f32 %v13313_v19, %v13388_v21  ;;  %v4675_v63 = vadd.f32 %v13273_v53, %v13411_v1  ;;  %v10799_v28 = vld [vmem:[#allocation17 + $0x3c4] ss:$12 sps:$4 sm:$0xff]  }
 0x5c8   :  { %15158 = vst [vmem:[#allocation139_spill] sm:$0xff] %v13413_v6  ;;  %7757 = vmatprep.mubr.bf16.mxu1 %v13186_v49  ;;  %7906 = vmatpush2.bf16.msra.mxu1 %v10782_v10  ;;  %v5325_v49 = vmax.f32 %v4790_v41, 0.0  ;;  %v10794_v55 = vld [vmem:[#allocation17 + $0x558] ss:$12 sps:$4 sm:$0xff]  }
 0x5c9   :  { %v13422_v59 = vpop.f32.mrf.mxu1  ;;  %v13424_v26 = vpop.f32.mrf.mxu0  ;;  %7907 = vmatprep.subr.bf16.mxu1 %v10790_v18  ;;  %v4687_v18 = vadd.f32 %v13304_v22, %v13388_v21  ;;  %v4792_v25 = vadd.f32 %v13291_v58, %v4679_v37  ;;  %v15161_v6 = vld [vmem:[#allocation94_spill] sm:$0xff]  ;;  %v10802_v53 = vld [vmem:[#allocation17 + $0x544] ss:$12 sps:$4 sm:$0xff]   ;;  %v10797_v22 = vld [vmem:[#allocation17 + $0x3c0] ss:$12 sps:$4 sm:$0xff]   ;;  %v4788_v41 = vadd.f32 %v13277_v17, %v4675_v63 }
 0x5ca   :  { %7795 = vmatpush2.bf16.msra.mxu0 %v10785_v30  ;;  %v10805_v37 = vld [vmem:[#allocation17 + $0x6ac] ss:$12 sps:$4 sm:$0xff]  }
 0x5cb   :  { %v13430_v10 = vpop.f32.mrf.mxu1  ;;  %v13432_v52 = vpop.f32.mrf.mxu0  ;;  %7796 = vmatprep.subr.bf16.mxu0 %v10793_v4  ;;  %v13444_v4 = vpack.c.bf16 %v5337_v60, %v5325_v49  ;;  %v4689_v49 = vadd.f32 %v13309_v56, %v13411_v1  ;;  %v10808_v56 = vld [vmem:[#allocation17 + $0x694] ss:$12 sps:$4 sm:$0xff]  }
 0x5cc   :  { %15160 = vst [vmem:[#allocation140_spill] sm:$0xff] %v13430_v10  ;;  %7908 = vmatpush2.bf16.msra.mxu1 %v10788_v57  ;;  %v4804_v10 = vadd.f32 %v13315_v8, %v4691_v2  ;;  %v5336_v8 = vmax.f32 %v4792_v25, 0.0  ;;  %v10817_v2 = vld [vmem:[#allocation17 + $0x82c] ss:$12 sps:$4 sm:$0xff]  }
 0x5cd   :  { %v13437_v19 = vpop.f32.mrf.mxu1  ;;  %v13439_v30 = vpop.f32.mrf.mxu0  ;;  %7645 = vmatmul.mubr.bf16.gmra.mxu0 %v15161_v6  ;;  %7909 = vmatprep.subr.bf16.mxu1 %v10796_v50  ;;  %15162 = vst [vmem:[#allocation141_spill] sm:$0xff] %v13444_v4  ;;  %v4800_v50 = vadd.f32 %v13307_v40, %v4687_v18  ;;  %v10803_v40 = vld [vmem:[#allocation17 + $0x6a8] ss:$12 sps:$4 sm:$0xff]   ;;  %v5324_v18 = vmax.f32 %v4788_v41, 0.0 }
 0x5ce   :  { %7797 = vmatpush2.bf16.msra.mxu0 %v10791_v27  ;;  %7800 = vmatprep.mubr.bf16.mxu0 %v13198_v23  ;;  %v10800_v27 = vld [vmem:[#allocation17 + $0x540] ss:$12 sps:$4 sm:$0xff]   ;;  %v5361_v63 = vmax.f32 %v4804_v10, 0.0  ;;  %v10815_v10 = vld [vmem:[#allocation17 + $0x828] ss:$12 sps:$4 sm:$0xff]  }
 0x5cf   :  { %v13447_v57 = vpop.f32.mrf.mxu1  ;;  %7758 = vmatmul.mubr.bf16.gmra.mxu1 %v13181_v9  ;;  %v13450_v58 = vpop.f32.mrf.mxu0  ;;  %7798 = vmatprep.subr.bf16.mxu0 %v10799_v28  ;;  %v4701_v28 = vadd.f32 %v13333_v20, %v13388_v21  ;;  %v5349_v9 = vmax.f32 %v4800_v50, 0.0  ;;  %v13470_v23 = vpack.c.bf16 %v5336_v8, %v5324_v18  ;;  %v4802_v20 = vadd.f32 %v13311_v36, %v4689_v49  ;;  %v10806_v50 = vld [vmem:[#allocation17 + $0x690] ss:$12 sps:$4 sm:$0xff]  }
 0x5d0   :  { %7910 = vmatpush2.bf16.msra.mxu1 %v10794_v55  ;;  %7913 = vmatprep.mubr.bf16.mxu1 %v13444_v4  ;;  %v4685_v55 = vadd.f32 %v13297_v29, %v13411_v1  ;;  %v10823_v29 = vld [vmem:[#allocation17 + $0x814] ss:$12 sps:$4 sm:$0xff]   ;;  %v10811_v49 = vld [vmem:[#allocation17 + $0x67c] ss:$12 sps:$4 sm:$0xff]  }
 0x5d1   :  { %v13456_v60 = vpop.f32.mrf.mxu1  ;;  %v13458_v17 = vpop.f32.mrf.mxu0  ;;  %7911 = vmatprep.subr.bf16.mxu1 %v10802_v53  ;;  %v4697_v53 = vadd.f32 %v13324_v39, %v13388_v21  ;;  %15163 = vst [vmem:[#allocation142_spill] sm:$0xff] %v13470_v23  ;;  %v13480_v39 = vpack.c.bf16 %v5361_v63, %v5349_v9  ;;  %v4699_v9 = vadd.f32 %v13329_v5, %v13411_v1  ;;  %v10814_v5 = vld [vmem:[#allocation17 + $0x664] ss:$12 sps:$4 sm:$0xff]  }
 0x5d2   :  { %7799 = vmatpush2.bf16.msra.mxu0 %v10797_v22 }
 0x5d3   :  { %v13464_v25 = vpop.f32.mrf.mxu1  ;;  %v13466_v4 = vpop.f32.mrf.mxu0  ;;  %7994 = vmatprep.subr.bf16.mxu0 %v10805_v37  ;;  %v4814_v37 = vadd.f32 %v13335_v44, %v4701_v28  ;;  %15164 = vst [vmem:[#allocation143_spill] sm:$0xff] %v13480_v39  ;;  %v10821_v44 = vld [vmem:[#allocation17 + $0x810] ss:$12 sps:$4 sm:$0xff]   ;;  %v5360_v28 = vmax.f32 %v4802_v20, 0.0 }
 0x5d4   :  { %7912 = vmatpush2.bf16.msra.mxu1 %v10800_v27  ;;  %v4798_v27 = vadd.f32 %v13301_v46, %v4685_v55  ;;  %v4711_v55 = vadd.f32 %v13353_v3, %v13388_v21  ;;  %v4812_v3 = vadd.f32 %v13331_v61, %v4699_v9  ;;  %v10820_v9 = vld [vmem:[#allocation17 + $0x64c] ss:$12 sps:$4 sm:$0xff]  }
 0x5d5   :  { %v13473_v22 = vpop.f32.mrf.mxu1  ;;  %v13475_v41 = vpop.f32.mrf.mxu0  ;;  %7801 = vmatmul.mubr.bf16.vlgmr.msra.gmra.mxu0 %v13193_v33  ;;  %8107 = vmatprep.subr.bf16.mxu1 %v10817_v2  ;;  %v4810_v2 = vadd.f32 %v13327_v7, %v4697_v53  ;;  %v5385_v18 = vmax.f32 %v4814_v37, 0.0  ;;  %v10809_v7 = vld [vmem:[#allocation17 + $0x678] ss:$12 sps:$4 sm:$0xff]   ;;  %v4695_v53 = vadd.f32 %v13317_v32, %v13411_v1 }
 0x5d6   :  { %7810 = vmatprep.mubr.bf16.mxu0 %v13210_v31  ;;  %7995 = vmatpush1.bf16.msra.mxu0 %v10803_v40  ;;  %v10829_v40 = vld [vmem:[#allocation17 + $0x7fc] ss:$12 sps:$4 sm:$0xff]   ;;  %v10827_v37 = vld [vmem:[#allocation17 + $0x7f8] ss:$12 sps:$4 sm:$0xff]  }
 0x5d7   :  { %v13483_v8 = vpop.f32.mrf.mxu1  ;;  %7914 = vmatmul.mubr.bf16.vlgmr.msra.gmra.mxu1 %v13470_v23  ;;  %v13486_v36 = vpop.f32.mrf.mxu0  ;;  %7996 = vmatprep.subr.bf16.mxu0 %v10808_v56  ;;  %v5348_v56 = vmax.f32 %v4798_v27, 0.0  ;;  %v10835_v32 = vld [vmem:[#allocation17 + $0x7e4] ss:$12 sps:$4 sm:$0xff]  }
 0x5d8   :  { %7923 = vmatprep.mubr.bf16.mxu1 %v13480_v39  ;;  %8108 = vmatpush1.bf16.msra.mxu1 %v10815_v10  ;;  %v5373_v39 = vmax.f32 %v4810_v2, 0.0  ;;  %v10812_v2 = vld [vmem:[#allocation17 + $0x660] ss:$12 sps:$4 sm:$0xff]  }
 0x5d9   :  { %v13492_v63 = vpop.f32.mrf.mxu1  ;;  %v13494_v46 = vpop.f32.mrf.mxu0  ;;  %8109 = vmatprep.subr.bf16.mxu1 %v10823_v29  ;;  %v4707_v29 = vadd.f32 %v13344_v11, %v13388_v21  ;;  %v13506_v23 = vpack.c.bf16 %v5360_v28, %v5348_v56 }
 0x5da   :  { %7997 = vmatpush1.bf16.msra.mxu0 %v10806_v50  ;;  %v13516_v11 = vpack.c.bf16 %v5385_v18, %v5373_v39  ;;  %v4709_v39 = vadd.f32 %v13349_v12, %v13411_v1  ;;  %v10826_v12 = vld [vmem:[#allocation17 + $0x634] ss:$12 sps:$4 sm:$0xff]  }
 0x5db   :  { %v13500_v10 = vpop.f32.mrf.mxu1  ;;  %v13502_v20 = vpop.f32.mrf.mxu0  ;;  %7998 = vmatprep.subr.bf16.mxu0 %v10811_v49  ;;  %15165 = vst [vmem:[#allocation144_spill] sm:$0xff] %v13506_v23  ;;  %v4824_v49 = vadd.f32 %v13355_v16, %v4711_v55  ;;  %v10833_v16 = vld [vmem:[#allocation17 + $0x7e0] ss:$12 sps:$4 sm:$0xff]   ;;  %v5384_v55 = vmax.f32 %v4812_v3, 0.0 }
 0x5dc   :  { %8110 = vmatpush1.bf16.msra.mxu1 %v10821_v44  ;;  %15166 = vst [vmem:[#allocation145_spill] sm:$0xff] %v13516_v11  ;;  %v4808_v44 = vadd.f32 %v13321_v0, %v4695_v53  ;;  %v4721_v53 = vadd.f32 %v13373_v48, %v13388_v21  ;;  %v4822_v48 = vadd.f32 %v13351_v43, %v4709_v39  ;;  %v10832_v39 = vld [vmem:[#allocation17 + $0x61c] ss:$12 sps:$4 sm:$0xff]  }
 0x5dd   :  { %v13509_v50 = vpop.f32.mrf.mxu1  ;;  %v13511_v27 = vpop.f32.mrf.mxu0  ;;  %7811 = vmatmul.mubr.bf16.gmra.mxu0 %v13205_v14  ;;  %8111 = vmatprep.subr.bf16.mxu1 %v10829_v40  ;;  %v4820_v40 = vadd.f32 %v13347_v15, %v4707_v29  ;;  %v5409_v56 = vmax.f32 %v4824_v49, 0.0  ;;  %v10818_v15 = vld [vmem:[#allocation17 + $0x648] ss:$12 sps:$4 sm:$0xff]   ;;  %v4705_v29 = vadd.f32 %v13337_v24, %v13411_v1  ;;  %v10859_v14 = vld [vmem:[#allocation17 + $0x784] ss:$12 sps:$4 sm:$0xff]  }
 0x5de   :  { %7820 = vmatprep.mubr.bf16.mxu0 %v13222_v51  ;;  %7999 = vmatpush1.bf16.msra.mxu0 %v10809_v7  ;;  %v10841_v7 = vld [vmem:[#allocation17 + $0x7cc] ss:$12 sps:$4 sm:$0xff]   ;;  %v10839_v49 = vld [vmem:[#allocation17 + $0x7c8] ss:$12 sps:$4 sm:$0xff]  }
 0x5df   :  { %v13519_v28 = vpop.f32.mrf.mxu1  ;;  %7924 = vmatmul.mubr.bf16.gmra.mxu1 %v13506_v23  ;;  %v13522_v61 = vpop.f32.mrf.mxu0  ;;  %8000 = vmatprep.subr.bf16.mxu0 %v10814_v5  ;;  %v5372_v5 = vmax.f32 %v4808_v44, 0.0  ;;  %v10847_v24 = vld [vmem:[#allocation17 + $0x7b4] ss:$12 sps:$4 sm:$0xff]  }
 0x5e0   :  { %7933 = vmatprep.mubr.bf16.mxu1 %v13516_v11  ;;  %8112 = vmatpush1.bf16.msra.mxu1 %v10827_v37  ;;  %v5397_v11 = vmax.f32 %v4820_v40, 0.0  ;;  %v10824_v40 = vld [vmem:[#allocation17 + $0x630] ss:$12 sps:$4 sm:$0xff]  }
 0x5e1   :  { %v13528_v18 = vpop.f32.mrf.mxu1  ;;  %v13530_v0 = vpop.f32.mrf.mxu0  ;;  %8113 = vmatprep.subr.bf16.mxu1 %v10835_v32  ;;  %v4717_v32 = vadd.f32 %v13364_v42, %v13388_v21  ;;  %v13542_v23 = vpack.c.bf16 %v5384_v55, %v5372_v5 }
 0x5e2   :  { %8001 = vmatpush1.bf16.msra.mxu0 %v10812_v2  ;;  %v13552_v42 = vpack.c.bf16 %v5409_v56, %v5397_v11  ;;  %v4719_v11 = vadd.f32 %v13369_v13, %v13411_v1  ;;  %v10838_v13 = vld [vmem:[#allocation17 + $0x604] ss:$12 sps:$4 sm:$0xff]  }
 0x5e3   :  { %v13536_v37 = vpop.f32.mrf.mxu1  ;;  %v13538_v3 = vpop.f32.mrf.mxu0  ;;  %8002 = vmatprep.subr.bf16.mxu0 %v10820_v9  ;;  %15167 = vst [vmem:[#allocation146_spill] sm:$0xff] %v13542_v23  ;;  %v4834_v9 = vadd.f32 %v13376_v38, %v4721_v53  ;;  %v10845_v38 = vld [vmem:[#allocation17 + $0x7b0] ss:$12 sps:$4 sm:$0xff]   ;;  %v5408_v53 = vmax.f32 %v4822_v48, 0.0 }
 0x5e4   :  { %8114 = vmatpush1.bf16.msra.mxu1 %v10833_v16  ;;  %15168 = vst [vmem:[#allocation147_spill] sm:$0xff] %v13552_v42  ;;  %v4818_v16 = vadd.f32 %v13341_v54, %v4705_v29  ;;  %v4731_v29 = vadd.f32 %v13400_v35, %v13388_v21  ;;  %v15172_v35 = vld [vmem:[#allocation130_spill] sm:$0xff] }
 0x5e5   :  { %v13545_v2 = vpop.f32.mrf.mxu1  ;;  %v13547_v44 = vpop.f32.mrf.mxu0  ;;  %7821 = vmatmul.mubr.bf16.gmra.mxu0 %v13217_v34  ;;  %8115 = vmatprep.subr.bf16.mxu1 %v10841_v7  ;;  %v4830_v7 = vadd.f32 %v13367_v47, %v4717_v32  ;;  %v5433_v5 = vmax.f32 %v4834_v9, 0.0  ;;  %v10830_v47 = vld [vmem:[#allocation17 + $0x618] ss:$12 sps:$4 sm:$0xff]  }
 0x5e6   :  { %7830 = vmatprep.mubr.bf16.mxu0 %v13234_v45  ;;  %8003 = vmatpush1.bf16.msra.mxu0 %v10818_v15  ;;  %v10853_v15 = vld [vmem:[#allocation17 + $0x79c] ss:$12 sps:$4 sm:$0xff]   ;;  %v10851_v9 = vld [vmem:[#allocation17 + $0x798] ss:$12 sps:$4 sm:$0xff]  }
 0x5e7   :  { %v13555_v55 = vpop.f32.mrf.mxu1  ;;  %7934 = vmatmul.mubr.bf16.gmra.mxu1 %v13542_v23  ;;  %v13558_v43 = vpop.f32.mrf.mxu0  ;;  %8004 = vmatprep.subr.bf16.mxu0 %v10826_v12  ;;  %v5396_v12 = vmax.f32 %v4818_v16, 0.0  ;;  %v15169_v32 = vld [vmem:[#allocation128_spill] sm:$0xff]  ;;  %v5421_v23 = vmax.f32 %v4830_v7, 0.0  ;;  %v15176_v7 = vld [vmem:[#allocation121_spill] sm:$0xff] }
 0x5e8   :  { %7943 = vmatprep.mubr.bf16.mxu1 %v13552_v42  ;;  %8116 = vmatpush1.bf16.msra.mxu1 %v10839_v49  ;;  %v4715_v49 = vadd.f32 %v15169_v32, %v13411_v1  ;;  %v15174_v32 = vld [vmem:[#allocation118_spill] sm:$0xff] }
 0x5e9   :  { %v13564_v56 = vpop.f32.mrf.mxu1  ;;  %v13566_v54 = vpop.f32.mrf.mxu0  ;;  %8117 = vmatprep.subr.bf16.mxu1 %v10847_v24  ;;  %v15170_v24 = vld [vmem:[#allocation133_spill] sm:$0xff]  ;;  %v13578_v34 = vpack.c.bf16 %v5408_v53, %v5396_v12 }
 0x5ea   :  { %8005 = vmatpush1.bf16.msra.mxu0 %v10824_v40  ;;  %v4727_v45 = vadd.f32 %v15170_v24, %v13388_v21  ;;  %v4832_v40 = vadd.f32 %v15172_v35, %v4719_v11  ;;  %v13588_v24 = vpack.c.bf16 %v5433_v5, %v5421_v23  ;;  %v15178_v53 = vld [vmem:[#allocation129_spill] sm:$0xff]  ;;  %v15181_v23 = vld [vmem:[#allocation135_spill] sm:$0xff] }
 0x5eb   :  { %v13572_v48 = vpop.f32.mrf.mxu1  ;;  %v13574_v42 = vpop.f32.mrf.mxu0  ;;  %8006 = vmatprep.subr.bf16.mxu0 %v10832_v39  ;;  %15171 = vst [vmem:[#allocation128_spill] sm:$0xff] %v13578_v34  ;;  %v15175_v39 = vld [vmem:[#allocation137_spill] sm:$0xff]  ;;  %v4828_v12 = vadd.f32 %v15178_v53, %v4715_v49  ;;  %v4729_v5 = vadd.f32 %v15181_v23, %v13411_v1  ;;  %v10850_v23 = vld [vmem:[#allocation17 + $0x754] ss:$12 sps:$4 sm:$0xff]  }
 0x5ec   :  { %8118 = vmatpush1.bf16.msra.mxu1 %v10845_v38  ;;  %v4844_v31 = vadd.f32 %v15175_v39, %v4731_v29  ;;  %15177 = vst [vmem:[#allocation130_spill] sm:$0xff] %v13588_v24  ;;  %v10836_v38 = vld [vmem:[#allocation17 + $0x600] ss:$12 sps:$4 sm:$0xff]  }
 0x5ed   :  { %v13581_v16 = vpop.f32.mrf.mxu1  ;;  %v13583_v51 = vpop.f32.mrf.mxu0  ;;  %7831 = vmatmul.mubr.bf16.gmra.mxu0 %v15174_v32  ;;  %8119 = vmatprep.subr.bf16.mxu1 %v10853_v15  ;;  %v10844_v35 = vld [vmem:[#allocation17 + $0x76c] ss:$12 sps:$4 sm:$0xff]  }
 0x5ee   :  { %15173 = vst [vmem:[#allocation133_spill] sm:$0xff] %v13583_v51  ;;  %7840 = vmatprep.mubr.bf16.mxu0 %v15176_v7  ;;  %8007 = vmatpush1.bf16.msra.mxu0 %v10830_v47  ;;  %v15180_v15 = vld [vmem:[#allocation134_spill] sm:$0xff]  ;;  %v10857_v29 = vld [vmem:[#allocation17 + $0x780] ss:$12 sps:$4 sm:$0xff]   ;;  %v5432_v47 = vmax.f32 %v4832_v40, 0.0 }
 0x5ef   :  { %v13591_v33 = vpop.f32.mrf.mxu1  ;;  %7944 = vmatmul.mubr.bf16.gmra.mxu1 %v13578_v34  ;;  %v13594_v11 = vpop.f32.mrf.mxu0  ;;  %8008 = vmatprep.subr.bf16.mxu0 %v10838_v13  ;;  %v4840_v32 = vadd.f32 %v15180_v15, %v4727_v45  ;;  %v10865_v53 = vld [vmem:[#allocation17 + $0x8ec] ss:$12 sps:$4 sm:$0xff]   ;;  %v5457_v34 = vmax.f32 %v4844_v31, 0.0  ;;  %v4741_v13 = vadd.f32 %v13432_v52, %v13388_v21  ;;  %v10842_v45 = vld [vmem:[#allocation17 + $0x768] ss:$12 sps:$4 sm:$0xff]   ;;  %v5420_v15 = vmax.f32 %v4828_v12, 0.0 }
 0x5f0   :  { %15179 = vst [vmem:[#allocation137_spill] sm:$0xff] %v13591_v33  ;;  %7953 = vmatprep.mubr.bf16.mxu1 %v13588_v24  ;;  %8120 = vmatpush1.bf16.msra.mxu1 %v10851_v9  ;;  %v15183_v9 = vld [vmem:[#allocation131_spill] sm:$0xff]  ;;  %v10863_v31 = vld [vmem:[#allocation17 + $0x8e8] ss:$12 sps:$4 sm:$0xff]  }
 0x5f1   :  { %v13600_v39 = vpop.f32.mrf.mxu1  ;;  %v13602_v49 = vpop.f32.mrf.mxu0  ;;  %8121 = vmatprep.subr.bf16.mxu1 %v10859_v14  ;;  %v4725_v24 = vadd.f32 %v15183_v9, %v13411_v1  ;;  %v5445_v6 = vmax.f32 %v4840_v32, 0.0  ;;  %v4737_v14 = vadd.f32 %v13416_v62, %v13388_v21  ;;  %v13614_v33 = vpack.c.bf16 %v5432_v47, %v5420_v15  ;;  %v15186_v52 = vld [vmem:[#allocation136_spill] sm:$0xff]  ;;  %v15189_v32 = vld [vmem:[#allocation123_spill] sm:$0xff] }
 0x5f2   :  { %15182 = vst [vmem:[#allocation129_spill] sm:$0xff] %v13602_v49  ;;  %8009 = vmatpush1.bf16.msra.mxu0 %v10836_v38  ;;  %v4842_v38 = vadd.f32 %v15186_v52, %v4729_v5  ;;  %v15188_v9 = vld [vmem:[#allocation120_spill] sm:$0xff] }
 0x5f3   :  { %v13608_v40 = vpop.f32.mrf.mxu1  ;;  %v13610_v7 = vpop.f32.mrf.mxu0  ;;  %8010 = vmatprep.subr.bf16.mxu0 %v10844_v35  ;;  %15185 = vst [vmem:[#allocation135_spill] sm:$0xff] %v13614_v33  ;;  %v4854_v35 = vadd.f32 %v13437_v19, %v4741_v13  ;;  %v13624_v62 = vpack.c.bf16 %v5457_v34, %v5445_v6  ;;  %v15191_v47 = vld [vmem:[#allocation132_spill] sm:$0xff]  ;;  %v10869_v19 = vld [vmem:[#allocation17 + $0x8d0] ss:$12 sps:$4 sm:$0xff]   ;;  %v4739_v34 = vadd.f32 %v13424_v26, %v13411_v1 }
 0x5f4   :  { %15184 = vst [vmem:[#allocation134_spill] sm:$0xff] %v13608_v40  ;;  %8122 = vmatpush1.bf16.msra.mxu1 %v10857_v29  ;;  %v10871_v40 = vld [vmem:[#allocation17 + $0x8d4] ss:$12 sps:$4 sm:$0xff]   ;;  %v10848_v29 = vld [vmem:[#allocation17 + $0x750] ss:$12 sps:$4 sm:$0xff]   ;;  %v4838_v15 = vadd.f32 %v15191_v47, %v4725_v24  ;;  %v5456_v13 = vmax.f32 %v4842_v38, 0.0 }
 0x5f5   :  { %v13617_v12 = vpop.f32.mrf.mxu1  ;;  %v13619_v51 = vpop.f32.mrf.mxu0  ;;  %7841 = vmatmul.mubr.bf16.gmra.mxu0 %v15188_v9  ;;  %8123 = vmatprep.subr.bf16.mxu1 %v10865_v53  ;;  %15190 = vst [vmem:[#allocation136_spill] sm:$0xff] %v13624_v62  ;;  %v10856_v52 = vld [vmem:[#allocation17 + $0x73c] ss:$12 sps:$4 sm:$0xff]   ;;  %v4850_v53 = vadd.f32 %v13422_v59, %v4737_v14  ;;  %v5481_v47 = vmax.f32 %v4854_v35, 0.0  ;;  %v10854_v59 = vld [vmem:[#allocation17 + $0x738] ss:$12 sps:$4 sm:$0xff]  }
 0x5f6   :  { %15187 = vst [vmem:[#allocation131_spill] sm:$0xff] %v13619_v51  ;;  %7850 = vmatprep.mubr.bf16.mxu0 %v15189_v32  ;;  %8011 = vmatpush2.bf16.msra.mxu0 %v10842_v45  ;;  %v10877_v45 = vld [vmem:[#allocation17 + $0x8bc] ss:$12 sps:$4 sm:$0xff]   ;;  %v5444_v14 = vmax.f32 %v4838_v15, 0.0  ;;  %v10862_v26 = vld [vmem:[#allocation17 + $0x724] ss:$12 sps:$4 sm:$0xff]  }
 0x5f7   :  { %v13627_v49 = vpop.f32.mrf.mxu1  ;;  %7954 = vmatmul.mubr.bf16.gmra.mxu1 %v13614_v33  ;;  %v13630_v5 = vpop.f32.mrf.mxu0  ;;  %8012 = vmatprep.subr.bf16.mxu0 %v10850_v23  ;;  %v4751_v23 = vadd.f32 %v13466_v4, %v13388_v21  ;;  %v5469_v32 = vmax.f32 %v4850_v53, 0.0  ;;  %v10875_v35 = vld [vmem:[#allocation17 + $0x8b8] ss:$12 sps:$4 sm:$0xff]   ;;  %v13653_v15 = vld [vmem:[#allocation16 + $0x8] sm:$0xf] }
 0x5f8   :  { %15192 = vst [vmem:[#allocation132_spill] sm:$0xff] %v13627_v49  ;;  %7963 = vmatprep.mubr.bf16.mxu1 %v13624_v62  ;;  %8124 = vmatpush2.bf16.msra.mxu1 %v10863_v31  ;;  %v15193_v31 = vld [vmem:[#allocation138_spill] sm:$0xff]  ;;  %v13650_v9 = vpack.c.bf16 %v5456_v13, %v5444_v14  ;;  %v15196_v4 = vld [vmem:[#allocation140_spill] sm:$0xff]  ;;  %v10860_v13 = vld [vmem:[#allocation17 + $0x720] ss:$12 sps:$4 sm:$0xff]  }
 0x5f9   :  { %v13636_v6 = vpop.f32.mrf.mxu1  ;;  %v13638_v24 = vpop.f32.mrf.mxu0  ;;  %8125 = vmatprep.subr.bf16.mxu1 %v10871_v40  ;;  %v4735_v62 = vadd.f32 %v15193_v31, %v13411_v1  ;;  %v4747_v40 = vadd.f32 %v13450_v58, %v13388_v21  ;;  %v4864_v53 = vadd.f32 %v13473_v22, %v4751_v23  ;;  %v15198_v51 = vld [vmem:[#allocation38_spill] sm:$0xff]  ;;  %v15199_v58 = vld [vmem:[#allocation125_spill] sm:$0xff] }
 0x5fa   :  { %8013 = vmatpush2.bf16.msra.mxu0 %v10848_v29  ;;  %15195 = vst [vmem:[#allocation148_spill] sm:$0xff] %v13650_v9  ;;  %v4852_v29 = vadd.f32 %v15196_v4, %v4739_v34  ;;  %v13663_v21 = vrot.slane %v13653_v15, %v15198_v51  ;;  %v15201_v34 = vld [vmem:[#allocation139_spill] sm:$0xff]  ;;  %v10868_v22 = vld [vmem:[#allocation17 + $0x70c] ss:$12 sps:$4 sm:$0xff]  }
 0x5fb   :  { %v13644_v38 = vpop.f32.mrf.mxu1  ;;  %v13646_v33 = vpop.f32.mrf.mxu0  ;;  %8014 = vmatprep.subr.bf16.mxu0 %v10856_v52  ;;  %v10883_v52 = vld [vmem:[#allocation17 + $0x8a4] ss:$12 sps:$4 sm:$0xff]   ;;  %v4848_v14 = vadd.f32 %v15201_v34, %v4735_v62  ;;  %v4860_v23 = vadd.f32 %v13456_v60, %v4747_v40  ;;  %v4749_v62 = vadd.f32 %v13458_v17, %v13411_v1  ;;  %v10874_v17 = vld [vmem:[#allocation17 + $0x6f4] ss:$12 sps:$4 sm:$0xff]  }
 0x5fc   :  { %15194 = vst [vmem:[#allocation138_spill] sm:$0xff] %v13644_v38  ;;  %8126 = vmatpush2.bf16.msra.mxu1 %v10869_v19  ;;  %v15197_v38 = vld [vmem:[#allocation122_spill] sm:$0xff]  ;;  %v13666_v19 = vpack.c.bf16 %v5481_v47, %v5469_v32  ;;  %v10881_v32 = vld [vmem:[#allocation17 + $0x8a0] ss:$12 sps:$4 sm:$0xff]   ;;  %v5480_v47 = vmax.f32 %v4852_v29, 0.0  ;;  %v4903_v60 = vadd.f32 %v13486_v36, %v13663_v21 }
 0x5fd   :  { %v13655_v49 = vpop.f32.mrf.mxu1  ;;  %v13657_v31 = vpop.f32.mrf.mxu0  ;;  %7851 = vmatmul.mubr.bf16.gmra.mxu0 %v15197_v38  ;;  %8127 = vmatprep.subr.bf16.mxu1 %v10877_v45  ;;  %v4907_v38 = vadd.f32 %v13502_v20, %v13663_v21  ;;  %v10866_v20 = vld [vmem:[#allocation17 + $0x708] ss:$12 sps:$4 sm:$0xff]   ;;  %v5468_v40 = vmax.f32 %v4848_v14, 0.0  ;;  %v4862_v36 = vadd.f32 %v13464_v25, %v4749_v62  ;;  %v10872_v25 = vld [vmem:[#allocation17 + $0x6f0] ss:$12 sps:$4 sm:$0xff]  }
 0x5fe   :  { %7860 = vmatprep.mubr.bf16.mxu0 %v15199_v58  ;;  %8015 = vmatpush2.bf16.msra.mxu0 %v10854_v59  ;;  %15200 = vst [vmem:[#allocation140_spill] sm:$0xff] %v13666_v19  ;;  %v5493_v58 = vmax.f32 %v4860_v23, 0.0 }
 0x5ff   :  { %v13669_v4 = vpop.f32.mrf.mxu1  ;;  %7964 = vmatmul.mubr.bf16.gmra.mxu1 %v13650_v9  ;;  %v13672_v45 = vpop.f32.mrf.mxu0  ;;  %8016 = vmatprep.subr.bf16.mxu0 %v10862_v26  ;;  %v10889_v26 = vld [vmem:[#allocation17 + $0x88c] ss:$12 sps:$4 sm:$0xff]   ;;  %v5505_v9 = vmax.f32 %v4864_v53, 0.0  ;;  %v10887_v53 = vld [vmem:[#allocation17 + $0x888] ss:$12 sps:$4 sm:$0xff]   ;;  %v13693_v51 = vpack.c.bf16 %v5480_v47, %v5468_v40 }
 0x600   :  { %7973 = vmatprep.mubr.bf16.mxu1 %v13666_v19  ;;  %8128 = vmatpush2.bf16.msra.mxu1 %v10875_v35  ;;  %v4745_v35 = vadd.f32 %v13439_v30, %v13411_v1 }
 0x601   :  { %v13680_v59 = vpop.f32.mrf.mxu1  ;;  %v13682_v34 = vpop.f32.mrf.mxu0  ;;  %8129 = vmatprep.subr.bf16.mxu1 %v10883_v52  ;;  %v5020_v52 = vadd.f32 %v13509_v50, %v4907_v38  ;;  %15203 = vst [vmem:[#allocation149_spill] sm:$0xff] %v13693_v51  ;;  %v5016_v50 = vadd.f32 %v13492_v63, %v4903_v60  ;;  %v15206_v38 = vld [vmem:[#allocation127_spill] sm:$0xff]  ;;  %v13707_v23 = vpack.c.bf16 %v5505_v9, %v5493_v58 }
 0x602   :  { %8017 = vmatpush2.bf16.msra.mxu0 %v10860_v13  ;;  %v15204_v13 = vld [vmem:[#allocation40_spill] sm:$0xff]  ;;  %v4917_v60 = vadd.f32 %v13538_v3, %v13663_v21  ;;  %v10890_v9 = vld [vmem:[#allocation17 + $0x870] ss:$12 sps:$4 sm:$0xff]  }
 0x603   :  { %v13688_v29 = vpop.f32.mrf.mxu1  ;;  %v13690_v19 = vpop.f32.mrf.mxu0  ;;  %8018 = vmatprep.subr.bf16.mxu0 %v10868_v22  ;;  %v13698_v14 = vrot.slane %v13653_v15, %v15204_v13  ;;  %v10892_v22 = vld [vmem:[#allocation17 + $0x874] ss:$12 sps:$4 sm:$0xff]   ;;  %15207 = vst [vmem:[#allocation150_spill] sm:$0xff] %v13707_v23  ;;  %v5339_v63 = vmax.f32 %v5020_v52, 0.0  ;;  %v4913_v52 = vadd.f32 %v13522_v61, %v13663_v21  ;;  %v10878_v3 = vld [vmem:[#allocation17 + $0x6d8] ss:$12 sps:$4 sm:$0xff]  }
 0x604   :  { %15202 = vst [vmem:[#allocation139_spill] sm:$0xff] %v13688_v29  ;;  %8130 = vmatpush2.bf16.msra.mxu1 %v10881_v32  ;;  %v15205_v29 = vld [vmem:[#allocation124_spill] sm:$0xff]  ;;  %v4858_v32 = vadd.f32 %v13447_v57, %v4745_v35  ;;  %v5504_v57 = vmax.f32 %v4862_v36, 0.0 }
 0x605   :  { %v13700_v1 = vpop.f32.mrf.mxu1  ;;  %v13702_v30 = vpop.f32.mrf.mxu0  ;;  %7861 = vmatmul.mubr.bf16.gmra.mxu0 %v15205_v29  ;;  %8131 = vmatprep.subr.bf16.mxu1 %v10889_v26  ;;  %v4905_v47 = vadd.f32 %v13494_v46, %v13698_v14  ;;  %v10880_v26 = vld [vmem:[#allocation17 + $0x6dc] ss:$12 sps:$4 sm:$0xff]   ;;  %v4901_v46 = vadd.f32 %v13475_v41, %v13698_v14  ;;  %v10886_v41 = vld [vmem:[#allocation17 + $0x6c4] ss:$12 sps:$4 sm:$0xff]  }
 0x606   :  { %7870 = vmatprep.mubr.bf16.mxu0 %v15206_v38  ;;  %8019 = vmatpush2.bf16.msra.mxu0 %v10866_v20  ;;  %v10895_v35 = vld [vmem:[#allocation17 + $0x85c] ss:$12 sps:$4 sm:$0xff]   ;;  %v5030_v38 = vadd.f32 %v13545_v2, %v4917_v60  ;;  %v10884_v2 = vld [vmem:[#allocation17 + $0x6c0] ss:$12 sps:$4 sm:$0xff]  }
 0x607   :  { %v13712_v62 = vpop.f32.mrf.mxu1  ;;  %7974 = vmatmul.mubr.bf16.gmra.mxu1 %v13693_v51  ;;  %v13715_v40 = vpop.f32.mrf.mxu0  ;;  %8020 = vmatprep.subr.bf16.mxu0 %v10874_v17  ;;  %v5327_v17 = vmax.f32 %v5016_v50, 0.0  ;;  %v5492_v51 = vmax.f32 %v4858_v32, 0.0  ;;  %v5014_v61 = vadd.f32 %v13483_v8, %v4901_v46  ;;  %v4927_v8 = vadd.f32 %v13574_v42, %v13663_v21  ;;  %v10896_v46 = vld [vmem:[#allocation17 + $0x840] ss:$12 sps:$4 sm:$0xff]  }
 0x608   :  { %7983 = vmatprep.mubr.bf16.mxu1 %v13707_v23  ;;  %8132 = vmatpush2.bf16.msra.mxu1 %v10887_v53  ;;  %v5018_v53 = vadd.f32 %v13500_v10, %v4905_v47  ;;  %v15210_v10 = vld [vmem:[#allocation126_spill] sm:$0xff]  ;;  %v10898_v47 = vld [vmem:[#allocation17 + $0x844] ss:$12 sps:$4 sm:$0xff]  }
 0x609   :  { %v13722_v58 = vpop.f32.mrf.mxu1  ;;  %v13724_v20 = vpop.f32.mrf.mxu0  ;;  %8133 = vmatprep.subr.bf16.mxu1 %v10892_v22  ;;  %v13734_v29 = vpack.c.bf16 %v5339_v63, %v5327_v17  ;;  %v10893_v22 = vld [vmem:[#allocation17 + $0x858] ss:$12 sps:$4 sm:$0xff]   ;;  %v13736_v50 = vpack.c.bf16 %v5504_v57, %v5492_v51  ;;  %v4915_v51 = vadd.f32 %v13530_v0, %v13698_v14  ;;  %v10899_v57 = vld [vmem:[#allocation17 + $0x170] ss:$12 sps:$4 sm:$0xff]   ;;  %v4911_v17 = vadd.f32 %v13511_v27, %v13698_v14 }
 0x60a   :  { %8021 = vmatpush2.bf16.msra.mxu0 %v10872_v25  ;;  %v5338_v63 = vmax.f32 %v5018_v53, 0.0  ;;  %v4923_v0 = vadd.f32 %v13558_v43, %v13663_v21  ;;  %v10903_v43 = vld [vmem:[#allocation17 + $0x158] ss:$12 sps:$4 sm:$0xff]  }
 0x60b   :  { %v13729_v23 = vpop.f32.mrf.mxu1  ;;  %v13731_v36 = vpop.f32.mrf.mxu0  ;;  %8022 = vmatprep.subr.bf16.mxu0 %v10880_v26  ;;  %15208 = vst [vmem:[#allocation151_spill] sm:$0xff] %v13734_v29  ;;  %15209 = vst [vmem:[#allocation152_spill] sm:$0xff] %v13736_v50  ;;  %v5026_v26 = vadd.f32 %v13528_v18, %v4913_v52  ;;  %v5363_v18 = vmax.f32 %v5030_v38, 0.0  ;;  %v5028_v38 = vadd.f32 %v13536_v37, %v4915_v51 }
 0x60c   :  { %8134 = vmatpush2.bf16.msra.mxu1 %v10890_v9  ;;  %v5024_v37 = vadd.f32 %v13519_v28, %v4911_v17  ;;  %v4925_v51 = vadd.f32 %v13566_v54, %v13698_v14  ;;  %v10907_v17 = vld [vmem:[#allocation17 + $0x140] ss:$12 sps:$4 sm:$0xff]   ;;  %v4937_v54 = vadd.f32 %v13610_v7, %v13663_v21 }
 0x60d   :  { %v13739_v25 = vpop.f32.mrf.mxu1  ;;  %v13741_v32 = vpop.f32.mrf.mxu0  ;;  %7871 = vmatmul.mubr.bf16.gmra.mxu0 %v15210_v10  ;;  %8135 = vmatprep.subr.bf16.mxu1 %v10895_v35  ;;  %v5326_v35 = vmax.f32 %v5014_v61, 0.0  ;;  %v5351_v53 = vmax.f32 %v5026_v26, 0.0  ;;  %v15214_v26 = vld [vmem:[#allocation37_spill] sm:$0xff] }
 0x60e   :  { %8023 = vmatpush2.bf16.msra.mxu0 %v10878_v3  ;;  %8026 = vmatprep.mubr.bf16.mxu0 %v13734_v29  ;;  %v10901_v3 = vld [vmem:[#allocation17 + $0x2f0] ss:$12 sps:$4 sm:$0xff]  }
 0x60f   :  { %v13750_v60 = vpop.f32.mrf.mxu1  ;;  %7984 = vmatmul.mubr.bf16.gmra.mxu1 %v13736_v50  ;;  %v13753_v9 = vpop.f32.mrf.mxu0  ;;  %8024 = vmatprep.subr.bf16.mxu0 %v10886_v41  ;;  %v10900_v41 = vld [vmem:[#allocation17 + $0xb0] ss:$12 sps:$4 sm:$0xff]   ;;  %v13763_v50 = vpack.c.bf16 %v5338_v63, %v5326_v35 }
 0x610   :  { %8136 = vmatpush2.bf16.msra.mxu1 %v10893_v22  ;;  %v5040_v22 = vadd.f32 %v13581_v16, %v4927_v8  ;;  %v15212_v29 = vld [vmem:[#allocation39_spill] sm:$0xff]  ;;  %v5036_v16 = vadd.f32 %v13564_v56, %v4923_v0 }
 0x611   :  { %v13759_v52 = vpop.f32.mrf.mxu1  ;;  %v13761_v42 = vpop.f32.mrf.mxu0  ;;  %8137 = vmatprep.subr.bf16.mxu1 %v10898_v47  ;;  %15211 = vst [vmem:[#allocation153_spill] sm:$0xff] %v13763_v50  ;;  %v13773_v10 = vrot.slane %v13653_v15, %v15212_v29  ;;  %v13775_v47 = vpack.c.bf16 %v5363_v18, %v5351_v53  ;;  %v10904_v18 = vld [vmem:[#allocation17 + $0x98] ss:$12 sps:$4 sm:$0xff]   ;;  %v5350_v53 = vmax.f32 %v5024_v37, 0.0 }
 0x612   :  { %8025 = vmatpush2.bf16.msra.mxu0 %v10884_v2  ;;  %v15215_v2 = vsub.s32 3, %v15214_v26  ;;  %v5387_v28 = vmax.f32 %v5040_v22, 0.0  ;;  %v5038_v26 = vadd.f32 %v13572_v48, %v4925_v51  ;;  %v10911_v48 = vld [vmem:[#allocation17 + $0x128] ss:$12 sps:$4 sm:$0xff]   ;;  %v5050_v51 = vadd.f32 %v13617_v12, %v4937_v54  ;;  %v15217_v54 = vld [vmem:[#allocation133_spill] sm:$0xff] }
 0x613   :  { %v13767_v61 = vpop.f32.mrf.mxu1  ;;  %v13769_v27 = vpop.f32.mrf.mxu0  ;;  %9648 = vmatprep.subr.bf16.mxu0 %v10899_v57  ;;  %15213 = vst [vmem:[#allocation154_spill] sm:$0xff] %v13775_v47  ;;  %v10912_v12 = vld [vmem:[#allocation17 + $0x68] ss:$12 sps:$4 sm:$0xff]  }
 0x614   :  { %v13780_v63 = vrot.slane %v13653_v15, %v15215_v2  ;;  %8138 = vmatpush2.bf16.msra.mxu1 %v10896_v46  ;;  %v5362_v15 = vmax.f32 %v5028_v38, 0.0  ;;  %v4921_v46 = vadd.f32 %v13547_v44, %v13698_v14  ;;  %v4933_v44 = vadd.f32 %v13594_v11, %v13663_v21 }
 0x615   :  { %v13786_v8 = vpop.f32.mrf.mxu1  ;;  %v5126_v57 = vpop.f32.mrf.mxu0  ;;  %8027 = vmatmul.mubr.bf16.vlgmr.msra.gmra.mxu0 %v13763_v50  ;;  %9712 = vmatprep.subr.bf16.mxu1 %v10901_v3  ;;  %v5375_v3 = vmax.f32 %v5036_v16, 0.0  ;;  %v5386_v50 = vmax.f32 %v5038_v26, 0.0 }
 0x616   :  { %8036 = vmatprep.mubr.bf16.mxu0 %v13775_v47  ;;  %9649 = vmatpush3.bf16.msra.mxu0 %v10900_v41  ;;  %v5127_v41 = vadd.f32 %v5126_v57, %v13773_v10  ;;  %v13800_v29 = vpack.c.bf16 %v5362_v15, %v5350_v53  ;;  %v5034_v7 = vadd.f32 %v13555_v55, %v4921_v46  ;;  %v15216_v15 = vld [vmem:[#allocation129_spill] sm:$0xff] }
 0x617   :  { %v5239_v35 = vpop.f32.mrf.mxu1  ;;  %v5128_v56 = vpop.f32.mrf.mxu0  ;;  %9650 = vmatprep.subr.bf16.mxu0 %v10903_v43  ;;  %v10908_v43 = vld [vmem:[#allocation17 + $0x80] ss:$12 sps:$4 sm:$0xff]   ;;  %v13803_v16 = vpack.c.bf16 %v5387_v28, %v5375_v3  ;;  %v5046_v55 = vadd.f32 %v13600_v39, %v4933_v44  ;;  %v4935_v46 = vadd.f32 %v15216_v15, %v13698_v14  ;;  %v10915_v39 = vld [vmem:[#allocation17 + $0x110] ss:$12 sps:$4 sm:$0xff]  }
 0x618   :  { %v5129_v0 = vadd.f32 %v5128_v56, %v13780_v63 }
 0x619   :  { %v5241_v38 = vpop.f32.mrf.mxu1  ;;  %v5130_v2 = vpop.f32.mrf.mxu0 }
 0x61a   :  { %v5131_v22 = vadd.f32 %v5130_v2, %v13773_v10  ;;  %9651 = vmatpush3.bf16.msra.mxu0 %v10904_v18  ;;  %v5242_v57 = vadd.f32 %v5241_v38, %v5129_v0  ;;  %v5240_v2 = vadd.f32 %v5239_v35, %v5127_v41  ;;  %v4931_v0 = vadd.f32 %v15217_v54, %v13698_v14 }
 0x61b   :  { %v5243_v56 = vpop.f32.mrf.mxu1  ;;  %v5132_v37 = vpop.f32.mrf.mxu0  ;;  %9652 = vmatprep.subr.bf16.mxu0 %v10907_v17  ;;  %v5374_v17 = vmax.f32 %v5034_v7, 0.0  ;;  %v4947_v35 = vadd.f32 %v13646_v33, %v13663_v21  ;;  %v5411_v41 = vmax.f32 %v5050_v51, 0.0 }
 0x61c   :  { %v5244_v47 = vadd.f32 %v5243_v56, %v5131_v22  ;;  %v5133_v11 = vadd.f32 %v5132_v37, %v13780_v63  ;;  %v5329_v38 = vmax.f32 %v5242_v57, 0.0  ;;  %v5328_v7 = vmax.f32 %v5240_v2, 0.0  ;;  %v10902_v57 = vld [vmem:[#allocation17 + $0x230] ss:$12 sps:$4 sm:$0xff]  }
 0x61d   :  { %v5245_v18 = vpop.f32.mrf.mxu1  ;;  %v5136_v13 = vpop.f32.mrf.mxu0  ;;  %8037 = vmatmul.mubr.bf16.gmra.mxu0 %v13800_v29  ;;  %v13817_v56 = vpack.c.bf16 %v5386_v50, %v5374_v17  ;;  %v4945_v17 = vadd.f32 %v13638_v24, %v13698_v14 }
 0x61e   :  { %v5246_v28 = vadd.f32 %v5245_v18, %v5133_v11  ;;  %8046 = vmatprep.mubr.bf16.mxu0 %v13803_v16  ;;  %9653 = vmatpush3.bf16.msra.mxu0 %v10908_v43  ;;  %v5340_v53 = vmax.f32 %v5244_v47, 0.0  ;;  %v4943_v43 = vadd.f32 %v13630_v5, %v13663_v21  ;;  %v5137_v37 = vadd.f32 %v5136_v13, %v13773_v10  ;;  %v15218_v18 = vld [vmem:[#allocation134_spill] sm:$0xff] }
 0x61f   :  { %v5249_v3 = vpop.f32.mrf.mxu1  ;;  %v5138_v26 = vpop.f32.mrf.mxu0  ;;  %9654 = vmatprep.subr.bf16.mxu0 %v10911_v48  ;;  %v5399_v47 = vmax.f32 %v5046_v55, 0.0  ;;  %v5048_v15 = vadd.f32 %v15218_v18, %v4935_v46  ;;  %v5060_v5 = vadd.f32 %v13655_v49, %v4947_v35  ;;  %v10905_v55 = vld [vmem:[#allocation17 + $0x2d8] ss:$12 sps:$4 sm:$0xff]   ;;  %v10916_v46 = vld [vmem:[#allocation17 + $0x50] ss:$12 sps:$4 sm:$0xff]  }
 0x620   :  { %v5341_v44 = vmax.f32 %v5246_v28, 0.0  ;;  %v5139_v22 = vadd.f32 %v5138_v26, %v13780_v63  ;;  %v15219_v28 = vld [vmem:[#allocation137_spill] sm:$0xff]  ;;  %v13830_v2 = vpack.c.bf16 %v5340_v53, %v5328_v7  ;;  %v5056_v24 = vadd.f32 %v13636_v6, %v4943_v43 }
 0x621   :  { %v5251_v11 = vpop.f32.mrf.mxu1  ;;  %v5140_v33 = vpop.f32.mrf.mxu0  ;;  %v5044_v50 = vadd.f32 %v15219_v28, %v4931_v0  ;;  %v10919_v0 = vld [vmem:[#allocation17 + $0xf8] ss:$12 sps:$4 sm:$0xff]   ;;  %v5410_v53 = vmax.f32 %v5048_v15, 0.0  ;;  %v5435_v18 = vmax.f32 %v5060_v5, 0.0  ;;  %v4957_v6 = vadd.f32 %v13690_v19, %v13663_v21 }
 0x622   :  { %v5141_v48 = vadd.f32 %v5140_v33, %v13773_v10  ;;  %v13824_v51 = vpack.c.bf16 %v5341_v44, %v5329_v38  ;;  %9655 = vmatpush3.bf16.msra.mxu0 %v10912_v12  ;;  %v5252_v26 = vadd.f32 %v5251_v11, %v5139_v22  ;;  %v13834_v12 = vpack.c.bf16 %v5411_v41, %v5399_v47  ;;  %v10906_v41 = vld [vmem:[#allocation17 + $0x218] ss:$12 sps:$4 sm:$0xff]   ;;  %v10909_v11 = vld [vmem:[#allocation17 + $0x2c0] ss:$12 sps:$4 sm:$0xff]  }
 0x623   :  { %v5253_v13 = vpop.f32.mrf.mxu1  ;;  %v5142_v54 = vpop.f32.mrf.mxu0  ;;  %9656 = vmatprep.subr.bf16.mxu0 %v10915_v39  ;;  %v5250_v44 = vadd.f32 %v5249_v3, %v5137_v37  ;;  %v15221_v39 = vld [vmem:[#allocation131_spill] sm:$0xff]  ;;  %v5398_v47 = vmax.f32 %v5044_v50, 0.0  ;;  %v10920_v15 = vld [vmem:[#allocation17 + $0x38] ss:$12 sps:$4 sm:$0xff]   ;;  %v4953_v50 = vadd.f32 %v13672_v45, %v13663_v21 }
 0x624   :  { %v5254_v33 = vadd.f32 %v5253_v13, %v5141_v48  ;;  %v5143_v38 = vadd.f32 %v5142_v54, %v13780_v63  ;;  %8139 = vmatprep.mubr.bf16.mxu1 %v13824_v51  ;;  %15220 = vst [vmem:[#allocation37_spill] sm:$0xff] %v13834_v12  ;;  %v4941_v22 = vadd.f32 %v15221_v39, %v13698_v14  ;;  %v15222_v48 = vld [vmem:[#allocation138_spill] sm:$0xff]  ;;  %v5353_v13 = vmax.f32 %v5252_v26, 0.0 }
 0x625   :  { %v5255_v49 = vpop.f32.mrf.mxu1  ;;  %v5146_v35 = vpop.f32.mrf.mxu0  ;;  %8047 = vmatmul.mubr.bf16.gmra.mxu0 %v13817_v56  ;;  %8140 = vmatmul.mubr.bf16.vlgmr.msra.gmra.mxu1 %v13830_v2  ;;  %v5058_v28 = vadd.f32 %v15222_v48, %v4945_v17  ;;  %v5352_v5 = vmax.f32 %v5250_v44, 0.0 }
 0x626   :  { %v5256_v7 = vadd.f32 %v5255_v49, %v5143_v38  ;;  %9713 = vmatpush3.bf16.msra.mxu1 %v10902_v57  ;;  %8056 = vmatprep.mubr.bf16.mxu0 %v13834_v12  ;;  %v5364_v3 = vmax.f32 %v5254_v33, 0.0  ;;  %v10922_v38 = vld [vmem:[#allocation17 + $0xe0] ss:$12 sps:$4 sm:$0xff]   ;;  %v5423_v49 = vmax.f32 %v5056_v24, 0.0  ;;  %v5147_v19 = vadd.f32 %v5146_v35, %v13773_v10  ;;  %v10913_v35 = vld [vmem:[#allocation17 + $0x2a8] ss:$12 sps:$4 sm:$0xff]  }
 0x627   :  { %v5259_v43 = vpop.f32.mrf.mxu1  ;;  %v5148_v37 = vpop.f32.mrf.mxu0  ;;  %9714 = vmatprep.subr.bf16.mxu1 %v10905_v55  ;;  %9657 = vmatpush3.bf16.msra.mxu0 %v10916_v46  ;;  %v13849_v55 = vpack.c.bf16 %v5410_v53, %v5398_v47  ;;  %v15223_v46 = vld [vmem:[#allocation132_spill] sm:$0xff]  ;;  %v5070_v24 = vadd.f32 %v13700_v1, %v4957_v6  ;;  %v10924_v53 = vld [vmem:[#allocation17 + $0x20] ss:$12 sps:$4 sm:$0xff]   ;;  %v5434_v47 = vmax.f32 %v5058_v28, 0.0  ;;  %v5066_v1 = vadd.f32 %v13680_v59, %v4953_v50 }
 0x628   :  { %v5365_v54 = vmax.f32 %v5256_v7, 0.0  ;;  %v5149_v57 = vadd.f32 %v5148_v37, %v13780_v63  ;;  %9658 = vmatprep.subr.bf16.mxu0 %v10919_v0  ;;  %v5054_v12 = vadd.f32 %v15223_v46, %v4941_v22  ;;  %v10910_v0 = vld [vmem:[#allocation17 + $0x200] ss:$12 sps:$4 sm:$0xff]   ;;  %v13856_v7 = vpack.c.bf16 %v5364_v3, %v5352_v5  ;;  %v10926_v5 = vld [vmem:[#allocation17 + $0x8] ss:$12 sps:$4 sm:$0xff]  }
 0x629   :  { %v5261_v33 = vpop.f32.mrf.mxu1  ;;  %v5150_v39 = vpop.f32.mrf.mxu0  ;;  %v13858_v37 = vpack.c.bf16 %v5435_v18, %v5423_v49  ;;  %v5260_v6 = vadd.f32 %v5259_v43, %v5147_v19  ;;  %v4951_v18 = vadd.f32 %v13657_v31, %v13698_v14  ;;  %v5459_v59 = vmax.f32 %v5070_v24, 0.0 }
 0x62a   :  { %v5151_v17 = vadd.f32 %v5150_v39, %v13773_v10  ;;  %v13853_v26 = vpack.c.bf16 %v5365_v54, %v5353_v13  ;;  %9715 = vmatpush3.bf16.msra.mxu1 %v10906_v41  ;;  %v5262_v22 = vadd.f32 %v5261_v33, %v5149_v57  ;;  %v10925_v41 = vld [vmem:[#allocation17 + $0xc8] ss:$12 sps:$4 sm:$0xff]   ;;  %v4967_v43 = vadd.f32 %v13731_v36, %v13663_v21  ;;  %v10931_v39 = vld [vmem:[#allocation17 + $0x470] ss:$12 sps:$4 sm:$0xff]  }
 0x62b   :  { %v5263_v45 = vpop.f32.mrf.mxu1  ;;  %v5152_v44 = vpop.f32.mrf.mxu0  ;;  %9716 = vmatprep.subr.bf16.mxu1 %v10909_v11  ;;  %9659 = vmatpush3.bf16.msra.mxu0 %v10920_v15  ;;  %v5422_v11 = vmax.f32 %v5054_v12, 0.0  ;;  %v4955_v15 = vadd.f32 %v13682_v34, %v13698_v14  ;;  %v10914_v57 = vld [vmem:[#allocation17 + $0x1e8] ss:$12 sps:$4 sm:$0xff]   ;;  %v10917_v12 = vld [vmem:[#allocation17 + $0x290] ss:$12 sps:$4 sm:$0xff]   ;;  %v5447_v46 = vmax.f32 %v5066_v1, 0.0 }
 0x62c   :  { %v5264_v48 = vadd.f32 %v5263_v45, %v5151_v17  ;;  %v5153_v13 = vadd.f32 %v5152_v44, %v13780_v63  ;;  %8149 = vmatprep.mubr.bf16.mxu1 %v13853_v26  ;;  %9660 = vmatprep.subr.bf16.mxu0 %v10922_v38  ;;  %v5377_v19 = vmax.f32 %v5262_v22, 0.0  ;;  %v4963_v17 = vadd.f32 %v13715_v40, %v13663_v21 }
 0x62d   :  { %v5265_v3 = vpop.f32.mrf.mxu1  ;;  %v5156_v54 = vpop.f32.mrf.mxu0  ;;  %8057 = vmatmul.mubr.bf16.gmra.mxu0 %v13849_v55  ;;  %8150 = vmatmul.mubr.bf16.gmra.mxu1 %v13856_v7  ;;  %v13872_v31 = vpack.c.bf16 %v5434_v47, %v5422_v11  ;;  %v5376_v36 = vmax.f32 %v5260_v6, 0.0  ;;  %v5064_v44 = vadd.f32 %v13669_v4, %v4951_v18  ;;  %v13886_v6 = vpack.c.bf16 %v5459_v59, %v5447_v46 }
 0x62e   :  { %v5266_v28 = vadd.f32 %v5265_v3, %v5153_v13  ;;  %8066 = vmatprep.mubr.bf16.mxu0 %v13858_v37  ;;  %9717 = vmatpush3.bf16.msra.mxu1 %v10910_v0  ;;  %v5388_v38 = vmax.f32 %v5264_v48, 0.0  ;;  %v5157_v0 = vadd.f32 %v5156_v54, %v13773_v10  ;;  %v10918_v48 = vld [vmem:[#allocation17 + $0x1d0] ss:$12 sps:$4 sm:$0xff]   ;;  %v5080_v13 = vadd.f32 %v13739_v25, %v4967_v43  ;;  %v10921_v3 = vld [vmem:[#allocation17 + $0x278] ss:$12 sps:$4 sm:$0xff]  }
 0x62f   :  { %v5269_v49 = vpop.f32.mrf.mxu1  ;;  %v5158_v50 = vpop.f32.mrf.mxu0  ;;  %9718 = vmatprep.subr.bf16.mxu1 %v10913_v35  ;;  %9661 = vmatpush3.bf16.msra.mxu0 %v10924_v53  ;;  %v15224_v35 = vld [vmem:[#allocation139_spill] sm:$0xff]  ;;  %15225 = vst [vmem:[#allocation129_spill] sm:$0xff] %v13886_v6  ;;  %v5076_v18 = vadd.f32 %v13722_v58, %v4963_v17  ;;  %v10923_v43 = vld [vmem:[#allocation17 + $0x1b8] ss:$12 sps:$4 sm:$0xff]   ;;  %v4961_v17 = vadd.f32 %v13702_v30, %v13698_v14 }
 0x630   :  { %v5389_v34 = vmax.f32 %v5266_v28, 0.0  ;;  %v5159_v33 = vadd.f32 %v5158_v50, %v13780_v63  ;;  %9662 = vmatprep.subr.bf16.mxu0 %v10925_v41  ;;  %v5068_v53 = vadd.f32 %v15224_v35, %v4955_v15  ;;  %v13884_v41 = vpack.c.bf16 %v5388_v38, %v5376_v36 }
 0x631   :  { %v5271_v24 = vpop.f32.mrf.mxu1  ;;  %v5160_v45 = vpop.f32.mrf.mxu0  ;;  %v5270_v15 = vadd.f32 %v5269_v49, %v5157_v0  ;;  %v4965_v50 = vadd.f32 %v13724_v20, %v13698_v14  ;;  %v5471_v36 = vmax.f32 %v5076_v18, 0.0 }
 0x632   :  { %v5161_v47 = vadd.f32 %v5160_v45, %v13773_v10  ;;  %v13881_v22 = vpack.c.bf16 %v5389_v34, %v5377_v19  ;;  %9719 = vmatpush3.bf16.msra.mxu1 %v10914_v57  ;;  %v5272_v4 = vadd.f32 %v5271_v24, %v5159_v33  ;;  %v5446_v57 = vmax.f32 %v5064_v44, 0.0  ;;  %v10927_v19 = vld [vmem:[#allocation17 + $0x260] ss:$12 sps:$4 sm:$0xff]  }
 0x633   :  { %v5273_v40 = vpop.f32.mrf.mxu1  ;;  %v5162_v1 = vpop.f32.mrf.mxu0  ;;  %9720 = vmatprep.subr.bf16.mxu1 %v10917_v12  ;;  %9663 = vmatpush3.bf16.msra.mxu0 %v10926_v5  ;;  %v5458_v38 = vmax.f32 %v5068_v53, 0.0  ;;  %v5483_v12 = vmax.f32 %v5080_v13, 0.0  ;;  %v4977_v34 = vadd.f32 %v13769_v27, %v13663_v21  ;;  %v5400_v0 = vmax.f32 %v5270_v15, 0.0  ;;  %v10928_v27 = vld [vmem:[#allocation17 + $0x1a0] ss:$12 sps:$4 sm:$0xff]  }
 0x634   :  { %v5274_v54 = vadd.f32 %v5273_v40, %v5161_v47  ;;  %v5163_v11 = vadd.f32 %v5162_v1, %v13780_v63  ;;  %8159 = vmatprep.mubr.bf16.mxu1 %v13881_v22  ;;  %9776 = vmatprep.subr.bf16.mxu0 %v10931_v39  ;;  %v5401_v33 = vmax.f32 %v5272_v4, 0.0  ;;  %v4973_v44 = vadd.f32 %v13753_v9, %v13663_v21 }
 0x635   :  { %v5275_v25 = vpop.f32.mrf.mxu1  ;;  %v5166_v28 = vpop.f32.mrf.mxu0  ;;  %8067 = vmatmul.mubr.bf16.gmra.mxu0 %v13872_v31  ;;  %8160 = vmatmul.mubr.bf16.gmra.mxu1 %v13884_v41  ;;  %v13907_v47 = vpack.c.bf16 %v5458_v38, %v5446_v57  ;;  %v13912_v1 = vpack.c.bf16 %v5483_v12, %v5471_v36  ;;  %v5090_v21 = vadd.f32 %v13786_v8, %v4977_v34  ;;  %v10930_v8 = vld [vmem:[#allocation17 + $0x188] ss:$12 sps:$4 sm:$0xff]  }
 0x636   :  { %v5276_v59 = vadd.f32 %v5275_v25, %v5163_v11  ;;  %8076 = vmatprep.mubr.bf16.mxu0 %v13886_v6  ;;  %9721 = vmatpush3.bf16.msra.mxu1 %v10918_v48  ;;  %v5412_v5 = vmax.f32 %v5274_v54, 0.0  ;;  %v5167_v20 = vadd.f32 %v5166_v28, %v13773_v10  ;;  %v5078_v48 = vadd.f32 %v13729_v23, %v4965_v50  ;;  %v10933_v50 = vld [vmem:[#allocation17 + $0x5f0] ss:$12 sps:$4 sm:$0xff]  }
 0x637   :  { %v5279_v58 = vpop.f32.mrf.mxu1  ;;  %v5168_v49 = vpop.f32.mrf.mxu0  ;;  %9722 = vmatprep.subr.bf16.mxu1 %v10921_v3  ;;  %15227 = vst [vmem:[#allocation134_spill] sm:$0xff] %v13907_v47  ;;  %15229 = vst [vmem:[#allocation131_spill] sm:$0xff] %v13912_v1  ;;  %v10929_v3 = vld [vmem:[#allocation17 + $0x248] ss:$12 sps:$4 sm:$0xff]   ;;  %v5074_v11 = vadd.f32 %v13712_v62, %v4961_v17  ;;  %v5086_v25 = vadd.f32 %v13759_v52, %v4973_v44  ;;  %v5507_v12 = vmax.f32 %v5090_v21, 0.0 }
 0x638   :  { %v5413_v39 = vmax.f32 %v5276_v59, 0.0  ;;  %v5169_v46 = vadd.f32 %v5168_v49, %v13780_v63  ;;  %v13910_v30 = vpack.c.bf16 %v5412_v5, %v5400_v0  ;;  %v5280_v18 = vadd.f32 %v5279_v58, %v5167_v20 }
 0x639   :  { %v5281_v24 = vpop.f32.mrf.mxu1  ;;  %v5170_v45 = vpop.f32.mrf.mxu0  ;;  %v5482_v57 = vmax.f32 %v5078_v48, 0.0  ;;  %v4975_v59 = vadd.f32 %v13761_v42, %v13698_v14  ;;  %v5470_v52 = vmax.f32 %v5074_v11, 0.0  ;;  %v5495_v42 = vmax.f32 %v5086_v25, 0.0 }
 0x63a   :  { %v5171_v35 = vadd.f32 %v5170_v45, %v13773_v10  ;;  %v13905_v53 = vpack.c.bf16 %v5413_v39, %v5401_v33  ;;  %9723 = vmatpush3.bf16.msra.mxu1 %v10923_v43  ;;  %15228 = vst [vmem:[#allocation137_spill] sm:$0xff] %v13910_v30  ;;  %v5282_v9 = vadd.f32 %v5281_v24, %v5169_v46  ;;  %v5424_v34 = vmax.f32 %v5280_v18, 0.0 }
 0x63b   :  { %v5283_v13 = vpop.f32.mrf.mxu1  ;;  %v5172_v40 = vpop.f32.mrf.mxu0  ;;  %9724 = vmatprep.subr.bf16.mxu1 %v10927_v19  ;;  %v4971_v19 = vadd.f32 %v13741_v32, %v13698_v14  ;;  %v13931_v0 = vpack.c.bf16 %v5482_v57, %v5470_v52  ;;  %v5088_v20 = vadd.f32 %v13767_v61, %v4975_v59 }
 0x63c   :  { %15226 = vst [vmem:[#allocation133_spill] sm:$0xff] %v13905_v53  ;;  %v5284_v4 = vadd.f32 %v5283_v13, %v5171_v35  ;;  %v5173_v54 = vadd.f32 %v5172_v40, %v13780_v63  ;;  %8169 = vmatprep.mubr.bf16.mxu1 %v13905_v53  ;;  %v5425_v5 = vmax.f32 %v5282_v9, 0.0  ;;  %v10990_v53 = vld [vmem:[#allocation17 + $0x608] ss:$12 sps:$4 sm:$0xff]  }
 0x63d   :  { %v5285_v23 = vpop.f32.mrf.mxu1  ;;  %v5176_v15 = vpop.f32.mrf.mxu0  ;;  %8077 = vmatmul.mubr.bf16.gmra.mxu0 %v13907_v47  ;;  %8170 = vmatmul.mubr.bf16.gmra.mxu1 %v13910_v30  ;;  %15231 = vst [vmem:[#allocation132_spill] sm:$0xff] %v13931_v0  ;;  %v5084_v48 = vadd.f32 %v13750_v60, %v4971_v19  ;;  %v5506_v21 = vmax.f32 %v5088_v20, 0.0  ;;  %v10986_v30 = vld [vmem:[#allocation17 + $0x6e0] ss:$12 sps:$4 sm:$0xff]  }
 0x63e   :  { %v5286_v28 = vadd.f32 %v5285_v23, %v5173_v54  ;;  %8086 = vmatprep.mubr.bf16.mxu0 %v13912_v1  ;;  %9725 = vmatpush3.bf16.msra.mxu1 %v10928_v27  ;;  %v5436_v43 = vmax.f32 %v5284_v4, 0.0  ;;  %v5177_v33 = vadd.f32 %v5176_v15, %v13773_v10  ;;  %v13938_v27 = vpack.c.bf16 %v5507_v12, %v5495_v42  ;;  %v10988_v47 = vld [vmem:[#allocation17 + $0x620] ss:$12 sps:$4 sm:$0xff]  }
 0x63f   :  { %v5289_v62 = vpop.f32.mrf.mxu1  ;;  %v5178_v38 = vpop.f32.mrf.mxu0  ;;  %9726 = vmatprep.subr.bf16.mxu1 %v10929_v3  ;;  %v5494_v15 = vmax.f32 %v5084_v48, 0.0 }
 0x640   :  { %v5437_v58 = vmax.f32 %v5286_v28, 0.0  ;;  %v5179_v49 = vadd.f32 %v5178_v38, %v13780_v63  ;;  %v13934_v24 = vpack.c.bf16 %v5436_v43, %v5424_v34  ;;  %15233 = vst [vmem:[#allocation155_spill] sm:$0xff] %v13938_v27  ;;  %v5290_v13 = vadd.f32 %v5289_v62, %v5177_v33  ;;  %v15237_v33 = vld [vmem:[#allocation82_spill] sm:$0xff] }
 0x641   :  { %v5291_v39 = vpop.f32.mrf.mxu1  ;;  %v5180_v46 = vpop.f32.mrf.mxu0  ;;  %v13949_v43 = vpack.c.bf16 %v5506_v21, %v5494_v15  ;;  %v10932_v21 = vld [vmem:[#allocation17 + $0x3b0] ss:$12 sps:$4 sm:$0xff]  }
 0x642   :  { %v5181_v17 = vadd.f32 %v5180_v46, %v13773_v10  ;;  %v13929_v36 = vpack.c.bf16 %v5437_v58, %v5425_v5  ;;  %9727 = vmatpush3.bf16.msra.mxu1 %v10930_v8  ;;  %15232 = vst [vmem:[#allocation139_spill] sm:$0xff] %v13934_v24  ;;  %v5292_v14 = vadd.f32 %v5291_v39, %v5179_v49  ;;  %v5448_v60 = vmax.f32 %v5290_v13, 0.0 }
 0x643   :  { %v5293_v45 = vpop.f32.mrf.mxu1  ;;  %v5182_v44 = vpop.f32.mrf.mxu0  ;;  %9840 = vmatprep.subr.bf16.mxu1 %v10933_v50  ;;  %15235 = vst [vmem:[#allocation157_spill] sm:$0xff] %v13949_v43 }
 0x644   :  { %15230 = vst [vmem:[#allocation138_spill] sm:$0xff] %v13929_v36  ;;  %v5294_v32 = vadd.f32 %v5293_v45, %v5181_v17  ;;  %v5183_v35 = vadd.f32 %v5182_v44, %v13780_v63  ;;  %8179 = vmatprep.mubr.bf16.mxu1 %v13929_v36  ;;  %v5449_v11 = vmax.f32 %v5292_v14, 0.0  ;;  %v230_v17 = vld [vmem:[#allocation19] sm:$0x7]  ;;  %v10984_v36 = vld [vmem:[#allocation17 + $0x638] ss:$12 sps:$4 sm:$0xff]  }
 0x645   :  { %v5295_v40 = vpop.f32.mrf.mxu1  ;;  %v5186_v3 = vpop.f32.mrf.mxu0  ;;  %8087 = vmatmul.mubr.bf16.gmra.mxu0 %v13931_v0  ;;  %8180 = vmatmul.mubr.bf16.gmra.mxu1 %v13934_v24  ;;  %v10983_v0 = vld [vmem:[#allocation17 + $0x6f8] ss:$12 sps:$4 sm:$0xff]  }
 0x646   :  { %v5296_v61 = vadd.f32 %v5295_v40, %v5183_v35  ;;  %8096 = vmatprep.mubr.bf16.mxu0 %v13938_v27  ;;  %v5460_v9 = vmax.f32 %v5294_v32, 0.0  ;;  %v5187_v25 = vadd.f32 %v5186_v3, %v13773_v10  ;;  %v15239_v3 = vld [vmem:[#allocation40_spill] sm:$0xff] }
 0x647   :  { %v5299_v4 = vpop.f32.mrf.mxu1  ;;  %v5188_v54 = vpop.f32.mrf.mxu0 }
 0x648   :  { %v5461_v18 = vmax.f32 %v5296_v61, 0.0  ;;  %v5189_v23 = vadd.f32 %v5188_v54, %v13780_v63  ;;  %v13951_v62 = vpack.c.bf16 %v5460_v9, %v5448_v60  ;;  %v5300_v49 = vadd.f32 %v5299_v4, %v5187_v25  ;;  %v15241_v60 = vld [vmem:[#allocation38_spill] sm:$0xff] }
 0x649   :  { %v5301_v28 = vpop.f32.mrf.mxu1  ;;  %v5190_v8 = vpop.f32.mrf.mxu0  ;;  %v13964_v61 = vrot.slane %v230_v17, %v15239_v3  ;;  %v13971_v25 = vrot.slane %v230_v17, %v15241_v60  ;;  %v15248_v60 = vld [vmem:[#allocation97_spill] sm:$0xff] }
 0x64a   :  { %v5191_v57 = vadd.f32 %v5190_v8, %v13773_v10  ;;  %v13947_v59 = vpack.c.bf16 %v5461_v18, %v5449_v11  ;;  %15236 = vst [vmem:[#allocation158_spill] sm:$0xff] %v13951_v62  ;;  %v5302_v12 = vadd.f32 %v5301_v28, %v5189_v23  ;;  %v5472_v14 = vmax.f32 %v5300_v49, 0.0  ;;  %v10935_v11 = vld [vmem:[#allocation17 + $0x458] ss:$12 sps:$4 sm:$0xff]  }
 0x64b   :  { %v5303_v38 = vpop.f32.mrf.mxu1  ;;  %v5192_v50 = vpop.f32.mrf.mxu0 }
 0x64c   :  { %15234 = vst [vmem:[#allocation156_spill] sm:$0xff] %v13947_v59  ;;  %v5304_v5 = vadd.f32 %v5303_v38, %v5191_v57  ;;  %v5193_v58 = vadd.f32 %v5192_v50, %v13780_v63  ;;  %8189 = vmatprep.mubr.bf16.mxu1 %v13947_v59  ;;  %v5473_v20 = vmax.f32 %v5302_v12, 0.0  ;;  %v15242_v57 = vld [vmem:[#allocation80_spill] sm:$0xff]  ;;  %v15243_v12 = vld [vmem:[#allocation81_spill] sm:$0xff] }
 0x64d   :  { %v5305_v52 = vpop.f32.mrf.mxu1  ;;  %v5196_v19 = vpop.f32.mrf.mxu0  ;;  %8097 = vmatmul.mubr.bf16.gmra.mxu0 %v13949_v43  ;;  %8190 = vmatmul.mubr.bf16.gmra.mxu1 %v13951_v62  ;;  %v15283_v43 = vld [vmem:[#allocation94_spill] sm:$0xff]  ;;  %v10966_v59 = vld [vmem:[#allocation17 + $0x830] ss:$12 sps:$4 sm:$0xff]  }
 0x64e   :  { %v5306_v34 = vadd.f32 %v5305_v52, %v5193_v58  ;;  %8252 = vmatprep.mubr.bf16.mxu0 %v15237_v33  ;;  %v5484_v39 = vmax.f32 %v5304_v5, 0.0  ;;  %v5197_v32 = vadd.f32 %v5196_v19, %v13773_v10  ;;  %v10936_v5 = vld [vmem:[#allocation17 + $0x398] ss:$12 sps:$4 sm:$0xff]   ;;  %v10939_v52 = vld [vmem:[#allocation17 + $0x440] ss:$12 sps:$4 sm:$0xff]  }
 0x64f   :  { %v5309_v46 = vpop.f32.mrf.mxu1  ;;  %v5198_v42 = vpop.f32.mrf.mxu0 }
 0x650   :  { %v5485_v45 = vmax.f32 %v5306_v34, 0.0  ;;  %v5199_v44 = vadd.f32 %v5198_v42, %v13780_v63  ;;  %v13966_v9 = vpack.c.bf16 %v5484_v39, %v5472_v14 }
 0x651   :  { %v5311_v35 = vpop.f32.mrf.mxu1  ;;  %v5200_v48 = vpop.f32.mrf.mxu0 }
 0x652   :  { %v5201_v13 = vadd.f32 %v5200_v48, %v13773_v10  ;;  %v13961_v40 = vpack.c.bf16 %v5485_v45, %v5473_v20  ;;  %15240 = vst [vmem:[#allocation40_spill] sm:$0xff] %v13966_v9  ;;  %v5312_v18 = vadd.f32 %v5311_v35, %v5199_v44  ;;  %v5310_v10 = vadd.f32 %v5309_v46, %v5197_v32  ;;  %v10940_v48 = vld [vmem:[#allocation17 + $0x380] ss:$12 sps:$4 sm:$0xff]  }
 0x653   :  { %v5313_v4 = vpop.f32.mrf.mxu1  ;;  %v5202_v54 = vpop.f32.mrf.mxu0 }
 0x654   :  { %15238 = vst [vmem:[#allocation82_spill] sm:$0xff] %v13961_v40  ;;  %v5314_v23 = vadd.f32 %v5313_v4, %v5201_v13  ;;  %v5203_v15 = vadd.f32 %v5202_v54, %v13780_v63  ;;  %8199 = vmatprep.mubr.bf16.mxu1 %v13961_v40  ;;  %v5497_v19 = vmax.f32 %v5312_v18, 0.0  ;;  %v5496_v46 = vmax.f32 %v5310_v10, 0.0 }
 0x655   :  { %v5315_v28 = vpop.f32.mrf.mxu1  ;;  %v7576_v8 = vpop.f32.mrf.mxu0  ;;  %8200 = vmatmul.mubr.bf16.gmra.mxu1 %v13966_v9  ;;  %8253 = vmatmul.mubr.bf16.vlgmr.msra.gmra.mxu0 %v15242_v57  ;;  %v15275_v9 = vld [vmem:[#allocation92_spill] sm:$0xff] }
 0x656   :  { %v5316_v38 = vadd.f32 %v5315_v28, %v5203_v15  ;;  %v7577_v50 = vadd.f32 %v7576_v8, %v13964_v61  ;;  %8260 = vmatprep.mubr.bf16.mxu0 %v15243_v12  ;;  %9777 = vmatpush3.bf16.msra.mxu0 %v10932_v21  ;;  %v5508_v63 = vmax.f32 %v5314_v23, 0.0  ;;  %v10943_v21 = vld [vmem:[#allocation17 + $0x428] ss:$12 sps:$4 sm:$0xff]  }
 0x657   :  { %v7689_v58 = vpop.f32.mrf.mxu1  ;;  %v7578_v49 = vpop.f32.mrf.mxu0  ;;  %9778 = vmatprep.subr.bf16.mxu0 %v10935_v11  ;;  %v15246_v11 = vld [vmem:[#allocation83_spill] sm:$0xff]  ;;  %v15247_v15 = vld [vmem:[#allocation86_spill] sm:$0xff] }
 0x658   :  { %v5509_v34 = vmax.f32 %v5316_v38, 0.0  ;;  %v13977_v33 = vadd.f32 %v7689_v58, %v7577_v50  ;;  %v7579_v39 = vadd.f32 %v7578_v49, %v13971_v25  ;;  %v13985_v14 = vpack.c.bf16 %v5508_v63, %v5496_v46  ;;  %v10944_v8 = vld [vmem:[#allocation17 + $0x368] ss:$12 sps:$4 sm:$0xff]   ;;  %v10947_v50 = vld [vmem:[#allocation17 + $0x410] ss:$12 sps:$4 sm:$0xff]  }
 0x659   :  { %v7691_v42 = vpop.f32.mrf.mxu1  ;;  %v7580_v17 = vpop.f32.mrf.mxu0  ;;  %v10934_v49 = vld [vmem:[#allocation17 + $0x530] ss:$12 sps:$4 sm:$0xff]  }
 0x65a   :  { %v13980_v20 = vadd.f32 %v7691_v42, %v7579_v39  ;;  %v7581_v45 = vadd.f32 %v7580_v17, %v13964_v61  ;;  %v13983_v44 = vpack.c.bf16 %v5509_v34, %v5497_v19  ;;  %9779 = vmatpush3.bf16.msra.mxu0 %v10936_v5  ;;  %15245 = vst [vmem:[#allocation80_spill] sm:$0xff] %v13985_v14  ;;  %v10937_v34 = vld [vmem:[#allocation17 + $0x5d8] ss:$12 sps:$4 sm:$0xff]   ;;  %v10948_v42 = vld [vmem:[#allocation17 + $0x350] ss:$12 sps:$4 sm:$0xff]  }
 0x65b   :  { %v7693_v32 = vpop.f32.mrf.mxu1  ;;  %v7582_v35 = vpop.f32.mrf.mxu0  ;;  %9780 = vmatprep.subr.bf16.mxu0 %v10939_v52 }
 0x65c   :  { %15244 = vst [vmem:[#allocation38_spill] sm:$0xff] %v13983_v44  ;;  %v13987_v13 = vadd.f32 %v7693_v32, %v7581_v45  ;;  %v7583_v3 = vadd.f32 %v7582_v35, %v13971_v25  ;;  %8209 = vmatprep.mubr.bf16.mxu1 %v13983_v44  ;;  %v15249_v32 = vld [vmem:[#allocation85_spill] sm:$0xff]  ;;  %v15250_v35 = vld [vmem:[#allocation96_spill] sm:$0xff] }
 0x65d   :  { %v7695_v4 = vpop.f32.mrf.mxu1  ;;  %v7586_v54 = vpop.f32.mrf.mxu0  ;;  %8210 = vmatmul.mubr.bf16.gmra.mxu1 %v13985_v14  ;;  %8261 = vmatmul.mubr.bf16.gmra.mxu0 %v15246_v11 }
 0x65e   :  { %v13993_v18 = vadd.f32 %v7695_v4, %v7583_v3  ;;  %v7587_v23 = vadd.f32 %v7586_v54, %v13964_v61  ;;  %8268 = vmatprep.mubr.bf16.mxu0 %v15247_v15  ;;  %8349 = vmatprep.mubr.bf16.mxu1 %v15248_v60  ;;  %v15251_v4 = vld [vmem:[#allocation87_spill] sm:$0xff]  ;;  %v10938_v54 = vld [vmem:[#allocation17 + $0x518] ss:$12 sps:$4 sm:$0xff]  }
 0x65f   :  { %v7699_v10 = vpop.f32.mrf.mxu1  ;;  %v7588_v28 = vpop.f32.mrf.mxu0  ;;  %9781 = vmatpush3.bf16.msra.mxu0 %v10940_v48  ;;  %v10951_v48 = vld [vmem:[#allocation17 + $0x3f8] ss:$12 sps:$4 sm:$0xff]   ;;  %v10941_v60 = vld [vmem:[#allocation17 + $0x5c0] ss:$12 sps:$4 sm:$0xff]  }
 0x660   :  { %v13998_v57 = vadd.f32 %v7699_v10, %v7587_v23  ;;  %v7589_v38 = vadd.f32 %v7588_v28, %v13971_v25  ;;  %9782 = vmatprep.subr.bf16.mxu0 %v10943_v21  ;;  %v15252_v23 = vld [vmem:[#allocation99_spill] sm:$0xff] }
 0x661   :  { %v7701_v12 = vpop.f32.mrf.mxu1  ;;  %v7590_v5 = vpop.f32.mrf.mxu0 }
 0x662   :  { %v14001_v63 = vadd.f32 %v7701_v12, %v7589_v38  ;;  %v7591_v58 = vadd.f32 %v7590_v5, %v13964_v61 }
 0x663   :  { %v7703_v52 = vpop.f32.mrf.mxu1  ;;  %v7592_v19 = vpop.f32.mrf.mxu0  ;;  %9783 = vmatpush3.bf16.msra.mxu0 %v10944_v8  ;;  %v10952_v8 = vld [vmem:[#allocation17 + $0x338] ss:$12 sps:$4 sm:$0xff]  }
 0x664   :  { %v14004_v39 = vadd.f32 %v7703_v52, %v7591_v58  ;;  %v7593_v46 = vadd.f32 %v7592_v19, %v13971_v25  ;;  %9784 = vmatprep.subr.bf16.mxu0 %v10947_v50  ;;  %v10942_v52 = vld [vmem:[#allocation17 + $0x500] ss:$12 sps:$4 sm:$0xff]  }
 0x665   :  { %v7705_v17 = vpop.f32.mrf.mxu1  ;;  %v7596_v45 = vpop.f32.mrf.mxu0  ;;  %8269 = vmatmul.mubr.bf16.gmra.mxu0 %v15249_v32  ;;  %8350 = vmatmul.mubr.bf16.vlgmr.msra.gmra.mxu1 %v15250_v35  ;;  %v10954_v19 = vld [vmem:[#allocation17 + $0x3e0] ss:$12 sps:$4 sm:$0xff]   ;;  %v15253_v35 = vld [vmem:[#allocation84_spill] sm:$0xff] }
 0x666   :  { %v14009_v3 = vadd.f32 %v7705_v17, %v7593_v46  ;;  %v7597_v21 = vadd.f32 %v7596_v45, %v13964_v61  ;;  %9841 = vmatpush3.bf16.msra.mxu1 %v10934_v49  ;;  %8276 = vmatprep.mubr.bf16.mxu0 %v15251_v4  ;;  %v10945_v17 = vld [vmem:[#allocation17 + $0x5a8] ss:$12 sps:$4 sm:$0xff]  }
 0x667   :  { %v7709_v11 = vpop.f32.mrf.mxu1  ;;  %8357 = vmatprep.mubr.bf16.mxu1 %v15252_v23  ;;  %v7598_v15 = vpop.f32.mrf.mxu0  ;;  %9842 = vmatprep.subr.bf16.mxu1 %v10937_v34  ;;  %v15256_v23 = vld [vmem:[#allocation101_spill] sm:$0xff] }
 0x668   :  { %v14014_v10 = vadd.f32 %v7709_v11, %v7597_v21  ;;  %v7599_v28 = vadd.f32 %v7598_v15, %v13971_v25  ;;  %9785 = vmatpush3.bf16.msra.mxu0 %v10948_v42  ;;  %v10956_v42 = vld [vmem:[#allocation17 + $0x320] ss:$12 sps:$4 sm:$0xff]   ;;  %v10957_v21 = vld [vmem:[#allocation17 + $0x3c8] ss:$12 sps:$4 sm:$0xff]  }
 0x669   :  { %v7711_v38 = vpop.f32.mrf.mxu1  ;;  %v7600_v50 = vpop.f32.mrf.mxu0  ;;  %9786 = vmatprep.subr.bf16.mxu0 %v10951_v48  ;;  %v15254_v48 = vld [vmem:[#allocation98_spill] sm:$0xff]  ;;  %v15255_v11 = vld [vmem:[#allocation89_spill] sm:$0xff] }
 0x66a   :  { %v14017_v12 = vadd.f32 %v7711_v38, %v7599_v28  ;;  %v7601_v5 = vadd.f32 %v7600_v50, %v13964_v61  ;;  %9843 = vmatpush3.bf16.msra.mxu1 %v10938_v54  ;;  %v10946_v28 = vld [vmem:[#allocation17 + $0x4e8] ss:$12 sps:$4 sm:$0xff]   ;;  %v10949_v50 = vld [vmem:[#allocation17 + $0x590] ss:$12 sps:$4 sm:$0xff]  }
 0x66b   :  { %v7713_v58 = vpop.f32.mrf.mxu1  ;;  %v7602_v49 = vpop.f32.mrf.mxu0  ;;  %9844 = vmatprep.subr.bf16.mxu1 %v10941_v60 }
 0x66c   :  { %v14020_v34 = vadd.f32 %v7713_v58, %v7601_v5  ;;  %v7603_v46 = vadd.f32 %v7602_v49, %v13971_v25  ;;  %9787 = vmatpush3.bf16.msra.mxu0 %v10952_v8  ;;  %v10958_v5 = vld [vmem:[#allocation17 + $0x308] ss:$12 sps:$4 sm:$0xff]  }
 0x66d   :  { %v7715_v45 = vpop.f32.mrf.mxu1  ;;  %v7606_v32 = vpop.f32.mrf.mxu0  ;;  %8277 = vmatmul.mubr.bf16.gmra.mxu0 %v15253_v35  ;;  %8358 = vmatmul.mubr.bf16.gmra.mxu1 %v15254_v48 }
 0x66e   :  { %v14025_v4 = vadd.f32 %v7715_v45, %v7603_v46  ;;  %v7607_v54 = vadd.f32 %v7606_v32, %v13964_v61  ;;  %8284 = vmatprep.mubr.bf16.mxu0 %v15255_v11  ;;  %8365 = vmatprep.mubr.bf16.mxu1 %v15256_v23  ;;  %v15259_v23 = vld [vmem:[#allocation88_spill] sm:$0xff] }
 0x66f   :  { %v7719_v15 = vpop.f32.mrf.mxu1  ;;  %v7608_v60 = vpop.f32.mrf.mxu0  ;;  %9845 = vmatpush3.bf16.msra.mxu1 %v10942_v52  ;;  %9788 = vmatprep.subr.bf16.mxu0 %v10954_v19  ;;  %v10950_v52 = vld [vmem:[#allocation17 + $0x4d0] ss:$12 sps:$4 sm:$0xff]  }
 0x670   :  { %v14030_v8 = vadd.f32 %v7719_v15, %v7607_v54  ;;  %v7609_v38 = vadd.f32 %v7608_v60, %v13971_v25  ;;  %9846 = vmatprep.subr.bf16.mxu1 %v10945_v17  ;;  %9789 = vmatpush3.bf16.msra.mxu0 %v10956_v42  ;;  %v10963_v19 = vld [vmem:[#allocation17 + $0x770] ss:$12 sps:$4 sm:$0xff]   ;;  %v10953_v17 = vld [vmem:[#allocation17 + $0x578] ss:$12 sps:$4 sm:$0xff]  }
 0x671   :  { %v7721_v58 = vpop.f32.mrf.mxu1  ;;  %v7610_v49 = vpop.f32.mrf.mxu0  ;;  %9790 = vmatprep.subr.bf16.mxu0 %v10957_v21  ;;  %v15260_v21 = vld [vmem:[#allocation100_spill] sm:$0xff] }
 0x672   :  { %v14033_v46 = vadd.f32 %v7721_v58, %v7609_v38  ;;  %v7611_v45 = vadd.f32 %v7610_v49, %v13964_v61  ;;  %v15263_v38 = vld [vmem:[#allocation103_spill] sm:$0xff] }
 0x673   :  { %v7723_v32 = vpop.f32.mrf.mxu1  ;;  %v7612_v35 = vpop.f32.mrf.mxu0  ;;  %9847 = vmatpush3.bf16.msra.mxu1 %v10946_v28  ;;  %v15262_v28 = vld [vmem:[#allocation91_spill] sm:$0xff] }
 0x674   :  { %15257 = vst [vmem:[#allocation81_spill] sm:$0xff] %v14033_v46  ;;  %v14036_v48 = vadd.f32 %v7723_v32, %v7611_v45  ;;  %v7613_v54 = vadd.f32 %v7612_v35, %v13971_v25  ;;  %9848 = vmatprep.subr.bf16.mxu1 %v10949_v50  ;;  %9791 = vmatpush3.bf16.msra.mxu0 %v10958_v5  ;;  %v10955_v50 = vld [vmem:[#allocation17 + $0x4b8] ss:$12 sps:$4 sm:$0xff]   ;;  %v10959_v32 = vld [vmem:[#allocation17 + $0x560] ss:$12 sps:$4 sm:$0xff]  }
 0x675   :  { %v7725_v42 = vpop.f32.mrf.mxu1  ;;  %v7616_v11 = vpop.f32.mrf.mxu0  ;;  %8285 = vmatmul.mubr.bf16.gmra.mxu0 %v15259_v23  ;;  %8366 = vmatmul.mubr.bf16.gmra.mxu1 %v15260_v21 }
 0x676   :  { %15258 = vst [vmem:[#allocation83_spill] sm:$0xff] %v14036_v48  ;;  %v14041_v15 = vadd.f32 %v7725_v42, %v7613_v54  ;;  %v7617_v60 = vadd.f32 %v7616_v11, %v13964_v61  ;;  %8292 = vmatprep.mubr.bf16.mxu0 %v15262_v28  ;;  %8373 = vmatprep.mubr.bf16.mxu1 %v15263_v38  ;;  %v10960_v28 = vld [vmem:[#allocation17 + $0x4a0] ss:$12 sps:$4 sm:$0xff]  }
 0x677   :  { %v7729_v58 = vpop.f32.mrf.mxu1  ;;  %v7618_v49 = vpop.f32.mrf.mxu0  ;;  %9849 = vmatpush3.bf16.msra.mxu1 %v10950_v52  ;;  %9904 = vmatprep.subr.bf16.mxu0 %v10963_v19  ;;  %v10961_v19 = vld [vmem:[#allocation17 + $0x548] ss:$12 sps:$4 sm:$0xff]   ;;  %v15308_v48 = vld [vmem:[#allocation145_spill] sm:$0xff] }
 0x678   :  { %15261 = vst [vmem:[#allocation86_spill] sm:$0xff] %v14041_v15  ;;  %v14046_v5 = vadd.f32 %v7729_v58, %v7617_v60  ;;  %v7619_v45 = vadd.f32 %v7618_v49, %v13971_v25  ;;  %9850 = vmatprep.subr.bf16.mxu1 %v10953_v17  ;;  %v15267_v17 = vld [vmem:[#allocation90_spill] sm:$0xff]  ;;  %v15306_v15 = vld [vmem:[#allocation144_spill] sm:$0xff] }
 0x679   :  { %v7731_v35 = vpop.f32.mrf.mxu1  ;;  %v7620_v54 = vpop.f32.mrf.mxu0  ;;  %v15268_v49 = vld [vmem:[#allocation102_spill] sm:$0xff] }
 0x67a   :  { %15264 = vst [vmem:[#allocation97_spill] sm:$0xff] %v14046_v5  ;;  %v14049_v42 = vadd.f32 %v7731_v35, %v7619_v45  ;;  %v7621_v11 = vadd.f32 %v7620_v54, %v13964_v61  ;;  %v15270_v54 = vld [vmem:[#allocation93_spill] sm:$0xff]  ;;  %v15305_v5 = vld [vmem:[#allocation118_spill] sm:$0xff] }
 0x67b   :  { %v7733_v23 = vpop.f32.mrf.mxu1  ;;  %v7622_v21 = vpop.f32.mrf.mxu0  ;;  %9851 = vmatpush3.bf16.msra.mxu1 %v10955_v50  ;;  %v15271_v50 = vld [vmem:[#allocation105_spill] sm:$0xff] }
 0x67c   :  { %15265 = vst [vmem:[#allocation85_spill] sm:$0xff] %v14049_v42  ;;  %v14052_v38 = vadd.f32 %v7733_v23, %v7621_v11  ;;  %v7623_v52 = vadd.f32 %v7622_v21, %v13971_v25  ;;  %9852 = vmatprep.subr.bf16.mxu1 %v10959_v32  ;;  %v10962_v21 = vld [vmem:[#allocation17 + $0x488] ss:$12 sps:$4 sm:$0xff]   ;;  %v15303_v42 = vld [vmem:[#allocation143_spill] sm:$0xff] }
 0x67d   :  { %v7735_v60 = vpop.f32.mrf.mxu1  ;;  %v7626_v58 = vpop.f32.mrf.mxu0  ;;  %8293 = vmatmul.mubr.bf16.gmra.mxu0 %v15267_v17  ;;  %8374 = vmatmul.mubr.bf16.gmra.mxu1 %v15268_v49  ;;  %v10965_v17 = vld [vmem:[#allocation17 + $0x8f0] ss:$12 sps:$4 sm:$0xff]  }
 0x67e   :  { %15266 = vst [vmem:[#allocation96_spill] sm:$0xff] %v14052_v38  ;;  %v14057_v45 = vadd.f32 %v7735_v60, %v7623_v52  ;;  %v7627_v35 = vadd.f32 %v7626_v58, %v13964_v61  ;;  %8300 = vmatprep.mubr.bf16.mxu0 %v15270_v54  ;;  %8381 = vmatprep.mubr.bf16.mxu1 %v15271_v50 }
 0x67f   :  { %v7739_v11 = vpop.f32.mrf.mxu1  ;;  %v7628_v23 = vpop.f32.mrf.mxu0  ;;  %9853 = vmatpush3.bf16.msra.mxu1 %v10960_v28 }
 0x680   :  { %15269 = vst [vmem:[#allocation87_spill] sm:$0xff] %v14057_v45  ;;  %v14062_v32 = vadd.f32 %v7739_v11, %v7627_v35  ;;  %v7629_v14 = vadd.f32 %v7628_v23, %v13971_v25  ;;  %9854 = vmatprep.subr.bf16.mxu1 %v10961_v19  ;;  %v15276_v19 = vld [vmem:[#allocation104_spill] sm:$0xff] }
 0x681   :  { %v7741_v44 = vpop.f32.mrf.mxu1  ;;  %v7630_v49 = vpop.f32.mrf.mxu0  ;;  %v10970_v45 = vld [vmem:[#allocation17 + $0x818] ss:$12 sps:$4 sm:$0xff]  }
 0x682   :  { %15272 = vst [vmem:[#allocation99_spill] sm:$0xff] %v14062_v32  ;;  %v14065_v52 = vadd.f32 %v7741_v44, %v7629_v14  ;;  %v7631_v60 = vadd.f32 %v7630_v49, %v13964_v61  ;;  %v15278_v14 = vld [vmem:[#allocation95_spill] sm:$0xff] }
 0x683   :  { %v7743_v58 = vpop.f32.mrf.mxu1  ;;  %v7632_v54 = vpop.f32.mrf.mxu0  ;;  %9855 = vmatpush3.bf16.msra.mxu1 %v10962_v21  ;;  %v15279_v49 = vld [vmem:[#allocation107_spill] sm:$0xff] }
 0x684   :  { %15273 = vst [vmem:[#allocation84_spill] sm:$0xff] %v14065_v52  ;;  %v14068_v50 = vadd.f32 %v7743_v58, %v7631_v60  ;;  %v7633_v28 = vadd.f32 %v7632_v54, %v13971_v25  ;;  %9968 = vmatprep.subr.bf16.mxu1 %v10965_v17  ;;  %v15302_v32 = vld [vmem:[#allocation119_spill] sm:$0xff] }
 0x685   :  { %v7745_v35 = vpop.f32.mrf.mxu1  ;;  %v7636_v11 = vpop.f32.mrf.mxu0  ;;  %8301 = vmatmul.mubr.bf16.gmra.mxu0 %v15275_v9  ;;  %8382 = vmatmul.mubr.bf16.gmra.mxu1 %v15276_v19 }
 0x686   :  { %15274 = vst [vmem:[#allocation98_spill] sm:$0xff] %v14068_v50  ;;  %v14073_v23 = vadd.f32 %v7745_v35, %v7633_v28  ;;  %v7637_v44 = vadd.f32 %v7636_v11, %v13964_v61  ;;  %8308 = vmatprep.mubr.bf16.mxu0 %v15278_v14  ;;  %8389 = vmatprep.mubr.bf16.mxu1 %v15279_v49 }
 0x687   :  { %v7749_v21 = vpop.f32.mrf.mxu1  ;;  %v7638_v60 = vpop.f32.mrf.mxu0 }
 0x688   :  { %15277 = vst [vmem:[#allocation89_spill] sm:$0xff] %v14073_v23  ;;  %v14078_v58 = vadd.f32 %v7749_v21, %v7637_v44  ;;  %v7639_v17 = vadd.f32 %v7638_v60, %v13971_v25  ;;  %v15284_v44 = vld [vmem:[#allocation106_spill] sm:$0xff] }
 0x689   :  { %v7751_v54 = vpop.f32.mrf.mxu1  ;;  %v7640_v40 = vpop.f32.mrf.mxu0 }
 0x68a   :  { %15280 = vst [vmem:[#allocation101_spill] sm:$0xff] %v14078_v58  ;;  %v14081_v62 = vadd.f32 %v7751_v54, %v7639_v17  ;;  %v7641_v9 = vadd.f32 %v7640_v40, %v13964_v61  ;;  %v15286_v17 = vld [vmem:[#allocation109_spill] sm:$0xff] }
 0x68b   :  { %v7753_v28 = vpop.f32.mrf.mxu1  ;;  %v7642_v35 = vpop.f32.mrf.mxu0  ;;  %v15287_v54 = vld [vmem:[#allocation113_spill] sm:$0xff] }
 0x68c   :  { %15281 = vst [vmem:[#allocation88_spill] sm:$0xff] %v14081_v62  ;;  %v14084_v19 = vadd.f32 %v7753_v28, %v7641_v9  ;;  %v7643_v11 = vadd.f32 %v7642_v35, %v13971_v25 }
 0x68d   :  { %v7755_v14 = vpop.f32.mrf.mxu1  ;;  %v7646_v49 = vpop.f32.mrf.mxu0  ;;  %8309 = vmatmul.mubr.bf16.gmra.mxu0 %v15283_v43  ;;  %8390 = vmatmul.mubr.bf16.gmra.mxu1 %v15284_v44  ;;  %v10964_v44 = vld [vmem:[#allocation17 + $0x6b0] ss:$12 sps:$4 sm:$0xff]  }
 0x68e   :  { %15282 = vst [vmem:[#allocation100_spill] sm:$0xff] %v14084_v19  ;;  %v14089_v21 = vadd.f32 %v7755_v14, %v7643_v11  ;;  %v7647_v60 = vadd.f32 %v7646_v49, %v13964_v61  ;;  %8397 = vmatprep.mubr.bf16.mxu1 %v15286_v17  ;;  %8446 = vmatprep.mubr.bf16.mxu0 %v15287_v54  ;;  %v10967_v54 = vld [vmem:[#allocation17 + $0x758] ss:$12 sps:$4 sm:$0xff]  }
 0x68f   :  { %v7759_v40 = vpop.f32.mrf.mxu1  ;;  %v7648_v62 = vpop.f32.mrf.mxu0 }
 0x690   :  { %15285 = vst [vmem:[#allocation91_spill] sm:$0xff] %v14089_v21  ;;  %v14094_v9 = vadd.f32 %v7759_v40, %v7647_v60  ;;  %v7649_v28 = vadd.f32 %v7648_v62, %v13971_v25  ;;  %v15291_v60 = vld [vmem:[#allocation108_spill] sm:$0xff] }
 0x691   :  { %v7761_v35 = vpop.f32.mrf.mxu1  ;;  %v7650_v19 = vpop.f32.mrf.mxu0  ;;  %v15292_v62 = vld [vmem:[#allocation112_spill] sm:$0xff] }
 0x692   :  { %15288 = vst [vmem:[#allocation103_spill] sm:$0xff] %v14094_v9  ;;  %v14097_v58 = vadd.f32 %v7761_v35, %v7649_v28  ;;  %v7651_v43 = vadd.f32 %v7650_v19, %v13964_v61  ;;  %v15294_v28 = vld [vmem:[#allocation111_spill] sm:$0xff] }
 0x693   :  { %v7763_v11 = vpop.f32.mrf.mxu1  ;;  %v7652_v14 = vpop.f32.mrf.mxu0  ;;  %v15295_v61 = vld [vmem:[#allocation115_spill] sm:$0xff] }
 0x694   :  { %15289 = vst [vmem:[#allocation90_spill] sm:$0xff] %v14097_v58  ;;  %v14100_v49 = vadd.f32 %v7763_v11, %v7651_v43  ;;  %v7653_v17 = vadd.f32 %v7652_v14, %v13971_v25  ;;  %v10968_v25 = vld [vmem:[#allocation17 + $0x698] ss:$12 sps:$4 sm:$0xff]   ;;  %v10971_v43 = vld [vmem:[#allocation17 + $0x740] ss:$12 sps:$4 sm:$0xff]  }
 0x695   :  { %v7765_v21 = vpop.f32.mrf.mxu1  ;;  %v14103_v23 = vpop.f32.mrf.mxu0  ;;  %8398 = vmatmul.mubr.bf16.gmra.mxu1 %v15291_v60  ;;  %8447 = vmatmul.mubr.bf16.vlgmr.msra.gmra.mxu0 %v15292_v62  ;;  %v10975_v62 = vld [vmem:[#allocation17 + $0x728] ss:$12 sps:$4 sm:$0xff]  }
 0x696   :  { %15290 = vst [vmem:[#allocation102_spill] sm:$0xff] %v14100_v49  ;;  %v14107_v40 = vadd.f32 %v7765_v21, %v7653_v17  ;;  %8405 = vmatprep.mubr.bf16.mxu1 %v15294_v28  ;;  %8454 = vmatprep.mubr.bf16.mxu0 %v15295_v61  ;;  %v10972_v17 = vld [vmem:[#allocation17 + $0x680] ss:$12 sps:$4 sm:$0xff]  }
 0x697   :  { %v14111_v19 = vpop.f32.mrf.mxu1  ;;  %v14113_v35 = vpop.f32.mrf.mxu0  ;;  %9905 = vmatpush3.bf16.msra.mxu0 %v10964_v44  ;;  %v15296_v44 = vld [vmem:[#allocation110_spill] sm:$0xff]  ;;  %v15299_v49 = vld [vmem:[#allocation141_spill] sm:$0xff] }
 0x698   :  { %15293 = vst [vmem:[#allocation93_spill] sm:$0xff] %v14107_v40  ;;  %9906 = vmatprep.subr.bf16.mxu0 %v10967_v54  ;;  %v15297_v54 = vld [vmem:[#allocation114_spill] sm:$0xff]  ;;  %v15298_v40 = vld [vmem:[#allocation117_spill] sm:$0xff] }
 0x699   :  { %v14115_v11 = vpop.f32.mrf.mxu1  ;;  %v14117_v14 = vpop.f32.mrf.mxu0 }
 0x69b   :  { %v14119_v60 = vpop.f32.mrf.mxu1  ;;  %v14121_v21 = vpop.f32.mrf.mxu0  ;;  %9907 = vmatpush3.bf16.msra.mxu0 %v10968_v25  ;;  %v10976_v25 = vld [vmem:[#allocation17 + $0x668] ss:$12 sps:$4 sm:$0xff]  }
 0x69c   :  { %9908 = vmatprep.subr.bf16.mxu0 %v10971_v43  ;;  %v10979_v43 = vld [vmem:[#allocation17 + $0x710] ss:$12 sps:$4 sm:$0xff]  }
 0x69d   :  { %v14123_v28 = vpop.f32.mrf.mxu1  ;;  %v14125_v61 = vpop.f32.mrf.mxu0  ;;  %8406 = vmatmul.mubr.bf16.gmra.mxu1 %v15296_v44  ;;  %8455 = vmatmul.mubr.bf16.gmra.mxu0 %v15297_v54 }
 0x69e   :  { %8462 = vmatprep.mubr.bf16.mxu0 %v15298_v40  ;;  %8543 = vmatprep.mubr.bf16.mxu1 %v15299_v49  ;;  %v10969_v40 = vld [vmem:[#allocation17 + $0x8d8] ss:$12 sps:$4 sm:$0xff]   ;;  %v10980_v49 = vld [vmem:[#allocation17 + $0x650] ss:$12 sps:$4 sm:$0xff]  }
 0x69f   :  { %v14131_v58 = vpop.f32.mrf.mxu1  ;;  %v14133_v9 = vpop.f32.mrf.mxu0  ;;  %9909 = vmatpush3.bf16.msra.mxu0 %v10972_v17  ;;  %v15300_v17 = vld [vmem:[#allocation116_spill] sm:$0xff] }
 0x6a0   :  { %9910 = vmatprep.subr.bf16.mxu0 %v10975_v62  ;;  %v15301_v62 = vld [vmem:[#allocation142_spill] sm:$0xff] }
 0x6a1   :  { %v14135_v50 = vpop.f32.mrf.mxu1  ;;  %v14137_v52 = vpop.f32.mrf.mxu0 }
 0x6a3   :  { %v14139_v44 = vpop.f32.mrf.mxu1  ;;  %v14141_v54 = vpop.f32.mrf.mxu0  ;;  %9911 = vmatpush3.bf16.msra.mxu0 %v10976_v25 }
 0x6a4   :  { %9912 = vmatprep.subr.bf16.mxu0 %v10979_v43  ;;  %v10973_v43 = vld [vmem:[#allocation17 + $0x8c0] ss:$12 sps:$4 sm:$0xff]  }
 0x6a5   :  { %v14143_v27 = vpop.f32.mrf.mxu1  ;;  %v14145_v24 = vpop.f32.mrf.mxu0  ;;  %8463 = vmatmul.mubr.bf16.gmra.mxu0 %v15300_v17  ;;  %8544 = vmatmul.mubr.bf16.vlgmr.msra.gmra.mxu1 %v15301_v62  ;;  %v10974_v62 = vld [vmem:[#allocation17 + $0x800] ss:$12 sps:$4 sm:$0xff]  }
 0x6a6   :  { %9969 = vmatpush3.bf16.msra.mxu1 %v10966_v59  ;;  %8470 = vmatprep.mubr.bf16.mxu0 %v15302_v32 }
 0x6a7   :  { %v14150_v38 = vpop.f32.mrf.mxu1  ;;  %8551 = vmatprep.mubr.bf16.mxu1 %v15303_v42  ;;  %v14153_v25 = vpop.f32.mrf.mxu0  ;;  %9970 = vmatprep.subr.bf16.mxu1 %v10969_v40  ;;  %v10977_v42 = vld [vmem:[#allocation17 + $0x8a8] ss:$12 sps:$4 sm:$0xff]  }
 0x6a8   :  { %9913 = vmatpush3.bf16.msra.mxu0 %v10980_v49 }
 0x6a9   :  { %v14155_v1 = vpop.f32.mrf.mxu1  ;;  %v14157_v17 = vpop.f32.mrf.mxu0  ;;  %9914 = vmatprep.subr.bf16.mxu0 %v10983_v0  ;;  %v10989_v0 = vld [vmem:[#allocation17 + $0x6c8] ss:$12 sps:$4 sm:$0xff]  }
 0x6aa   :  { %9971 = vmatpush3.bf16.msra.mxu1 %v10970_v45  ;;  %v15307_v45 = vld [vmem:[#allocation121_spill] sm:$0xff] }
 0x6ab   :  { %v14159_v59 = vpop.f32.mrf.mxu1  ;;  %v14161_v32 = vpop.f32.mrf.mxu0  ;;  %9972 = vmatprep.subr.bf16.mxu1 %v10973_v43 }
 0x6ac   :  { %9915 = vmatpush3.bf16.msra.mxu0 %v10984_v36  ;;  %v10978_v36 = vld [vmem:[#allocation17 + $0x7e8] ss:$12 sps:$4 sm:$0xff]  }
 0x6ad   :  { %v14163_v40 = vpop.f32.mrf.mxu1  ;;  %v14165_v49 = vpop.f32.mrf.mxu0  ;;  %8471 = vmatmul.mubr.bf16.gmra.mxu0 %v15305_v5  ;;  %8552 = vmatmul.mubr.bf16.gmra.mxu1 %v15306_v15 }
 0x6ae   :  { %15304 = vst [vmem:[#allocation105_spill] sm:$0xff] %v14163_v40  ;;  %8478 = vmatprep.mubr.bf16.mxu0 %v15307_v45  ;;  %8559 = vmatprep.mubr.bf16.mxu1 %v15308_v48  ;;  %v10981_v40 = vld [vmem:[#allocation17 + $0x890] ss:$12 sps:$4 sm:$0xff]  }
 0x6af   :  { %v14171_v46 = vpop.f32.mrf.mxu1  ;;  %v14173_v43 = vpop.f32.mrf.mxu0  ;;  %9973 = vmatpush3.bf16.msra.mxu1 %v10974_v62  ;;  %9916 = vmatprep.subr.bf16.mxu0 %v10986_v30  ;;  %v10982_v48 = vld [vmem:[#allocation17 + $0x7d0] ss:$12 sps:$4 sm:$0xff]  }
 0x6b0   :  { %15309 = vst [vmem:[#allocation92_spill] sm:$0xff] %v14171_v46  ;;  %9974 = vmatprep.subr.bf16.mxu1 %v10977_v42  ;;  %9917 = vmatpush3.bf16.msra.mxu0 %v10988_v47  ;;  %v10985_v46 = vld [vmem:[#allocation17 + $0x878] ss:$12 sps:$4 sm:$0xff]  }
 0x6b1   :  { %v14175_v6 = vpop.f32.mrf.mxu1  ;;  %v14177_v5 = vpop.f32.mrf.mxu0  ;;  %9918 = vmatprep.subr.bf16.mxu0 %v10989_v0  ;;  %v15315_v47 = vld [vmem:[#allocation120_spill] sm:$0xff]  ;;  %v15316_v42 = vld [vmem:[#allocation146_spill] sm:$0xff]  ;;  %v15318_v0 = vld [vmem:[#allocation147_spill] sm:$0xff] }
 0x6b2   :  { %15310 = vst [vmem:[#allocation104_spill] sm:$0xff] %v14175_v6  ;;  %v15317_v6 = vld [vmem:[#allocation123_spill] sm:$0xff] }
 0x6b3   :  { %v14179_v15 = vpop.f32.mrf.mxu1  ;;  %v14181_v45 = vpop.f32.mrf.mxu0  ;;  %9975 = vmatpush3.bf16.msra.mxu1 %v10978_v36 }
 0x6b4   :  { %15311 = vst [vmem:[#allocation95_spill] sm:$0xff] %v14179_v15  ;;  %15312 = vst [vmem:[#allocation107_spill] sm:$0xff] %v14181_v45  ;;  %9976 = vmatprep.subr.bf16.mxu1 %v10981_v40  ;;  %9919 = vmatpush3.bf16.msra.mxu0 %v10990_v53  ;;  %v10987_v40 = vld [vmem:[#allocation17 + $0x7b8] ss:$12 sps:$4 sm:$0xff]   ;;  %v10991_v53 = vld [vmem:[#allocation17 + $0x860] ss:$12 sps:$4 sm:$0xff]  }
 0x6b5   :  { %v14183_v62 = vpop.f32.mrf.mxu1  ;;  %v14185_v30 = vpop.f32.mrf.mxu0  ;;  %8479 = vmatmul.mubr.bf16.gmra.mxu0 %v15315_v47  ;;  %8560 = vmatmul.mubr.bf16.gmra.mxu1 %v15316_v42  ;;  %v10993_v42 = vld [vmem:[#allocation17 + $0x848] ss:$12 sps:$4 sm:$0xff]  }
 0x6b6   :  { %15313 = vst [vmem:[#allocation94_spill] sm:$0xff] %v14183_v62  ;;  %15314 = vst [vmem:[#allocation106_spill] sm:$0xff] %v14185_v30  ;;  %8486 = vmatprep.mubr.bf16.mxu0 %v15317_v6  ;;  %8567 = vmatprep.mubr.bf16.mxu1 %v15318_v0  ;;  %v10992_v6 = vld [vmem:[#allocation17 + $0x7a0] ss:$12 sps:$4 sm:$0xff]  }
 0x6b7   :  { %v14191_v15 = vpop.f32.mrf.mxu1  ;;  %v14193_v45 = vpop.f32.mrf.mxu0  ;;  %9977 = vmatpush3.bf16.msra.mxu1 %v10982_v48  ;;  %v15327_v48 = vld [vmem:[#allocation122_spill] sm:$0xff] }
 0x6b8   :  { %15319 = vst [vmem:[#allocation109_spill] sm:$0xff] %v14191_v15  ;;  %15320 = vst [vmem:[#allocation113_spill] sm:$0xff] %v14193_v45  ;;  %9978 = vmatprep.subr.bf16.mxu1 %v10985_v46  ;;  %v15328_v46 = vld [vmem:[#allocation128_spill] sm:$0xff]  ;;  %v15329_v45 = vld [vmem:[#allocation125_spill] sm:$0xff] }
 0x6b9   :  { %v14195_v36 = vpop.f32.mrf.mxu1  ;;  %v14197_v62 = vpop.f32.mrf.mxu0 }
 0x6ba   :  { %15321 = vst [vmem:[#allocation108_spill] sm:$0xff] %v14195_v36  ;;  %15322 = vst [vmem:[#allocation112_spill] sm:$0xff] %v14197_v62  ;;  %v15330_v36 = vld [vmem:[#allocation130_spill] sm:$0xff] }
 0x6bb   :  { %v14199_v30 = vpop.f32.mrf.mxu1  ;;  %v14201_v47 = vpop.f32.mrf.mxu0  ;;  %9979 = vmatpush3.bf16.msra.mxu1 %v10987_v40  ;;  %v10994_v40 = vld [vmem:[#allocation17 + $0x788] ss:$12 sps:$4 sm:$0xff]  }
 0x6bc   :  { %15323 = vst [vmem:[#allocation111_spill] sm:$0xff] %v14199_v30  ;;  %15324 = vst [vmem:[#allocation115_spill] sm:$0xff] %v14201_v47  ;;  %9980 = vmatprep.subr.bf16.mxu1 %v10991_v53 }
 0x6bd   :  { %v14203_v0 = vpop.f32.mrf.mxu1  ;;  %v14205_v15 = vpop.f32.mrf.mxu0  ;;  %8487 = vmatmul.mubr.bf16.gmra.mxu0 %v15327_v48  ;;  %8568 = vmatmul.mubr.bf16.gmra.mxu1 %v15328_v46 }
 0x6be   :  { %15325 = vst [vmem:[#allocation110_spill] sm:$0xff] %v14203_v0  ;;  %15326 = vst [vmem:[#allocation114_spill] sm:$0xff] %v14205_v15  ;;  %8494 = vmatprep.mubr.bf16.mxu0 %v15329_v45  ;;  %8575 = vmatprep.mubr.bf16.mxu1 %v15330_v36  ;;  %v15339_v36 = vld [vmem:[#allocation124_spill] sm:$0xff] }
 0x6bf   :  { %v14211_v62 = vpop.f32.mrf.mxu1  ;;  %v14213_v30 = vpop.f32.mrf.mxu0  ;;  %9981 = vmatpush3.bf16.msra.mxu1 %v10992_v6  ;;  %v15341_v6 = vld [vmem:[#allocation127_spill] sm:$0xff] }
 0x6c0   :  { %15331 = vst [vmem:[#allocation117_spill] sm:$0xff] %v14211_v62  ;;  %15332 = vst [vmem:[#allocation141_spill] sm:$0xff] %v14213_v30  ;;  %9982 = vmatprep.subr.bf16.mxu1 %v10993_v42  ;;  %v15340_v62 = vld [vmem:[#allocation135_spill] sm:$0xff]  ;;  %v15342_v42 = vld [vmem:[#allocation136_spill] sm:$0xff] }
 0x6c1   :  { %v14215_v53 = vpop.f32.mrf.mxu1  ;;  %v14217_v0 = vpop.f32.mrf.mxu0 }
 0x6c2   :  { %15333 = vst [vmem:[#allocation116_spill] sm:$0xff] %v14215_v53  ;;  %15334 = vst [vmem:[#allocation142_spill] sm:$0xff] %v14217_v0 }
 0x6c3   :  { %v14219_v15 = vpop.f32.mrf.mxu1  ;;  %v14221_v48 = vpop.f32.mrf.mxu0  ;;  %9983 = vmatpush3.bf16.msra.mxu1 %v10994_v40 }
 0x6c4   :  { %15335 = vst [vmem:[#allocation119_spill] sm:$0xff] %v14219_v15  ;;  %15336 = vst [vmem:[#allocation143_spill] sm:$0xff] %v14221_v48 }
 0x6c5   :  { %v14223_v46 = vpop.f32.mrf.mxu1  ;;  %v14225_v45 = vpop.f32.mrf.mxu0  ;;  %8495 = vmatmul.mubr.bf16.gmra.mxu0 %v15339_v36  ;;  %8576 = vmatmul.mubr.bf16.gmra.mxu1 %v15340_v62  ;;  %v15350_v36 = vld [vmem:[#allocation148_spill] sm:$0xff] }
 0x6c6   :  { %15337 = vst [vmem:[#allocation118_spill] sm:$0xff] %v14223_v46  ;;  %15338 = vst [vmem:[#allocation144_spill] sm:$0xff] %v14225_v45  ;;  %8502 = vmatprep.mubr.bf16.mxu0 %v15341_v6  ;;  %8583 = vmatprep.mubr.bf16.mxu1 %v15342_v42  ;;  %v15349_v45 = vld [vmem:[#allocation126_spill] sm:$0xff]  ;;  %v15351_v62 = vld [vmem:[#allocation140_spill] sm:$0xff] }
 0x6c7   :  { %v14231_v53 = vpop.f32.mrf.mxu1  ;;  %v14233_v0 = vpop.f32.mrf.mxu0  ;;  %v15352_v6 = vld [vmem:[#allocation151_spill] sm:$0xff] }
 0x6c8   :  { %15343 = vst [vmem:[#allocation121_spill] sm:$0xff] %v14231_v53  ;;  %15344 = vst [vmem:[#allocation145_spill] sm:$0xff] %v14233_v0 }
 0x6c9   :  { %v14235_v15 = vpop.f32.mrf.mxu0  ;;  %v14237_v48 = vpop.f32.mrf.mxu1 }
 0x6ca   :  { %15345 = vst [vmem:[#allocation120_spill] sm:$0xff] %v14235_v15  ;;  %15346 = vst [vmem:[#allocation146_spill] sm:$0xff] %v14237_v48 }
 0x6cb   :  { %v14239_v40 = vpop.f32.mrf.mxu0  ;;  %v14247_v42 = vpop.f32.mrf.mxu1 }
 0x6cc   :  { %15347 = vst [vmem:[#allocation123_spill] sm:$0xff] %v14239_v40  ;;  %15353 = vst [vmem:[#allocation122_spill] sm:$0xff] %v14247_v42 }
 0x6cd   :  { %v14241_v46 = vpop.f32.mrf.mxu0  ;;  %8503 = vmatmul.mubr.bf16.gmra.mxu0 %v15349_v45  ;;  %8584 = vmatmul.mubr.bf16.gmra.mxu1 %v15350_v36  ;;  %v14253_v15 = vpop.f32.mrf.mxu1  ;;  %v15359_v45 = vld [vmem:[#allocation153_spill] sm:$0xff]  ;;  %v15360_v36 = vld [vmem:[#allocation150_spill] sm:$0xff] }
 0x6ce   :  { %15348 = vst [vmem:[#allocation147_spill] sm:$0xff] %v14241_v46  ;;  %8591 = vmatprep.mubr.bf16.mxu1 %v15351_v62  ;;  %8640 = vmatprep.mubr.bf16.mxu0 %v15352_v6  ;;  %15356 = vst [vmem:[#allocation130_spill] sm:$0xff] %v14253_v15  ;;  %v15358_v46 = vld [vmem:[#allocation149_spill] sm:$0xff]  ;;  %v15361_v62 = vld [vmem:[#allocation154_spill] sm:$0xff] }
 0x6cf   :  { %v14249_v53 = vpop.f32.mrf.mxu0  ;;  %v14261_v6 = vpop.f32.mrf.mxu1  ;;  %v15364_v15 = vld [vmem:[#allocation152_spill] sm:$0xff] }
 0x6d0   :  { %15354 = vst [vmem:[#allocation128_spill] sm:$0xff] %v14249_v53  ;;  %15362 = vst [vmem:[#allocation135_spill] sm:$0xff] %v14261_v6 }
 0x6d1   :  { %v14251_v0 = vpop.f32.mrf.mxu0  ;;  %v14263_v53 = vpop.f32.mrf.mxu1 }
 0x6d2   :  { %15355 = vst [vmem:[#allocation125_spill] sm:$0xff] %v14251_v0  ;;  %15363 = vst [vmem:[#allocation127_spill] sm:$0xff] %v14263_v53 }
 0x6d3   :  { %v14255_v48 = vpop.f32.mrf.mxu0 }
 0x6d4   :  { %15357 = vst [vmem:[#allocation124_spill] sm:$0xff] %v14255_v48  ;;  %v7807_v48 = vadd.f32 %v14117_v14, %v13987_v13  ;;  %v7813_v13 = vadd.f32 %v14125_v61, %v13998_v57  ;;  %v7817_v57 = vadd.f32 %v14137_v52, %v14004_v39  ;;  %v15369_v39 = vld [vmem:[#allocation53_spill] sm:$0xff] }
 0x6d5   :  { %v8028_v40 = vpop.f32.mrf.mxu0  ;;  %8592 = vmatmul.mubr.bf16.gmra.mxu1 %v15358_v46  ;;  %8641 = vmatmul.mubr.bf16.vlgmr.msra.gmra.mxu0 %v15359_v45  ;;  %v7803_v46 = vadd.f32 %v14103_v23, %v13977_v33  ;;  %v14271_v45 = vpop.f32.mrf.mxu1 }
 0x6d6   :  { %8599 = vmatprep.mubr.bf16.mxu1 %v15360_v36  ;;  %8648 = vmatprep.mubr.bf16.mxu0 %v15361_v62  ;;  %15365 = vst [vmem:[#allocation136_spill] sm:$0xff] %v14271_v45  ;;  %v7805_v62 = vadd.f32 %v14113_v35, %v13980_v20  ;;  %v7920_v45 = vadd.f32 %v14119_v60, %v7807_v48  ;;  %v15366_v35 = vld [vmem:[#allocation37_spill] sm:$0xff]  ;;  %v15367_v48 = vld [vmem:[#allocation50_spill] sm:$0xff] }
 0x6d7   :  { %v8030_v42 = vpop.f32.mrf.mxu0  ;;  %v14280_v33 = vpop.f32.mrf.mxu1 }
 0x6d9   :  { %v8032_v30 = vpop.f32.mrf.mxu0 }
 0x6db   :  { %v8034_v0 = vpop.f32.mrf.mxu0 }
 0x6dd   :  { %v8038_v47 = vpop.f32.mrf.mxu0  ;;  %8600 = vmatmul.mubr.bf16.gmra.mxu1 %v15364_v15  ;;  %8649 = vmatmul.mubr.bf16.gmra.mxu0 %v13800_v29  ;;  %v7916_v15 = vadd.f32 %v14111_v19, %v7803_v46  ;;  %v7809_v29 = vadd.f32 %v14121_v21, %v13993_v18  ;;  %v7815_v21 = vadd.f32 %v14133_v9, %v14001_v63 }
 0x6de   :  { %8656 = vmatprep.mubr.bf16.mxu0 %v13803_v16  ;;  %8737 = vmatprep.mubr.bf16.mxu1 %v13824_v51  ;;  %v7918_v51 = vadd.f32 %v14115_v11, %v7805_v62  ;;  %v7819_v63 = vadd.f32 %v14141_v54, %v14009_v3 }
 0x6df   :  { %v8040_v36 = vpop.f32.mrf.mxu0  ;;  %v8029_v23 = vadd.f32 %v8028_v40, %v7916_v15  ;;  %v7922_v11 = vadd.f32 %v14123_v28, %v7809_v29  ;;  %v15368_v28 = vld [vmem:[#allocation49_spill] sm:$0xff] }
 0x6e0   :  { %v8031_v19 = vadd.f32 %v8030_v42, %v7918_v51 }
 0x6e1   :  { %v8042_v53 = vpop.f32.mrf.mxu0  ;;  %v8035_v46 = vadd.f32 %v8034_v0, %v7922_v11  ;;  %v7823_v0 = vadd.f32 %v14145_v24, %v14014_v10  ;;  %v7825_v10 = vadd.f32 %v14153_v25, %v14017_v12  ;;  %v15372_v11 = vld [vmem:[#allocation54_spill] sm:$0xff]  ;;  %v7829_v12 = vadd.f32 %v14161_v32, %v14025_v4  ;;  %v15374_v4 = vld [vmem:[#allocation57_spill] sm:$0xff] }
 0x6e3   :  { %v8044_v16 = vpop.f32.mrf.mxu0 }
 0x6e5   :  { %v14284_v6 = vpop.f32.mrf.mxu0  ;;  %v8141_v20 = vpop.f32.mrf.mxu1  ;;  %8657 = vmatmul.mubr.bf16.gmra.mxu0 %v13817_v56  ;;  %8738 = vmatmul.mubr.bf16.vlgmr.msra.gmra.mxu1 %v13830_v2  ;;  %v8033_v56 = vadd.f32 %v8032_v30, %v7920_v45  ;;  %v7928_v45 = vadd.f32 %v14135_v50, %v7815_v21  ;;  %v15370_v50 = vld [vmem:[#allocation51_spill] sm:$0xff] }
 0x6e6   :  { %v8142_v18 = vadd.f32 %v8141_v20, %v8029_v23  ;;  %8664 = vmatprep.mubr.bf16.mxu0 %v15366_v35  ;;  %8745 = vmatprep.mubr.bf16.mxu1 %v13853_v26  ;;  %v7926_v26 = vadd.f32 %v14131_v58, %v7813_v13  ;;  %v7930_v58 = vadd.f32 %v14139_v44, %v7817_v57 }
 0x6e7   :  { %v14293_v14 = vpop.f32.mrf.mxu0  ;;  %v8143_v60 = vpop.f32.mrf.mxu1  ;;  %v8041_v3 = vadd.f32 %v8040_v36, %v7928_v45  ;;  %v7932_v44 = vadd.f32 %v14143_v27, %v7819_v63  ;;  %v15380_v63 = vld [vmem:[#allocation83_spill] sm:$0xff] }
 0x6e8   :  { %v8802_v2 = vadd.f32 %v8142_v18, %v15367_v48  ;;  %v8144_v40 = vadd.f32 %v8143_v60, %v8031_v19  ;;  %v8039_v29 = vadd.f32 %v8038_v47, %v7926_v26  ;;  %v7827_v18 = vadd.f32 %v14157_v17, %v14020_v34  ;;  %v15373_v17 = vld [vmem:[#allocation59_spill] sm:$0xff]  ;;  %v15376_v26 = vld [vmem:[#allocation133_spill] sm:$0xff] }
 0x6e9   :  { %v14300_v61 = vpop.f32.mrf.mxu0  ;;  %v8145_v42 = vpop.f32.mrf.mxu1  ;;  %v8045_v27 = vadd.f32 %v8044_v16, %v7932_v44  ;;  %v7833_v16 = vadd.f32 %v14165_v49, %v14030_v8 }
 0x6ea   :  { %8850 = vst [vmem:[#allocation20] sm:$0xff] %v8802_v2  ;;  %v8803_v62 = vadd.f32 %v8144_v40, %v15368_v28  ;;  %v8146_v15 = vadd.f32 %v8145_v42, %v8033_v56  ;;  %v7938_v56 = vadd.f32 %v14155_v1, %v7825_v10  ;;  %v15375_v42 = vld [vmem:[#allocation129_spill] sm:$0xff] }
 0x6eb   :  { %v14306_v9 = vpop.f32.mrf.mxu0  ;;  %v8147_v30 = vpop.f32.mrf.mxu1  ;;  %v15378_v28 = vld [vmem:[#allocation81_spill] sm:$0xff] }
 0x6ec   :  { %8851 = vst [vmem:[#allocation20 + $0x8] sm:$0xff] %v8803_v62  ;;  %v8805_v52 = vadd.f32 %v8146_v15, %v15369_v39  ;;  %v8148_v51 = vadd.f32 %v8147_v30, %v8035_v46  ;;  %v8051_v1 = vadd.f32 %v14293_v14, %v7938_v56  ;;  %v15379_v14 = vld [vmem:[#allocation62_spill] sm:$0xff]  ;;  %v7837_v30 = vadd.f32 %v14177_v5, %v15380_v63  ;;  %v15381_v39 = vld [vmem:[#allocation92_spill] sm:$0xff] }
 0x6ed   :  { %v14313_v23 = vpop.f32.mrf.mxu0  ;;  %v8151_v20 = vpop.f32.mrf.mxu1  ;;  %8665 = vmatmul.mubr.bf16.gmra.mxu0 %v13849_v55  ;;  %8746 = vmatmul.mubr.bf16.gmra.mxu1 %v13856_v7  ;;  %v8043_v55 = vadd.f32 %v8042_v53, %v7930_v58  ;;  %v15371_v7 = vld [vmem:[#allocation56_spill] sm:$0xff]  ;;  %v15394_v56 = vld [vmem:[#allocation138_spill] sm:$0xff] }
 0x6ee   :  { %8853 = vst [vmem:[#allocation20 + $0x18] sm:$0xff] %v8805_v52  ;;  %v8806_v54 = vadd.f32 %v8148_v51, %v15370_v50  ;;  %v8152_v47 = vadd.f32 %v8151_v20, %v8039_v29  ;;  %8672 = vmatprep.mubr.bf16.mxu0 %v13858_v37  ;;  %8753 = vmatprep.mubr.bf16.mxu1 %v13881_v22  ;;  %v15382_v58 = vld [vmem:[#allocation60_spill] sm:$0xff]  ;;  %v15383_v20 = vld [vmem:[#allocation86_spill] sm:$0xff] }
 0x6ef   :  { %v14321_v13 = vpop.f32.mrf.mxu0  ;;  %v8153_v24 = vpop.f32.mrf.mxu1  ;;  %v7936_v22 = vadd.f32 %v14150_v38, %v7823_v0  ;;  %v7940_v38 = vadd.f32 %v14159_v59, %v7827_v18  ;;  %v15377_v59 = vld [vmem:[#allocation105_spill] sm:$0xff]  ;;  %v7946_v52 = vadd.f32 %v15381_v39, %v7833_v16  ;;  %v15405_v39 = vld [vmem:[#allocation108_spill] sm:$0xff] }
 0x6f0   :  { %8854 = vst [vmem:[#allocation20 + $0x20] sm:$0xff] %v8806_v54  ;;  %v8808_v36 = vadd.f32 %v8152_v47, %v15371_v7  ;;  %v8154_v19 = vadd.f32 %v8153_v24, %v8041_v3  ;;  %v7942_v46 = vadd.f32 %v15377_v59, %v7829_v12  ;;  %v15385_v47 = vld [vmem:[#allocation104_spill] sm:$0xff]  ;;  %v15386_v24 = vld [vmem:[#allocation65_spill] sm:$0xff]  ;;  %v15387_v7 = vld [vmem:[#allocation95_spill] sm:$0xff] }
 0x6f1   :  { %v14328_v35 = vpop.f32.mrf.mxu0  ;;  %v8155_v37 = vpop.f32.mrf.mxu1  ;;  %v8049_v34 = vadd.f32 %v14284_v6, %v7936_v22  ;;  %v8059_v5 = vadd.f32 %v14313_v23, %v7946_v52  ;;  %v15392_v23 = vld [vmem:[#allocation63_spill] sm:$0xff]  ;;  %v15397_v16 = vld [vmem:[#allocation113_spill] sm:$0xff] }
 0x6f2   :  { %8856 = vst [vmem:[#allocation20 + $0x30] sm:$0xff] %v8808_v36  ;;  %v8809_v60 = vadd.f32 %v8154_v19, %v15372_v11  ;;  %v8156_v21 = vadd.f32 %v8155_v37, %v8043_v55  ;;  %v8055_v51 = vadd.f32 %v14306_v9, %v7942_v46  ;;  %v7950_v9 = vadd.f32 %v15387_v7, %v7837_v30  ;;  %v15388_v36 = vld [vmem:[#allocation97_spill] sm:$0xff]  ;;  %v15389_v19 = vld [vmem:[#allocation106_spill] sm:$0xff] }
 0x6f3   :  { %v14334_v25 = vpop.f32.mrf.mxu0  ;;  %v8157_v53 = vpop.f32.mrf.mxu1  ;;  %v7843_v18 = vadd.f32 %v15389_v19, %v15388_v36  ;;  %v15391_v11 = vld [vmem:[#allocation137_spill] sm:$0xff]  ;;  %v15414_v36 = vld [vmem:[#allocation156_spill] sm:$0xff]  ;;  %v15415_v19 = vld [vmem:[#allocation110_spill] sm:$0xff] }
 0x6f4   :  { %8857 = vst [vmem:[#allocation20 + $0x38] sm:$0xff] %v8809_v60  ;;  %v8811_v48 = vadd.f32 %v8156_v21, %v15373_v17  ;;  %v8158_v2 = vadd.f32 %v8157_v53, %v8045_v27  ;;  %v15390_v27 = vld [vmem:[#allocation134_spill] sm:$0xff]  ;;  %v15393_v53 = vld [vmem:[#allocation131_spill] sm:$0xff] }
 0x6f5   :  { %v14342_v40 = vpop.f32.mrf.mxu0  ;;  %v8161_v57 = vpop.f32.mrf.mxu1  ;;  %8673 = vmatmul.mubr.bf16.gmra.mxu0 %v13872_v31  ;;  %8754 = vmatmul.mubr.bf16.gmra.mxu1 %v13884_v41  ;;  %v7835_v31 = vadd.f32 %v14173_v43, %v15378_v28  ;;  %v8053_v41 = vadd.f32 %v14300_v61, %v7940_v38  ;;  %v15384_v61 = vld [vmem:[#allocation107_spill] sm:$0xff]  ;;  %v15396_v38 = vld [vmem:[#allocation85_spill] sm:$0xff] }
 0x6f6   :  { %8859 = vst [vmem:[#allocation20 + $0x48] sm:$0xff] %v8811_v48  ;;  %v8812_v32 = vadd.f32 %v8158_v2, %v15374_v4  ;;  %v8162_v6 = vadd.f32 %v8161_v57, %v8049_v34  ;;  %8680 = vmatprep.mubr.bf16.mxu0 %v15375_v42  ;;  %8761 = vmatprep.mubr.bf16.mxu1 %v15376_v26  ;;  %v15395_v34 = vld [vmem:[#allocation94_spill] sm:$0xff]  ;;  %v15400_v42 = vld [vmem:[#allocation112_spill] sm:$0xff] }
 0x6f7   :  { %v14351_v8 = vpop.f32.mrf.mxu0  ;;  %v8163_v49 = vpop.f32.mrf.mxu1  ;;  %v7839_v3 = vadd.f32 %v15384_v61, %v15383_v20  ;;  %v7948_v44 = vadd.f32 %v15385_v47, %v7835_v31  ;;  %v7845_v57 = vadd.f32 %v15397_v16, %v15396_v38  ;;  %v15407_v20 = vld [vmem:[#allocation111_spill] sm:$0xff]  ;;  %v15420_v38 = vld [vmem:[#allocation98_spill] sm:$0xff] }
 0x6f8   :  { %8860 = vst [vmem:[#allocation20 + $0x50] sm:$0xff] %v8812_v32  ;;  %v8814_v62 = vadd.f32 %v8162_v6, %v15379_v14  ;;  %v8164_v15 = vadd.f32 %v8163_v49, %v8051_v1  ;;  %v8063_v1 = vadd.f32 %v14328_v35, %v7950_v9  ;;  %v15399_v6 = vld [vmem:[#allocation96_spill] sm:$0xff]  ;;  %v15401_v49 = vld [vmem:[#allocation109_spill] sm:$0xff]  ;;  %v15404_v35 = vld [vmem:[#allocation115_spill] sm:$0xff] }
 0x6f9   :  { %v14359_v45 = vpop.f32.mrf.mxu0  ;;  %v8165_v29 = vpop.f32.mrf.mxu1  ;;  %v8061_v60 = vadd.f32 %v14321_v13, %v7948_v44  ;;  %v7952_v17 = vadd.f32 %v15395_v34, %v7839_v3  ;;  %v15398_v13 = vld [vmem:[#allocation68_spill] sm:$0xff]  ;;  %v7847_v26 = vadd.f32 %v15400_v42, %v15399_v6  ;;  %v7956_v28 = vadd.f32 %v15401_v49, %v7843_v18  ;;  %v15408_v61 = vld [vmem:[#allocation99_spill] sm:$0xff]  ;;  %v15409_v3 = vld [vmem:[#allocation114_spill] sm:$0xff] }
 0x6fa   :  { %8862 = vst [vmem:[#allocation20 + $0x60] sm:$0xff] %v8814_v62  ;;  %v8815_v0 = vadd.f32 %v8164_v15, %v15382_v58  ;;  %v8166_v43 = vadd.f32 %v8165_v29, %v8053_v41  ;;  %v15402_v41 = vld [vmem:[#allocation66_spill] sm:$0xff]  ;;  %v15403_v15 = vld [vmem:[#allocation87_spill] sm:$0xff]  ;;  %v7958_v52 = vadd.f32 %v15405_v39, %v7845_v57  ;;  %v15423_v6 = vld [vmem:[#allocation89_spill] sm:$0xff] }
 0x6fb   :  { %v14366_v50 = vpop.f32.mrf.mxu0  ;;  %v8167_v54 = vpop.f32.mrf.mxu1  ;;  %v8065_v31 = vadd.f32 %v14334_v25, %v7952_v17  ;;  %v7849_v63 = vadd.f32 %v15404_v35, %v15403_v15  ;;  %v15406_v58 = vld [vmem:[#allocation71_spill] sm:$0xff]  ;;  %v7960_v25 = vadd.f32 %v15407_v20, %v7847_v26  ;;  %v15421_v16 = vld [vmem:[#allocation142_spill] sm:$0xff]  ;;  %v15425_v49 = vld [vmem:[#allocation116_spill] sm:$0xff] }
 0x6fc   :  { %8863 = vst [vmem:[#allocation20 + $0x68] sm:$0xff] %v8815_v0  ;;  %v8817_v10 = vadd.f32 %v8166_v43, %v15386_v24  ;;  %v8168_v55 = vadd.f32 %v8167_v54, %v8055_v51  ;;  %v8069_v51 = vadd.f32 %v14342_v40, %v7956_v28  ;;  %v7853_v54 = vadd.f32 %v15409_v3, %v15408_v61  ;;  %v15411_v24 = vld [vmem:[#allocation139_spill] sm:$0xff]  ;;  %v15412_v40 = vld [vmem:[#allocation69_spill] sm:$0xff]  ;;  %v15434_v61 = vld [vmem:[#allocation118_spill] sm:$0xff] }
 0x6fd   :  { %v14374_v37 = vpop.f32.mrf.mxu0  ;;  %v8171_v22 = vpop.f32.mrf.mxu1  ;;  %8681 = vmatmul.mubr.bf16.gmra.mxu0 %v15390_v27  ;;  %8762 = vmatmul.mubr.bf16.gmra.mxu1 %v15391_v11  ;;  %v15413_v9 = vld [vmem:[#allocation155_spill] sm:$0xff]  ;;  %v7962_v18 = vadd.f32 %v15415_v19, %v7849_v63  ;;  %v15416_v11 = vld [vmem:[#allocation84_spill] sm:$0xff]  ;;  %v7857_v57 = vadd.f32 %v15421_v16, %v15420_v38  ;;  %v15427_v15 = vld [vmem:[#allocation101_spill] sm:$0xff] }
 0x6fe   :  { %8865 = vst [vmem:[#allocation20 + $0x78] sm:$0xff] %v8817_v10  ;;  %v8818_v21 = vadd.f32 %v8168_v55, %v15392_v23  ;;  %v8172_v12 = vadd.f32 %v8171_v22, %v8059_v5  ;;  %8688 = vmatprep.mubr.bf16.mxu0 %v15393_v53  ;;  %8769 = vmatprep.mubr.bf16.mxu1 %v15394_v56  ;;  %v15410_v5 = vld [vmem:[#allocation132_spill] sm:$0xff]  ;;  %v15419_v56 = vld [vmem:[#allocation117_spill] sm:$0xff]  ;;  %v15444_v38 = vld [vmem:[#allocation146_spill] sm:$0xff] }
 0x6ff   :  { %v14383_v48 = vpop.f32.mrf.mxu0  ;;  %v8173_v2 = vpop.f32.mrf.mxu1  ;;  %v8071_v10 = vadd.f32 %v14351_v8, %v7958_v52  ;;  %v15418_v8 = vld [vmem:[#allocation74_spill] sm:$0xff]  ;;  %v7966_v34 = vadd.f32 %v15419_v56, %v7853_v54  ;;  %v15429_v39 = vld [vmem:[#allocation157_spill] sm:$0xff]  ;;  %v15443_v56 = vld [vmem:[#allocation123_spill] sm:$0xff] }
 0x700   :  { %8866 = vst [vmem:[#allocation20 + $0x80] sm:$0xff] %v8818_v21  ;;  %v8820_v4 = vadd.f32 %v8172_v12, %v15398_v13  ;;  %v8174_v32 = vadd.f32 %v8173_v2, %v8061_v60  ;;  %v15417_v60 = vld [vmem:[#allocation141_spill] sm:$0xff]  ;;  %v8073_v21 = vadd.f32 %v14359_v45, %v7960_v25  ;;  %v15422_v13 = vld [vmem:[#allocation72_spill] sm:$0xff]  ;;  %v15424_v45 = vld [vmem:[#allocation143_spill] sm:$0xff] }
 0x701   :  { %v14391_v59 = vpop.f32.mrf.mxu0  ;;  %v8175_v46 = vpop.f32.mrf.mxu1  ;;  %v7855_v23 = vadd.f32 %v15417_v60, %v15416_v11  ;;  %v7859_v42 = vadd.f32 %v15424_v45, %v15423_v6  ;;  %v15430_v52 = vld [vmem:[#allocation158_spill] sm:$0xff]  ;;  %v15440_v11 = vld [vmem:[#allocation120_spill] sm:$0xff]  ;;  %v15447_v6 = vld [vmem:[#allocation147_spill] sm:$0xff] }
 0x702   :  { %8868 = vst [vmem:[#allocation20 + $0x90] sm:$0xff] %v8820_v4  ;;  %v8821_v14 = vadd.f32 %v8174_v32, %v15402_v41  ;;  %v8176_v62 = vadd.f32 %v8175_v46, %v8063_v1  ;;  %v8075_v1 = vadd.f32 %v14366_v50, %v7962_v18  ;;  %v15426_v41 = vld [vmem:[#allocation77_spill] sm:$0xff]  ;;  %v15428_v50 = vld [vmem:[#allocation144_spill] sm:$0xff]  ;;  %v15433_v25 = vld [vmem:[#allocation82_spill] sm:$0xff] }
 0x703   :  { %v14398_v30 = vpop.f32.mrf.mxu0  ;;  %v8177_v29 = vpop.f32.mrf.mxu1  ;;  %v7968_v28 = vadd.f32 %v15425_v49, %v7855_v23  ;;  %v7863_v35 = vadd.f32 %v15428_v50, %v15427_v15  ;;  %v7972_v3 = vadd.f32 %v15434_v61, %v7859_v42  ;;  %v15449_v49 = vld [vmem:[#allocation122_spill] sm:$0xff] }
 0x704   :  { %8869 = vst [vmem:[#allocation20 + $0x98] sm:$0xff] %v8821_v14  ;;  %v8823_v0 = vadd.f32 %v8176_v62, %v15406_v58  ;;  %v8178_v43 = vadd.f32 %v8177_v29, %v8065_v31  ;;  %v8079_v31 = vadd.f32 %v14374_v37, %v7966_v34  ;;  %v15432_v37 = vld [vmem:[#allocation75_spill] sm:$0xff]  ;;  %v15452_v15 = vld [vmem:[#allocation130_spill] sm:$0xff] }
 0x705   :  { %v14406_v47 = vpop.f32.mrf.mxu0  ;;  %v8181_v44 = vpop.f32.mrf.mxu1  ;;  %8689 = vmatmul.mubr.bf16.gmra.mxu0 %v15410_v5  ;;  %8770 = vmatmul.mubr.bf16.gmra.mxu1 %v15411_v24  ;;  %v15435_v5 = vld [vmem:[#allocation88_spill] sm:$0xff]  ;;  %v15436_v24 = vld [vmem:[#allocation145_spill] sm:$0xff]  ;;  %v8085_v23 = vadd.f32 %v14398_v30, %v7972_v3 }
 0x706   :  { %8871 = vst [vmem:[#allocation20 + $0xa8] sm:$0xff] %v8823_v0  ;;  %v8824_v55 = vadd.f32 %v8178_v43, %v15412_v40  ;;  %v8182_v7 = vadd.f32 %v8181_v44, %v8069_v51  ;;  %8696 = vmatprep.mubr.bf16.mxu0 %v15413_v9  ;;  %8777 = vmatprep.mubr.bf16.mxu1 %v15414_v36  ;;  %v15431_v51 = vld [vmem:[#allocation119_spill] sm:$0xff]  ;;  %v15438_v9 = vld [vmem:[#allocation121_spill] sm:$0xff] }
 0x707   :  { %v14415_v22 = vpop.f32.mrf.mxu0  ;;  %v8183_v27 = vpop.f32.mrf.mxu1  ;;  %v7970_v58 = vadd.f32 %v15431_v51, %v7857_v57  ;;  %v8081_v0 = vadd.f32 %v14383_v48, %v7968_v28  ;;  %v7976_v36 = vadd.f32 %v15438_v9, %v7863_v35  ;;  %v15453_v35 = vld [vmem:[#allocation90_spill] sm:$0xff]  ;;  %v15461_v9 = vld [vmem:[#allocation93_spill] sm:$0xff] }
 0x708   :  { %8872 = vst [vmem:[#allocation20 + $0xb0] sm:$0xff] %v8824_v55  ;;  %v8826_v12 = vadd.f32 %v8182_v7, %v15418_v8  ;;  %v8184_v53 = vadd.f32 %v8183_v27, %v8071_v10  ;;  %v7865_v10 = vadd.f32 %v15436_v24, %v15435_v5  ;;  %v15437_v55 = vld [vmem:[#allocation79_spill] sm:$0xff]  ;;  %v15439_v27 = vld [vmem:[#allocation100_spill] sm:$0xff]  ;;  %v15458_v5 = vld [vmem:[#allocation125_spill] sm:$0xff] }
 0x709   :  { %v14422_v17 = vpop.f32.mrf.mxu0  ;;  %v8185_v2 = vpop.f32.mrf.mxu1  ;;  %v8083_v40 = vadd.f32 %v14391_v59, %v7970_v58  ;;  %v7867_v60 = vadd.f32 %v15440_v11, %v15439_v27  ;;  %v8089_v57 = vadd.f32 %v14406_v47, %v7976_v36  ;;  %v15451_v47 = vld [vmem:[#allocation38_spill] sm:$0xff]  ;;  %v15462_v36 = vld [vmem:[#allocation124_spill] sm:$0xff] }
 0x70a   :  { %8874 = vst [vmem:[#allocation20 + $0xc0] sm:$0xff] %v8826_v12  ;;  %v8827_v4 = vadd.f32 %v8184_v53, %v15422_v13  ;;  %v8186_v32 = vadd.f32 %v8185_v2, %v8073_v21  ;;  %v15441_v21 = vld [vmem:[#allocation78_spill] sm:$0xff]  ;;  %v15442_v53 = vld [vmem:[#allocation91_spill] sm:$0xff]  ;;  %v7978_v16 = vadd.f32 %v15444_v38, %v7865_v10 }
 0x70b   :  { %v14430_v26 = vpop.f32.mrf.mxu0  ;;  %v8187_v46 = vpop.f32.mrf.mxu1  ;;  %v7869_v59 = vadd.f32 %v15443_v56, %v15442_v53  ;;  %v7980_v28 = vadd.f32 %v15449_v49, %v7867_v60  ;;  %v15464_v56 = vld [vmem:[#allocation80_spill] sm:$0xff] }
 0x70c   :  { %8875 = vst [vmem:[#allocation20 + $0xc8] sm:$0xff] %v8827_v4  ;;  %v8829_v14 = vadd.f32 %v8186_v32, %v15426_v41  ;;  %v8188_v62 = vadd.f32 %v8187_v46, %v8075_v1  ;;  %v15445_v1 = vld [vmem:[#allocation31_spill] sm:$0xff]  ;;  %v15448_v46 = vld [vmem:[#allocation40_spill] sm:$0xff] }
 0x70d   :  { %v14437_v63 = vpop.f32.mrf.mxu0  ;;  %v8191_v29 = vpop.f32.mrf.mxu1  ;;  %8697 = vmatmul.mubr.bf16.gmra.mxu0 %v15429_v39  ;;  %8778 = vmatmul.mubr.bf16.gmra.mxu1 %v15430_v52  ;;  %v15446_v32 = vld [vmem:[#allocation103_spill] sm:$0xff]  ;;  %v15450_v41 = vld [vmem:[#allocation32_spill] sm:$0xff]  ;;  %v7982_v50 = vadd.f32 %v15452_v15, %v7869_v59  ;;  %v8093_v58 = vadd.f32 %v14422_v17, %v7980_v28 }
 0x70e   :  { %8877 = vst [vmem:[#allocation20 + $0xd8] sm:$0xff] %v8829_v14  ;;  %v8830_v43 = vadd.f32 %v8188_v62, %v15432_v37  ;;  %v8192_v20 = vadd.f32 %v8191_v29, %v8079_v31  ;;  %8785 = vmatprep.mubr.bf16.mxu1 %v15433_v25  ;;  %v7873_v30 = vadd.f32 %v15447_v6, %v15446_v32  ;;  %v15454_v29 = vld [vmem:[#allocation128_spill] sm:$0xff]  ;;  %v15469_v15 = vld [vmem:[#allocation39_spill] sm:$0xff] }
 0x70f   :  { %v14446_v54 = vpop.f32.mrf.mxu0  ;;  %v8193_v44 = vpop.f32.mrf.mxu1  ;;  %v8091_v31 = vadd.f32 %v14415_v22, %v7978_v16  ;;  %v7875_v39 = vadd.f32 %v15454_v29, %v15453_v35  ;;  %v8095_v10 = vadd.f32 %v14430_v26, %v7982_v50  ;;  %v15465_v59 = vld [vmem:[#allocation136_spill] sm:$0xff]  ;;  %v15466_v16 = vld [vmem:[#allocation35_spill] sm:$0xff] }
 0x710   :  { %8878 = vst [vmem:[#allocation20 + $0xe0] sm:$0xff] %v8830_v43  ;;  %v8832_v7 = vadd.f32 %v8192_v20, %v15437_v55  ;;  %v8194_v48 = vadd.f32 %v8193_v44, %v8081_v0  ;;  %v15455_v0 = vld [vmem:[#allocation36_spill] sm:$0xff]  ;;  %v15456_v20 = vld [vmem:[#allocation135_spill] sm:$0xff]  ;;  %v15457_v44 = vld [vmem:[#allocation102_spill] sm:$0xff] }
 0x711   :  { %v8102_v19 = vpop.f32.mrf.mxu0  ;;  %v8195_v18 = vpop.f32.mrf.mxu1  ;;  %v7986_v25 = vadd.f32 %v15456_v20, %v7873_v30  ;;  %v7877_v24 = vadd.f32 %v15458_v5, %v15457_v44  ;;  %v15467_v6 = vld [vmem:[#allocation48_spill] sm:$0xff] }
 0x712   :  { %8880 = vst [vmem:[#allocation20 + $0xf0] sm:$0xff] %v8832_v7  ;;  %v8833_v8 = vadd.f32 %v8194_v48, %v15441_v21  ;;  %v8196_v12 = vadd.f32 %v8195_v18, %v8083_v40  ;;  %v15459_v40 = vld [vmem:[#allocation33_spill] sm:$0xff]  ;;  %v15460_v48 = vld [vmem:[#allocation127_spill] sm:$0xff]  ;;  %v7879_v18 = vadd.f32 %v15462_v36, %v15461_v9 }
 0x713   :  { %v8104_v34 = vpop.f32.mrf.mxu0  ;;  %v8197_v2 = vpop.f32.mrf.mxu1  ;;  %v7988_v17 = vadd.f32 %v15460_v48, %v7875_v39  ;;  %v8099_v60 = vadd.f32 %v14437_v63, %v7986_v25 }
 0x714   :  { %8881 = vst [vmem:[#allocation20 + $0xf8] sm:$0xff] %v8833_v8  ;;  %v8835_v13 = vadd.f32 %v8196_v12, %v15445_v1  ;;  %v8198_v4 = vadd.f32 %v8197_v2, %v8085_v23  ;;  %v15463_v23 = vld [vmem:[#allocation34_spill] sm:$0xff]  ;;  %v7990_v2 = vadd.f32 %v15465_v59, %v7877_v24 }
 0x715   :  { %v8201_v45 = vpop.f32.mrf.mxu1  ;;  %v9664_v42 = vpop.f32.mrf.mxu0  ;;  %8786 = vmatmul.mubr.bf16.gmra.mxu1 %v15448_v46  ;;  %v8101_v38 = vadd.f32 %v14446_v54, %v7988_v17 }
 0x716   :  { %8883 = vst [vmem:[#allocation20 + $0x108] sm:$0xff] %v8835_v13  ;;  %v8836_v14 = vadd.f32 %v8198_v4, %v15450_v41  ;;  %v8202_v62 = vadd.f32 %v8201_v45, %v8089_v57  ;;  %8793 = vmatprep.mubr.bf16.mxu1 %v15451_v47  ;;  %v7992_v13 = vadd.f32 %v14280_v33, %v7879_v18  ;;  %v11151_v47 = vld [vmem:[#allocation19] sm:$0x7] }
 0x717   :  { %v8203_v52 = vpop.f32.mrf.mxu1  ;;  %v9665_v51 = vpop.f32.mrf.mxu0  ;;  %v8103_v32 = vadd.f32 %v8102_v19, %v7990_v2  ;;  %v14492_v33 = vrot.slane %v11151_v47, %v15469_v15  ;;  %v15470_v19 = vld [vmem:[#allocation47_spill] sm:$0xff] }
 0x718   :  { %8884 = vst [vmem:[#allocation20 + $0x110] sm:$0xff] %v8836_v14  ;;  %v8838_v37 = vadd.f32 %v8202_v62, %v15455_v0  ;;  %v8204_v43 = vadd.f32 %v8203_v52, %v8091_v31  ;;  %v9666_v22 = vadd.f32 %v9665_v51, %v9664_v42  ;;  %v8105_v28 = vadd.f32 %v8104_v34, %v7992_v13  ;;  %v15468_v31 = vld [vmem:[#allocation42_spill] sm:$0xff]  ;;  %v15471_v51 = vld [vmem:[#allocation41_spill] sm:$0xff] }
 0x719   :  { %v8205_v61 = vpop.f32.mrf.mxu1  ;;  %v9667_v3 = vpop.f32.mrf.mxu0 }
 0x71a   :  { %8886 = vst [vmem:[#allocation20 + $0x120] sm:$0xff] %v8838_v37  ;;  %v8839_v55 = vadd.f32 %v8204_v43, %v15459_v40  ;;  %v8206_v7 = vadd.f32 %v8205_v61, %v8093_v58  ;;  %v8255_v37 = vadd.f32 %v9666_v22, %v14492_v33 }
 0x71b   :  { %v8207_v27 = vpop.f32.mrf.mxu1  ;;  %v9668_v11 = vpop.f32.mrf.mxu0 }
 0x71c   :  { %8887 = vst [vmem:[#allocation20 + $0x128] sm:$0xff] %v8839_v55  ;;  %v8841_v21 = vadd.f32 %v8206_v7, %v15463_v23  ;;  %v8208_v8 = vadd.f32 %v8207_v27, %v8095_v10  ;;  %v9669_v12 = vadd.f32 %v9668_v11, %v9667_v3 }
 0x71d   :  { %v8211_v53 = vpop.f32.mrf.mxu1  ;;  %v9670_v26 = vpop.f32.mrf.mxu0  ;;  %8794 = vmatmul.mubr.bf16.gmra.mxu1 %v15464_v56 }
 0x71e   :  { %8889 = vst [vmem:[#allocation20 + $0x138] sm:$0xff] %v8841_v21  ;;  %v8842_v57 = vadd.f32 %v8208_v8, %v15466_v16  ;;  %v8212_v1 = vadd.f32 %v8211_v53, %v8099_v60  ;;  %v8258_v24 = vadd.f32 %v9669_v12, %v14492_v33 }
 0x71f   :  { %v8213_v63 = vpop.f32.mrf.mxu1  ;;  %v9671_v4 = vpop.f32.mrf.mxu0 }
 0x720   :  { %8890 = vst [vmem:[#allocation20 + $0x140] sm:$0xff] %v8842_v57  ;;  %v8844_v30 = vadd.f32 %v8212_v1, %v15467_v6  ;;  %v8214_v45 = vadd.f32 %v8213_v63, %v8101_v38  ;;  %v9672_v42 = vadd.f32 %v9671_v4, %v9670_v26 }
 0x721   :  { %v8215_v46 = vpop.f32.mrf.mxu1  ;;  %v9673_v49 = vpop.f32.mrf.mxu0 }
 0x722   :  { %8892 = vst [vmem:[#allocation20 + $0x150] sm:$0xff] %v8844_v30  ;;  %v8845_v54 = vadd.f32 %v8214_v45, %v15468_v31  ;;  %v8216_v41 = vadd.f32 %v8215_v46, %v8103_v32  ;;  %v8263_v22 = vadd.f32 %v9672_v42, %v14492_v33 }
 0x723   :  { %v8217_v14 = vpop.f32.mrf.mxu1  ;;  %v9674_v62 = vpop.f32.mrf.mxu0 }
 0x724   :  { %8893 = vst [vmem:[#allocation20 + $0x158] sm:$0xff] %v8845_v54  ;;  %v8847_v50 = vadd.f32 %v8216_v41, %v15470_v19  ;;  %v8218_v35 = vadd.f32 %v8217_v14, %v8105_v28  ;;  %v9675_v29 = vadd.f32 %v9674_v62, %v9673_v49 }
 0x725   :  { %v9676_v39 = vpop.f32.mrf.mxu0  ;;  %v9728_v52 = vpop.f32.mrf.mxu1 }
 0x726   :  { %8895 = vst [vmem:[#allocation20 + $0x168] sm:$0xff] %v8847_v50  ;;  %v8848_v34 = vadd.f32 %v8218_v35, %v15471_v51  ;;  %v8266_v8 = vadd.f32 %v9675_v29, %v14492_v33 }
 0x727   :  { %v9677_v58 = vpop.f32.mrf.mxu0  ;;  %v9729_v0 = vpop.f32.mrf.mxu1 }
 0x728   :  { %8896 = vst [vmem:[#allocation20 + $0x170] sm:$0xff] %v8848_v34  ;;  %v9678_v43 = vadd.f32 %v9677_v58, %v9676_v39  ;;  %v9730_v20 = vadd.f32 %v9729_v0, %v9728_v52 }
 0x729   :  { %v9679_v25 = vpop.f32.mrf.mxu0  ;;  %v9731_v61 = vpop.f32.mrf.mxu1 }
 0x72a   :  { %v14497_v3 = vadd.f32 %v9730_v20, %v8255_v37  ;;  %v8271_v16 = vadd.f32 %v9678_v43, %v14492_v33 }
 0x72b   :  { %v9680_v44 = vpop.f32.mrf.mxu0  ;;  %v9732_v5 = vpop.f32.mrf.mxu1 }
 0x72c   :  { %v9681_v10 = vadd.f32 %v9680_v44, %v9679_v25  ;;  %v9733_v40 = vadd.f32 %v9732_v5, %v9731_v61 }
 0x72d   :  { %v9682_v55 = vpop.f32.mrf.mxu0  ;;  %v9734_v7 = vpop.f32.mrf.mxu1 }
 0x72e   :  { %v14500_v48 = vadd.f32 %v9733_v40, %v8258_v24  ;;  %v8274_v30 = vadd.f32 %v9681_v10, %v14492_v33 }
 0x72f   :  { %v9683_v17 = vpop.f32.mrf.mxu0  ;;  %v9735_v9 = vpop.f32.mrf.mxu1 }
 0x730   :  { %v9684_v36 = vadd.f32 %v9683_v17, %v9682_v55  ;;  %v9736_v18 = vadd.f32 %v9735_v9, %v9734_v7 }
 0x731   :  { %v9685_v27 = vpop.f32.mrf.mxu0  ;;  %v9737_v11 = vpop.f32.mrf.mxu1 }
 0x732   :  { %v14503_v60 = vadd.f32 %v9736_v18, %v8263_v22  ;;  %v8279_v41 = vadd.f32 %v9684_v36, %v14492_v33 }
 0x733   :  { %v9686_v23 = vpop.f32.mrf.mxu0  ;;  %v9738_v21 = vpop.f32.mrf.mxu1 }
 0x734   :  { %v9687_v12 = vadd.f32 %v9686_v23, %v9685_v27  ;;  %v9739_v53 = vadd.f32 %v9738_v21, %v9737_v11 }
 0x735   :  { %v9688_v26 = vpop.f32.mrf.mxu0  ;;  %v9740_v56 = vpop.f32.mrf.mxu1 }
 0x736   :  { %v14506_v59 = vadd.f32 %v9739_v53, %v8266_v8  ;;  %v8282_v29 = vadd.f32 %v9687_v12, %v14492_v33 }
 0x737   :  { %v9689_v2 = vpop.f32.mrf.mxu0  ;;  %v9741_v38 = vpop.f32.mrf.mxu1 }
 0x738   :  { %v9690_v57 = vadd.f32 %v9689_v2, %v9688_v26  ;;  %v9742_v1 = vadd.f32 %v9741_v38, %v9740_v56 }
 0x739   :  { %v9691_v13 = vpop.f32.mrf.mxu0  ;;  %v9743_v63 = vpop.f32.mrf.mxu1 }
 0x73a   :  { %v14509_v4 = vadd.f32 %v9742_v1, %v8271_v16  ;;  %v8287_v43 = vadd.f32 %v9690_v57, %v14492_v33 }
 0x73b   :  { %v9692_v32 = vpop.f32.mrf.mxu0  ;;  %v9744_v6 = vpop.f32.mrf.mxu1 }
 0x73c   :  { %v9693_v45 = vadd.f32 %v9692_v32, %v9691_v13  ;;  %v9745_v42 = vadd.f32 %v9744_v6, %v9743_v63 }
 0x73d   :  { %v9694_v46 = vpop.f32.mrf.mxu0  ;;  %v9746_v49 = vpop.f32.mrf.mxu1 }
 0x73e   :  { %v14512_v28 = vadd.f32 %v9745_v42, %v8274_v30  ;;  %v8290_v40 = vadd.f32 %v9693_v45, %v14492_v33 }
 0x73f   :  { %v9695_v31 = vpop.f32.mrf.mxu0  ;;  %v9747_v54 = vpop.f32.mrf.mxu1 }
 0x740   :  { %v9696_v14 = vadd.f32 %v9695_v31, %v9694_v46  ;;  %v9748_v62 = vadd.f32 %v9747_v54, %v9746_v49 }
 0x741   :  { %v9697_v47 = vpop.f32.mrf.mxu0  ;;  %v9749_v15 = vpop.f32.mrf.mxu1 }
 0x742   :  { %v14515_v19 = vadd.f32 %v9748_v62, %v8279_v41  ;;  %v8295_v27 = vadd.f32 %v9696_v14, %v14492_v33 }
 0x743   :  { %v9698_v50 = vpop.f32.mrf.mxu0  ;;  %v9750_v35 = vpop.f32.mrf.mxu1 }
 0x744   :  { %v9699_v39 = vadd.f32 %v9698_v50, %v9697_v47  ;;  %v9751_v52 = vadd.f32 %v9750_v35, %v9749_v15 }
 0x745   :  { %v9700_v51 = vpop.f32.mrf.mxu0  ;;  %v9752_v34 = vpop.f32.mrf.mxu1 }
 0x746   :  { %v14518_v58 = vadd.f32 %v9751_v52, %v8282_v29  ;;  %v8298_v56 = vadd.f32 %v9699_v39, %v14492_v33 }
 0x747   :  { %v9701_v0 = vpop.f32.mrf.mxu0  ;;  %v9753_v37 = vpop.f32.mrf.mxu1 }
 0x748   :  { %v9702_v20 = vadd.f32 %v9701_v0, %v9700_v51  ;;  %v9754_v25 = vadd.f32 %v9753_v37, %v9752_v34 }
 0x749   :  { %v9703_v61 = vpop.f32.mrf.mxu0  ;;  %v9755_v44 = vpop.f32.mrf.mxu1 }
 0x74a   :  { %v14521_v5 = vadd.f32 %v9754_v25, %v8287_v43  ;;  %v8303_v32 = vadd.f32 %v9702_v20, %v14492_v33 }
 0x74b   :  { %v9704_v24 = vpop.f32.mrf.mxu0  ;;  %v9756_v10 = vpop.f32.mrf.mxu1 }
 0x74c   :  { %15472 = vst [vmem:[#allocation126_spill] sm:$0xff] %v14521_v5  ;;  %v9705_v55 = vadd.f32 %v9704_v24, %v9703_v61  ;;  %v9757_v7 = vadd.f32 %v9756_v10, %v9755_v44 }
 0x74d   :  { %v9706_v17 = vpop.f32.mrf.mxu0  ;;  %v9758_v9 = vpop.f32.mrf.mxu1 }
 0x74e   :  { %v14524_v22 = vadd.f32 %v9757_v7, %v8290_v40  ;;  %v8306_v31 = vadd.f32 %v9705_v55, %v14492_v33 }
 0x74f   :  { %v9707_v36 = vpop.f32.mrf.mxu0  ;;  %v9759_v18 = vpop.f32.mrf.mxu1 }
 0x750   :  { %15473 = vst [vmem:[#allocation148_spill] sm:$0xff] %v14524_v22  ;;  %v9708_v11 = vadd.f32 %v9707_v36, %v9706_v17  ;;  %v9760_v23 = vadd.f32 %v9759_v18, %v9758_v9 }
 0x751   :  { %v9709_v21 = vpop.f32.mrf.mxu0  ;;  %v9761_v8 = vpop.f32.mrf.mxu1 }
 0x752   :  { %v14527_v12 = vadd.f32 %v9760_v23, %v8295_v27  ;;  %v8311_v50 = vadd.f32 %v9708_v11, %v14492_v33 }
 0x753   :  { %v9710_v53 = vpop.f32.mrf.mxu0  ;;  %v9762_v26 = vpop.f32.mrf.mxu1 }
 0x754   :  { %15474 = vst [vmem:[#allocation140_spill] sm:$0xff] %v14527_v12  ;;  %v9711_v2 = vadd.f32 %v9710_v53, %v9709_v21  ;;  %v9763_v38 = vadd.f32 %v9762_v26, %v9761_v8 }
 0x755   :  { %v9764_v16 = vpop.f32.mrf.mxu1  ;;  %v14530_v57 = vpop.f32.mrf.mxu0 }
 0x756   :  { %v14532_v1 = vadd.f32 %v9763_v38, %v8298_v56  ;;  %v8314_v0 = vadd.f32 %v9711_v2, %v14492_v33 }
 0x757   :  { %v9765_v13 = vpop.f32.mrf.mxu1  ;;  %v14534_v63 = vpop.f32.mrf.mxu0 }
 0x758   :  { %15475 = vst [vmem:[#allocation151_spill] sm:$0xff] %v14532_v1  ;;  %v9766_v6 = vadd.f32 %v9765_v13, %v9764_v16 }
 0x759   :  { %v9767_v30 = vpop.f32.mrf.mxu1  ;;  %v14537_v45 = vpop.f32.mrf.mxu0 }
 0x75a   :  { %v14539_v42 = vadd.f32 %v9766_v6, %v8303_v32 }
 0x75b   :  { %v9768_v46 = vpop.f32.mrf.mxu1  ;;  %v14541_v49 = vpop.f32.mrf.mxu0 }
 0x75c   :  { %15476 = vst [vmem:[#allocation149_spill] sm:$0xff] %v14539_v42  ;;  %v9769_v54 = vadd.f32 %v9768_v46, %v9767_v30 }
 0x75d   :  { %v9770_v41 = vpop.f32.mrf.mxu1  ;;  %v14544_v14 = vpop.f32.mrf.mxu0 }
 0x75e   :  { %v14546_v62 = vadd.f32 %v9769_v54, %v8306_v31 }
 0x75f   :  { %v9771_v47 = vpop.f32.mrf.mxu1  ;;  %v14548_v15 = vpop.f32.mrf.mxu0 }
 0x760   :  { %15477 = vst [vmem:[#allocation153_spill] sm:$0xff] %v14546_v62  ;;  %v9772_v35 = vadd.f32 %v9771_v47, %v9770_v41 }
 0x761   :  { %v9773_v29 = vpop.f32.mrf.mxu1  ;;  %v14551_v39 = vpop.f32.mrf.mxu0 }
 0x762   :  { %v14553_v52 = vadd.f32 %v9772_v35, %v8311_v50 }
 0x763   :  { %v9774_v51 = vpop.f32.mrf.mxu1  ;;  %v14555_v34 = vpop.f32.mrf.mxu0 }
 0x764   :  { %15478 = vst [vmem:[#allocation150_spill] sm:$0xff] %v14553_v52  ;;  %v9775_v37 = vadd.f32 %v9774_v51, %v9773_v29 }
 0x765   :  { %v14558_v43 = vpop.f32.mrf.mxu0  ;;  %v14560_v20 = vpop.f32.mrf.mxu1 }
 0x766   :  { %v14562_v25 = vadd.f32 %v9775_v37, %v8314_v0 }
 0x767   :  { %v14564_v61 = vpop.f32.mrf.mxu0  ;;  %v9857_v44 = vpop.f32.mrf.mxu1 }
 0x768   :  { %15479 = vst [vmem:[#allocation154_spill] sm:$0xff] %v14562_v25 }
 0x769   :  { %v14566_v24 = vpop.f32.mrf.mxu0  ;;  %v14568_v10 = vpop.f32.mrf.mxu1 }
 0x76b   :  { %v14570_v40 = vpop.f32.mrf.mxu0  ;;  %v14572_v55 = vpop.f32.mrf.mxu1 }
 0x76d   :  { %v14574_v7 = vpop.f32.mrf.mxu0  ;;  %v14576_v33 = vpop.f32.mrf.mxu1 }
 0x76f   :  { %v14578_v17 = vpop.f32.mrf.mxu0  ;;  %v14580_v9 = vpop.f32.mrf.mxu1 }
 0x771   :  { %v14582_v36 = vpop.f32.mrf.mxu0  ;;  %v14584_v18 = vpop.f32.mrf.mxu1 }
 0x773   :  { %v14586_v27 = vpop.f32.mrf.mxu0  ;;  %v14588_v11 = vpop.f32.mrf.mxu1 }
 0x775   :  { %v14590_v23 = vpop.f32.mrf.mxu0  ;;  %v14592_v21 = vpop.f32.mrf.mxu1 }
 0x777   :  { %v14594_v8 = vpop.f32.mrf.mxu0  ;;  %v14596_v53 = vpop.f32.mrf.mxu1 }
 0x779   :  { %v14598_v26 = vpop.f32.mrf.mxu0  ;;  %v14600_v56 = vpop.f32.mrf.mxu1 }
 0x77a   :  { %15480 = vst [vmem:[#allocation152_spill] sm:$0xff] %v14598_v26 }
 0x77b   :  { %v14602_v2 = vpop.f32.mrf.mxu0  ;;  %v14604_v38 = vpop.f32.mrf.mxu1 }
 0x77c   :  { %15481 = vst [vmem:[#allocation37_spill] sm:$0xff] %v14602_v2 }
 0x77d   :  { %v14606_v16 = vpop.f32.mrf.mxu0  ;;  %v14608_v13 = vpop.f32.mrf.mxu1 }
 0x77e   :  { %15482 = vst [vmem:[#allocation50_spill] sm:$0xff] %v14606_v16 }
 0x77f   :  { %v14610_v32 = vpop.f32.mrf.mxu0  ;;  %v14612_v6 = vpop.f32.mrf.mxu1 }
 0x780   :  { %15483 = vst [vmem:[#allocation49_spill] sm:$0xff] %v14610_v32 }
 0x781   :  { %v14614_v30 = vpop.f32.mrf.mxu0  ;;  %v14616_v46 = vpop.f32.mrf.mxu1 }
 0x782   :  { %15484 = vst [vmem:[#allocation53_spill] sm:$0xff] %v14614_v30 }
 0x783   :  { %v14618_v31 = vpop.f32.mrf.mxu0  ;;  %v14620_v54 = vpop.f32.mrf.mxu1 }
 0x784   :  { %15485 = vst [vmem:[#allocation51_spill] sm:$0xff] %v14618_v31 }
 0x785   :  { %v14622_v41 = vpop.f32.mrf.mxu0  ;;  %v14624_v47 = vpop.f32.mrf.mxu1 }
 0x786   :  { %15486 = vst [vmem:[#allocation56_spill] sm:$0xff] %v14622_v41 }
 0x787   :  { %v14626_v50 = vpop.f32.mrf.mxu0  ;;  %v14628_v35 = vpop.f32.mrf.mxu1 }
 0x788   :  { %15487 = vst [vmem:[#allocation54_spill] sm:$0xff] %v14626_v50 }
 0x789   :  { %v14630_v29 = vpop.f32.mrf.mxu0  ;;  %v14632_v51 = vpop.f32.mrf.mxu1 }
 0x78a   :  { %15488 = vst [vmem:[#allocation59_spill] sm:$0xff] %v14630_v29  ;;  %15489 = vst [vmem:[#allocation57_spill] sm:$0xff] %v14632_v51 }
 0x78b   :  { %v14634_v0 = vpop.f32.mrf.mxu0  ;;  %v14636_v37 = vpop.f32.mrf.mxu1 }
 0x78c   :  { %15490 = vst [vmem:[#allocation129_spill] sm:$0xff] %v14634_v0  ;;  %15491 = vst [vmem:[#allocation133_spill] sm:$0xff] %v14636_v37 }
 0x78d   :  { %v14638_v25 = vpop.f32.mrf.mxu0  ;;  %v14640_v52 = vpop.f32.mrf.mxu1 }
 0x78e   :  { %15492 = vst [vmem:[#allocation105_spill] sm:$0xff] %v14638_v25  ;;  %15493 = vst [vmem:[#allocation81_spill] sm:$0xff] %v14640_v52 }
 0x78f   :  { %v14642_v62 = vpop.f32.mrf.mxu0  ;;  %v14644_v42 = vpop.f32.mrf.mxu1 }
 0x790   :  { %15494 = vst [vmem:[#allocation62_spill] sm:$0xff] %v14642_v62  ;;  %15495 = vst [vmem:[#allocation83_spill] sm:$0xff] %v14644_v42 }
 0x791   :  { %v14646_v41 = vpop.f32.mrf.mxu0  ;;  %v14648_v50 = vpop.f32.mrf.mxu1 }
 0x792   :  { %15496 = vst [vmem:[#allocation92_spill] sm:$0xff] %v14646_v41  ;;  %15497 = vst [vmem:[#allocation60_spill] sm:$0xff] %v14648_v50 }
 0x793   :  { %v14650_v1 = vpop.f32.mrf.mxu0  ;;  %v14652_v29 = vpop.f32.mrf.mxu1 }
 0x794   :  { %15498 = vst [vmem:[#allocation86_spill] sm:$0xff] %v14650_v1  ;;  %15499 = vst [vmem:[#allocation107_spill] sm:$0xff] %v14652_v29  ;;  %v9794_v29 = vadd.f32 %v14534_v63, %v14530_v57  ;;  %v9861_v57 = vadd.f32 %v14572_v55, %v14568_v10  ;;  %v9800_v63 = vadd.f32 %v14548_v15, %v14544_v14 }
 0x795   :  { %v14654_v31 = vpop.f32.mrf.mxu1  ;;  %v9920_v0 = vpop.f32.mrf.mxu0  ;;  %v9803_v10 = vadd.f32 %v14555_v34, %v14551_v39  ;;  %v9806_v39 = vadd.f32 %v14564_v61, %v14558_v43  ;;  %v9809_v43 = vadd.f32 %v14570_v40, %v14566_v24  ;;  %v9812_v24 = vadd.f32 %v14578_v17, %v14574_v7 }
 0x796   :  { %15500 = vst [vmem:[#allocation104_spill] sm:$0xff] %v14654_v31  ;;  %v9815_v7 = vadd.f32 %v14586_v27, %v14582_v36  ;;  %v9818_v36 = vadd.f32 %v14594_v8, %v14590_v23 }
 0x797   :  { %v14656_v30 = vpop.f32.mrf.mxu1  ;;  %v9921_v25 = vpop.f32.mrf.mxu0 }
 0x798   :  { %15501 = vst [vmem:[#allocation65_spill] sm:$0xff] %v14656_v30  ;;  %v9858_v30 = vadd.f32 %v9857_v44, %v14560_v20  ;;  %v9922_v37 = vadd.f32 %v9921_v25, %v9920_v0  ;;  %v8457_v25 = vadd.f32 %v9800_v63, %v14503_v60  ;;  %v9867_v0 = vadd.f32 %v14588_v11, %v14584_v18 }
 0x799   :  { %v14658_v12 = vpop.f32.mrf.mxu1  ;;  %v9923_v52 = vpop.f32.mrf.mxu0  ;;  %v8460_v60 = vadd.f32 %v9803_v10, %v14506_v59  ;;  %v9870_v18 = vadd.f32 %v14596_v53, %v14592_v21  ;;  %v8465_v59 = vadd.f32 %v9806_v39, %v14509_v4  ;;  %v9873_v21 = vadd.f32 %v14604_v38, %v14600_v56 }
 0x79a   :  { %15502 = vst [vmem:[#allocation95_spill] sm:$0xff] %v14658_v12  ;;  %v8468_v4 = vadd.f32 %v9809_v43, %v14512_v28  ;;  %v9876_v56 = vadd.f32 %v14612_v6, %v14608_v13  ;;  %v8473_v28 = vadd.f32 %v9812_v24, %v14515_v19  ;;  %v9879_v13 = vadd.f32 %v14620_v54, %v14616_v46  ;;  %v15522_v24 = vld [vmem:[#allocation49_spill] sm:$0xff] }
 0x79b   :  { %v14660_v62 = vpop.f32.mrf.mxu1  ;;  %v9924_v42 = vpop.f32.mrf.mxu0  ;;  %v8557_v63 = vadd.f32 %v9867_v0, %v8460_v60  ;;  %v8476_v19 = vadd.f32 %v9815_v7, %v14518_v58  ;;  %v9882_v46 = vadd.f32 %v14628_v35, %v14624_v47 }
 0x79c   :  { %15503 = vst [vmem:[#allocation97_spill] sm:$0xff] %v14660_v62  ;;  %v8449_v62 = vadd.f32 %v9794_v29, %v14497_v3  ;;  %v9925_v26 = vadd.f32 %v9924_v42, %v9923_v52 }
 0x79d   :  { %v14662_v32 = vpop.f32.mrf.mxu1  ;;  %v9926_v41 = vpop.f32.mrf.mxu0 }
 0x79e   :  { %15504 = vst [vmem:[#allocation106_spill] sm:$0xff] %v14662_v32  ;;  %v9797_v32 = vadd.f32 %v14541_v49, %v14537_v45  ;;  %v8546_v2 = vadd.f32 %v9858_v30, %v8449_v62  ;;  %v9864_v49 = vadd.f32 %v14580_v9, %v14576_v33 }
 0x79f   :  { %v14664_v50 = vpop.f32.mrf.mxu1  ;;  %v9927_v1 = vpop.f32.mrf.mxu0 }
 0x7a0   :  { %15505 = vst [vmem:[#allocation134_spill] sm:$0xff] %v14664_v50  ;;  %v8452_v44 = vadd.f32 %v9797_v32, %v14500_v48  ;;  %v9928_v30 = vadd.f32 %v9927_v1, %v9926_v41  ;;  %v15508_v48 = vld [vmem:[#allocation52_spill] sm:$0xff] }
 0x7a1   :  { %v14668_v31 = vpop.f32.mrf.mxu1  ;;  %v9929_v16 = vpop.f32.mrf.mxu0 }
 0x7a2   :  { %15506 = vst [vmem:[#allocation137_spill] sm:$0xff] %v14668_v31  ;;  %v8549_v45 = vadd.f32 %v9861_v57, %v8452_v44 }
 0x7a3   :  { %v14671_v22 = vpop.f32.mrf.mxu1  ;;  %v9930_v12 = vpop.f32.mrf.mxu0 }
 0x7a4   :  { %15507 = vst [vmem:[#allocation63_spill] sm:$0xff] %v14671_v22  ;;  %v8643_v22 = vadd.f32 %v9922_v37, %v8546_v2  ;;  %v8646_v55 = vadd.f32 %v9925_v26, %v8549_v45  ;;  %v9931_v1 = vadd.f32 %v9930_v12, %v9929_v16  ;;  %v15509_v26 = vld [vmem:[#allocation55_spill] sm:$0xff]  ;;  %v15510_v16 = vld [vmem:[#allocation58_spill] sm:$0xff] }
 0x7a5   :  { %v9932_v51 = vpop.f32.mrf.mxu0  ;;  %v9984_v50 = vpop.f32.mrf.mxu1 }
 0x7a6   :  { %v8654_v44 = vadd.f32 %v9931_v1, %v8557_v63  ;;  %v8573_v63 = vadd.f32 %v9879_v13, %v8476_v19 }
 0x7a7   :  { %v9933_v31 = vpop.f32.mrf.mxu0  ;;  %v9985_v20 = vpop.f32.mrf.mxu1 }
 0x7a8   :  { %v9986_v3 = vadd.f32 %v9985_v20, %v9984_v50  ;;  %v8554_v50 = vadd.f32 %v9864_v49, %v8457_v25  ;;  %v9934_v12 = vadd.f32 %v9933_v31, %v9932_v51  ;;  %v8562_v25 = vadd.f32 %v9870_v18, %v8465_v59  ;;  %v15511_v51 = vld [vmem:[#allocation61_spill] sm:$0xff]  ;;  %v15514_v18 = vld [vmem:[#allocation126_spill] sm:$0xff] }
 0x7a9   :  { %v9935_v29 = vpop.f32.mrf.mxu0  ;;  %v9987_v5 = vpop.f32.mrf.mxu1  ;;  %v8481_v58 = vadd.f32 %v9818_v36, %v15514_v18  ;;  %v15516_v59 = vld [vmem:[#allocation37_spill] sm:$0xff] }
 0x7aa   :  { %v8740_v62 = vadd.f32 %v9986_v3, %v8643_v22  ;;  %v8651_v9 = vadd.f32 %v9928_v30, %v8554_v50 }
 0x7ab   :  { %v9936_v14 = vpop.f32.mrf.mxu0  ;;  %v9988_v15 = vpop.f32.mrf.mxu1 }
 0x7ac   :  { %v8804_v2 = vadd.f32 %v8740_v62, %v15508_v48  ;;  %v9989_v42 = vadd.f32 %v9988_v15, %v9987_v5  ;;  %v8659_v15 = vadd.f32 %v9934_v12, %v8562_v25  ;;  %v9937_v31 = vadd.f32 %v9936_v14, %v9935_v29  ;;  %v15512_v14 = vld [vmem:[#allocation64_spill] sm:$0xff]  ;;  %v15519_v25 = vld [vmem:[#allocation133_spill] sm:$0xff] }
 0x7ad   :  { %v9938_v52 = vpop.f32.mrf.mxu0  ;;  %v9990_v32 = vpop.f32.mrf.mxu1 }
 0x7ae   :  { %8852 = vst [vmem:[#allocation20 + $0x10] sm:$0xff] %v8804_v2  ;;  %v8743_v22 = vadd.f32 %v9989_v42, %v8646_v55  ;;  %v8565_v42 = vadd.f32 %v9873_v21, %v8468_v4  ;;  %v15520_v21 = vld [vmem:[#allocation148_spill] sm:$0xff]  ;;  %v15521_v4 = vld [vmem:[#allocation50_spill] sm:$0xff] }
 0x7af   :  { %v9939_v34 = vpop.f32.mrf.mxu0  ;;  %v9991_v33 = vpop.f32.mrf.mxu1 }
 0x7b0   :  { %v8807_v41 = vadd.f32 %v8743_v22, %v15509_v26  ;;  %v9992_v5 = vadd.f32 %v9991_v33, %v9990_v32  ;;  %v8662_v50 = vadd.f32 %v9937_v31, %v8565_v42  ;;  %v9940_v29 = vadd.f32 %v9939_v34, %v9938_v52  ;;  %v15513_v34 = vld [vmem:[#allocation67_spill] sm:$0xff] }
 0x7b1   :  { %v9941_v37 = vpop.f32.mrf.mxu0  ;;  %v9993_v57 = vpop.f32.mrf.mxu1  ;;  %v8570_v33 = vadd.f32 %v9876_v56, %v8473_v28  ;;  %v15525_v28 = vld [vmem:[#allocation83_spill] sm:$0xff] }
 0x7b2   :  { %8855 = vst [vmem:[#allocation20 + $0x28] sm:$0xff] %v8807_v41  ;;  %v8748_v11 = vadd.f32 %v9992_v5, %v8651_v9 }
 0x7b3   :  { %v9942_v61 = vpop.f32.mrf.mxu0  ;;  %v9994_v20 = vpop.f32.mrf.mxu1  ;;  %v8667_v1 = vadd.f32 %v9940_v29, %v8570_v33 }
 0x7b4   :  { %v8810_v3 = vadd.f32 %v8748_v11, %v15510_v16  ;;  %v9995_v45 = vadd.f32 %v9994_v20, %v9993_v57  ;;  %v9943_v52 = vadd.f32 %v9942_v61, %v9941_v37  ;;  %v15515_v11 = vld [vmem:[#allocation152_spill] sm:$0xff]  ;;  %v15517_v61 = vld [vmem:[#allocation70_spill] sm:$0xff] }
 0x7b5   :  { %v9944_v49 = vpop.f32.mrf.mxu0  ;;  %v9996_v62 = vpop.f32.mrf.mxu1  ;;  %v9821_v23 = vadd.f32 %v15516_v59, %v15515_v11 }
 0x7b6   :  { %8858 = vst [vmem:[#allocation20 + $0x40] sm:$0xff] %v8810_v3  ;;  %v8751_v53 = vadd.f32 %v9995_v45, %v8654_v44  ;;  %v8670_v20 = vadd.f32 %v9943_v52, %v8573_v63  ;;  %v8578_v45 = vadd.f32 %v9882_v46, %v8481_v58  ;;  %v15531_v52 = vld [vmem:[#allocation107_spill] sm:$0xff]  ;;  %v15533_v63 = vld [vmem:[#allocation56_spill] sm:$0xff]  ;;  %v15534_v46 = vld [vmem:[#allocation54_spill] sm:$0xff] }
 0x7b7   :  { %v9945_v40 = vpop.f32.mrf.mxu0  ;;  %v9997_v10 = vpop.f32.mrf.mxu1 }
 0x7b8   :  { %v8813_v55 = vadd.f32 %v8751_v53, %v15511_v51  ;;  %v9998_v30 = vadd.f32 %v9997_v10, %v9996_v62  ;;  %v9946_v37 = vadd.f32 %v9945_v40, %v9944_v49  ;;  %v15518_v62 = vld [vmem:[#allocation57_spill] sm:$0xff]  ;;  %v8484_v53 = vadd.f32 %v9821_v23, %v15520_v21 }
 0x7b9   :  { %v9947_v48 = vpop.f32.mrf.mxu0  ;;  %v9999_v2 = vpop.f32.mrf.mxu1  ;;  %v9885_v47 = vadd.f32 %v15519_v25, %v15518_v62  ;;  %v9824_v10 = vadd.f32 %v15522_v24, %v15521_v4  ;;  %v15523_v40 = vld [vmem:[#allocation73_spill] sm:$0xff]  ;;  %v15539_v62 = vld [vmem:[#allocation59_spill] sm:$0xff] }
 0x7ba   :  { %8861 = vst [vmem:[#allocation20 + $0x58] sm:$0xff] %v8813_v55  ;;  %v8756_v38 = vadd.f32 %v9998_v30, %v8659_v15  ;;  %v8675_v51 = vadd.f32 %v9946_v37, %v8578_v45  ;;  %v15536_v37 = vld [vmem:[#allocation104_spill] sm:$0xff]  ;;  %v15540_v25 = vld [vmem:[#allocation129_spill] sm:$0xff] }
 0x7bb   :  { %v9948_v17 = vpop.f32.mrf.mxu0  ;;  %v10000_v32 = vpop.f32.mrf.mxu1  ;;  %v8581_v56 = vadd.f32 %v9885_v47, %v8484_v53  ;;  %v9833_v47 = vadd.f32 %v15540_v25, %v15539_v62  ;;  %v15558_v25 = vld [vmem:[#allocation46_spill] sm:$0xff] }
 0x7bc   :  { %v8816_v0 = vadd.f32 %v8756_v38, %v15512_v14  ;;  %v10001_v22 = vadd.f32 %v10000_v32, %v9999_v2  ;;  %v9949_v49 = vadd.f32 %v9948_v17, %v9947_v48  ;;  %v15524_v38 = vld [vmem:[#allocation81_spill] sm:$0xff]  ;;  %v15529_v48 = vld [vmem:[#allocation76_spill] sm:$0xff] }
 0x7bd   :  { %v9950_v60 = vpop.f32.mrf.mxu0  ;;  %v10002_v39 = vpop.f32.mrf.mxu1  ;;  %v9888_v7 = vadd.f32 %v15525_v28, %v15524_v38  ;;  %v15527_v14 = vld [vmem:[#allocation53_spill] sm:$0xff]  ;;  %v15546_v38 = vld [vmem:[#allocation62_spill] sm:$0xff] }
 0x7be   :  { %8864 = vst [vmem:[#allocation20 + $0x70] sm:$0xff] %v8816_v0  ;;  %v8759_v6 = vadd.f32 %v10001_v22, %v8662_v50  ;;  %v15526_v50 = vld [vmem:[#allocation140_spill] sm:$0xff]  ;;  %v15528_v0 = vld [vmem:[#allocation51_spill] sm:$0xff]  ;;  %v8678_v33 = vadd.f32 %v9949_v49, %v8581_v56  ;;  %v15543_v49 = vld [vmem:[#allocation97_spill] sm:$0xff] }
 0x7bf   :  { %v9951_v27 = vpop.f32.mrf.mxu0  ;;  %v10003_v9 = vpop.f32.mrf.mxu1  ;;  %v8489_v29 = vadd.f32 %v9824_v10, %v15526_v50  ;;  %v9827_v22 = vadd.f32 %v15528_v0, %v15527_v14  ;;  %v15545_v56 = vld [vmem:[#allocation105_spill] sm:$0xff] }
 0x7c0   :  { %v8819_v26 = vadd.f32 %v8759_v6, %v15513_v34  ;;  %v10004_v41 = vadd.f32 %v10003_v9, %v10002_v39  ;;  %v9952_v13 = vadd.f32 %v9951_v27, %v9950_v60  ;;  %v15535_v60 = vld [vmem:[#allocation29_spill] sm:$0xff]  ;;  %v9836_v28 = vadd.f32 %v15546_v38, %v15545_v56 }
 0x7c1   :  { %v9953_v5 = vpop.f32.mrf.mxu0  ;;  %v10005_v57 = vpop.f32.mrf.mxu1  ;;  %v8586_v9 = vadd.f32 %v9888_v7, %v8489_v29 }
 0x7c2   :  { %8867 = vst [vmem:[#allocation20 + $0x88] sm:$0xff] %v8819_v26  ;;  %v8764_v54 = vadd.f32 %v10004_v41, %v8667_v1  ;;  %v15530_v1 = vld [vmem:[#allocation60_spill] sm:$0xff]  ;;  %v15532_v41 = vld [vmem:[#allocation151_spill] sm:$0xff] }
 0x7c3   :  { %v9954_v8 = vpop.f32.mrf.mxu0  ;;  %v10006_v43 = vpop.f32.mrf.mxu1  ;;  %v9891_v34 = vadd.f32 %v15531_v52, %v15530_v1  ;;  %v8683_v58 = vadd.f32 %v9952_v13, %v8586_v9  ;;  %v15552_v9 = vld [vmem:[#allocation86_spill] sm:$0xff] }
 0x7c4   :  { %v8822_v44 = vadd.f32 %v8764_v54, %v15517_v61  ;;  %v10007_v12 = vadd.f32 %v10006_v43, %v10005_v57  ;;  %v8492_v57 = vadd.f32 %v9827_v22, %v15532_v41  ;;  %v9830_v54 = vadd.f32 %v15534_v46, %v15533_v63  ;;  %v15537_v61 = vld [vmem:[#allocation65_spill] sm:$0xff] }
 0x7c5   :  { %v9956_v16 = vpop.f32.mrf.mxu0  ;;  %v10008_v3 = vpop.f32.mrf.mxu1  ;;  %v9955_v11 = vadd.f32 %v9954_v8, %v9953_v5  ;;  %v15541_v5 = vld [vmem:[#allocation30_spill] sm:$0xff] }
 0x7c6   :  { %8870 = vst [vmem:[#allocation20 + $0xa0] sm:$0xff] %v8822_v44  ;;  %v8767_v35 = vadd.f32 %v10007_v12, %v8670_v20  ;;  %v8589_v20 = vadd.f32 %v9891_v34, %v8492_v57  ;;  %v9894_v44 = vadd.f32 %v15537_v61, %v15536_v37  ;;  %v15557_v37 = vld [vmem:[#allocation43_spill] sm:$0xff] }
 0x7c7   :  { %v9957_v15 = vpop.f32.mrf.mxu0  ;;  %v10009_v31 = vpop.f32.mrf.mxu1 }
 0x7c8   :  { %v8825_v55 = vadd.f32 %v8767_v35, %v15523_v40  ;;  %v10010_v30 = vadd.f32 %v10009_v31, %v10008_v3  ;;  %v15538_v3 = vld [vmem:[#allocation149_spill] sm:$0xff]  ;;  %v8686_v21 = vadd.f32 %v9955_v11, %v8589_v20  ;;  %v9958_v53 = vadd.f32 %v9957_v15, %v9956_v16  ;;  %v15547_v16 = vld [vmem:[#allocation28_spill] sm:$0xff] }
 0x7c9   :  { %v9959_v2 = vpop.f32.mrf.mxu0  ;;  %v10011_v42 = vpop.f32.mrf.mxu1  ;;  %v8497_v45 = vadd.f32 %v9830_v54, %v15538_v3  ;;  %v15554_v54 = vld [vmem:[#allocation137_spill] sm:$0xff] }
 0x7ca   :  { %8873 = vst [vmem:[#allocation20 + $0xb8] sm:$0xff] %v8825_v55  ;;  %v8772_v32 = vadd.f32 %v10010_v30, %v8675_v51  ;;  %v15542_v51 = vld [vmem:[#allocation95_spill] sm:$0xff]  ;;  %v15544_v30 = vld [vmem:[#allocation153_spill] sm:$0xff] }
 0x7cb   :  { %v10012_v39 = vpop.f32.mrf.mxu1  ;;  %v9960_v19 = vpop.f32.mrf.mxu0  ;;  %v8594_v31 = vadd.f32 %v9894_v44, %v8497_v45  ;;  %v9897_v40 = vadd.f32 %v15543_v49, %v15542_v51 }
 0x7cc   :  { %v8828_v17 = vadd.f32 %v8772_v32, %v15529_v48  ;;  %v10013_v6 = vadd.f32 %v10012_v39, %v10011_v42  ;;  %v8500_v42 = vadd.f32 %v9833_v47, %v15544_v30  ;;  %v9961_v50 = vadd.f32 %v9960_v19, %v9959_v2  ;;  %v15548_v39 = vld [vmem:[#allocation106_spill] sm:$0xff]  ;;  %v15553_v2 = vld [vmem:[#allocation44_spill] sm:$0xff] }
 0x7cd   :  { %v10014_v36 = vpop.f32.mrf.mxu1  ;;  %v9962_v23 = vpop.f32.mrf.mxu0  ;;  %v8691_v32 = vadd.f32 %v9958_v53, %v8594_v31  ;;  %v15559_v53 = vld [vmem:[#allocation45_spill] sm:$0xff] }
 0x7ce   :  { %8876 = vst [vmem:[#allocation20 + $0xd0] sm:$0xff] %v8828_v17  ;;  %v8775_v26 = vadd.f32 %v10013_v6, %v8678_v33  ;;  %v8597_v22 = vadd.f32 %v9897_v40, %v8500_v42  ;;  %v15549_v33 = vld [vmem:[#allocation134_spill] sm:$0xff] }
 0x7cf   :  { %v10015_v18 = vpop.f32.mrf.mxu1  ;;  %v9963_v24 = vpop.f32.mrf.mxu0  ;;  %v9900_v13 = vadd.f32 %v15549_v33, %v15548_v39  ;;  %v15550_v17 = vld [vmem:[#allocation150_spill] sm:$0xff] }
 0x7d0   :  { %v8831_v27 = vadd.f32 %v8775_v26, %v15535_v60  ;;  %v10016_v59 = vadd.f32 %v10015_v18, %v10014_v36  ;;  %v8505_v6 = vadd.f32 %v9836_v28, %v15550_v17  ;;  %v15551_v36 = vld [vmem:[#allocation92_spill] sm:$0xff]  ;;  %v8694_v34 = vadd.f32 %v9961_v50, %v8597_v22  ;;  %v15555_v18 = vld [vmem:[#allocation63_spill] sm:$0xff]  ;;  %v15556_v60 = vld [vmem:[#allocation154_spill] sm:$0xff] }
 0x7d1   :  { %v10017_v43 = vpop.f32.mrf.mxu1  ;;  %v9965_v14 = vpop.f32.mrf.mxu0  ;;  %v9839_v1 = vadd.f32 %v15552_v9, %v15551_v36  ;;  %v9964_v26 = vadd.f32 %v9963_v24, %v9962_v23 }
 0x7d2   :  { %8879 = vst [vmem:[#allocation20 + $0xe8] sm:$0xff] %v8831_v27  ;;  %v8780_v12 = vadd.f32 %v10016_v59, %v8683_v58  ;;  %v8602_v46 = vadd.f32 %v9900_v13, %v8505_v6  ;;  %v9903_v58 = vadd.f32 %v15555_v18, %v15554_v54 }
 0x7d3   :  { %v10018_v35 = vpop.f32.mrf.mxu1  ;;  %v9966_v57 = vpop.f32.mrf.mxu0  ;;  %v8508_v27 = vadd.f32 %v9839_v1, %v15556_v60 }
 0x7d4   :  { %v8834_v8 = vadd.f32 %v8780_v12, %v15541_v5  ;;  %v10019_v4 = vadd.f32 %v10018_v35, %v10017_v43  ;;  %v8699_v43 = vadd.f32 %v9964_v26, %v8602_v46  ;;  %v9967_v20 = vadd.f32 %v9966_v57, %v9965_v14 }
 0x7d5   :  { %v10020_v10 = vpop.f32.mrf.mxu1  ;;  %v8605_v12 = vadd.f32 %v9903_v58, %v8508_v27 }
 0x7d6   :  { %8882 = vst [vmem:[#allocation20 + $0x100] sm:$0xff] %v8834_v8  ;;  %v8783_v55 = vadd.f32 %v10019_v4, %v8686_v21 }
 0x7d7   :  { %v10021_v7 = vpop.f32.mrf.mxu1  ;;  %v8702_v62 = vadd.f32 %v9967_v20, %v8605_v12 }
 0x7d8   :  { %v8837_v15 = vadd.f32 %v8783_v55, %v15547_v16  ;;  %v10022_v29 = vadd.f32 %v10021_v7, %v10020_v10 }
 0x7d9   :  { %v10023_v0 = vpop.f32.mrf.mxu1 }
 0x7da   :  { %8885 = vst [vmem:[#allocation20 + $0x118] sm:$0xff] %v8837_v15  ;;  %v8788_v48 = vadd.f32 %v10022_v29, %v8691_v32 }
 0x7db   :  { %v10024_v52 = vpop.f32.mrf.mxu1 }
 0x7dc   :  { %v8840_v19 = vadd.f32 %v8788_v48, %v15553_v2  ;;  %v10025_v41 = vadd.f32 %v10024_v52, %v10023_v0 }
 0x7dd   :  { %v10026_v63 = vpop.f32.mrf.mxu1 }
 0x7de   :  { %8888 = vst [vmem:[#allocation20 + $0x130] sm:$0xff] %v8840_v19  ;;  %v8791_v11 = vadd.f32 %v10025_v41, %v8694_v34 }
 0x7df   :  { %v10027_v59 = vpop.f32.mrf.mxu1 }
 0x7e0   :  { %v8843_v61 = vadd.f32 %v8791_v11, %v15557_v37  ;;  %v10028_v44 = vadd.f32 %v10027_v59, %v10026_v63 }
 0x7e1   :  { %v10029_v23 = vpop.f32.mrf.mxu1 }
 0x7e2   :  { %8891 = vst [vmem:[#allocation20 + $0x148] sm:$0xff] %v8843_v61  ;;  %v8796_v3 = vadd.f32 %v10028_v44, %v8699_v43 }
 0x7e3   :  { %v10030_v45 = vpop.f32.mrf.mxu1 }
 0x7e4   :  { %v8846_v47 = vadd.f32 %v8796_v3, %v15558_v25  ;;  %v10031_v35 = vadd.f32 %v10030_v45, %v10029_v23 }
 0x7e6   :  { %8894 = vst [vmem:[#allocation20 + $0x160] sm:$0xff] %v8846_v47  ;;  %v8799_v21 = vadd.f32 %v10031_v35, %v8702_v62 }
 0x7e8   :  { %v8849_v5 = vadd.f32 %v8799_v21, %v15559_v53 }
 0x7ea   :  { %8897 = vst [vmem:[#allocation20 + $0x178] sm:$0xff] %v8849_v5 }
 0x7eb   :  { %11383 = shalt.err (!%p11380_p3)
}
 0x7ec   :  { %8909 = dma.vmem_to_hbm [thread:$0]  %s8904_s10, 6144, %s14782_s11, [#allocation4], %s11416_s30, %s11416_s30, %s11417_s12  }
 0x7ed   :  { %11404 = dma.done.wait [#allocation4], 6144  }
 0x7ee   :  { %11405 = vsyncadd [#allocation4], 4294961152 }
 0x7ef   :  { %8913 = vsyncpa [#allocation3], 1 }
 0x7f0   :  { %8914 = vsyncpa [#allocation6], 1 }
 0x7f1   :  { %8915 = vsyncpa [#allocation9], 1 }
 0x7f2   :  { %8916 = vsyncpa [#allocation12], 1 }
 0x7f3   :  { %8917 = vsyncpa [#allocation15], 1 }
 0x7f4   :  { %8918 = vsyncpa [#allocation18], 1 }
 0x7f5   :  { %8919 = vsyncpa [#allocation4], 1 }

</bundles_post_ra>
